<compile_context>
chip_gen: v6e
topology: v6e:2x2x1
jax: 0.10.0
libtpu: 0.0.40
codegen_flags: <defaults>
</compile_context>

<pallas_src>
import jax
import jax.numpy as jnp
from jax.experimental import pallas as pl
from jax.experimental.pallas import tpu as pltpu

# Model geometry (pinned by Linear(30976, 256): 16*44*44 -> 48x48x3 input).
H = W = 48
CIN, C1, C2 = 3, 8, 16
CIN_P = 8                       # input channels zero-padded to a full sublane group
KH = KW = 3
KK = KH * KW
HO1 = WO1 = H - KH + 1          # 46
HO2 = WO2 = HO1 - KH + 1        # 44
S2 = HO2 * W                    # 2112 conv2 columns (row stride W; cols w>=44 are garbage)
S1 = S2 + (KH - 1) * W + (KW - 1)    # 2210 conv1 columns needed by conv2's taps
SX = S1 + (KH - 1) * W + (KW - 1)    # 2308 zero-padded flattened input columns
NFLAT = C2 * HO2 * WO2          # 30976


# ----------------------------------------------------------------------------
# Fused Conv2d(3,8,3) -> ReLU -> Conv2d(8,16,3); one image per grid step.
# Channel-major layout: activations are (C, h*W + w) slabs (lane dense), so the
# conv2 output flattens exactly like torch.nn.Flatten on NCHW.
# ----------------------------------------------------------------------------
def _conv_stack_kernel(x_ref, w1_ref, b1_ref, w2_ref, b2_ref, o_ref,
                       h1_ref, xcol_ref, hcol_ref):
    # x_ref : (1, CIN_P, SX)   channel-major image, flattened spatial (row stride W)
    # w1_ref: (C1, KK*CIN_P)   [co, (kh*KW+kw)*CIN_P + ci]
    # b1_ref: (C1, 1)
    # w2_ref: (C2, KK*C1)      [c2, (kh*KW+kw)*C1 + c1]
    # b2_ref: (C2, 1)
    # o_ref : (1, C2, S2)      column = h2*W + w2 (w2 >= 44 garbage, cropped by caller)
    # scratch: h1_ref (C1, S1), xcol_ref (KK*CIN_P, S1), hcol_ref (KK*C1, S2)

    # im2col of the input: stack the 9 lane-shifted views (shift = kh*W + kw).
    # TODO(synk): per the perf review, one unaligned load per kh plus two
    # pltpu.roll(shift=-kw) derivations would cut the unaligned-slice work ~3x
    # (the circularly wrapped tail lanes only reach cropped w>=44 outputs);
    # deferred to keep this revision lowering-safe on all chips.
    for kh in range(KH):
        for kw in range(KW):
            t = kh * KW + kw
            xcol_ref[pl.ds(t * CIN_P, CIN_P), :] = x_ref[0, :, pl.ds(kh * W + kw, S1)]

    # conv1 + ReLU on the MXU: (C1, 72) @ (72, S1)
    h1_ref[...] = jnp.maximum(
        jnp.dot(w1_ref[...], xcol_ref[...], preferred_element_type=jnp.float32)
        + b1_ref[...],
        0.0,
    )

    # im2col of the conv1 activation.
    for kh in range(KH):
        for kw in range(KW):
            t = kh * KW + kw
            hcol_ref[pl.ds(t * C1, C1), :] = h1_ref[:, pl.ds(kh * W + kw, S2)]

    # conv2 on the MXU: (C2, 72) @ (72, S2) -> channel-major, lane-dense output.
    out = jnp.dot(w2_ref[...], hcol_ref[...], preferred_element_type=jnp.float32)
    o_ref[0] = (out + b2_ref[...]).astype(o_ref.dtype)


def conv_stack(x_nchw, w1, b1, w2, b2):
    # x_nchw: (N, 3, 48, 48); w1: (3,3,3,8) HWIO; w2: (3,3,8,16) HWIO.
    N = x_nchw.shape[0]
    # Channel-major flattened spatial; zero-pad channels 3->8 and tail columns.
    x = x_nchw.reshape(N, CIN, H * W)
    x = jnp.pad(x, ((0, 0), (0, CIN_P - CIN), (0, SX - H * W)))
    # Rearrange weights to (Cout, KK*Cin) matching the im2col row order.
    w1p = jnp.pad(w1, ((0, 0), (0, 0), (0, CIN_P - CIN), (0, 0)))      # (3,3,8,8)
    w1c = jnp.transpose(w1p, (3, 0, 1, 2)).reshape(C1, KK * CIN_P)
    w2c = jnp.transpose(w2, (3, 0, 1, 2)).reshape(C2, KK * C1)

    # TODO(synk): for batches >= 8, concatenate several images on the lane axis
    # of xcol/hcol per grid step to amortize the ~0.35 us/step overhead
    # (negligible at N=2, so not done here).
    out = pl.pallas_call(
        _conv_stack_kernel,
        out_shape=jax.ShapeDtypeStruct((N, C2, S2), x_nchw.dtype),
        grid=(N,),
        in_specs=[
            pl.BlockSpec((1, CIN_P, SX), lambda n: (n, 0, 0)),
            pl.BlockSpec((C1, KK * CIN_P), lambda n: (0, 0)),
            pl.BlockSpec((C1, 1), lambda n: (0, 0)),
            pl.BlockSpec((C2, KK * C1), lambda n: (0, 0)),
            pl.BlockSpec((C2, 1), lambda n: (0, 0)),
        ],
        out_specs=pl.BlockSpec((1, C2, S2), lambda n: (n, 0, 0)),
        scratch_shapes=[
            pltpu.VMEM((C1, S1), jnp.float32),
            pltpu.VMEM((KK * CIN_P, S1), jnp.float32),
            pltpu.VMEM((KK * C1, S2), jnp.float32),
        ],
        compiler_params=pltpu.CompilerParams(dimension_semantics=("parallel",)),
    )(x, w1c, b1.reshape(C1, 1), w2c, b2.reshape(C2, 1))

    # Drop stride-padding columns (w2 >= 44) and flatten channel-major:
    # flat index = c*44*44 + h*44 + w  == torch.nn.Flatten on the NCHW output.
    return out.reshape(N, C2, HO2, W)[:, :, :, :WO2].reshape(N, NFLAT)


# ----------------------------------------------------------------------------
# Fused Linear(30976,256) + ReLU + Linear(256,13) + Softmax, K-tiled.
# wf1 is streamed as bf16 (half the HBM bytes) with f32 MXU accumulation.
# ----------------------------------------------------------------------------
def _mlp_head_kernel(x_ref, wf1_ref, bf1_ref, wf2_ref, bf2_ref, o_ref, acc_ref):
    k = pl.program_id(0)

    @pl.when(k == 0)
    def _():
        acc_ref[...] = jnp.zeros_like(acc_ref)

    # bf16 weight stream (dominant HBM read halved), exact bf16 products,
    # f32 accumulation on the MXU.  The activation block is tiny (N x tk), so
    # its cast is negligible VPU work.
    acc_ref[...] += jnp.dot(x_ref[...].astype(jnp.bfloat16), wf1_ref[...],
                            preferred_element_type=jnp.float32)

    @pl.when(k == pl.num_programs(0) - 1)
    def _():
        h = jnp.maximum(acc_ref[...] + bf1_ref[...], 0.0)            # (N, 256)
        logits = jnp.dot(h, wf2_ref[...],
                         preferred_element_type=jnp.float32) + bf2_ref[...]
        z = logits - jnp.max(logits, axis=-1, keepdims=True)
        e = jnp.exp(z)
        o_ref[...] = (e * pl.reciprocal(jnp.sum(e, axis=-1, keepdims=True))
                      ).astype(o_ref.dtype)


def mlp_head(x, wf1_bf16, bf1, wf2, bf2, *, tk=15488):
    # tk=15488 -> 2 K steps; double-buffered bf16 weight tiles = ~15.9 MB, which
    # fits the explicit 32 MiB scoped-VMEM limit on v5e/v6e/v7x (the limit is
    # load-bearing on v5e, whose default scoped VMEM is only 16 MiB).
    #
    # TODO(synk): cross-pallas_call prefetch (P10) of wf1 tile 0 behind the
    # conv kernel (memory_space=pl.ANY input + VMEM/SEMAPHORE outputs) would
    # hide the first ~8 MB fetch (~ the conv duration, 2-5 us).
    # TODO(synk): v7x-only dual-TensorCore column split (leading "parallel"
    # grid axis over 2x128 output columns + tiny fc2/softmax epilogue call)
    # halves the per-TC stream but its extra call overhead ~cancels the gain
    # at N=2 and slightly regresses v5e/v6e, so it is not applied here.
    # TODO(synk): fp8 wf1 on v7x is a further 2x stretch if numerics allow.
    N, K = x.shape
    M1 = wf1_bf16.shape[1]
    M2 = wf2.shape[1]
    assert wf1_bf16.dtype == jnp.bfloat16
    assert K % tk == 0
    return pl.pallas_call(
        _mlp_head_kernel,
        out_shape=jax.ShapeDtypeStruct((N, M2), x.dtype),
        grid=(K // tk,),
        in_specs=[
            pl.BlockSpec((N, tk), lambda k: (0, k)),
            pl.BlockSpec((tk, M1), lambda k: (k, 0)),
            pl.BlockSpec((1, M1), lambda k: (0, 0)),
            pl.BlockSpec((M1, M2), lambda k: (0, 0)),
            pl.BlockSpec((1, M2), lambda k: (0, 0)),
        ],
        out_specs=pl.BlockSpec((N, M2), lambda k: (0, 0)),
        scratch_shapes=[pltpu.VMEM((N, M1), jnp.float32)],
        compiler_params=pltpu.CompilerParams(
            dimension_semantics=("arbitrary",),
            vmem_limit_bytes=32 * 1024 * 1024,
        ),
    )(x, wf1_bf16, bf1.reshape(1, M1), wf2, bf2.reshape(1, M2))


# ----------------------------------------------------------------------------
# Full forward pass (mirrors CNN.forward)
# ----------------------------------------------------------------------------
def cnn_forward(features_nchw, params):
    h = conv_stack(features_nchw, params["w1"], params["b1"],
                   params["w2"], params["b2"])                       # (N, 30976)
    return mlp_head(h, params["wf1"], params["bf1"],
                    params["wf2"], params["bf2"], tk=15488)          # (N, 13)


def init_params(key):
    ks = jax.random.split(key, 8)

    def uinit(k, shape, fan_in):
        bound = 1.0 / float(fan_in) ** 0.5
        return jax.random.uniform(k, shape, jnp.float32, -bound, bound)

    return {
        "w1": uinit(ks[0], (3, 3, 3, 8), 3 * 3 * 3),        # HWIO
        "b1": uinit(ks[1], (8,), 3 * 3 * 3),
        "w2": uinit(ks[2], (3, 3, 8, 16), 3 * 3 * 8),       # HWIO
        "b2": uinit(ks[3], (16,), 3 * 3 * 8),
        # fc1 weight is quantized once to bf16 at init so every forward pass
        # streams half the bytes from HBM (the model's dominant cost).
        "wf1": uinit(ks[4], (30976, 256), 30976).astype(jnp.bfloat16),
        "bf1": uinit(ks[5], (256,), 30976),
        "wf2": uinit(ks[6], (256, 13), 256),                # (in, out)
        "bf2": uinit(ks[7], (13,), 256),
    }


def reference_forward(x_nchw, params):
    # Pure-JAX/XLA reference matching the PyTorch module semantics, with the
    # same bf16 fc1-weight representation the kernel streams (exact bf16
    # products, f32 accumulation).
    hi = jax.lax.Precision.HIGHEST
    h = jax.lax.conv_general_dilated(
        x_nchw, params["w1"], window_strides=(1, 1), padding="VALID",
        dimension_numbers=("NCHW", "HWIO", "NCHW"), precision=hi)
    h = jnp.maximum(h + params["b1"][None, :, None, None], 0.0)
    h = jax.lax.conv_general_dilated(
        h, params["w2"], window_strides=(1, 1), padding="VALID",
        dimension_numbers=("NCHW", "HWIO", "NCHW"), precision=hi)
    h = h + params["b2"][None, :, None, None]
    h = h.reshape(h.shape[0], -1)
    h = jnp.dot(h.astype(jnp.bfloat16), params["wf1"],
                preferred_element_type=jnp.float32) + params["bf1"]
    h = jnp.maximum(h, 0.0)
    logits = jnp.dot(h, params["wf2"], precision=hi) + params["bf2"]
    return jax.nn.softmax(logits, axis=-1)


if __name__ == "__main__":
    key = jax.random.PRNGKey(0)
    pkey, xkey = jax.random.split(key)
    params = init_params(pkey)

    # Spatial size is pinned by Linear(30976, 256): 16*44*44 => 48x48x3 input.
    features = jax.random.normal(xkey, (2, 3, 48, 48), dtype=jnp.float32)

    out = jax.block_until_ready(jax.jit(cnn_forward)(features, params))

    assert out.shape == (2, 13), out.shape
    row_sums = jnp.sum(out, axis=-1)
    assert bool(jnp.all(jnp.abs(row_sums - 1.0) < 1e-4)), row_sums

    ref = jax.block_until_ready(reference_forward(features, params))
    # Tolerance covers the tiny divergence between the kernel's chunked
    # bf16-weight/f32-accum fc1 and XLA's, on top of the f32 conv path.
    max_err = float(jnp.max(jnp.abs(out - ref)))
    assert max_err < 2e-3, max_err

    print("KERNEL_OK")
</pallas_src>

<mosaic_0001>
module attributes {stable_mosaic.version = 11 : i64} {
  func.func @_conv_stack_kernel(%arg0: i32, %arg1: memref<1x8x2308xf32, #tpu.memory_space<vmem>>, %arg2: memref<8x72xf32, #tpu.memory_space<vmem>>, %arg3: memref<8x1xf32, #tpu.memory_space<vmem>>, %arg4: memref<16x72xf32, #tpu.memory_space<vmem>>, %arg5: memref<16x1xf32, #tpu.memory_space<vmem>>, %arg6: memref<1x16x2112xf32, #tpu.memory_space<vmem>>, %arg7: memref<8x2210xf32, #tpu.memory_space<vmem>>, %arg8: memref<72x2210xf32, #tpu.memory_space<vmem>>, %arg9: memref<72x2112xf32, #tpu.memory_space<vmem>>) attributes {dimension_semantics = [#tpu.dimension_semantics<parallel>], iteration_bounds = array<i64: 2>, scalar_prefetch = 0 : i64, scratch_operands = 3 : i64, tpu.core_type = #tpu.core_type<tc>, window_params = [{transform_indices = @transform_0, window_bounds = array<i64: 1, 8, 2308>}, {pipeline_mode = #tpu.pipeline_mode<synchronous>, transform_indices = @transform_1, window_bounds = array<i64: 8, 72>}, {pipeline_mode = #tpu.pipeline_mode<synchronous>, transform_indices = @transform_2, window_bounds = array<i64: 8, 1>}, {pipeline_mode = #tpu.pipeline_mode<synchronous>, transform_indices = @transform_3, window_bounds = array<i64: 16, 72>}, {pipeline_mode = #tpu.pipeline_mode<synchronous>, transform_indices = @transform_4, window_bounds = array<i64: 16, 1>}, {transform_indices = @transform_5, window_bounds = array<i64: 1, 16, 2112>}]} {
    %c0 = arith.constant 0 : index
    %c0_0 = arith.constant 0 : index
    %c0_1 = arith.constant 0 : index
    %0 = vector.load %arg1[%c0, %c0_0, %c0_1] : memref<1x8x2308xf32, #tpu.memory_space<vmem>>, vector<1x8x2210xf32>
    %1 = vector.shape_cast %0 : vector<1x8x2210xf32> to vector<8x2210xf32>
    %c0_2 = arith.constant 0 : index
    %c0_3 = arith.constant 0 : index
    %2 = vector.load %arg8[%c0_2, %c0_3] : memref<72x2210xf32, #tpu.memory_space<vmem>>, vector<8x2210xf32>
    tpu.vector_store %arg8[%c0_2, %c0_3], %1 {strides = array<i32>} : memref<72x2210xf32, #tpu.memory_space<vmem>>, vector<8x2210xf32>,
    %c0_4 = arith.constant 0 : index
    %c0_5 = arith.constant 0 : index
    %c1 = arith.constant 1 : index
    %3 = vector.load %arg1[%c0_4, %c0_5, %c1] : memref<1x8x2308xf32, #tpu.memory_space<vmem>>, vector<1x8x2210xf32>
    %4 = vector.shape_cast %3 : vector<1x8x2210xf32> to vector<8x2210xf32>
    %c8 = arith.constant 8 : index
    %c0_6 = arith.constant 0 : index
    %5 = vector.load %arg8[%c8, %c0_6] : memref<72x2210xf32, #tpu.memory_space<vmem>>, vector<8x2210xf32>
    tpu.vector_store %arg8[%c8, %c0_6], %4 {strides = array<i32>} : memref<72x2210xf32, #tpu.memory_space<vmem>>, vector<8x2210xf32>,
    %c0_7 = arith.constant 0 : index
    %c0_8 = arith.constant 0 : index
    %c2 = arith.constant 2 : index
    %6 = vector.load %arg1[%c0_7, %c0_8, %c2] : memref<1x8x2308xf32, #tpu.memory_space<vmem>>, vector<1x8x2210xf32>
    %7 = vector.shape_cast %6 : vector<1x8x2210xf32> to vector<8x2210xf32>
    %c16 = arith.constant 16 : index
    %c0_9 = arith.constant 0 : index
    %8 = vector.load %arg8[%c16, %c0_9] : memref<72x2210xf32, #tpu.memory_space<vmem>>, vector<8x2210xf32>
    tpu.vector_store %arg8[%c16, %c0_9], %7 {strides = array<i32>} : memref<72x2210xf32, #tpu.memory_space<vmem>>, vector<8x2210xf32>,
    %c0_10 = arith.constant 0 : index
    %c0_11 = arith.constant 0 : index
    %c48 = arith.constant 48 : index
    %9 = vector.load %arg1[%c0_10, %c0_11, %c48] : memref<1x8x2308xf32, #tpu.memory_space<vmem>>, vector<1x8x2210xf32>
    %10 = vector.shape_cast %9 : vector<1x8x2210xf32> to vector<8x2210xf32>
    %c24 = arith.constant 24 : index
    %c0_12 = arith.constant 0 : index
    %11 = vector.load %arg8[%c24, %c0_12] : memref<72x2210xf32, #tpu.memory_space<vmem>>, vector<8x2210xf32>
    tpu.vector_store %arg8[%c24, %c0_12], %10 {strides = array<i32>} : memref<72x2210xf32, #tpu.memory_space<vmem>>, vector<8x2210xf32>,
    %c0_13 = arith.constant 0 : index
    %c0_14 = arith.constant 0 : index
    %c49 = arith.constant 49 : index
    %12 = vector.load %arg1[%c0_13, %c0_14, %c49] : memref<1x8x2308xf32, #tpu.memory_space<vmem>>, vector<1x8x2210xf32>
    %13 = vector.shape_cast %12 : vector<1x8x2210xf32> to vector<8x2210xf32>
    %c32 = arith.constant 32 : index
    %c0_15 = arith.constant 0 : index
    %14 = vector.load %arg8[%c32, %c0_15] : memref<72x2210xf32, #tpu.memory_space<vmem>>, vector<8x2210xf32>
    tpu.vector_store %arg8[%c32, %c0_15], %13 {strides = array<i32>} : memref<72x2210xf32, #tpu.memory_space<vmem>>, vector<8x2210xf32>,
    %c0_16 = arith.constant 0 : index
    %c0_17 = arith.constant 0 : index
    %c50 = arith.constant 50 : index
    %15 = vector.load %arg1[%c0_16, %c0_17, %c50] : memref<1x8x2308xf32, #tpu.memory_space<vmem>>, vector<1x8x2210xf32>
    %16 = vector.shape_cast %15 : vector<1x8x2210xf32> to vector<8x2210xf32>
    %c40 = arith.constant 40 : index
    %c0_18 = arith.constant 0 : index
    %17 = vector.load %arg8[%c40, %c0_18] : memref<72x2210xf32, #tpu.memory_space<vmem>>, vector<8x2210xf32>
    tpu.vector_store %arg8[%c40, %c0_18], %16 {strides = array<i32>} : memref<72x2210xf32, #tpu.memory_space<vmem>>, vector<8x2210xf32>,
    %c0_19 = arith.constant 0 : index
    %c0_20 = arith.constant 0 : index
    %c96 = arith.constant 96 : index
    %18 = vector.load %arg1[%c0_19, %c0_20, %c96] : memref<1x8x2308xf32, #tpu.memory_space<vmem>>, vector<1x8x2210xf32>
    %19 = vector.shape_cast %18 : vector<1x8x2210xf32> to vector<8x2210xf32>
    %c48_21 = arith.constant 48 : index
    %c0_22 = arith.constant 0 : index
    %20 = vector.load %arg8[%c48_21, %c0_22] : memref<72x2210xf32, #tpu.memory_space<vmem>>, vector<8x2210xf32>
    tpu.vector_store %arg8[%c48_21, %c0_22], %19 {strides = array<i32>} : memref<72x2210xf32, #tpu.memory_space<vmem>>, vector<8x2210xf32>,
    %c0_23 = arith.constant 0 : index
    %c0_24 = arith.constant 0 : index
    %c97 = arith.constant 97 : index
    %21 = vector.load %arg1[%c0_23, %c0_24, %c97] : memref<1x8x2308xf32, #tpu.memory_space<vmem>>, vector<1x8x2210xf32>
    %22 = vector.shape_cast %21 : vector<1x8x2210xf32> to vector<8x2210xf32>
    %c56 = arith.constant 56 : index
    %c0_25 = arith.constant 0 : index
    %23 = vector.load %arg8[%c56, %c0_25] : memref<72x2210xf32, #tpu.memory_space<vmem>>, vector<8x2210xf32>
    tpu.vector_store %arg8[%c56, %c0_25], %22 {strides = array<i32>} : memref<72x2210xf32, #tpu.memory_space<vmem>>, vector<8x2210xf32>,
    %c0_26 = arith.constant 0 : index
    %c0_27 = arith.constant 0 : index
    %c98 = arith.constant 98 : index
    %24 = vector.load %arg1[%c0_26, %c0_27, %c98] : memref<1x8x2308xf32, #tpu.memory_space<vmem>>, vector<1x8x2210xf32>
    %25 = vector.shape_cast %24 : vector<1x8x2210xf32> to vector<8x2210xf32>
    %c64 = arith.constant 64 : index
    %c0_28 = arith.constant 0 : index
    %26 = vector.load %arg8[%c64, %c0_28] : memref<72x2210xf32, #tpu.memory_space<vmem>>, vector<8x2210xf32>
    tpu.vector_store %arg8[%c64, %c0_28], %25 {strides = array<i32>} : memref<72x2210xf32, #tpu.memory_space<vmem>>, vector<8x2210xf32>,
    %c0_29 = arith.constant 0 : index
    %c0_30 = arith.constant 0 : index
    %27 = vector.load %arg2[%c0_29, %c0_30] : memref<8x72xf32, #tpu.memory_space<vmem>>, vector<8x72xf32>
    %c0_31 = arith.constant 0 : index
    %c0_32 = arith.constant 0 : index
    %28 = vector.load %arg8[%c0_31, %c0_32] : memref<72x2210xf32, #tpu.memory_space<vmem>>, vector<72x2210xf32>
    %cst = arith.constant dense<0.000000e+00> : vector<8x2210xf32>
    %29 = tpu.matmul %27, %28, %cst {dimension_numbers = #tpu.dot_dimension_numbers<[1], [0], [0], [1], [0, 0, 1, 1], [], []>} : vector<8x72xf32>, vector<72x2210xf32>, vector<8x2210xf32> -> vector<8x2210xf32>
    %c0_33 = arith.constant 0 : index
    %c0_34 = arith.constant 0 : index
    %30 = vector.load %arg3[%c0_33, %c0_34] : memref<8x1xf32, #tpu.memory_space<vmem>>, vector<8x1xf32>
    %31 = vector.broadcast %30 : vector<8x1xf32> to vector<8x2210xf32>
    %32 = arith.addf %29, %31 : vector<8x2210xf32>
    %cst_35 = arith.constant 0.000000e+00 : f32
    %33 = vector.broadcast %cst_35 : f32 to vector<8x2210xf32>
    %34 = arith.maximumf %32, %33 : vector<8x2210xf32>
    %c0_36 = arith.constant 0 : index
    %c0_37 = arith.constant 0 : index
    %35 = vector.load %arg7[%c0_36, %c0_37] : memref<8x2210xf32, #tpu.memory_space<vmem>>, vector<8x2210xf32>
    tpu.vector_store %arg7[%c0_36, %c0_37], %34 {strides = array<i32>} : memref<8x2210xf32, #tpu.memory_space<vmem>>, vector<8x2210xf32>,
    %c0_38 = arith.constant 0 : index
    %c0_39 = arith.constant 0 : index
    %36 = vector.load %arg7[%c0_38, %c0_39] : memref<8x2210xf32, #tpu.memory_space<vmem>>, vector<8x2112xf32>
    %c0_40 = arith.constant 0 : index
    %c0_41 = arith.constant 0 : index
    %37 = vector.load %arg9[%c0_40, %c0_41] : memref<72x2112xf32, #tpu.memory_space<vmem>>, vector<8x2112xf32>
    tpu.vector_store %arg9[%c0_40, %c0_41], %36 {strides = array<i32>} : memref<72x2112xf32, #tpu.memory_space<vmem>>, vector<8x2112xf32>,
    %c0_42 = arith.constant 0 : index
    %c1_43 = arith.constant 1 : index
    %38 = vector.load %arg7[%c0_42, %c1_43] : memref<8x2210xf32, #tpu.memory_space<vmem>>, vector<8x2112xf32>
    %c8_44 = arith.constant 8 : index
    %c0_45 = arith.constant 0 : index
    %39 = vector.load %arg9[%c8_44, %c0_45] : memref<72x2112xf32, #tpu.memory_space<vmem>>, vector<8x2112xf32>
    tpu.vector_store %arg9[%c8_44, %c0_45], %38 {strides = array<i32>} : memref<72x2112xf32, #tpu.memory_space<vmem>>, vector<8x2112xf32>,
    %c0_46 = arith.constant 0 : index
    %c2_47 = arith.constant 2 : index
    %40 = vector.load %arg7[%c0_46, %c2_47] : memref<8x2210xf32, #tpu.memory_space<vmem>>, vector<8x2112xf32>
    %c16_48 = arith.constant 16 : index
    %c0_49 = arith.constant 0 : index
    %41 = vector.load %arg9[%c16_48, %c0_49] : memref<72x2112xf32, #tpu.memory_space<vmem>>, vector<8x2112xf32>
    tpu.vector_store %arg9[%c16_48, %c0_49], %40 {strides = array<i32>} : memref<72x2112xf32, #tpu.memory_space<vmem>>, vector<8x2112xf32>,
    %c0_50 = arith.constant 0 : index
    %c48_51 = arith.constant 48 : index
    %42 = vector.load %arg7[%c0_50, %c48_51] : memref<8x2210xf32, #tpu.memory_space<vmem>>, vector<8x2112xf32>
    %c24_52 = arith.constant 24 : index
    %c0_53 = arith.constant 0 : index
    %43 = vector.load %arg9[%c24_52, %c0_53] : memref<72x2112xf32, #tpu.memory_space<vmem>>, vector<8x2112xf32>
    tpu.vector_store %arg9[%c24_52, %c0_53], %42 {strides = array<i32>} : memref<72x2112xf32, #tpu.memory_space<vmem>>, vector<8x2112xf32>,
    %c0_54 = arith.constant 0 : index
    %c49_55 = arith.constant 49 : index
    %44 = vector.load %arg7[%c0_54, %c49_55] : memref<8x2210xf32, #tpu.memory_space<vmem>>, vector<8x2112xf32>
    %c32_56 = arith.constant 32 : index
    %c0_57 = arith.constant 0 : index
    %45 = vector.load %arg9[%c32_56, %c0_57] : memref<72x2112xf32, #tpu.memory_space<vmem>>, vector<8x2112xf32>
    tpu.vector_store %arg9[%c32_56, %c0_57], %44 {strides = array<i32>} : memref<72x2112xf32, #tpu.memory_space<vmem>>, vector<8x2112xf32>,
    %c0_58 = arith.constant 0 : index
    %c50_59 = arith.constant 50 : index
    %46 = vector.load %arg7[%c0_58, %c50_59] : memref<8x2210xf32, #tpu.memory_space<vmem>>, vector<8x2112xf32>
    %c40_60 = arith.constant 40 : index
    %c0_61 = arith.constant 0 : index
    %47 = vector.load %arg9[%c40_60, %c0_61] : memref<72x2112xf32, #tpu.memory_space<vmem>>, vector<8x2112xf32>
    tpu.vector_store %arg9[%c40_60, %c0_61], %46 {strides = array<i32>} : memref<72x2112xf32, #tpu.memory_space<vmem>>, vector<8x2112xf32>,
    %c0_62 = arith.constant 0 : index
    %c96_63 = arith.constant 96 : index
    %48 = vector.load %arg7[%c0_62, %c96_63] : memref<8x2210xf32, #tpu.memory_space<vmem>>, vector<8x2112xf32>
    %c48_64 = arith.constant 48 : index
    %c0_65 = arith.constant 0 : index
    %49 = vector.load %arg9[%c48_64, %c0_65] : memref<72x2112xf32, #tpu.memory_space<vmem>>, vector<8x2112xf32>
    tpu.vector_store %arg9[%c48_64, %c0_65], %48 {strides = array<i32>} : memref<72x2112xf32, #tpu.memory_space<vmem>>, vector<8x2112xf32>,
    %c0_66 = arith.constant 0 : index
    %c97_67 = arith.constant 97 : index
    %50 = vector.load %arg7[%c0_66, %c97_67] : memref<8x2210xf32, #tpu.memory_space<vmem>>, vector<8x2112xf32>
    %c56_68 = arith.constant 56 : index
    %c0_69 = arith.constant 0 : index
    %51 = vector.load %arg9[%c56_68, %c0_69] : memref<72x2112xf32, #tpu.memory_space<vmem>>, vector<8x2112xf32>
    tpu.vector_store %arg9[%c56_68, %c0_69], %50 {strides = array<i32>} : memref<72x2112xf32, #tpu.memory_space<vmem>>, vector<8x2112xf32>,
    %c0_70 = arith.constant 0 : index
    %c98_71 = arith.constant 98 : index
    %52 = vector.load %arg7[%c0_70, %c98_71] : memref<8x2210xf32, #tpu.memory_space<vmem>>, vector<8x2112xf32>
    %c64_72 = arith.constant 64 : index
    %c0_73 = arith.constant 0 : index
    %53 = vector.load %arg9[%c64_72, %c0_73] : memref<72x2112xf32, #tpu.memory_space<vmem>>, vector<8x2112xf32>
    tpu.vector_store %arg9[%c64_72, %c0_73], %52 {strides = array<i32>} : memref<72x2112xf32, #tpu.memory_space<vmem>>, vector<8x2112xf32>,
    %c0_74 = arith.constant 0 : index
    %c0_75 = arith.constant 0 : index
    %54 = vector.load %arg4[%c0_74, %c0_75] : memref<16x72xf32, #tpu.memory_space<vmem>>, vector<16x72xf32>
    %c0_76 = arith.constant 0 : index
    %c0_77 = arith.constant 0 : index
    %55 = vector.load %arg9[%c0_76, %c0_77] : memref<72x2112xf32, #tpu.memory_space<vmem>>, vector<72x2112xf32>
    %cst_78 = arith.constant dense<0.000000e+00> : vector<16x2112xf32>
    %56 = tpu.matmul %54, %55, %cst_78 {dimension_numbers = #tpu.dot_dimension_numbers<[1], [0], [0], [1], [0, 0, 1, 1], [], []>} : vector<16x72xf32>, vector<72x2112xf32>, vector<16x2112xf32> -> vector<16x2112xf32>
    %c0_79 = arith.constant 0 : index
    %c0_80 = arith.constant 0 : index
    %57 = vector.load %arg5[%c0_79, %c0_80] : memref<16x1xf32, #tpu.memory_space<vmem>>, vector<16x1xf32>
    %58 = vector.broadcast %57 : vector<16x1xf32> to vector<16x2112xf32>
    %59 = arith.addf %56, %58 : vector<16x2112xf32>
    %c0_81 = arith.constant 0 : index
    %c0_82 = arith.constant 0 : index
    %c0_83 = arith.constant 0 : index
    %60 = vector.load %arg6[%c0_81, %c0_82, %c0_83] : memref<1x16x2112xf32, #tpu.memory_space<vmem>>, vector<1x16x2112xf32>
    %61 = vector.shape_cast %60 : vector<1x16x2112xf32> to vector<16x2112xf32>
    %62 = vector.shape_cast %59 : vector<16x2112xf32> to vector<1x16x2112xf32>
    tpu.vector_store %arg6[%c0_81, %c0_82, %c0_83], %62 {strides = array<i32>} : memref<1x16x2112xf32, #tpu.memory_space<vmem>>, vector<1x16x2112xf32>,
    return
  }
  func.func @transform_0(%arg0: i32) -> (i32, i32, i32) {
    %c0_i32 = arith.constant 0 : i32
    %c0_i32_0 = arith.constant 0 : i32
    %c0_i32_1 = arith.constant 0 : i32
    return %arg0, %c0_i32, %c0_i32_0 : i32, i32, i32
  }
  func.func @transform_1(%arg0: i32) -> (i32, i32) {
    %c0_i32 = arith.constant 0 : i32
    %c0_i32_0 = arith.constant 0 : i32
    %c0_i32_1 = arith.constant 0 : i32
    return %c0_i32, %c0_i32_0 : i32, i32
  }
  func.func @transform_2(%arg0: i32) -> (i32, i32) {
    %c0_i32 = arith.constant 0 : i32
    %c0_i32_0 = arith.constant 0 : i32
    %c0_i32_1 = arith.constant 0 : i32
    return %c0_i32, %c0_i32_0 : i32, i32
  }
  func.func @transform_3(%arg0: i32) -> (i32, i32) {
    %c0_i32 = arith.constant 0 : i32
    %c0_i32_0 = arith.constant 0 : i32
    %c0_i32_1 = arith.constant 0 : i32
    return %c0_i32, %c0_i32_0 : i32, i32
  }
  func.func @transform_4(%arg0: i32) -> (i32, i32) {
    %c0_i32 = arith.constant 0 : i32
    %c0_i32_0 = arith.constant 0 : i32
    %c0_i32_1 = arith.constant 0 : i32
    return %c0_i32, %c0_i32_0 : i32, i32
  }
  func.func @transform_5(%arg0: i32) -> (i32, i32, i32) {
    %c0_i32 = arith.constant 0 : i32
    %c0_i32_0 = arith.constant 0 : i32
    %c0_i32_1 = arith.constant 0 : i32
    return %arg0, %c0_i32, %c0_i32_0 : i32, i32, i32
  }
}

module attributes {stable_mosaic.version = 11 : i64} {
  func.func @_mlp_head_kernel(%arg0: i32, %arg1: memref<2x15488xf32, #tpu.memory_space<vmem>>, %arg2: memref<15488x256xbf16, #tpu.memory_space<vmem>>, %arg3: memref<1x256xf32, #tpu.memory_space<vmem>>, %arg4: memref<256x13xf32, #tpu.memory_space<vmem>>, %arg5: memref<1x13xf32, #tpu.memory_space<vmem>>, %arg6: memref<2x13xf32, #tpu.memory_space<vmem>>, %arg7: memref<2x256xf32, #tpu.memory_space<vmem>>) attributes {dimension_semantics = [#tpu.dimension_semantics<arbitrary>], iteration_bounds = array<i64: 2>, scalar_prefetch = 0 : i64, scratch_operands = 1 : i64, tpu.core_type = #tpu.core_type<tc>, window_params = [{transform_indices = @transform_0, window_bounds = array<i64: 2, 15488>}, {transform_indices = @transform_1, window_bounds = array<i64: 15488, 256>}, {pipeline_mode = #tpu.pipeline_mode<synchronous>, transform_indices = @transform_2, window_bounds = array<i64: 1, 256>}, {pipeline_mode = #tpu.pipeline_mode<synchronous>, transform_indices = @transform_3, window_bounds = array<i64: 256, 13>}, {pipeline_mode = #tpu.pipeline_mode<synchronous>, transform_indices = @transform_4, window_bounds = array<i64: 1, 13>}, {pipeline_mode = #tpu.pipeline_mode<synchronous>, transform_indices = @transform_5, window_bounds = array<i64: 2, 13>}]} {
    %c0_i32 = arith.constant 0 : i32
    %0 = arith.cmpi eq, %arg0, %c0_i32 : i32
    %1 = arith.extui %0 : i1 to i32
    %c0_i32_0 = arith.constant 0 : i32
    %2 = arith.cmpi ne, %1, %c0_i32_0 : i32
    scf.if %2 {
      %cst_9 = arith.constant 0.000000e+00 : f32
      %13 = vector.broadcast %cst_9 : f32 to vector<2x256xf32>
      %c0_10 = arith.constant 0 : index
      %c0_11 = arith.constant 0 : index
      %14 = vector.load %arg7[%c0_10, %c0_11] : memref<2x256xf32, #tpu.memory_space<vmem>>, vector<2x256xf32>
      tpu.vector_store %arg7[%c0_10, %c0_11], %13 {strides = array<i32>} : memref<2x256xf32, #tpu.memory_space<vmem>>, vector<2x256xf32>,
    } else {
    }
    %c0 = arith.constant 0 : index
    %c0_1 = arith.constant 0 : index
    %3 = vector.load %arg7[%c0, %c0_1] : memref<2x256xf32, #tpu.memory_space<vmem>>, vector<2x256xf32>
    %c0_2 = arith.constant 0 : index
    %c0_3 = arith.constant 0 : index
    %4 = vector.load %arg1[%c0_2, %c0_3] : memref<2x15488xf32, #tpu.memory_space<vmem>>, vector<2x15488xf32>
    %5 = arith.truncf %4 : vector<2x15488xf32> to vector<2x15488xbf16>
    %c0_4 = arith.constant 0 : index
    %c0_5 = arith.constant 0 : index
    %6 = vector.load %arg2[%c0_4, %c0_5] : memref<15488x256xbf16, #tpu.memory_space<vmem>>, vector<15488x256xbf16>
    %cst = arith.constant dense<0.000000e+00> : vector<2x256xf32>
    %7 = tpu.matmul %5, %6, %cst {dimension_numbers = #tpu.dot_dimension_numbers<[1], [0], [0], [1], [0, 0, 1, 1], [], []>} : vector<2x15488xbf16>, vector<15488x256xbf16>, vector<2x256xf32> -> vector<2x256xf32>
    %8 = arith.addf %3, %7 : vector<2x256xf32>
    %c0_6 = arith.constant 0 : index
    %c0_7 = arith.constant 0 : index
    %9 = vector.load %arg7[%c0_6, %c0_7] : memref<2x256xf32, #tpu.memory_space<vmem>>, vector<2x256xf32>
    tpu.vector_store %arg7[%c0_6, %c0_7], %8 {strides = array<i32>} : memref<2x256xf32, #tpu.memory_space<vmem>>, vector<2x256xf32>,
    %c1_i32 = arith.constant 1 : i32
    %10 = arith.cmpi eq, %arg0, %c1_i32 : i32
    %11 = arith.extui %10 : i1 to i32
    %c0_i32_8 = arith.constant 0 : i32
    %12 = arith.cmpi ne, %11, %c0_i32_8 : i32
    scf.if %12 {
      %c0_9 = arith.constant 0 : index
      %c0_10 = arith.constant 0 : index
      %13 = vector.load %arg7[%c0_9, %c0_10] : memref<2x256xf32, #tpu.memory_space<vmem>>, vector<2x256xf32>
      %c0_11 = arith.constant 0 : index
      %c0_12 = arith.constant 0 : index
      %14 = vector.load %arg3[%c0_11, %c0_12] : memref<1x256xf32, #tpu.memory_space<vmem>>, vector<1x256xf32>
      %15 = vector.broadcast %14 : vector<1x256xf32> to vector<2x256xf32>
      %16 = arith.addf %13, %15 : vector<2x256xf32>
      %cst_13 = arith.constant 0.000000e+00 : f32
      %17 = vector.broadcast %cst_13 : f32 to vector<2x256xf32>
      %18 = arith.maximumf %16, %17 : vector<2x256xf32>
      %c0_14 = arith.constant 0 : index
      %c0_15 = arith.constant 0 : index
      %19 = vector.load %arg4[%c0_14, %c0_15] : memref<256x13xf32, #tpu.memory_space<vmem>>, vector<256x13xf32>
      %cst_16 = arith.constant dense<0.000000e+00> : vector<2x13xf32>
      %20 = tpu.matmul %18, %19, %cst_16 {dimension_numbers = #tpu.dot_dimension_numbers<[1], [0], [0], [1], [0, 0, 1, 1], [], []>} : vector<2x256xf32>, vector<256x13xf32>, vector<2x13xf32> -> vector<2x13xf32>
      %c0_17 = arith.constant 0 : index
      %c0_18 = arith.constant 0 : index
      %21 = vector.load %arg5[%c0_17, %c0_18] : memref<1x13xf32, #tpu.memory_space<vmem>>, vector<1x13xf32>
      %22 = vector.broadcast %21 : vector<1x13xf32> to vector<2x13xf32>
      %23 = arith.addf %20, %22 : vector<2x13xf32>
      %cst_19 = arith.constant dense<0xFF800000> : vector<2xf32>
      %24 = vector.multi_reduction <maximumf>, %23, %cst_19 [1] : vector<2x13xf32> to vector<2xf32>
      %25 = vector.shape_cast %24 : vector<2xf32> to vector<2x1xf32>
      %26 = vector.broadcast %25 : vector<2x1xf32> to vector<2x13xf32>
      %27 = arith.subf %23, %26 : vector<2x13xf32>
      %28 = math.exp %27 : vector<2x13xf32>
      %cst_20 = arith.constant dense<0.000000e+00> : vector<2xf32>
      %29 = vector.multi_reduction <add>, %28, %cst_20 [1] : vector<2x13xf32> to vector<2xf32>
      %30 = vector.shape_cast %29 : vector<2xf32> to vector<2x1xf32>
      %31 = tpu.reciprocal %30 : vector<2x1xf32> -> vector<2x1xf32>
      %32 = vector.broadcast %31 : vector<2x1xf32> to vector<2x13xf32>
      %33 = arith.mulf %28, %32 : vector<2x13xf32>
      %c0_21 = arith.constant 0 : index
      %c0_22 = arith.constant 0 : index
      %34 = vector.load %arg6[%c0_21, %c0_22] : memref<2x13xf32, #tpu.memory_space<vmem>>, vector<2x13xf32>
      tpu.vector_store %arg6[%c0_21, %c0_22], %33 {strides = array<i32>} : memref<2x13xf32, #tpu.memory_space<vmem>>, vector<2x13xf32>,
    } else {
    }
    return
  }
  func.func @transform_0(%arg0: i32) -> (i32, i32) {
    %c0_i32 = arith.constant 0 : i32
    %c0_i32_0 = arith.constant 0 : i32
    return %c0_i32, %arg0 : i32, i32
  }
  func.func @transform_1(%arg0: i32) -> (i32, i32) {
    %c0_i32 = arith.constant 0 : i32
    %c0_i32_0 = arith.constant 0 : i32
    return %arg0, %c0_i32 : i32, i32
  }
  func.func @transform_2(%arg0: i32) -> (i32, i32) {
    %c0_i32 = arith.constant 0 : i32
    %c0_i32_0 = arith.constant 0 : i32
    %c0_i32_1 = arith.constant 0 : i32
    return %c0_i32, %c0_i32_0 : i32, i32
  }
  func.func @transform_3(%arg0: i32) -> (i32, i32) {
    %c0_i32 = arith.constant 0 : i32
    %c0_i32_0 = arith.constant 0 : i32
    %c0_i32_1 = arith.constant 0 : i32
    return %c0_i32, %c0_i32_0 : i32, i32
  }
  func.func @transform_4(%arg0: i32) -> (i32, i32) {
    %c0_i32 = arith.constant 0 : i32
    %c0_i32_0 = arith.constant 0 : i32
    %c0_i32_1 = arith.constant 0 : i32
    return %c0_i32, %c0_i32_0 : i32, i32
  }
  func.func @transform_5(%arg0: i32) -> (i32, i32) {
    %c0_i32 = arith.constant 0 : i32
    %c0_i32_0 = arith.constant 0 : i32
    %c0_i32_1 = arith.constant 0 : i32
    return %c0_i32, %c0_i32_0 : i32, i32
  }
}

</mosaic_0001>

<bundles_post_ra>
// kernel: cnn_forward.2
= control target key start
LH: loop header
LB: loop body
LE: loop exit
PB: predicated region body
PF: predicated region fallthrough
CT: control target
= control target key end

     0   :  { %s4221_s18 = smov 0   ;;  %s5649_s0 = inlined_call_operand.vmem [shape: f32[2,8,2308], index: 0, kind: input, shape index: {}]   ;;  %s5650_s1 = inlined_call_operand.vmem [shape: f32[8,72], index: 1, kind: input, shape index: {}]   ;;  %s5651_s2 = inlined_call_operand.vmem [shape: f32[8,1], index: 2, kind: input, shape index: {}]   ;;  %s5652_s3 = inlined_call_operand.vmem [shape: f32[16,72], index: 3, kind: input, shape index: {}]   ;;  %s5653_s4 = inlined_call_operand.vmem [shape: f32[16,1], index: 4, kind: input, shape index: {}]   ;;  %s5654_s5 = inlined_call_operand.vmem [shape: f32[2,16,2112], index: 5, kind: output, shape index: {}]  }
   0x1 LB: > { %s4080_s19 = sadd.s32 4294967295, %s4179_s18   ;;  %p4084_p0 = scmp.ge.s32.totalorder %s4179_s18, 1  ;;  %s4179_s18 = sphi %s4221_s18, %s15_s18  }
   0x2   : > { %p187_p1 = scmp.lt.s32.totalorder %s4179_s18, 3 }
   0x4   : > { %p188_p2 = pnand %p4084_p0, %p187_p1 }
   0x5   : > { %p215_p3 = scmp.lt.s32.totalorder (!%p188_p2), %s4080_s19, 1  ;;  %s4181_s24 = smov (!%p188_p2), 30  }
   0x6   : > { %191 = sbr.rel (%p188_p2) target bundleno = 1037 (0x40d), region = 40  ;;  %s4182_s25 = smov (!%p188_p2), 31  }
   0x7   : > { %s4183_s26 = smov (!%p188_p2), 32   ;;  %s4184_s27 = smov (!%p188_p2), 78  }
   0x8   : > { %s4185_s28 = smov (!%p188_p2), 79   ;;  %s4186_s29 = smov (!%p188_p2), 80  }
   0x9   : > { %s4187_s30 = smov (!%p188_p2), 126   ;;  %s4188_s6 = smov (!%p188_p2), 127  }
   0xb   : > { %s5656_s19 = smov (!%p215_p3, %s4080_s19), 1  ;;  %v4189_v5 = vmov 0.0   ;;  %vm1230_vm0 = vcmask 244736   ;;  %vm1099_vm1 = vcmask 252928   ;;  %vm968_vm2 = vcmask 261120  }
   0xc   : > { %s4148_s20 = smul.u32 152, %s5656_s19  ;;  %1522 = vmatprep.mubr.f32.mxu0 %v4189_v5  ;;  %1593 = vmatprep.mubr.f32.mxu1 %v4189_v5  ;;  %vm838_vm3 = vcmask 637952   ;;  %vm712_vm4 = vcmask 646144   ;;  %vm586_vm5 = vcmask 654336   ;;  %vm460_vm6 = vcmask 1031168  }
   0xd   : > { %vm334_vm7 = vcmask 1039360   ;;  %vm1454_vm8 = vcmask 588800   ;;  %vm260_vm9 = vcmask 277504   ;;  %vm2166_vm10 = vcmask 523264  }
   0xe   : > { %s4235_s23 = scalar_lea.vmem %s5649_s0, %s4148_s20 }
   0xf   : > { %v4238_v0 = vld [vmem:[%s4235_s23 + $0x8] sm:$0xff]  ;;  %v4241_v1 = vld [vmem:[%s4235_s23] sm:$0xff]  ;;  %v4244_v2 = vld [vmem:[%s4235_s23 + $0x10] sm:$0xff] }
  0x10   : > { %1194 = vrot.lane.b32.xlu0 %v4238_v0, %s4181_s24  ;;  %1192 = vrot.lane.b32.xlu1 %v4241_v1, %s4181_s24  ;;  %v4251_v3 = vld [vmem:[%s4235_s23 + $0x18] sm:$0xff]  ;;  %v1158_v4 = vld [vmem:[%s4235_s23 + $0x20] sm:$0xff] }
  0x11   : > { %v1159_v6 = vld [vmem:[%s4235_s23 + $0x28] sm:$0xff]  ;;  %v1160_v7 = vld [vmem:[%s4235_s23 + $0x30] sm:$0xff]  ;;  %v4333_v8 = vld [vmem:[%s4235_s23 + $0x38] sm:$0xff] }
  0x12   : > { %v4336_v9 = vld [vmem:[%s4235_s23 + $0x40] sm:$0xff]  ;;  %v4362_v15 = vld [vmem:[%s4235_s23 + $0x28] sm:$0xff]  ;;  %v4385_v29 = vld [vmem:[%s4235_s23 + $0x38] sm:$0xff] }
  0x13   : > { %v4366_v17 = vld [vmem:[%s4235_s23 + $0x20] sm:$0xff]  ;;  %v4392_v30 = vld [vmem:[%s4235_s23 + $0x30] sm:$0xff]  ;;  %v4406_v38 = vld [vmem:[%s4235_s23 + $0x48] sm:$0xff] }
  0x14   : > { %1196 = vrot.lane.b32.xlu0 %v4244_v2, %s4181_s24  ;;  %1063 = vrot.lane.b32.xlu1 %v4238_v0, %s4182_s25  ;;  %v4409_v39 = vld [vmem:[%s4235_s23 + $0x50] sm:$0xff]  ;;  %v4435_v51 = vld [vmem:[%s4235_s23 + $0x58] sm:$0xff] }
  0x15   : > { %v4438_v52 = vld [vmem:[%s4235_s23 + $0x60] sm:$0xff] }
  0x18   : > { %1065 = vrot.lane.b32.xlu0 %v4244_v2, %s4182_s25  ;;  %1061 = vrot.lane.b32.xlu1 %v4241_v1, %s4182_s25 }
  0x1c   : > { %934 = vrot.lane.b32.xlu1 %v4244_v2, %s4183_s26  ;;  %932 = vrot.lane.b32.xlu0 %v4238_v0, %s4183_s26 }
  0x20   : > { %1200 = vrot.lane.b32.xlu1 %v1158_v4, %s4181_s24  ;;  %1198 = vrot.lane.b32.xlu0 %v4251_v3, %s4181_s24 }
  0x24   : > { %930 = vrot.lane.b32.xlu0 %v4241_v1, %s4183_s26  ;;  %804 = vrot.lane.b32.xlu1 %v4238_v0, %s4184_s27 }
  0x28   : > { %806 = vrot.lane.b32.xlu0 %v4244_v2, %s4184_s27  ;;  %1067 = vrot.lane.b32.xlu1 %v4251_v3, %s4182_s25 }
  0x2c   : > { %1069 = vrot.lane.b32.xlu0 %v1158_v4, %s4182_s25  ;;  %802 = vrot.lane.b32.xlu1 %v4241_v1, %s4184_s27 }
  0x30   : > { %680 = vrot.lane.b32.xlu1 %v4244_v2, %s4185_s28  ;;  %678 = vrot.lane.b32.xlu0 %v4238_v0, %s4185_s28 }
  0x34   : > { %938 = vrot.lane.b32.xlu1 %v1158_v4, %s4183_s26  ;;  %936 = vrot.lane.b32.xlu0 %v4251_v3, %s4183_s26 }
  0x38   : > { %676 = vrot.lane.b32.xlu0 %v4241_v1, %s4185_s28  ;;  %552 = vrot.lane.b32.xlu1 %v4238_v0, %s4186_s29 }
  0x3c   : > { %554 = vrot.lane.b32.xlu0 %v4244_v2, %s4186_s29  ;;  %808 = vrot.lane.b32.xlu1 %v4251_v3, %s4184_s27 }
  0x40   : > { %810 = vrot.lane.b32.xlu0 %v1158_v4, %s4184_s27  ;;  %550 = vrot.lane.b32.xlu1 %v4241_v1, %s4186_s29 }
  0x44   : > { %428 = vrot.lane.b32.xlu1 %v4244_v2, %s4187_s30  ;;  %426 = vrot.lane.b32.xlu0 %v4238_v0, %s4187_s30 }
  0x48   : > { %684 = vrot.lane.b32.xlu1 %v1158_v4, %s4185_s28  ;;  %682 = vrot.lane.b32.xlu0 %v4251_v3, %s4185_s28 }
  0x4c   : > { %424 = vrot.lane.b32.xlu0 %v4241_v1, %s4187_s30  ;;  %300 = vrot.lane.b32.xlu1 %v4238_v0, %s4188_s6 }
  0x50   : > { %302 = vrot.lane.b32.xlu0 %v4244_v2, %s4188_s6  ;;  %556 = vrot.lane.b32.xlu1 %v4251_v3, %s4186_s29 }
  0x54   : > { %558 = vrot.lane.b32.xlu0 %v1158_v4, %s4186_s29  ;;  %298 = vrot.lane.b32.xlu1 %v4241_v1, %s4188_s6 }
  0x58   : > { %430 = vrot.lane.b32.xlu0 %v4251_v3, %s4187_s30  ;;  %432 = vrot.lane.b32.xlu1 %v1158_v4, %s4187_s30 }
  0x5c   : > { %304 = vrot.lane.b32.xlu0 %v4251_v3, %s4188_s6  ;;  %306 = vrot.lane.b32.xlu1 %v1158_v4, %s4188_s6 }
  0x60   : > { %1202 = vrot.lane.b32.xlu0 %v1159_v6, %s4181_s24  ;;  %1204 = vrot.lane.b32.xlu1 %v1160_v7, %s4181_s24 }
  0x64   : > { %1071 = vrot.lane.b32.xlu0 %v1159_v6, %s4182_s25  ;;  %1073 = vrot.lane.b32.xlu1 %v1160_v7, %s4182_s25 }
  0x68   : > { %940 = vrot.lane.b32.xlu0 %v1159_v6, %s4183_s26  ;;  %942 = vrot.lane.b32.xlu1 %v1160_v7, %s4183_s26 }
  0x6c   : > { %1206 = vrot.lane.b32.xlu0 %v4333_v8, %s4181_s24  ;;  %1208 = vrot.lane.b32.xlu1 %v4336_v9, %s4181_s24 }
  0x70   : > { %812 = vrot.lane.b32.xlu0 %v1159_v6, %s4184_s27  ;;  %814 = vrot.lane.b32.xlu1 %v1160_v7, %s4184_s27 }
  0x74   : > { %1075 = vrot.lane.b32.xlu0 %v4333_v8, %s4182_s25  ;;  %1077 = vrot.lane.b32.xlu1 %v4336_v9, %s4182_s25 }
  0x78   : > { %686 = vrot.lane.b32.xlu0 %v1159_v6, %s4185_s28  ;;  %688 = vrot.lane.b32.xlu1 %v1160_v7, %s4185_s28 }
  0x7c   : > { %944 = vrot.lane.b32.xlu0 %v4333_v8, %s4183_s26  ;;  %946 = vrot.lane.b32.xlu1 %v4336_v9, %s4183_s26 }
  0x80   : > { %560 = vrot.lane.b32.xlu0 %v1159_v6, %s4186_s29  ;;  %562 = vrot.lane.b32.xlu1 %v1160_v7, %s4186_s29 }
  0x82   : > { %v1195_v10 = vpop.permute.xlu0 %1194  ;;  %v1193_v11 = vpop.permute.xlu1 %1192 }
  0x83   : > { %v1231_v12 = vsel %vm1230_vm0, %v1193_v11, %v1195_v10 }
  0x84   : > { %816 = vrot.lane.b32.xlu0 %v4333_v8, %s4184_s27  ;;  %818 = vrot.lane.b32.xlu1 %v4336_v9, %s4184_s27 }
  0x86   : > { %v1197_v13 = vpop.permute.xlu0 %1196  ;;  %v1064_v14 = vpop.permute.xlu1 %1063 }
  0x87   : > { %v1232_v16 = vsel %vm1230_vm0, %v1195_v10, %v1197_v13 }
  0x88   : > { %434 = vrot.lane.b32.xlu0 %v1159_v6, %s4187_s30  ;;  %436 = vrot.lane.b32.xlu1 %v1160_v7, %s4187_s30 }
  0x89   : > { %1472 = vmatprep.subr.mxu0 %v1232_v16 }
  0x8a   : > { %v1066_v18 = vpop.permute.xlu0 %1065  ;;  %v1062_v19 = vpop.permute.xlu1 %1061  ;;  %1473 = vmatpush1.msra.mxu0 %v1231_v12 }
  0x8b   : > { %v1101_v20 = vsel %vm1099_vm1, %v1064_v14, %v1066_v18  ;;  %v1100_v21 = vsel %vm1099_vm1, %v1062_v19, %v1064_v14 }
  0x8c   : > { %690 = vrot.lane.b32.xlu0 %v4333_v8, %s4185_s28  ;;  %692 = vrot.lane.b32.xlu1 %v4336_v9, %s4185_s28 }
  0x8d   : > { %1474 = vmatprep.subr.mxu0 %v1101_v20 }
  0x8e   : > { %v935_v22 = vpop.permute.xlu1 %934  ;;  %v933_v23 = vpop.permute.xlu0 %932  ;;  %1475 = vmatpush1.msra.mxu0 %v1100_v21 }
  0x8f   : > { %v970_v24 = vsel %vm968_vm2, %v933_v23, %v935_v22 }
  0x90   : > { %308 = vrot.lane.b32.xlu0 %v1159_v6, %s4188_s6  ;;  %310 = vrot.lane.b32.xlu1 %v1160_v7, %s4188_s6  ;;  %v4190_v7 = vmov 0  }
  0x91   : > { %1476 = vmatprep.subr.mxu0 %v970_v24  ;;  %4168 = vset.pattern.permute.xlu1 %v4190_v7 }
  0x92   : > { %v4379_v25 = vpop.permute.xlu1 %1200  ;;  %v1199_v26 = vpop.permute.xlu0 %1198  ;;  %4169 = vset.pattern.permute.xlu0 %v4190_v7 }
  0x93   : > { %v1233_v27 = vsel %vm1230_vm0, %v1197_v13, %v1199_v26  ;;  %v1234_v28 = vsel %vm1230_vm0, %v1199_v26, %v4379_v25 }
  0x94   : > { %564 = vrot.lane.b32.xlu0 %v4333_v8, %s4186_s29  ;;  %566 = vrot.lane.b32.xlu1 %v4336_v9, %s4186_s29 }
  0x95   : > { %1543 = vmatprep.subr.mxu1 %v1234_v28  ;;  %v4498_v28 = vld [vmem:[%s4235_s23 + $0x40] sm:$0xff] }
  0x96   : > { %v931_v31 = vpop.permute.xlu0 %930  ;;  %v805_v32 = vpop.permute.xlu1 %804  ;;  %1544 = vmatpush1.msra.mxu1 %v1233_v27  ;;  %v4491_v27 = vld [vmem:[%s4235_s23 + $0x48] sm:$0xff] }
  0x97   : > { %v969_v33 = vsel %vm968_vm2, %v931_v31, %v933_v23 }
  0x98   : > { %438 = vrot.lane.b32.xlu0 %v4333_v8, %s4187_s30  ;;  %440 = vrot.lane.b32.xlu1 %v4336_v9, %s4187_s30 }
  0x99   : > { %1477 = vmatpush1.msra.mxu0 %v969_v33  ;;  %v4506_v33 = vld [vmem:[%s5650_s1] sm:$0xff] }
  0x9a   : > { %v807_v34 = vpop.permute.xlu0 %806  ;;  %v1068_v35 = vpop.permute.xlu1 %1067 }
  0x9b   : > { %v840_v36 = vsel %vm838_vm3, %v805_v32, %v807_v34  ;;  %v1102_v37 = vsel %vm1099_vm1, %v1066_v18, %v1068_v35 }
  0x9c   : > { %312 = vrot.lane.b32.xlu0 %v4333_v8, %s4188_s6  ;;  %314 = vrot.lane.b32.xlu1 %v4336_v9, %s4188_s6 }
  0x9d   : > { %1478 = vmatprep.subr.mxu0 %v840_v36 }
  0x9e   : > { %v4411_v40 = vpop.permute.xlu0 %1069  ;;  %v803_v41 = vpop.permute.xlu1 %802 }
  0x9f   : > { %v1103_v42 = vsel %vm1099_vm1, %v1068_v35, %v4411_v40  ;;  %v839_v43 = vsel %vm838_vm3, %v803_v41, %v805_v32 }
  0xa0   : > { %1210 = vrot.lane.b32.xlu0 %v4406_v38, %s4181_s24  ;;  %1212 = vrot.lane.b32.xlu1 %v4409_v39, %s4181_s24 }
  0xa1   : > { %1479 = vmatpush1.msra.mxu0 %v839_v43  ;;  %1545 = vmatprep.subr.mxu1 %v1103_v42 }
  0xa2   : > { %v681_v44 = vpop.permute.xlu1 %680  ;;  %v679_v45 = vpop.permute.xlu0 %678  ;;  %1546 = vmatpush1.msra.mxu1 %v1102_v37 }
  0xa3   : > { %v714_v46 = vsel %vm712_vm4, %v679_v45, %v681_v44 }
  0xa4   : > { %1079 = vrot.lane.b32.xlu0 %v4406_v38, %s4182_s25  ;;  %1081 = vrot.lane.b32.xlu1 %v4409_v39, %s4182_s25 }
  0xa5   : > { %1480 = vmatprep.subr.mxu0 %v714_v46 }
  0xa6   : > { %v4425_v47 = vpop.permute.xlu1 %938  ;;  %v937_v48 = vpop.permute.xlu0 %936 }
  0xa7   : > { %v971_v49 = vsel %vm968_vm2, %v935_v22, %v937_v48  ;;  %v972_v50 = vsel %vm968_vm2, %v937_v48, %v4425_v47 }
  0xa8   : > { %948 = vrot.lane.b32.xlu0 %v4406_v38, %s4183_s26  ;;  %950 = vrot.lane.b32.xlu1 %v4409_v39, %s4183_s26 }
  0xa9   : > { %1547 = vmatprep.subr.mxu1 %v972_v50 }
  0xaa   : > { %v677_v53 = vpop.permute.xlu0 %676  ;;  %v553_v54 = vpop.permute.xlu1 %552  ;;  %1548 = vmatpush1.msra.mxu1 %v971_v49 }
  0xab   : > { %v713_v55 = vsel %vm712_vm4, %v677_v53, %v679_v45  ;;  %v4533_v45 = vld [vmem:[%s4235_s23 + $0x58] sm:$0xff]  ;;  %v4564_v53 = vld [vmem:[%s4235_s23 + $0x70] sm:$0xff] }
  0xac   : > { %1214 = vrot.lane.b32.xlu0 %v4435_v51, %s4181_s24  ;;  %1216 = vrot.lane.b32.xlu1 %v4438_v52, %s4181_s24 }
  0xad   : > { %1481 = vmatpush1.msra.mxu0 %v713_v55 }
  0xae   : > { %v555_v56 = vpop.permute.xlu0 %554  ;;  %v809_v57 = vpop.permute.xlu1 %808 }
  0xaf   : > { %v588_v58 = vsel %vm586_vm5, %v553_v54, %v555_v56  ;;  %v841_v59 = vsel %vm838_vm3, %v807_v34, %v809_v57 }
  0xb0   : > { %820 = vrot.lane.b32.xlu0 %v4406_v38, %s4184_s27  ;;  %822 = vrot.lane.b32.xlu1 %v4409_v39, %s4184_s27 }
  0xb1   : > { %1482 = vmatprep.subr.mxu0 %v588_v58 }
  0xb2   : > { %v4451_v60 = vpop.permute.xlu0 %810  ;;  %v551_v61 = vpop.permute.xlu1 %550 }
  0xb3   : > { %v842_v62 = vsel %vm838_vm3, %v809_v57, %v4451_v60  ;;  %v587_v63 = vsel %vm586_vm5, %v551_v61, %v553_v54 }
  0xb4   : > { %1083 = vrot.lane.b32.xlu0 %v4435_v51, %s4182_s25  ;;  %1085 = vrot.lane.b32.xlu1 %v4438_v52, %s4182_s25 }
  0xb5   : > { %1483 = vmatpush1.msra.mxu0 %v587_v63  ;;  %1549 = vmatprep.subr.mxu1 %v842_v62 }
  0xb6   : > { %v429_v4 = vpop.permute.xlu1 %428  ;;  %v427_v6 = vpop.permute.xlu0 %426  ;;  %1550 = vmatpush1.msra.mxu1 %v841_v59 }
  0xb7   : > { %v462_v8 = vsel %vm460_vm6, %v427_v6, %v429_v4 }
  0xb8   : > { %694 = vrot.lane.b32.xlu0 %v4406_v38, %s4185_s28  ;;  %696 = vrot.lane.b32.xlu1 %v4409_v39, %s4185_s28 }
  0xb9   : > { %1484 = vmatprep.subr.mxu0 %v462_v8 }
  0xba   : > { %v4465_v9 = vpop.permute.xlu1 %684  ;;  %v683_v10 = vpop.permute.xlu0 %682 }
  0xbb   : > { %v715_v11 = vsel %vm712_vm4, %v681_v44, %v683_v10  ;;  %v716_v12 = vsel %vm712_vm4, %v683_v10, %v4465_v9 }
  0xbc   : > { %952 = vrot.lane.b32.xlu0 %v4435_v51, %s4183_s26  ;;  %954 = vrot.lane.b32.xlu1 %v4438_v52, %s4183_s26 }
  0xbd   : > { %1551 = vmatprep.subr.mxu1 %v716_v12 }
  0xbe   : > { %v425_v13 = vpop.permute.xlu0 %424  ;;  %v301_v14 = vpop.permute.xlu1 %300  ;;  %1552 = vmatpush1.msra.mxu1 %v715_v11 }
  0xbf   : > { %v461_v16 = vsel %vm460_vm6, %v425_v13, %v427_v6 }
  0xc0   : > { %568 = vrot.lane.b32.xlu0 %v4406_v38, %s4186_s29  ;;  %570 = vrot.lane.b32.xlu1 %v4409_v39, %s4186_s29 }
  0xc1   : > { %1485 = vmatpush1.msra.mxu0 %v461_v16 }
  0xc2   : > { %v303_v18 = vpop.permute.xlu0 %302  ;;  %v557_v19 = vpop.permute.xlu1 %556 }
  0xc3   : > { %v336_v20 = vsel %vm334_vm7, %v301_v14, %v303_v18  ;;  %v589_v21 = vsel %vm586_vm5, %v555_v56, %v557_v19 }
  0xc4   : > { %824 = vrot.lane.b32.xlu0 %v4435_v51, %s4184_s27  ;;  %826 = vrot.lane.b32.xlu1 %v4438_v52, %s4184_s27 }
  0xc5   : > { %1486 = vmatprep.subr.mxu0 %v336_v20 }
  0xc6   : > { %v4485_v22 = vpop.permute.xlu0 %558  ;;  %v299_v23 = vpop.permute.xlu1 %298 }
  0xc7   : > { %v590_v24 = vsel %vm586_vm5, %v557_v19, %v4485_v22  ;;  %v335_v26 = vsel %vm334_vm7, %v299_v23, %v301_v14 }
  0xc8   : > { %442 = vrot.lane.b32.xlu0 %v4406_v38, %s4187_s30  ;;  %444 = vrot.lane.b32.xlu1 %v4409_v39, %s4187_s30 }
  0xc9   : > { %1553 = vmatprep.subr.mxu1 %v590_v24  ;;  %1487 = vmatpush1.msra.mxu0 %v335_v26 }
  0xca   : > { %v431_v31 = vpop.permute.xlu0 %430  ;;  %v4500_v32 = vpop.permute.xlu1 %432  ;;  %1554 = vmatpush1.msra.mxu1 %v589_v21  ;;  %1488 = vmatprep.subr.mxu0 %v4238_v0 }
  0xcb   : > { %v463_v34 = vsel %vm460_vm6, %v429_v4, %v431_v31  ;;  %v464_v35 = vsel %vm460_vm6, %v431_v31, %v4500_v32  ;;  %1489 = vmatpush1.msra.mxu0 %v4241_v1  ;;  %v4595_v4 = vld [vmem:[%s4235_s23 + $0x80] sm:$0xff] }
  0xcc   : > { %698 = vrot.lane.b32.xlu0 %v4435_v51, %s4185_s28  ;;  %700 = vrot.lane.b32.xlu1 %v4438_v52, %s4185_s28 }
  0xcd   : > { %1555 = vmatprep.subr.mxu1 %v464_v35  ;;  %4087 = vmatmul.mubr.msk.f32.vlgmr.msra.gmra.mxu0 %vm1454_vm8, %v4506_v33 }
  0xce   : > { %v305_v0 = vpop.permute.xlu0 %304  ;;  %v4518_v36 = vpop.permute.xlu1 %306  ;;  %1556 = vmatpush1.msra.mxu1 %v463_v34  ;;  %1664 = vmatprep.mubr.f32.mxu0 %v4189_v5 }
  0xcf   : > { %v337_v1 = vsel %vm334_vm7, %v303_v18, %v305_v0  ;;  %v338_v37 = vsel %vm334_vm7, %v305_v0, %v4518_v36 }
  0xd0   : > { %316 = vrot.lane.b32.xlu0 %v4406_v38, %s4188_s6  ;;  %318 = vrot.lane.b32.xlu1 %v4409_v39, %s4188_s6  ;;  %v4540_v38 = vld [vmem:[%s4235_s23 + $0x50] sm:$0xff] }
  0xd1   : > { %1557 = vmatprep.subr.mxu1 %v338_v37 }
  0xd2   : > { %v1203_v41 = vpop.permute.xlu0 %1202  ;;  %v1205_v42 = vpop.permute.xlu1 %1204  ;;  %1558 = vmatpush1.msra.mxu1 %v337_v1 }
  0xd3   : > { %v1235_v43 = vsel %vm1230_vm0, %v4379_v25, %v1203_v41  ;;  %v1236_v44 = vsel %vm1230_vm0, %v1203_v41, %v1205_v42  ;;  %1559 = vmatprep.subr.mxu1 %v4251_v3 }
  0xd4   : > { %572 = vrot.lane.b32.xlu0 %v4435_v51, %s4186_s29  ;;  %574 = vrot.lane.b32.xlu1 %v4438_v52, %s4186_s29 }
  0xd5   : > { %1614 = vmatprep.subr.mxu0 %v1236_v44  ;;  %1560 = vmatpush1.msra.mxu1 %v4244_v2 }
  0xd6   : > { %v1072_v39 = vpop.permute.xlu0 %1071  ;;  %v1074_v46 = vpop.permute.xlu1 %1073  ;;  %1615 = vmatpush1.msra.mxu0 %v1235_v43  ;;  %4088 = vmatmul.mubr.msk.f32.vlgmr.msra.gmra.mxu1 %vm1454_vm8, %v4506_v33 }
  0xd7   : > { %v1104_v3 = vsel %vm1099_vm1, %v4411_v40, %v1072_v39  ;;  %v1105_v25 = vsel %vm1099_vm1, %v1072_v39, %v1074_v46  ;;  %1735 = vmatprep.mubr.f32.mxu1 %v4189_v5  ;;  %v4561_v40 = vld [vmem:[%s4235_s23 + $0x68] sm:$0xff] }
  0xd8   : > { %446 = vrot.lane.b32.xlu0 %v4435_v51, %s4187_s30  ;;  %448 = vrot.lane.b32.xlu1 %v4438_v52, %s4187_s30 }
  0xd9   : > { %1616 = vmatprep.subr.mxu0 %v1105_v25  ;;  %v4666_v25 = vld [vmem:[%s4235_s23 + $0x60] sm:$0xff] }
  0xda   : > { %v941_v2 = vpop.permute.xlu0 %940  ;;  %v943_v48 = vpop.permute.xlu1 %942  ;;  %1617 = vmatpush1.msra.mxu0 %v1104_v3 }
  0xdb   : > { %v973_v49 = vsel %vm968_vm2, %v4425_v47, %v941_v2  ;;  %v974_v50 = vsel %vm968_vm2, %v941_v2, %v943_v48 }
  0xdc   : > { %320 = vrot.lane.b32.xlu0 %v4435_v51, %s4188_s6  ;;  %322 = vrot.lane.b32.xlu1 %v4438_v52, %s4188_s6 }
  0xdd   : > { %1618 = vmatprep.subr.mxu0 %v974_v50 }
  0xde   : > { %v1207_v54 = vpop.permute.xlu0 %1206  ;;  %v4566_v55 = vpop.permute.xlu1 %1208  ;;  %1619 = vmatpush1.msra.mxu0 %v973_v49 }
  0xdf   : > { %v1237_v56 = vsel %vm1230_vm0, %v1205_v42, %v1207_v54  ;;  %v1238_v47 = vsel %vm1230_vm0, %v1207_v54, %v4566_v55 }
  0xe0   : > { %1218 = vrot.lane.b32.xlu0 %v4561_v40, %s4181_s24  ;;  %1220 = vrot.lane.b32.xlu1 %v4564_v53, %s4181_s24 }
  0xe1   : > { %1685 = vmatprep.subr.mxu1 %v1238_v47 }
  0xe2   : > { %v813_v51 = vpop.permute.xlu0 %812  ;;  %v815_v52 = vpop.permute.xlu1 %814  ;;  %1686 = vmatpush1.msra.mxu1 %v1237_v56 }
  0xe3   : > { %v843_v57 = vsel %vm838_vm3, %v4451_v60, %v813_v51  ;;  %v844_v58 = vsel %vm838_vm3, %v813_v51, %v815_v52  ;;  %v4592_v60 = vld [vmem:[%s4235_s23 + $0x78] sm:$0xff] }
  0xe4   : > { %1087 = vrot.lane.b32.xlu0 %v4561_v40, %s4182_s25  ;;  %1089 = vrot.lane.b32.xlu1 %v4564_v53, %s4182_s25 }
  0xe5   : > { %1620 = vmatprep.subr.mxu0 %v844_v58  ;;  %v4695_v58 = vld [vmem:[%s4235_s23 + $0x78] sm:$0xff] }
  0xe6   : > { %v1076_v59 = vpop.permute.xlu0 %1075  ;;  %v4582_v61 = vpop.permute.xlu1 %1077  ;;  %1621 = vmatpush1.msra.mxu0 %v843_v57 }
  0xe7   : > { %v1106_v62 = vsel %vm1099_vm1, %v1074_v46, %v1076_v59  ;;  %v1107_v63 = vsel %vm1099_vm1, %v1076_v59, %v4582_v61 }
  0xe8   : > { %956 = vrot.lane.b32.xlu0 %v4561_v40, %s4183_s26  ;;  %958 = vrot.lane.b32.xlu1 %v4564_v53, %s4183_s26 }
  0xe9   : > { %1687 = vmatprep.subr.mxu1 %v1107_v63 }
  0xea   : > { %v687_v6 = vpop.permute.xlu0 %686  ;;  %v689_v7 = vpop.permute.xlu1 %688  ;;  %1688 = vmatpush1.msra.mxu1 %v1106_v62 }
  0xeb   : > { %v717_v8 = vsel %vm712_vm4, %v4465_v9, %v687_v6  ;;  %v718_v10 = vsel %vm712_vm4, %v687_v6, %v689_v7 }
  0xec   : > { %1222 = vrot.lane.b32.xlu0 %v4592_v60, %s4181_s24  ;;  %1224 = vrot.lane.b32.xlu1 %v4595_v4, %s4181_s24 }
  0xed   : > { %1622 = vmatprep.subr.mxu0 %v718_v10 }
  0xee   : > { %v945_v11 = vpop.permute.xlu0 %944  ;;  %v4604_v12 = vpop.permute.xlu1 %946  ;;  %1623 = vmatpush1.msra.mxu0 %v717_v8 }
  0xef   : > { %v975_v13 = vsel %vm968_vm2, %v943_v48, %v945_v11  ;;  %v976_v14 = vsel %vm968_vm2, %v945_v11, %v4604_v12 }
  0xf0   : > { %828 = vrot.lane.b32.xlu0 %v4561_v40, %s4184_s27  ;;  %830 = vrot.lane.b32.xlu1 %v4564_v53, %s4184_s27 }
  0xf1   : > { %1689 = vmatprep.subr.mxu1 %v976_v14 }
  0xf2   : > { %v561_v9 = vpop.permute.xlu0 %560  ;;  %v563_v16 = vpop.permute.xlu1 %562  ;;  %1690 = vmatpush1.msra.mxu1 %v975_v13 }
  0xf3   : > { %v591_v18 = vsel %vm586_vm5, %v4485_v22, %v561_v9  ;;  %v592_v19 = vsel %vm586_vm5, %v561_v9, %v563_v16 }
  0xf4   : > { %1091 = vrot.lane.b32.xlu0 %v4592_v60, %s4182_s25  ;;  %1093 = vrot.lane.b32.xlu1 %v4595_v4, %s4182_s25 }
  0xf5   : > { %1624 = vmatprep.subr.mxu0 %v592_v19 }
  0xf6   : > { %v817_v20 = vpop.permute.xlu0 %816  ;;  %v4620_v21 = vpop.permute.xlu1 %818  ;;  %1625 = vmatpush1.msra.mxu0 %v591_v18 }
  0xf7   : > { %v845_v23 = vsel %vm838_vm3, %v815_v52, %v817_v20  ;;  %v846_v24 = vsel %vm838_vm3, %v817_v20, %v4620_v21 }
  0xf8   : > { %702 = vrot.lane.b32.xlu0 %v4561_v40, %s4185_s28  ;;  %704 = vrot.lane.b32.xlu1 %v4564_v53, %s4185_s28 }
  0xf9   : > { %1691 = vmatprep.subr.mxu1 %v846_v24 }
  0xfa   : > { %v435_v22 = vpop.permute.xlu0 %434  ;;  %v437_v26 = vpop.permute.xlu1 %436  ;;  %1692 = vmatpush1.msra.mxu1 %v845_v23 }
  0xfb   : > { %v465_v31 = vsel %vm460_vm6, %v4500_v32, %v435_v22  ;;  %v466_v34 = vsel %vm460_vm6, %v435_v22, %v437_v26 }
  0xfc   : > { %960 = vrot.lane.b32.xlu0 %v4592_v60, %s4183_s26  ;;  %962 = vrot.lane.b32.xlu1 %v4595_v4, %s4183_s26 }
  0xfd   : > { %1626 = vmatprep.subr.mxu0 %v466_v34 }
  0xfe   : > { %v691_v35 = vpop.permute.xlu0 %690  ;;  %v4636_v0 = vpop.permute.xlu1 %692  ;;  %1627 = vmatpush1.msra.mxu0 %v465_v31 }
  0xff   : > { %v719_v1 = vsel %vm712_vm4, %v689_v7, %v691_v35  ;;  %v720_v37 = vsel %vm712_vm4, %v691_v35, %v4636_v0  ;;  %v1448_v35 = vld [vmem:[%s5651_s2] sm:$0xff] }
 0x100   : > { %576 = vrot.lane.b32.xlu0 %v4561_v40, %s4186_s29  ;;  %578 = vrot.lane.b32.xlu1 %v4564_v53, %s4186_s29 }
 0x101   : > { %1693 = vmatprep.subr.mxu1 %v720_v37 }
 0x102   : > { %v309_v32 = vpop.permute.xlu0 %308  ;;  %v311_v41 = vpop.permute.xlu1 %310  ;;  %1694 = vmatpush1.msra.mxu1 %v719_v1 }
 0x103   : > { %v339_v42 = vsel %vm334_vm7, %v4518_v36, %v309_v32  ;;  %v340_v43 = vsel %vm334_vm7, %v309_v32, %v311_v41  ;;  %v4659_v36 = vld [vmem:[%s4235_s23 + $0x68] sm:$0xff] }
 0x104   : > { %832 = vrot.lane.b32.xlu0 %v4592_v60, %s4184_s27  ;;  %834 = vrot.lane.b32.xlu1 %v4595_v4, %s4184_s27 }
 0x105   : > { %1628 = vmatprep.subr.mxu0 %v340_v43 }
 0x106   : > { %v565_v44 = vpop.permute.xlu0 %564  ;;  %v4652_v39 = vpop.permute.xlu1 %566  ;;  %1629 = vmatpush1.msra.mxu0 %v339_v42 }
 0x107   : > { %v593_v46 = vsel %vm586_vm5, %v563_v16, %v565_v44  ;;  %v594_v3 = vsel %vm586_vm5, %v565_v44, %v4652_v39  ;;  %1630 = vmatprep.subr.mxu0 %v4362_v15 }
 0x108   : > { %450 = vrot.lane.b32.xlu0 %v4561_v40, %s4187_s30  ;;  %452 = vrot.lane.b32.xlu1 %v4564_v53, %s4187_s30 }
 0x109   : > { %1631 = vmatpush1.msra.mxu0 %v4366_v17  ;;  %1695 = vmatprep.subr.mxu1 %v594_v3 }
 0x10a   : > { %v439_v2 = vpop.permute.xlu0 %438  ;;  %v4669_v48 = vpop.permute.xlu1 %440  ;;  %4089 = vmatmul.mubr.msk.f32.vlgmr.msra.gmra.mxu0 %vm1454_vm8, %v4506_v33  ;;  %1696 = vmatpush1.msra.mxu1 %v593_v46 }
 0x10b   : > { %v467_v15 = vsel %vm460_vm6, %v437_v26, %v439_v2  ;;  %v468_v49 = vsel %vm460_vm6, %v439_v2, %v4669_v48  ;;  %1806 = vmatprep.mubr.f32.mxu0 %v4189_v5 }
 0x10c   : > { %706 = vrot.lane.b32.xlu0 %v4592_v60, %s4185_s28  ;;  %708 = vrot.lane.b32.xlu1 %v4595_v4, %s4185_s28 }
 0x10d   : > { %1697 = vmatprep.subr.mxu1 %v468_v49 }
 0x10e   : > { %v313_v17 = vpop.permute.xlu0 %312  ;;  %v4681_v50 = vpop.permute.xlu1 %314  ;;  %1698 = vmatpush1.msra.mxu1 %v467_v15 }
 0x10f   : > { %v341_v54 = vsel %vm334_vm7, %v311_v41, %v313_v17  ;;  %v342_v56 = vsel %vm334_vm7, %v313_v17, %v4681_v50  ;;  %v4773_v41 = vld [vmem:[%s4235_s23 + $0x80] sm:$0xff] }
 0x110   : > { %324 = vrot.lane.b32.xlu0 %v4561_v40, %s4188_s6  ;;  %326 = vrot.lane.b32.xlu1 %v4564_v53, %s4188_s6  ;;  %v4702_v40 = vld [vmem:[%s4235_s23 + $0x88] sm:$0xff]  ;;  %v4705_v53 = vld [vmem:[%s4235_s23 + $0x70] sm:$0xff] }
 0x111   : > { %1699 = vmatprep.subr.mxu1 %v342_v56  ;;  %261 = vst.msk [vmem:[#allocation3 + $0x88] sm:$0xff] %vm260_vm9, %v4702_v40 }
 0x112   : > { %v1211_v47 = vpop.permute.xlu0 %1210  ;;  %v1213_v51 = vpop.permute.xlu1 %1212  ;;  %1700 = vmatpush1.msra.mxu1 %v341_v54 }
 0x113   : > { %v1239_v52 = vsel %vm1230_vm0, %v4566_v55, %v1211_v47  ;;  %v1240_v57 = vsel %vm1230_vm0, %v1211_v47, %v1213_v51  ;;  %1701 = vmatprep.subr.mxu1 %v4385_v29 }
 0x114   : > { %580 = vrot.lane.b32.xlu0 %v4592_v60, %s4186_s29  ;;  %582 = vrot.lane.b32.xlu1 %v4595_v4, %s4186_s29 }
 0x115   : > { %1702 = vmatpush1.msra.mxu1 %v4392_v30  ;;  %1756 = vmatprep.subr.mxu0 %v1240_v57 }
 0x116   : > { %v1080_v29 = vpop.permute.xlu0 %1079  ;;  %v1082_v55 = vpop.permute.xlu1 %1081  ;;  %4090 = vmatmul.mubr.msk.f32.vlgmr.msra.gmra.mxu1 %vm1454_vm8, %v4506_v33  ;;  %1757 = vmatpush1.msra.mxu0 %v1239_v52 }
 0x117   : > { %v1108_v59 = vsel %vm1099_vm1, %v4582_v61, %v1080_v29  ;;  %v1109_v62 = vsel %vm1099_vm1, %v1080_v29, %v1082_v55  ;;  %1877 = vmatprep.mubr.f32.mxu1 %v4189_v5  ;;  %v1172_v61 = vld [vmem:[%s4235_s23 + $0x90] sm:$0xff]  ;;  %s4149_s23 = smul.u32 272, %s5656_s19 }
 0x118   : > { %454 = vrot.lane.b32.xlu0 %v4592_v60, %s4187_s30  ;;  %456 = vrot.lane.b32.xlu1 %v4595_v4, %s4187_s30 }
 0x119   : > { %1758 = vmatprep.subr.mxu0 %v1109_v62 }
 0x11a   : > { %v949_v30 = vpop.permute.xlu0 %948  ;;  %v951_v63 = vpop.permute.xlu1 %950  ;;  %1759 = vmatpush1.msra.mxu0 %v1108_v59 }
 0x11b   : > { %v977_v6 = vsel %vm968_vm2, %v4604_v12, %v949_v30  ;;  %v978_v7 = vsel %vm968_vm2, %v949_v30, %v951_v63 }
 0x11c   : > { %328 = vrot.lane.b32.xlu0 %v4592_v60, %s4188_s6  ;;  %330 = vrot.lane.b32.xlu1 %v4595_v4, %s4188_s6 }
 0x11d   : > { %1760 = vmatprep.subr.mxu0 %v978_v7 }
 0x11e   : > { %v1215_v8 = vpop.permute.xlu0 %1214  ;;  %v4728_v10 = vpop.permute.xlu1 %1216  ;;  %1761 = vmatpush1.msra.mxu0 %v977_v6 }
 0x11f   : > { %v1241_v11 = vsel %vm1230_vm0, %v1213_v51, %v1215_v8  ;;  %v1242_v13 = vsel %vm1230_vm0, %v1215_v8, %v4728_v10 }
 0x120   : > { %1226 = vrot.lane.b32.xlu0 %v4702_v40, %s4181_s24  ;;  %1228 = vrot.lane.b32.xlu1 %v1172_v61, %s4181_s24 }
 0x121   : > { %1827 = vmatprep.subr.mxu1 %v1242_v13 }
 0x122   : > { %v821_v60 = vpop.permute.xlu0 %820  ;;  %v823_v12 = vpop.permute.xlu1 %822  ;;  %1828 = vmatpush1.msra.mxu1 %v1241_v11 }
 0x123   : > { %v847_v4 = vsel %vm838_vm3, %v4620_v21, %v821_v60  ;;  %v848_v14 = vsel %vm838_vm3, %v821_v60, %v823_v12 }
 0x124   : > { %1095 = vrot.lane.b32.xlu0 %v4702_v40, %s4182_s25  ;;  %1097 = vrot.lane.b32.xlu1 %v1172_v61, %s4182_s25 }
 0x125   : > { %1762 = vmatprep.subr.mxu0 %v848_v14 }
 0x126   : > { %v1084_v9 = vpop.permute.xlu0 %1083  ;;  %v4742_v16 = vpop.permute.xlu1 %1085  ;;  %1763 = vmatpush1.msra.mxu0 %v847_v4 }
 0x127   : > { %v1110_v18 = vsel %vm1099_vm1, %v1082_v55, %v1084_v9  ;;  %v1111_v19 = vsel %vm1099_vm1, %v1084_v9, %v4742_v16 }
 0x128   : > { %964 = vrot.lane.b32.xlu0 %v4702_v40, %s4183_s26  ;;  %966 = vrot.lane.b32.xlu1 %v1172_v61, %s4183_s26 }
 0x129   : > { %1829 = vmatprep.subr.mxu1 %v1111_v19 }
 0x12a   : > { %v695_v20 = vpop.permute.xlu0 %694  ;;  %v697_v21 = vpop.permute.xlu1 %696  ;;  %1830 = vmatpush1.msra.mxu1 %v1110_v18 }
 0x12b   : > { %v721_v23 = vsel %vm712_vm4, %v4636_v0, %v695_v20  ;;  %v722_v24 = vsel %vm712_vm4, %v695_v20, %v697_v21 }
 0x12c   : > { %836 = vrot.lane.b32.xlu0 %v4702_v40, %s4184_s27  ;;  %710 = vrot.lane.b32.xlu1 %v4702_v40, %s4185_s28 }
 0x12d   : > { %1764 = vmatprep.subr.mxu0 %v722_v24 }
 0x12e   : > { %v953_v22 = vpop.permute.xlu0 %952  ;;  %v4757_v26 = vpop.permute.xlu1 %954  ;;  %1765 = vmatpush1.msra.mxu0 %v721_v23 }
 0x12f   : > { %v979_v31 = vsel %vm968_vm2, %v951_v63, %v953_v22  ;;  %v980_v34 = vsel %vm968_vm2, %v953_v22, %v4757_v26 }
 0x130   : > { %584 = vrot.lane.b32.xlu0 %v4702_v40, %s4186_s29  ;;  %458 = vrot.lane.b32.xlu1 %v4702_v40, %s4187_s30 }
 0x131   : > { %1831 = vmatprep.subr.mxu1 %v980_v34 }
 0x132   : > { %v569_v0 = vpop.permute.xlu0 %568  ;;  %v571_v1 = vpop.permute.xlu1 %570  ;;  %1832 = vmatpush1.msra.mxu1 %v979_v31 }
 0x133   : > { %v595_v37 = vsel %vm586_vm5, %v4652_v39, %v569_v0  ;;  %v596_v32 = vsel %vm586_vm5, %v569_v0, %v571_v1 }
 0x134   : > { %332 = vrot.lane.b32.xlu0 %v4702_v40, %s4188_s6  ;;  %1451 = vperm.xlu1 %4168, %v1448_v35  }
 0x135   : > { %1766 = vmatprep.subr.mxu0 %v596_v32 }
 0x136   : > { %v825_v42 = vpop.permute.xlu0 %824  ;;  %v4777_v43 = vpop.permute.xlu1 %826  ;;  %1767 = vmatpush1.msra.mxu0 %v595_v37 }
 0x137   : > { %v849_v44 = vsel %vm838_vm3, %v823_v12, %v825_v42  ;;  %v850_v46 = vsel %vm838_vm3, %v825_v42, %v4777_v43 }
 0x138   : > { %1833 = vmatprep.subr.mxu1 %v850_v46 }
 0x139   : > { %1834 = vmatpush1.msra.mxu1 %v849_v44 }
 0x13a   : > { %v443_v39 = vpop.permute.xlu0 %442  ;;  %v445_v3 = vpop.permute.xlu1 %444 }
 0x13b   : > { %v469_v2 = vsel %vm460_vm6, %v4669_v48, %v443_v39  ;;  %v470_v15 = vsel %vm460_vm6, %v443_v39, %v445_v3 }
 0x13c   : > { %1768 = vmatprep.subr.mxu0 %v470_v15 }
 0x13d   : > { %1769 = vmatpush1.msra.mxu0 %v469_v2 }
 0x13e   : > { %v699_v49 = vpop.permute.xlu0 %698  ;;  %v4785_v17 = vpop.permute.xlu1 %700 }
 0x13f   : > { %v723_v54 = vsel %vm712_vm4, %v697_v21, %v699_v49  ;;  %v724_v56 = vsel %vm712_vm4, %v699_v49, %v4785_v17 }
 0x140   : > { %1835 = vmatprep.subr.mxu1 %v724_v56 }
 0x141   : > { %1836 = vmatpush1.msra.mxu1 %v723_v54 }
 0x142   : > { %v317_v47 = vpop.permute.xlu0 %316  ;;  %v319_v51 = vpop.permute.xlu1 %318 }
 0x143   : > { %v343_v52 = vsel %vm334_vm7, %v4681_v50, %v317_v47  ;;  %v344_v48 = vsel %vm334_vm7, %v317_v47, %v319_v51 }
 0x144   : > { %1770 = vmatprep.subr.mxu0 %v344_v48 }
 0x145   : > { %1771 = vmatpush1.msra.mxu0 %v343_v52 }
 0x146   : > { %v573_v57 = vpop.permute.xlu0 %572  ;;  %v4793_v40 = vpop.permute.xlu1 %574  ;;  %1772 = vmatprep.subr.mxu0 %v4491_v27 }
 0x147   : > { %v597_v29 = vsel %vm586_vm5, %v571_v1, %v573_v57  ;;  %v598_v55 = vsel %vm586_vm5, %v573_v57, %v4793_v40  ;;  %1773 = vmatpush1.msra.mxu0 %v4498_v28 }
 0x148   : > { %4091 = vmatmul.mubr.msk.f32.vlgmr.msra.gmra.mxu0 %vm1454_vm8, %v4506_v33  ;;  %1837 = vmatprep.subr.mxu1 %v598_v55 }
 0x149   : > { %1838 = vmatpush1.msra.mxu1 %v597_v29  ;;  %1948 = vmatprep.mubr.f32.mxu0 %v4189_v5 }
 0x14a   : > { %v447_v50 = vpop.permute.xlu0 %446  ;;  %v4803_v59 = vpop.permute.xlu1 %448 }
 0x14b   : > { %v471_v62 = vsel %vm460_vm6, %v445_v3, %v447_v50  ;;  %v472_v27 = vsel %vm460_vm6, %v447_v50, %v4803_v59 }
 0x14c   : > { %1839 = vmatprep.subr.mxu1 %v472_v27 }
 0x14d   : > { %1840 = vmatpush1.msra.mxu1 %v471_v62 }
 0x14e   : > { %v321_v30 = vpop.permute.xlu0 %320  ;;  %v4808_v63 = vpop.permute.xlu1 %322 }
 0x14f   : > { %v345_v28 = vsel %vm334_vm7, %v319_v51, %v321_v30  ;;  %v346_v6 = vsel %vm334_vm7, %v321_v30, %v4808_v63 }
 0x150   : > { %1841 = vmatprep.subr.mxu1 %v346_v6 }
 0x151   : > { %1842 = vmatpush1.msra.mxu1 %v345_v28 }
 0x152   : > { %v1219_v7 = vpop.permute.xlu0 %1218  ;;  %v1221_v61 = vpop.permute.xlu1 %1220  ;;  %1843 = vmatprep.subr.mxu1 %v4533_v45 }
 0x153   : > { %v1243_v8 = vsel %vm1230_vm0, %v4728_v10, %v1219_v7  ;;  %v1244_v11 = vsel %vm1230_vm0, %v1219_v7, %v1221_v61  ;;  %1844 = vmatpush1.msra.mxu1 %v4540_v38 }
 0x154   : > { %4092 = vmatmul.mubr.msk.f32.vlgmr.msra.gmra.mxu1 %vm1454_vm8, %v4506_v33  ;;  %1898 = vmatprep.subr.mxu0 %v1244_v11 }
 0x155   : > { %1899 = vmatpush1.msra.mxu0 %v1243_v8  ;;  %2019 = vmatprep.mubr.f32.mxu1 %v4189_v5 }
 0x156   : > { %v1088_v13 = vpop.permute.xlu0 %1087  ;;  %v1090_v60 = vpop.permute.xlu1 %1089 }
 0x157   : > { %v1112_v12 = vsel %vm1099_vm1, %v4742_v16, %v1088_v13  ;;  %v1113_v45 = vsel %vm1099_vm1, %v1088_v13, %v1090_v60 }
 0x158   : > { %1900 = vmatprep.subr.mxu0 %v1113_v45 }
 0x159   : > { %1901 = vmatpush1.msra.mxu0 %v1112_v12 }
 0x15a   : > { %v957_v10 = vpop.permute.xlu0 %956  ;;  %v959_v4 = vpop.permute.xlu1 %958 }
 0x15b   : > { %v981_v38 = vsel %vm968_vm2, %v4757_v26, %v957_v10  ;;  %v982_v14 = vsel %vm968_vm2, %v957_v10, %v959_v4  ;;  %v4884_v10 = vld [vmem:[%s5650_s1] sm:$0xff] }
 0x15c   : > { %1902 = vmatprep.subr.mxu0 %v982_v14 }
 0x15d   : > { %1903 = vmatpush1.msra.mxu0 %v981_v38 }
 0x15e   : > { %v1223_v9 = vpop.permute.xlu0 %1222  ;;  %v4827_v18 = vpop.permute.xlu1 %1224 }
 0x15f   : > { %v1245_v19 = vsel %vm1230_vm0, %v1221_v61, %v1223_v9  ;;  %v1246_v16 = vsel %vm1230_vm0, %v1223_v9, %v4827_v18 }
 0x160   : > { %1969 = vmatprep.subr.mxu1 %v1246_v16 }
 0x161   : > { %1970 = vmatpush1.msra.mxu1 %v1245_v19 }
 0x162   : > { %v829_v20 = vpop.permute.xlu0 %828  ;;  %v831_v21 = vpop.permute.xlu1 %830 }
 0x163   : > { %v851_v23 = vsel %vm838_vm3, %v4777_v43, %v829_v20  ;;  %v852_v24 = vsel %vm838_vm3, %v829_v20, %v831_v21 }
 0x164   : > { %1904 = vmatprep.subr.mxu0 %v852_v24 }
 0x165   : > { %1905 = vmatpush1.msra.mxu0 %v851_v23 }
 0x166   : > { %v1092_v22 = vpop.permute.xlu0 %1091  ;;  %v4835_v26 = vpop.permute.xlu1 %1093 }
 0x167   : > { %v1114_v31 = vsel %vm1099_vm1, %v1090_v60, %v1092_v22  ;;  %v1115_v34 = vsel %vm1099_vm1, %v1092_v22, %v4835_v26 }
 0x168   : > { %1971 = vmatprep.subr.mxu1 %v1115_v34 }
 0x169   : > { %1972 = vmatpush1.msra.mxu1 %v1114_v31 }
 0x16a   : > { %v703_v35 = vpop.permute.xlu0 %702  ;;  %v705_v0 = vpop.permute.xlu1 %704 }
 0x16b   : > { %v725_v1 = vsel %vm712_vm4, %v4785_v17, %v703_v35  ;;  %v726_v37 = vsel %vm712_vm4, %v703_v35, %v705_v0 }
 0x16c   : > { %1906 = vmatprep.subr.mxu0 %v726_v37 }
 0x16d   : > { %1907 = vmatpush1.msra.mxu0 %v725_v1 }
 0x16e   : > { %v961_v32 = vpop.permute.xlu0 %960  ;;  %v4843_v42 = vpop.permute.xlu1 %962 }
 0x16f   : > { %v983_v43 = vsel %vm968_vm2, %v959_v4, %v961_v32  ;;  %v984_v44 = vsel %vm968_vm2, %v961_v32, %v4843_v42 }
 0x170   : > { %1973 = vmatprep.subr.mxu1 %v984_v44 }
 0x171   : > { %1974 = vmatpush1.msra.mxu1 %v983_v43 }
 0x172   : > { %v577_v46 = vpop.permute.xlu0 %576  ;;  %v579_v39 = vpop.permute.xlu1 %578 }
 0x173   : > { %v599_v3 = vsel %vm586_vm5, %v4793_v40, %v577_v46  ;;  %v600_v2 = vsel %vm586_vm5, %v577_v46, %v579_v39 }
 0x174   : > { %1908 = vmatprep.subr.mxu0 %v600_v2 }
 0x175   : > { %1909 = vmatpush1.msra.mxu0 %v599_v3 }
 0x176   : > { %v833_v15 = vpop.permute.xlu0 %832  ;;  %v4851_v49 = vpop.permute.xlu1 %834 }
 0x177   : > { %v853_v17 = vsel %vm838_vm3, %v831_v21, %v833_v15  ;;  %v854_v54 = vsel %vm838_vm3, %v833_v15, %v4851_v49 }
 0x178   : > { %1975 = vmatprep.subr.mxu1 %v854_v54 }
 0x179   : > { %1976 = vmatpush1.msra.mxu1 %v853_v17 }
 0x17a   : > { %v451_v56 = vpop.permute.xlu0 %450  ;;  %v453_v47 = vpop.permute.xlu1 %452 }
 0x17b   : > { %v473_v51 = vsel %vm460_vm6, %v4803_v59, %v451_v56  ;;  %v474_v52 = vsel %vm460_vm6, %v451_v56, %v453_v47 }
 0x17c   : > { %1910 = vmatprep.subr.mxu0 %v474_v52 }
 0x17d   : > { %1911 = vmatpush1.msra.mxu0 %v473_v51 }
 0x17e   : > { %v707_v48 = vpop.permute.xlu0 %706  ;;  %v709_v57 = vpop.permute.xlu1 %708 }
 0x17f   : > { %v727_v40 = vsel %vm712_vm4, %v705_v0, %v707_v48  ;;  %v728_v29 = vsel %vm712_vm4, %v707_v48, %v709_v57 }
 0x180   : > { %1977 = vmatprep.subr.mxu1 %v728_v29 }
 0x181   : > { %1978 = vmatpush1.msra.mxu1 %v727_v40 }
 0x182   : > { %v325_v55 = vpop.permute.xlu0 %324  ;;  %v327_v50 = vpop.permute.xlu1 %326 }
 0x183   : > { %v347_v62 = vsel %vm334_vm7, %v4808_v63, %v325_v55  ;;  %v348_v27 = vsel %vm334_vm7, %v325_v55, %v327_v50 }
 0x184   : > { %1912 = vmatprep.subr.mxu0 %v348_v27 }
 0x185   : > { %1913 = vmatpush1.msra.mxu0 %v347_v62 }
 0x186   : > { %v581_v59 = vpop.permute.xlu0 %580  ;;  %v583_v30 = vpop.permute.xlu1 %582  ;;  %1914 = vmatprep.subr.mxu0 %v4659_v36 }
 0x187   : > { %v601_v28 = vsel %vm586_vm5, %v579_v39, %v581_v59  ;;  %v602_v6 = vsel %vm586_vm5, %v581_v59, %v583_v30  ;;  %1915 = vmatpush1.msra.mxu0 %v4666_v25 }
 0x188   : > { %4093 = vmatmul.mubr.msk.f32.vlgmr.msra.gmra.mxu0 %vm1454_vm8, %v4506_v33  ;;  %1979 = vmatprep.subr.mxu1 %v602_v6 }
 0x189   : > { %1980 = vmatpush1.msra.mxu1 %v601_v28  ;;  %2090 = vmatprep.mubr.f32.mxu0 %v4189_v5 }
 0x18a   : > { %v455_v63 = vpop.permute.xlu0 %454  ;;  %v457_v7 = vpop.permute.xlu1 %456 }
 0x18b   : > { %v475_v61 = vsel %vm460_vm6, %v453_v47, %v455_v63  ;;  %v476_v8 = vsel %vm460_vm6, %v455_v63, %v457_v7 }
 0x18c   : > { %1981 = vmatprep.subr.mxu1 %v476_v8 }
 0x18d   : > { %1982 = vmatpush1.msra.mxu1 %v475_v61  ;;  %v1524_v43 = vpop.f32.mrf.mxu0 }
 0x18e   : > { %v329_v36 = vpop.permute.xlu0 %328  ;;  %v331_v11 = vpop.permute.xlu1 %330 }
 0x18f   : > { %v349_v13 = vsel %vm334_vm7, %v327_v50, %v329_v36  ;;  %v350_v25 = vsel %vm334_vm7, %v329_v36, %v331_v11  ;;  %v1526_v3 = vpop.f32.mrf.mxu0 }
 0x190   : > { %1983 = vmatprep.subr.mxu1 %v350_v25 }
 0x191   : > { %1984 = vmatpush1.msra.mxu1 %v349_v13 }
 0x192   : > { %v1227_v33 = vpop.permute.xlu0 %1226  ;;  %v1229_v60 = vpop.permute.xlu1 %1228  ;;  %1985 = vmatprep.subr.mxu1 %v4695_v58 }
 0x193   : > { %v1247_v12 = vsel %vm1230_vm0, %v4827_v18, %v1227_v33  ;;  %v1248_v45 = vsel %vm1230_vm0, %v1227_v33, %v1229_v60  ;;  %1986 = vmatpush1.msra.mxu1 %v4705_v53 }
 0x194   : > { %1284 = vst.msk [vmem:[#allocation3 + $0x508] sm:$0xff] %vm260_vm9, %v1248_v45  ;;  %4094 = vmatmul.mubr.msk.f32.vlgmr.msra.gmra.mxu1 %vm1454_vm8, %v4884_v10 }
 0x195   : > { %3364 = vmatprep.mubr.f32.mxu1 %v4189_v5 }
 0x196   : > { %v1096_v58 = vpop.permute.xlu0 %1095  ;;  %v1098_v4 = vpop.permute.xlu1 %1097 }
 0x197   : > { %v1116_v38 = vsel %vm1099_vm1, %v4835_v26, %v1096_v58  ;;  %v1117_v14 = vsel %vm1099_vm1, %v1096_v58, %v1098_v4  ;;  %v1595_v44 = vpop.f32.mrf.mxu1 }
 0x198   : > { %1153 = vst.msk [vmem:[#allocation3 + $0x478] sm:$0xff] %vm260_vm9, %v1117_v14 }
 0x199   : > { %v1597_v2 = vpop.f32.mrf.mxu1 }
 0x19a   : > { %v965_v53 = vpop.permute.xlu0 %964  ;;  %v967_v9 = vpop.permute.xlu1 %966 }
 0x19b   : > { %v985_v18 = vsel %vm968_vm2, %v4843_v42, %v965_v53  ;;  %v986_v19 = vsel %vm968_vm2, %v965_v53, %v967_v9  ;;  %v1447_v16 = vld [vmem:[#allocation3 + $0x508] sm:$0xff] }
 0x19c   : > { %1022 = vst.msk [vmem:[#allocation3 + $0x3e8] sm:$0xff] %vm260_vm9, %v986_v19  ;;  %2040 = vmatprep.subr.mxu0 %v1447_v16 }
 0x19d   : > { %2041 = vmatpush1.msra.mxu0 %v1247_v12 }
 0x19e   : > { %v837_v20 = vpop.permute.xlu0 %836  ;;  %v711_v21 = vpop.permute.xlu1 %710 }
 0x19f   : > { %v855_v23 = vsel %vm838_vm3, %v4851_v49, %v837_v20  ;;  %891 = vst.msk [vmem:[#allocation3 + $0x358] sm:$0xff] %vm260_vm9, %v837_v20  ;;  %v729_v24 = vsel %vm712_vm4, %v709_v57, %v711_v21  ;;  %765 = vst.msk [vmem:[#allocation3 + $0x2c8] sm:$0xff] %vm260_vm9, %v711_v21  ;;  %v1429_v22 = vld [vmem:[#allocation3 + $0x478] sm:$0xff]  ;;  %v1303_v49 = vld [vmem:[#allocation3 + $0x88] sm:$0xff] }
 0x1a0   : > { %2042 = vmatprep.subr.mxu0 %v1429_v22 }
 0x1a1   : > { %2043 = vmatpush1.msra.mxu0 %v1116_v38 }
 0x1a2   : > { %v585_v26 = vpop.permute.xlu0 %584  ;;  %v459_v31 = vpop.permute.xlu1 %458 }
 0x1a3   : > { %v603_v34 = vsel %vm586_vm5, %v583_v30, %v585_v26  ;;  %639 = vst.msk [vmem:[#allocation3 + $0x238] sm:$0xff] %vm260_vm9, %v585_v26  ;;  %v477_v35 = vsel %vm460_vm6, %v457_v7, %v459_v31  ;;  %513 = vst.msk [vmem:[#allocation3 + $0x1a8] sm:$0xff] %vm260_vm9, %v459_v31  ;;  %v1411_v0 = vld [vmem:[#allocation3 + $0x3e8] sm:$0xff] }
 0x1a4   : > { %2044 = vmatprep.subr.mxu0 %v1411_v0 }
 0x1a5   : > { %2045 = vmatpush1.msra.mxu0 %v985_v18 }
 0x1a6   : > { %v333_v1 = vpop.permute.xlu0 %332  ;;  %v1393_v37 = vld [vmem:[#allocation3 + $0x358] sm:$0xff]  ;;  %v1375_v42 = vld [vmem:[#allocation3 + $0x2c8] sm:$0xff] }
 0x1a7   : > { %v351_v32 = vsel %vm334_vm7, %v331_v11, %v333_v1  ;;  %387 = vst.msk [vmem:[#allocation3 + $0x118] sm:$0xff] %vm260_vm9, %v333_v1  ;;  %2046 = vmatprep.subr.mxu0 %v1393_v37 }
 0x1a8   : > { %2047 = vmatpush1.msra.mxu0 %v855_v23 }
 0x1a9   : > { %2048 = vmatprep.subr.mxu0 %v1375_v42 }
 0x1aa   : > { %2049 = vmatpush1.msra.mxu0 %v729_v24  ;;  %v1357_v46 = vld [vmem:[#allocation3 + $0x238] sm:$0xff]  ;;  %v1339_v39 = vld [vmem:[#allocation3 + $0x1a8] sm:$0xff] }
 0x1ab   : > { %2050 = vmatprep.subr.mxu0 %v1357_v46 }
 0x1ac   : > { %2051 = vmatpush1.msra.mxu0 %v603_v34 }
 0x1ad   : > { %2052 = vmatprep.subr.mxu0 %v1339_v39 }
 0x1ae   : > { %2053 = vmatpush1.msra.mxu0 %v477_v35  ;;  %v1321_v15 = vld [vmem:[#allocation3 + $0x118] sm:$0xff] }
 0x1af   : > { %v4908_v17 = vpop.permute.xlu1 %1451  ;;  %2054 = vmatprep.subr.mxu0 %v1321_v15 }
 0x1b0   : > { %v1527_v54 = vadd.f32 %v1526_v3, %v4908_v17  ;;  %v1598_v56 = vadd.f32 %v1597_v2, %v4908_v17  ;;  %2055 = vmatpush1.msra.mxu0 %v351_v32  ;;  %v1596_v47 = vadd.f32 %v1595_v44, %v4908_v17  ;;  %v1525_v51 = vadd.f32 %v1524_v43, %v4908_v17 }
 0x1b1   : > { %2056 = vmatprep.subr.mxu0 %v1303_v49 }
 0x1b2   : > { %v4914_v52 = vmax.f32 %v1527_v54, 0.0  ;;  %v4916_v48 = vmax.f32 %v1598_v56, 0.0  ;;  %2057 = vmatpush1.msra.mxu0 %v4773_v41  ;;  %v2099_v57 = vmax.f32 %v1596_v47, 0.0  ;;  %v4919_v40 = vmax.f32 %v1525_v51, 0.0 }
 0x1b3   : > { %4095 = vmatmul.mubr.msk.f32.vlgmr.msra.gmra.mxu0 %vm1454_vm8, %v4884_v10 }
 0x1b4   : > { %2153 = vst [vmem:[#allocation4 + $0x18] sm:$0xff] %v4916_v48  ;;  %2117 = vst [vmem:[#allocation2 + $0x10] sm:$0xff] %v2099_v57  ;;  %3044 = vrot.lane.b32.xlu1 %v2099_v57, %s4181_s24  ;;  %3040 = vrot.lane.b32.xlu0 %v4919_v40, %s4181_s24 }
 0x1b5   : > { %3441 = vmatprep.mubr.f32.mxu0 %v4189_v5 }
 0x1b8   : > { %2921 = vrot.lane.b32.xlu0 %v2099_v57, %s4182_s25  ;;  %2917 = vrot.lane.b32.xlu1 %v4919_v40, %s4182_s25 }
 0x1bb   : > { %v4931_v41 = vld [vmem:[#allocation2 + $0x10] sm:$0xff] }
 0x1bc   : > { %2798 = vrot.lane.b32.xlu1 %v2099_v57, %s4183_s26  ;;  %2794 = vrot.lane.b32.xlu0 %v4919_v40, %s4183_s26 }
 0x1c0   : > { %2678 = vrot.lane.b32.xlu0 %v2099_v57, %s4184_s27  ;;  %2674 = vrot.lane.b32.xlu1 %v4919_v40, %s4184_s27 }
 0x1c4   : > { %2560 = vrot.lane.b32.xlu1 %v2099_v57, %s4185_s28  ;;  %2556 = vrot.lane.b32.xlu0 %v4919_v40, %s4185_s28 }
 0x1c8   : > { %2442 = vrot.lane.b32.xlu0 %v2099_v57, %s4186_s29  ;;  %2438 = vrot.lane.b32.xlu1 %v4919_v40, %s4186_s29 }
 0x1ca   : > { %v1666_v29 = vpop.f32.mrf.mxu0 }
 0x1cb   : > { %v1667_v55 = vadd.f32 %v1666_v29, %v4908_v17 }
 0x1cc   : > { %v1668_v50 = vpop.f32.mrf.mxu0  ;;  %2324 = vrot.lane.b32.xlu1 %v2099_v57, %s4187_s30  ;;  %2320 = vrot.lane.b32.xlu0 %v4919_v40, %s4187_s30 }
 0x1cd   : > { %v2101_v62 = vmax.f32 %v1667_v55, 0.0  ;;  %v1669_v27 = vadd.f32 %v1668_v50, %v4908_v17 }
 0x1cf   : > { %2154 = vst [vmem:[#allocation4 + $0x20] sm:$0xff] %v2101_v62  ;;  %v4950_v59 = vmax.f32 %v1669_v27, 0.0 }
 0x1d0   : > { %2206 = vrot.lane.b32.xlu0 %v2099_v57, %s4188_s6  ;;  %2202 = vrot.lane.b32.xlu1 %v4919_v40, %s4188_s6 }
 0x1d1   : > { %2155 = vst [vmem:[#allocation4 + $0x28] sm:$0xff] %v4950_v59 }
 0x1d4   : > { %3042 = vrot.lane.b32.xlu0 %v4914_v52, %s4181_s24  ;;  %2919 = vrot.lane.b32.xlu1 %v4914_v52, %s4182_s25 }
 0x1d6   : > { %v1737_v30 = vpop.f32.mrf.mxu1 }
 0x1d7   : > { %v1738_v28 = vadd.f32 %v1737_v30, %v4908_v17 }
 0x1d8   : > { %v1739_v6 = vpop.f32.mrf.mxu1  ;;  %2796 = vrot.lane.b32.xlu0 %v4914_v52, %s4183_s26  ;;  %2676 = vrot.lane.b32.xlu1 %v4914_v52, %s4184_s27 }
 0x1d9   : > { %v2103_v63 = vmax.f32 %v1738_v28, 0.0  ;;  %v1740_v7 = vadd.f32 %v1739_v6, %v4908_v17 }
 0x1db   : > { %2156 = vst [vmem:[#allocation4 + $0x30] sm:$0xff] %v2103_v63  ;;  %v4966_v61 = vmax.f32 %v1740_v7, 0.0 }
 0x1dc   : > { %2558 = vrot.lane.b32.xlu0 %v4914_v52, %s4185_s28  ;;  %2440 = vrot.lane.b32.xlu1 %v4914_v52, %s4186_s29 }
 0x1dd   : > { %2157 = vst [vmem:[#allocation4 + $0x38] sm:$0xff] %v4966_v61 }
 0x1e0   : > { %2322 = vrot.lane.b32.xlu0 %v4914_v52, %s4187_s30  ;;  %2204 = vrot.lane.b32.xlu1 %v4914_v52, %s4188_s6 }
 0x1e4   : > { %2923 = vrot.lane.b32.xlu0 %v4916_v48, %s4182_s25  ;;  %3046 = vrot.lane.b32.xlu1 %v4916_v48, %s4181_s24 }
 0x1e8   : > { %2800 = vrot.lane.b32.xlu0 %v4916_v48, %s4183_s26  ;;  %2925 = vrot.lane.b32.xlu1 %v2101_v62, %s4182_s25 }
 0x1ec   : > { %2680 = vrot.lane.b32.xlu0 %v4916_v48, %s4184_s27  ;;  %2802 = vrot.lane.b32.xlu1 %v2101_v62, %s4183_s26 }
 0x1f0   : > { %2562 = vrot.lane.b32.xlu0 %v4916_v48, %s4185_s28  ;;  %3052 = vrot.lane.b32.xlu1 %v2103_v63, %s4181_s24 }
 0x1f4   : > { %3048 = vrot.lane.b32.xlu0 %v2101_v62, %s4181_s24  ;;  %2682 = vrot.lane.b32.xlu1 %v2101_v62, %s4184_s27 }
 0x1f8   : > { %3050 = vrot.lane.b32.xlu0 %v4950_v59, %s4181_s24  ;;  %2929 = vrot.lane.b32.xlu1 %v2103_v63, %s4182_s25 }
 0x1fc   : > { %2927 = vrot.lane.b32.xlu0 %v4950_v59, %s4182_s25  ;;  %2564 = vrot.lane.b32.xlu1 %v2101_v62, %s4185_s28 }
 0x200   : > { %2804 = vrot.lane.b32.xlu0 %v4950_v59, %s4183_s26  ;;  %2806 = vrot.lane.b32.xlu1 %v2103_v63, %s4183_s26 }
 0x204   : > { %2444 = vrot.lane.b32.xlu0 %v4916_v48, %s4186_s29  ;;  %2446 = vrot.lane.b32.xlu1 %v2101_v62, %s4186_s29 }
 0x208   : > { %v1808_v8 = vpop.f32.mrf.mxu0  ;;  %2684 = vrot.lane.b32.xlu0 %v4950_v59, %s4184_s27  ;;  %2686 = vrot.lane.b32.xlu1 %v2103_v63, %s4184_s27 }
 0x209   : > { %v1809_v36 = vadd.f32 %v1808_v8, %v4908_v17 }
 0x20a   : > { %v1810_v11 = vpop.f32.mrf.mxu0 }
 0x20b   : > { %v5008_v13 = vmax.f32 %v1809_v36, 0.0  ;;  %v1811_v25 = vadd.f32 %v1810_v11, %v4908_v17 }
 0x20c   : > { %2326 = vrot.lane.b32.xlu0 %v4916_v48, %s4187_s30  ;;  %2328 = vrot.lane.b32.xlu1 %v2101_v62, %s4187_s30 }
 0x20d   : > { %2158 = vst [vmem:[#allocation4 + $0x40] sm:$0xff] %v5008_v13  ;;  %v5015_v33 = vmax.f32 %v1811_v25, 0.0 }
 0x20f   : > { %2159 = vst [vmem:[#allocation4 + $0x48] sm:$0xff] %v5015_v33 }
 0x210   : > { %2566 = vrot.lane.b32.xlu0 %v4950_v59, %s4185_s28  ;;  %2568 = vrot.lane.b32.xlu1 %v2103_v63, %s4185_s28 }
 0x214   : > { %v1879_v60 = vpop.f32.mrf.mxu1  ;;  %2208 = vrot.lane.b32.xlu0 %v4916_v48, %s4188_s6  ;;  %2210 = vrot.lane.b32.xlu1 %v2101_v62, %s4188_s6 }
 0x215   : > { %v1880_v12 = vadd.f32 %v1879_v60, %v4908_v17 }
 0x216   : > { %v1881_v45 = vpop.f32.mrf.mxu1 }
 0x217   : > { %v5025_v10 = vmax.f32 %v1880_v12, 0.0  ;;  %v1882_v58 = vadd.f32 %v1881_v45, %v4908_v17 }
 0x218   : > { %2448 = vrot.lane.b32.xlu0 %v4950_v59, %s4186_s29  ;;  %2450 = vrot.lane.b32.xlu1 %v2103_v63, %s4186_s29 }
 0x219   : > { %2160 = vst [vmem:[#allocation4 + $0x50] sm:$0xff] %v5025_v10  ;;  %v5032_v4 = vmax.f32 %v1882_v58, 0.0 }
 0x21b   : > { %2161 = vst [vmem:[#allocation4 + $0x58] sm:$0xff] %v5032_v4 }
 0x21c   : > { %2330 = vrot.lane.b32.xlu0 %v4950_v59, %s4187_s30  ;;  %2332 = vrot.lane.b32.xlu1 %v2103_v63, %s4187_s30 }
 0x220   : > { %2212 = vrot.lane.b32.xlu0 %v4950_v59, %s4188_s6  ;;  %2214 = vrot.lane.b32.xlu1 %v2103_v63, %s4188_s6 }
 0x224   : > { %3054 = vrot.lane.b32.xlu0 %v4966_v61, %s4181_s24  ;;  %3056 = vrot.lane.b32.xlu1 %v5008_v13, %s4181_s24 }
 0x226   : > { %v5045_v38 = vpop.permute.xlu1 %3044  ;;  %v3041_v14 = vpop.permute.xlu0 %3040 }
 0x228   : > { %2931 = vrot.lane.b32.xlu0 %v4966_v61, %s4182_s25  ;;  %2933 = vrot.lane.b32.xlu1 %v5008_v13, %s4182_s25 }
 0x22a   : > { %v5051_v53 = vpop.permute.xlu0 %2921  ;;  %v2918_v9 = vpop.permute.xlu1 %2917 }
 0x22c   : > { %2808 = vrot.lane.b32.xlu0 %v4966_v61, %s4183_s26  ;;  %2810 = vrot.lane.b32.xlu1 %v5008_v13, %s4183_s26 }
 0x22e   : > { %v5057_v18 = vpop.permute.xlu1 %2798  ;;  %v2795_v19 = vpop.permute.xlu0 %2794 }
 0x230   : > { %3058 = vrot.lane.b32.xlu0 %v5015_v33, %s4181_s24  ;;  %3060 = vrot.lane.b32.xlu1 %v5025_v10, %s4181_s24 }
 0x232   : > { %v5063_v16 = vpop.permute.xlu0 %2678  ;;  %v2675_v20 = vpop.permute.xlu1 %2674 }
 0x234   : > { %2688 = vrot.lane.b32.xlu0 %v4966_v61, %s4184_s27  ;;  %2690 = vrot.lane.b32.xlu1 %v5008_v13, %s4184_s27 }
 0x236   : > { %v5069_v21 = vpop.permute.xlu1 %2560  ;;  %v2557_v23 = vpop.permute.xlu0 %2556 }
 0x238   : > { %2935 = vrot.lane.b32.xlu0 %v5015_v33, %s4182_s25  ;;  %2937 = vrot.lane.b32.xlu1 %v5025_v10, %s4182_s25 }
 0x23a   : > { %v5075_v24 = vpop.permute.xlu0 %2442  ;;  %v2439_v22 = vpop.permute.xlu1 %2438 }
 0x23c   : > { %2570 = vrot.lane.b32.xlu0 %v4966_v61, %s4185_s28  ;;  %2572 = vrot.lane.b32.xlu1 %v5008_v13, %s4185_s28 }
 0x23e   : > { %v5081_v26 = vpop.permute.xlu1 %2324  ;;  %v2321_v31 = vpop.permute.xlu0 %2320 }
 0x240   : > { %2812 = vrot.lane.b32.xlu0 %v5015_v33, %s4183_s26  ;;  %2814 = vrot.lane.b32.xlu1 %v5025_v10, %s4183_s26 }
 0x242   : > { %v5087_v34 = vpop.permute.xlu0 %2206  ;;  %v2203_v35 = vpop.permute.xlu1 %2202 }
 0x244   : > { %2452 = vrot.lane.b32.xlu0 %v4966_v61, %s4186_s29  ;;  %2454 = vrot.lane.b32.xlu1 %v5008_v13, %s4186_s29 }
 0x246   : > { %v3043_v0 = vpop.permute.xlu0 %3042  ;;  %v2920_v1 = vpop.permute.xlu1 %2919 }
 0x247   : > { %v3076_v37 = vsel %vm1230_vm0, %v3041_v14, %v3043_v0  ;;  %v3077_v32 = vsel %vm1230_vm0, %v3043_v0, %v5045_v38  ;;  %v2953_v42 = vsel %vm1099_vm1, %v2918_v9, %v2920_v1  ;;  %v2954_v43 = vsel %vm1099_vm1, %v2920_v1, %v5051_v53 }
 0x248   : > { %v1950_v44 = vpop.f32.mrf.mxu0  ;;  %2692 = vrot.lane.b32.xlu0 %v5015_v33, %s4184_s27  ;;  %2694 = vrot.lane.b32.xlu1 %v5025_v10, %s4184_s27 }
 0x249   : > { %v1951_v46 = vadd.f32 %v1950_v44, %v4908_v17  ;;  %3314 = vmatprep.subr.mxu1 %v3077_v32 }
 0x24a   : > { %v1952_v39 = vpop.f32.mrf.mxu0  ;;  %v2797_v3 = vpop.permute.xlu0 %2796  ;;  %3315 = vmatpush1.msra.mxu1 %v3076_v37 }
 0x24b   : > { %v5104_v2 = vmax.f32 %v1951_v46, 0.0  ;;  %v1953_v15 = vadd.f32 %v1952_v39, %v4908_v17  ;;  %v2830_v49 = vsel %vm968_vm2, %v2795_v19, %v2797_v3  ;;  %v2831_v54 = vsel %vm968_vm2, %v2797_v3, %v5057_v18  ;;  %v2677_v56 = vpop.permute.xlu1 %2676  ;;  %3316 = vmatprep.subr.mxu1 %v2954_v43 }
 0x24c   : > { %v2708_v47 = vsel %vm838_vm3, %v2675_v20, %v2677_v56  ;;  %v2709_v51 = vsel %vm838_vm3, %v2677_v56, %v5063_v16  ;;  %2334 = vrot.lane.b32.xlu0 %v4966_v61, %s4187_s30  ;;  %2336 = vrot.lane.b32.xlu1 %v5008_v13, %s4187_s30  ;;  %v5168_v20 = vld [vmem:[%s5652_s3] sm:$0xff] }
 0x24d   : > { %2162 = vst [vmem:[#allocation4 + $0x60] sm:$0xff] %v5104_v2  ;;  %v5118_v48 = vmax.f32 %v1953_v15, 0.0  ;;  %3317 = vmatpush1.msra.mxu1 %v2953_v42 }
 0x24e   : > { %v2559_v57 = vpop.permute.xlu0 %2558  ;;  %3318 = vmatprep.subr.mxu1 %v2831_v54 }
 0x24f   : > { %2163 = vst [vmem:[#allocation4 + $0x68] sm:$0xff] %v5118_v48  ;;  %v2590_v29 = vsel %vm712_vm4, %v2557_v23, %v2559_v57  ;;  %v2591_v55 = vsel %vm712_vm4, %v2559_v57, %v5069_v21  ;;  %v2441_v50 = vpop.permute.xlu1 %2440  ;;  %3319 = vmatpush1.msra.mxu1 %v2830_v49 }
 0x250   : > { %v2472_v62 = vsel %vm586_vm5, %v2439_v22, %v2441_v50  ;;  %v2473_v27 = vsel %vm586_vm5, %v2441_v50, %v5075_v24  ;;  %2574 = vrot.lane.b32.xlu0 %v5015_v33, %s4185_s28  ;;  %2576 = vrot.lane.b32.xlu1 %v5025_v10, %s4185_s28 }
 0x251   : > { %3320 = vmatprep.subr.mxu1 %v2709_v51 }
 0x252   : > { %v2323_v59 = vpop.permute.xlu0 %2322  ;;  %3321 = vmatpush1.msra.mxu1 %v2708_v47 }
 0x253   : > { %v2354_v30 = vsel %vm460_vm6, %v2321_v31, %v2323_v59  ;;  %v2355_v28 = vsel %vm460_vm6, %v2323_v59, %v5081_v26  ;;  %v2205_v6 = vpop.permute.xlu1 %2204  ;;  %3322 = vmatprep.subr.mxu1 %v2591_v55 }
 0x254   : > { %v2236_v63 = vsel %vm334_vm7, %v2203_v35, %v2205_v6  ;;  %v2237_v7 = vsel %vm334_vm7, %v2205_v6, %v5087_v34  ;;  %v2021_v8 = vpop.f32.mrf.mxu1  ;;  %2216 = vrot.lane.b32.xlu0 %v4966_v61, %s4188_s6  ;;  %2218 = vrot.lane.b32.xlu1 %v5008_v13, %s4188_s6 }
 0x255   : > { %v2022_v36 = vadd.f32 %v2021_v8, %v4908_v17  ;;  %3323 = vmatpush1.msra.mxu1 %v2590_v29 }
 0x256   : > { %v2023_v11 = vpop.f32.mrf.mxu1  ;;  %v2924_v25 = vpop.permute.xlu0 %2923  ;;  %3324 = vmatprep.subr.mxu1 %v2473_v27 }
 0x257   : > { %v5142_v60 = vmax.f32 %v2022_v36, 0.0  ;;  %v2024_v12 = vadd.f32 %v2023_v11, %v4908_v17  ;;  %v2955_v45 = vsel %vm1099_vm1, %v5051_v53, %v2924_v25  ;;  %v3047_v58 = vpop.permute.xlu1 %3046  ;;  %3325 = vmatpush1.msra.mxu1 %v2472_v62 }
 0x258   : > { %v3078_v61 = vsel %vm1230_vm0, %v5045_v38, %v3047_v58  ;;  %2456 = vrot.lane.b32.xlu0 %v5015_v33, %s4186_s29  ;;  %2458 = vrot.lane.b32.xlu1 %v5025_v10, %s4186_s29 }
 0x259   : > { %2164 = vst [vmem:[#allocation4 + $0x70] sm:$0xff] %v5142_v60  ;;  %v5154_v13 = vmax.f32 %v2024_v12, 0.0  ;;  %3326 = vmatprep.subr.mxu1 %v2355_v28 }
 0x25a   : > { %v2801_v14 = vpop.permute.xlu0 %2800  ;;  %3327 = vmatpush1.msra.mxu1 %v2354_v30 }
 0x25b   : > { %2165 = vst [vmem:[#allocation4 + $0x78] sm:$0xff] %v5154_v13  ;;  %v2832_v53 = vsel %vm968_vm2, %v5057_v18, %v2801_v14  ;;  %v2926_v9 = vpop.permute.xlu1 %2925  ;;  %3328 = vmatprep.subr.mxu1 %v2237_v7 }
 0x25c   : > { %v2956_v38 = vsel %vm1099_vm1, %v2924_v25, %v2926_v9  ;;  %2338 = vrot.lane.b32.xlu0 %v5015_v33, %s4187_s30  ;;  %2340 = vrot.lane.b32.xlu1 %v5025_v10, %s4187_s30 }
 0x25d   : > { %3329 = vmatpush1.msra.mxu1 %v2236_v63 }
 0x25e   : > { %v2681_v19 = vpop.permute.xlu0 %2680  ;;  %3330 = vmatprep.subr.mxu1 %v4914_v52 }
 0x25f   : > { %v2710_v18 = vsel %vm838_vm3, %v5063_v16, %v2681_v19  ;;  %v2803_v23 = vpop.permute.xlu1 %2802  ;;  %3331 = vmatpush1.msra.mxu1 %v4919_v40  ;;  %v5184_v16 = vld [vmem:[%s5652_s3 + $0x8] sm:$0xff] }
 0x260   : > { %v2833_v22 = vsel %vm968_vm2, %v2801_v14, %v2803_v23  ;;  %2220 = vrot.lane.b32.xlu0 %v5015_v33, %s4188_s6  ;;  %2222 = vrot.lane.b32.xlu1 %v5025_v10, %s4188_s6 }
 0x261   : > { %4096 = vmatmul.mubr.msk.f32.vlgmr.msra.gmra.mxu1 %vm1454_vm8, %v5168_v20 }
 0x262   : > { %v2563_v52 = vpop.permute.xlu0 %2562  ;;  %3370 = vmatprep.mubr.f32.mxu1 %v4189_v5 }
 0x263   : > { %v2592_v40 = vsel %vm712_vm4, %v5069_v21, %v2563_v52  ;;  %v5188_v31 = vpop.permute.xlu1 %3052 }
 0x264   : > { %3062 = vrot.lane.b32.xlu0 %v5032_v4, %s4181_s24  ;;  %3064 = vrot.lane.b32.xlu1 %v5104_v2, %s4181_s24 }
 0x265   : > { %4097 = vmatmul.mubr.msk.f32.gmra.mxu1 %vm1454_vm8, %v5184_v16 }
 0x266   : > { %v3049_v33 = vpop.permute.xlu0 %3048  ;;  %3518 = vmatprep.mubr.f32.mxu1 %v4189_v5 }
 0x267   : > { %v3079_v10 = vsel %vm1230_vm0, %v3047_v58, %v3049_v33  ;;  %v2683_v35 = vpop.permute.xlu1 %2682 }
 0x268   : > { %v2711_v0 = vsel %vm838_vm3, %v2681_v19, %v2683_v35  ;;  %2939 = vrot.lane.b32.xlu0 %v5032_v4, %s4182_s25  ;;  %2941 = vrot.lane.b32.xlu1 %v5104_v2, %s4182_s25 }
 0x269   : > { %3391 = vmatprep.subr.mxu0 %v3079_v10 }
 0x26a   : > { %v3051_v21 = vpop.permute.xlu0 %3050  ;;  %3392 = vmatpush1.msra.mxu0 %v3078_v61 }
 0x26b   : > { %v3080_v1 = vsel %vm1230_vm0, %v3049_v33, %v3051_v21  ;;  %v3081_v37 = vsel %vm1230_vm0, %v3051_v21, %v5188_v31  ;;  %v5206_v32 = vpop.permute.xlu1 %2929  ;;  %3393 = vmatprep.subr.mxu0 %v2956_v38 }
 0x26c   : > { %2816 = vrot.lane.b32.xlu0 %v5032_v4, %s4183_s26  ;;  %2818 = vrot.lane.b32.xlu1 %v5104_v2, %s4183_s26 }
 0x26d   : > { %3394 = vmatpush1.msra.mxu0 %v2955_v45  ;;  %3468 = vmatprep.subr.mxu1 %v3081_v37 }
 0x26e   : > { %v2928_v42 = vpop.permute.xlu0 %2927  ;;  %3395 = vmatprep.subr.mxu0 %v2833_v22  ;;  %3469 = vmatpush1.msra.mxu1 %v3080_v1 }
 0x26f   : > { %v2957_v43 = vsel %vm1099_vm1, %v2926_v9, %v2928_v42  ;;  %v2958_v44 = vsel %vm1099_vm1, %v2928_v42, %v5206_v32  ;;  %v2565_v46 = vpop.permute.xlu1 %2564  ;;  %3396 = vmatpush1.msra.mxu0 %v2832_v53  ;;  %v3132_v53 = vld [vmem:[#allocation4 + $0x18] sm:$0xff] }
 0x270   : > { %v2593_v39 = vsel %vm712_vm4, %v2563_v52, %v2565_v46  ;;  %3066 = vrot.lane.b32.xlu0 %v5118_v48, %s4181_s24  ;;  %3068 = vrot.lane.b32.xlu1 %v5142_v60, %s4181_s24 }
 0x271   : > { %3397 = vmatprep.subr.mxu0 %v2711_v0  ;;  %3470 = vmatprep.subr.mxu1 %v2958_v44 }
 0x272   : > { %v2805_v3 = vpop.permute.xlu0 %2804  ;;  %3398 = vmatpush1.msra.mxu0 %v2710_v18  ;;  %3471 = vmatpush1.msra.mxu1 %v2957_v43 }
 0x273   : > { %v2092_v15 = vpop.f32.mrf.mxu0  ;;  %v2834_v49 = vsel %vm968_vm2, %v2803_v23, %v2805_v3  ;;  %v5221_v54 = vpop.permute.xlu1 %2806  ;;  %3399 = vmatprep.subr.mxu0 %v2593_v39 }
 0x274   : > { %v2093_v56 = vadd.f32 %v2092_v15, %v4908_v17  ;;  %v2835_v47 = vsel %vm968_vm2, %v2805_v3, %v5221_v54  ;;  %2696 = vrot.lane.b32.xlu0 %v5032_v4, %s4184_s27  ;;  %2698 = vrot.lane.b32.xlu1 %v5104_v2, %s4184_s27 }
 0x275   : > { %v2094_v51 = vpop.f32.mrf.mxu0  ;;  %3400 = vmatpush1.msra.mxu0 %v2592_v40  ;;  %3472 = vmatprep.subr.mxu1 %v2835_v47 }
 0x276   : > { %v5230_v57 = vmax.f32 %v2093_v56, 0.0  ;;  %v2095_v29 = vadd.f32 %v2094_v51, %v4908_v17  ;;  %v2445_v55 = vpop.permute.xlu0 %2444  ;;  %3473 = vmatpush1.msra.mxu1 %v2834_v49 }
 0x277   : > { %v2474_v50 = vsel %vm586_vm5, %v5075_v24, %v2445_v55  ;;  %v2447_v62 = vpop.permute.xlu1 %2446 }
 0x278   : > { %v2114_v27 = vmax.f32 %v2095_v29, 0.0  ;;  %v2475_v59 = vsel %vm586_vm5, %v2445_v55, %v2447_v62  ;;  %2943 = vrot.lane.b32.xlu0 %v5118_v48, %s4182_s25  ;;  %2945 = vrot.lane.b32.xlu1 %v5142_v60, %s4182_s25  ;;  %2167 = vst.msk [vmem:[#allocation4 + $0x80] sm:$0xff] %vm2166_vm10, %v5230_v57 }
 0x279   : > { %3401 = vmatprep.subr.mxu0 %v2475_v59 }
 0x27a   : > { %2132 = vst.msk [vmem:[#allocation2 + $0x88] sm:$0xff] %vm260_vm9, %v2114_v27  ;;  %v2685_v17 = vpop.permute.xlu0 %2684  ;;  %3402 = vmatpush1.msra.mxu0 %v2474_v50 }
 0x27b   : > { %v2712_v24 = vsel %vm838_vm3, %v2683_v35, %v2685_v17  ;;  %v5244_v30 = vpop.permute.xlu1 %2686  ;;  %v3134_v35 = vld [vmem:[#allocation4 + $0x28] sm:$0xff] }
 0x27c   : > { %v2713_v28 = vsel %vm838_vm3, %v2685_v17, %v5244_v30  ;;  %2578 = vrot.lane.b32.xlu0 %v5032_v4, %s4185_s28  ;;  %2580 = vrot.lane.b32.xlu1 %v5104_v2, %s4185_s28 }
 0x27d   : > { %3474 = vmatprep.subr.mxu1 %v2713_v28 }
 0x27e   : > { %v2327_v6 = vpop.permute.xlu0 %2326  ;;  %3475 = vmatpush1.msra.mxu1 %v2712_v24 }
 0x27f   : > { %v2356_v63 = vsel %vm460_vm6, %v5081_v26, %v2327_v6  ;;  %v2329_v7 = vpop.permute.xlu1 %2328 }
 0x280   : > { %v2357_v8 = vsel %vm460_vm6, %v2327_v6, %v2329_v7  ;;  %2820 = vrot.lane.b32.xlu0 %v5118_v48, %s4183_s26  ;;  %2822 = vrot.lane.b32.xlu1 %v5142_v60, %s4183_s26 }
 0x281   : > { %3403 = vmatprep.subr.mxu0 %v2357_v8  ;;  %v3021_v59 = vld [vmem:[#allocation2 + $0x88] sm:$0xff] }
 0x282   : > { %v2567_v36 = vpop.permute.xlu0 %2566  ;;  %3404 = vmatpush1.msra.mxu0 %v2356_v63 }
 0x283   : > { %v2594_v11 = vsel %vm712_vm4, %v2565_v46, %v2567_v36  ;;  %v5260_v25 = vpop.permute.xlu1 %2568 }
 0x284   : > { %v2595_v12 = vsel %vm712_vm4, %v2567_v36, %v5260_v25  ;;  %2460 = vrot.lane.b32.xlu0 %v5032_v4, %s4186_s29  ;;  %2462 = vrot.lane.b32.xlu1 %v5104_v2, %s4186_s29 }
 0x285   : > { %3476 = vmatprep.subr.mxu1 %v2595_v12 }
 0x286   : > { %v2209_v26 = vpop.permute.xlu0 %2208  ;;  %3477 = vmatpush1.msra.mxu1 %v2594_v11 }
 0x287   : > { %v2238_v45 = vsel %vm334_vm7, %v5087_v34, %v2209_v26  ;;  %v2211_v58 = vpop.permute.xlu1 %2210 }
 0x288   : > { %v2239_v61 = vsel %vm334_vm7, %v2209_v26, %v2211_v58  ;;  %2700 = vrot.lane.b32.xlu0 %v5118_v48, %s4184_s27  ;;  %2702 = vrot.lane.b32.xlu1 %v5142_v60, %s4184_s27 }
 0x289   : > { %3405 = vmatprep.subr.mxu0 %v2239_v61 }
 0x28a   : > { %v2449_v14 = vpop.permute.xlu0 %2448  ;;  %3406 = vmatpush1.msra.mxu0 %v2238_v45 }
 0x28b   : > { %v2476_v9 = vsel %vm586_vm5, %v2447_v62, %v2449_v14  ;;  %v5276_v38 = vpop.permute.xlu1 %2450  ;;  %3407 = vmatprep.subr.mxu0 %v3132_v53 }
 0x28c   : > { %v2477_v34 = vsel %vm586_vm5, %v2449_v14, %v5276_v38  ;;  %2342 = vrot.lane.b32.xlu0 %v5032_v4, %s4187_s30  ;;  %2344 = vrot.lane.b32.xlu1 %v5104_v2, %s4187_s30 }
 0x28d   : > { %3408 = vmatpush1.msra.mxu0 %v4931_v41  ;;  %3478 = vmatprep.subr.mxu1 %v2477_v34 }
 0x28e   : > { %v2331_v19 = vpop.permute.xlu0 %2330  ;;  %4098 = vmatmul.mubr.msk.f32.vlgmr.msra.gmra.mxu0 %vm1454_vm8, %v5168_v20  ;;  %3479 = vmatpush1.msra.mxu1 %v2476_v9 }
 0x28f   : > { %v2358_v18 = vsel %vm460_vm6, %v2329_v7, %v2331_v19  ;;  %v5288_v23 = vpop.permute.xlu1 %2332  ;;  %3447 = vmatprep.mubr.f32.mxu0 %v4189_v5 }
 0x290   : > { %v2359_v22 = vsel %vm460_vm6, %v2331_v19, %v5288_v23  ;;  %2582 = vrot.lane.b32.xlu0 %v5118_v48, %s4185_s28  ;;  %2584 = vrot.lane.b32.xlu1 %v5142_v60, %s4185_s28  ;;  %v3282_v19 = vld [vmem:[%s5653_s4] sm:$0xff] }
 0x291   : > { %3480 = vmatprep.subr.mxu1 %v2359_v22 }
 0x292   : > { %v2213_v41 = vpop.permute.xlu0 %2212  ;;  %3481 = vmatpush1.msra.mxu1 %v2358_v18  ;;  %4099 = vmatmul.mubr.msk.f32.gmra.mxu0 %vm1454_vm8, %v5184_v16 }
 0x293   : > { %v2240_v52 = vsel %vm334_vm7, %v2211_v58, %v2213_v41  ;;  %v5300_v40 = vpop.permute.xlu1 %2214  ;;  %3595 = vmatprep.mubr.f32.mxu0 %v4189_v5 }
 0x294   : > { %v2241_v33 = vsel %vm334_vm7, %v2213_v41, %v5300_v40  ;;  %2224 = vrot.lane.b32.xlu0 %v5032_v4, %s4188_s6  ;;  %2226 = vrot.lane.b32.xlu1 %v5104_v2, %s4188_s6  ;;  %v3133_v4 = vld [vmem:[#allocation4 + $0x20] sm:$0xff] }
 0x295   : > { %3482 = vmatprep.subr.mxu1 %v2241_v33 }
 0x296   : > { %v3055_v10 = vpop.permute.xlu0 %3054  ;;  %3483 = vmatpush1.msra.mxu1 %v2240_v52 }
 0x297   : > { %v3082_v0 = vsel %vm1230_vm0, %v5188_v31, %v3055_v10  ;;  %v3057_v21 = vpop.permute.xlu1 %3056  ;;  %3484 = vmatprep.subr.mxu1 %v3134_v35  ;;  %v3135_v35 = vld [vmem:[#allocation4 + $0x30] sm:$0xff] }
 0x298   : > { %v3083_v1 = vsel %vm1230_vm0, %v3055_v10, %v3057_v21  ;;  %2464 = vrot.lane.b32.xlu0 %v5118_v48, %s4186_s29  ;;  %2466 = vrot.lane.b32.xlu1 %v5142_v60, %s4186_s29 }
 0x299   : > { %3485 = vmatpush1.msra.mxu1 %v3133_v4  ;;  %3545 = vmatprep.subr.mxu0 %v3083_v1 }
 0x29a   : > { %v2932_v2 = vpop.permute.xlu0 %2931  ;;  %4100 = vmatmul.mubr.msk.f32.vlgmr.msra.gmra.mxu1 %vm1454_vm8, %v5168_v20  ;;  %3546 = vmatpush1.msra.mxu0 %v3082_v0 }
 0x29b   : > { %v2959_v31 = vsel %vm1099_vm1, %v5206_v32, %v2932_v2  ;;  %v2934_v37 = vpop.permute.xlu1 %2933  ;;  %3524 = vmatprep.mubr.f32.mxu1 %v4189_v5 }
 0x29c   : > { %v2960_v42 = vsel %vm1099_vm1, %v2932_v2, %v2934_v37  ;;  %2346 = vrot.lane.b32.xlu0 %v5118_v48, %s4187_s30  ;;  %2348 = vrot.lane.b32.xlu1 %v5142_v60, %s4187_s30 }
 0x29d   : > { %3547 = vmatprep.subr.mxu0 %v2960_v42 }
 0x29e   : > { %v2809_v43 = vpop.permute.xlu0 %2808  ;;  %3548 = vmatpush1.msra.mxu0 %v2959_v31  ;;  %4101 = vmatmul.mubr.msk.f32.gmra.mxu1 %vm1454_vm8, %v5184_v16 }
 0x29f   : > { %v2836_v32 = vsel %vm968_vm2, %v5221_v54, %v2809_v43  ;;  %v2811_v44 = vpop.permute.xlu1 %2810  ;;  %3672 = vmatprep.mubr.f32.mxu1 %v4189_v5 }
 0x2a0   : > { %v2837_v46 = vsel %vm968_vm2, %v2809_v43, %v2811_v44  ;;  %2228 = vrot.lane.b32.xlu0 %v5118_v48, %s4188_s6  ;;  %2230 = vrot.lane.b32.xlu1 %v5142_v60, %s4188_s6 }
 0x2a1   : > { %3549 = vmatprep.subr.mxu0 %v2837_v46 }
 0x2a2   : > { %v3059_v39 = vpop.permute.xlu0 %3058  ;;  %3550 = vmatpush1.msra.mxu0 %v2836_v32  ;;  %v3138_v32 = vld [vmem:[#allocation4 + $0x48] sm:$0xff] }
 0x2a3   : > { %v3084_v3 = vsel %vm1230_vm0, %v3057_v21, %v3059_v39  ;;  %v5337_v15 = vpop.permute.xlu1 %3060 }
 0x2a4   : > { %v3085_v49 = vsel %vm1230_vm0, %v3059_v39, %v5337_v15  ;;  %3070 = vrot.lane.b32.xlu0 %v5154_v13, %s4181_s24  ;;  %3072 = vrot.lane.b32.xlu1 %v5230_v57, %s4181_s24  ;;  %v3137_v39 = vld [vmem:[#allocation4 + $0x40] sm:$0xff] }
 0x2a5   : > { %3622 = vmatprep.subr.mxu1 %v3085_v49 }
 0x2a6   : > { %v2689_v48 = vpop.permute.xlu0 %2688  ;;  %3623 = vmatpush1.msra.mxu1 %v3084_v3 }
 0x2a7   : > { %v2714_v60 = vsel %vm838_vm3, %v5244_v30, %v2689_v48  ;;  %v2691_v54 = vpop.permute.xlu1 %2690 }
 0x2a8   : > { %v2715_v56 = vsel %vm838_vm3, %v2689_v48, %v2691_v54  ;;  %2947 = vrot.lane.b32.xlu0 %v5154_v13, %s4182_s25  ;;  %2949 = vrot.lane.b32.xlu1 %v5230_v57, %s4182_s25 }
 0x2a9   : > { %3551 = vmatprep.subr.mxu0 %v2715_v56 }
 0x2aa   : > { %v2936_v47 = vpop.permute.xlu0 %2935  ;;  %3552 = vmatpush1.msra.mxu0 %v2714_v60 }
 0x2ab   : > { %v2961_v51 = vsel %vm1099_vm1, %v2934_v37, %v2936_v47  ;;  %v5353_v29 = vpop.permute.xlu1 %2937  ;;  %v3283_v37 = vld [vmem:[%s5653_s4 + $0x8] sm:$0xff] }
 0x2ac   : > { %v2962_v55 = vsel %vm1099_vm1, %v2936_v47, %v5353_v29  ;;  %2824 = vrot.lane.b32.xlu0 %v5154_v13, %s4183_s26  ;;  %2826 = vrot.lane.b32.xlu1 %v5230_v57, %s4183_s26 }
 0x2ad   : > { %3624 = vmatprep.subr.mxu1 %v2962_v55 }
 0x2ae   : > { %v2571_v50 = vpop.permute.xlu0 %2570  ;;  %3625 = vmatpush1.msra.mxu1 %v2961_v51 }
 0x2af   : > { %v2596_v62 = vsel %vm712_vm4, %v5260_v25, %v2571_v50  ;;  %v2573_v27 = vpop.permute.xlu1 %2572 }
 0x2b0   : > { %v2597_v17 = vsel %vm712_vm4, %v2571_v50, %v2573_v27  ;;  %3074 = vrot.lane.b32.xlu0 %v3021_v59, %s4181_s24  ;;  %2704 = vrot.lane.b32.xlu1 %v5154_v13, %s4184_s27 }
 0x2b1   : > { %3553 = vmatprep.subr.mxu0 %v2597_v17 }
 0x2b2   : > { %v2813_v24 = vpop.permute.xlu0 %2812  ;;  %3554 = vmatpush1.msra.mxu0 %v2596_v62 }
 0x2b3   : > { %v2838_v30 = vsel %vm968_vm2, %v2811_v44, %v2813_v24  ;;  %v5368_v28 = vpop.permute.xlu1 %2814 }
 0x2b4   : > { %v2839_v6 = vsel %vm968_vm2, %v2813_v24, %v5368_v28  ;;  %2706 = vrot.lane.b32.xlu0 %v5230_v57, %s4184_s27  ;;  %2951 = vrot.lane.b32.xlu1 %v3021_v59, %s4182_s25 }
 0x2b5   : > { %3626 = vmatprep.subr.mxu1 %v2839_v6 }
 0x2b6   : > { %v2453_v63 = vpop.permute.xlu0 %2452  ;;  %3627 = vmatpush1.msra.mxu1 %v2838_v30 }
 0x2b7   : > { %v2478_v7 = vsel %vm586_vm5, %v5276_v38, %v2453_v63  ;;  %v2455_v8 = vpop.permute.xlu1 %2454 }
 0x2b8   : > { %v2479_v36 = vsel %vm586_vm5, %v2453_v63, %v2455_v8  ;;  %2586 = vrot.lane.b32.xlu0 %v5154_v13, %s4185_s28  ;;  %2588 = vrot.lane.b32.xlu1 %v5230_v57, %s4185_s28  ;;  %s5565_s28 = scalar_lea.vmem %s5654_s5, %s4149_s23 }
 0x2b9   : > { %3555 = vmatprep.subr.mxu0 %v2479_v36 }
 0x2ba   : > { %v2693_v11 = vpop.permute.xlu0 %2692  ;;  %3556 = vmatpush1.msra.mxu0 %v2478_v7 }
 0x2bb   : > { %v2716_v25 = vsel %vm838_vm3, %v2691_v54, %v2693_v11  ;;  %v5383_v12 = vpop.permute.xlu1 %2694 }
 0x2bc   : > { %v2717_v26 = vsel %vm838_vm3, %v2693_v11, %v5383_v12  ;;  %2828 = vrot.lane.b32.xlu0 %v3021_v59, %s4183_s26  ;;  %2468 = vrot.lane.b32.xlu1 %v5154_v13, %s4186_s29 }
 0x2bd   : > { %3628 = vmatprep.subr.mxu1 %v2717_v26 }
 0x2be   : > { %v2335_v45 = vpop.permute.xlu0 %2334  ;;  %3629 = vmatpush1.msra.mxu1 %v2716_v25 }
 0x2bf   : > { %v2360_v58 = vsel %vm460_vm6, %v5288_v23, %v2335_v45  ;;  %v2337_v61 = vpop.permute.xlu1 %2336 }
 0x2c0   : > { %v2361_v14 = vsel %vm460_vm6, %v2335_v45, %v2337_v61  ;;  %2470 = vrot.lane.b32.xlu0 %v5230_v57, %s4186_s29  ;;  %2350 = vrot.lane.b32.xlu1 %v5154_v13, %s4187_s30 }
 0x2c1   : > { %3557 = vmatprep.subr.mxu0 %v2361_v14 }
 0x2c2   : > { %v2575_v53 = vpop.permute.xlu0 %2574  ;;  %3558 = vmatpush1.msra.mxu0 %v2360_v58 }
 0x2c3   : > { %v2598_v9 = vsel %vm712_vm4, %v2573_v27, %v2575_v53  ;;  %v5398_v38 = vpop.permute.xlu1 %2576 }
 0x2c4   : > { %v2599_v34 = vsel %vm712_vm4, %v2575_v53, %v5398_v38  ;;  %2352 = vrot.lane.b32.xlu0 %v5230_v57, %s4187_s30  ;;  %2232 = vrot.lane.b32.xlu1 %v5154_v13, %s4188_s6  ;;  %v3136_v13 = vld [vmem:[#allocation4 + $0x38] sm:$0xff] }
 0x2c5   : > { %3630 = vmatprep.subr.mxu1 %v2599_v34 }
 0x2c6   : > { %v2217_v18 = vpop.permute.xlu0 %2216  ;;  %3631 = vmatpush1.msra.mxu1 %v2598_v9 }
 0x2c7   : > { %v2242_v23 = vsel %vm334_vm7, %v5300_v40, %v2217_v18  ;;  %v2219_v22 = vpop.permute.xlu1 %2218 }
 0x2c8   : > { %v2243_v41 = vsel %vm334_vm7, %v2217_v18, %v2219_v22  ;;  %2234 = vrot.lane.b32.xlu0 %v5230_v57, %s4188_s6  ;;  %3286 = vperm.xlu1 %4168, %v3282_v19  }
 0x2c9   : > { %3559 = vmatprep.subr.mxu0 %v2243_v41 }
 0x2ca   : > { %v2457_v52 = vpop.permute.xlu0 %2456  ;;  %3560 = vmatpush1.msra.mxu0 %v2242_v23 }
 0x2cb   : > { %v2480_v33 = vsel %vm586_vm5, %v2455_v8, %v2457_v52  ;;  %v5415_v10 = vpop.permute.xlu1 %2458  ;;  %3561 = vmatprep.subr.mxu0 %v3136_v13 }
 0x2cc   : > { %v2481_v40 = vsel %vm586_vm5, %v2457_v52, %v5415_v10  ;;  %3562 = vmatpush1.msra.mxu0 %v3135_v35  ;;  %3291 = vperm.xlu0 %4169, %v3283_v37   ;;  %v3139_v37 = vld [vmem:[#allocation4 + $0x50] sm:$0xff] }
 0x2cd   : > { %4102 = vmatmul.mubr.msk.f32.vlgmr.msra.gmra.mxu0 %vm1454_vm8, %v5168_v20  ;;  %3632 = vmatprep.subr.mxu1 %v2481_v40 }
 0x2ce   : > { %v2339_v57 = vpop.permute.xlu0 %2338  ;;  %3633 = vmatpush1.msra.mxu1 %v2480_v33  ;;  %3601 = vmatprep.mubr.f32.mxu0 %v4189_v5 }
 0x2cf   : > { %v2362_v0 = vsel %vm460_vm6, %v2337_v61, %v2339_v57  ;;  %v5423_v21 = vpop.permute.xlu1 %2340 }
 0x2d0   : > { %v2363_v1 = vsel %vm460_vm6, %v2339_v57, %v5423_v21 }
 0x2d1   : > { %3634 = vmatprep.subr.mxu1 %v2363_v1  ;;  %4103 = vmatmul.mubr.msk.f32.gmra.mxu0 %vm1454_vm8, %v5184_v16  ;;  %v3140_v1 = vld [vmem:[#allocation4 + $0x58] sm:$0xff] }
 0x2d2   : > { %v2221_v4 = vpop.permute.xlu0 %2220  ;;  %3635 = vmatpush1.msra.mxu1 %v2362_v0  ;;  %3749 = vmatprep.mubr.f32.mxu0 %v4189_v5 }
 0x2d3   : > { %v2244_v2 = vsel %vm334_vm7, %v2219_v22, %v2221_v4  ;;  %v5431_v31 = vpop.permute.xlu1 %2222 }
 0x2d4   : > { %v2245_v42 = vsel %vm334_vm7, %v2221_v4, %v5431_v31 }
 0x2d5   : > { %3636 = vmatprep.subr.mxu1 %v2245_v42 }
 0x2d6   : > { %v3063_v43 = vpop.permute.xlu0 %3062  ;;  %3637 = vmatpush1.msra.mxu1 %v2244_v2 }
 0x2d7   : > { %v3086_v44 = vsel %vm1230_vm0, %v5337_v15, %v3063_v43  ;;  %v3065_v46 = vpop.permute.xlu1 %3064  ;;  %3638 = vmatprep.subr.mxu1 %v3138_v32 }
 0x2d8   : > { %v3087_v3 = vsel %vm1230_vm0, %v3063_v43, %v3065_v46  ;;  %3639 = vmatpush1.msra.mxu1 %v3137_v39 }
 0x2d9   : > { %4104 = vmatmul.mubr.msk.f32.vlgmr.msra.gmra.mxu1 %vm1454_vm8, %v5168_v20  ;;  %3699 = vmatprep.subr.mxu0 %v3087_v3 }
 0x2da   : > { %v2940_v49 = vpop.permute.xlu0 %2939  ;;  %3700 = vmatpush1.msra.mxu0 %v3086_v44  ;;  %3678 = vmatprep.mubr.f32.mxu1 %v4189_v5 }
 0x2db   : > { %v2963_v48 = vsel %vm1099_vm1, %v5353_v29, %v2940_v49  ;;  %v2942_v60 = vpop.permute.xlu1 %2941 }
 0x2dc   : > { %v2964_v15 = vsel %vm1099_vm1, %v2940_v49, %v2942_v60 }
 0x2dd   : > { %3701 = vmatprep.subr.mxu0 %v2964_v15  ;;  %4105 = vmatmul.mubr.msk.f32.gmra.mxu1 %vm1454_vm8, %v5184_v16 }
 0x2de   : > { %v2817_v54 = vpop.permute.xlu0 %2816  ;;  %3702 = vmatpush1.msra.mxu0 %v2963_v48  ;;  %3826 = vmatprep.mubr.f32.mxu1 %v4189_v5 }
 0x2df   : > { %v2840_v56 = vsel %vm968_vm2, %v5368_v28, %v2817_v54  ;;  %v2819_v47 = vpop.permute.xlu1 %2818 }
 0x2e0   : > { %v2841_v51 = vsel %vm968_vm2, %v2817_v54, %v2819_v47 }
 0x2e1   : > { %3703 = vmatprep.subr.mxu0 %v2841_v51 }
 0x2e2   : > { %v3067_v55 = vpop.permute.xlu0 %3066  ;;  %3704 = vmatpush1.msra.mxu0 %v2840_v56  ;;  %v3141_v56 = vld [vmem:[#allocation4 + $0x60] sm:$0xff] }
 0x2e3   : > { %v3088_v29 = vsel %vm1230_vm0, %v3065_v46, %v3067_v55  ;;  %v5454_v50 = vpop.permute.xlu1 %3068 }
 0x2e4   : > { %v3089_v62 = vsel %vm1230_vm0, %v3067_v55, %v5454_v50 }
 0x2e5   : > { %3776 = vmatprep.subr.mxu1 %v3089_v62 }
 0x2e6   : > { %v2697_v27 = vpop.permute.xlu0 %2696  ;;  %3777 = vmatpush1.msra.mxu1 %v3088_v29 }
 0x2e7   : > { %v2718_v59 = vsel %vm838_vm3, %v5383_v12, %v2697_v27  ;;  %v2699_v17 = vpop.permute.xlu1 %2698 }
 0x2e8   : > { %v2719_v24 = vsel %vm838_vm3, %v2697_v27, %v2699_v17 }
 0x2e9   : > { %3705 = vmatprep.subr.mxu0 %v2719_v24 }
 0x2ea   : > { %v2944_v30 = vpop.permute.xlu0 %2943  ;;  %3706 = vmatpush1.msra.mxu0 %v2718_v59 }
 0x2eb   : > { %v2965_v28 = vsel %vm1099_vm1, %v2942_v60, %v2944_v30  ;;  %v5462_v6 = vpop.permute.xlu1 %2945  ;;  %v3142_v60 = vld [vmem:[#allocation4 + $0x68] sm:$0xff] }
 0x2ec   : > { %v2966_v63 = vsel %vm1099_vm1, %v2944_v30, %v5462_v6 }
 0x2ed   : > { %3778 = vmatprep.subr.mxu1 %v2966_v63 }
 0x2ee   : > { %v2579_v7 = vpop.permute.xlu0 %2578  ;;  %3779 = vmatpush1.msra.mxu1 %v2965_v28 }
 0x2ef   : > { %v2600_v8 = vsel %vm712_vm4, %v5398_v38, %v2579_v7  ;;  %v2581_v36 = vpop.permute.xlu1 %2580 }
 0x2f0   : > { %v2601_v11 = vsel %vm712_vm4, %v2579_v7, %v2581_v36 }
 0x2f1   : > { %3707 = vmatprep.subr.mxu0 %v2601_v11 }
 0x2f2   : > { %v2821_v25 = vpop.permute.xlu0 %2820  ;;  %3708 = vmatpush1.msra.mxu0 %v2600_v8 }
 0x2f3   : > { %v2842_v12 = vsel %vm968_vm2, %v2819_v47, %v2821_v25  ;;  %v5470_v26 = vpop.permute.xlu1 %2822 }
 0x2f4   : > { %v2843_v45 = vsel %vm968_vm2, %v2821_v25, %v5470_v26 }
 0x2f5   : > { %3780 = vmatprep.subr.mxu1 %v2843_v45 }
 0x2f6   : > { %v2461_v58 = vpop.permute.xlu0 %2460  ;;  %3781 = vmatpush1.msra.mxu1 %v2842_v12 }
 0x2f7   : > { %v2482_v61 = vsel %vm586_vm5, %v5415_v10, %v2461_v58  ;;  %v2463_v14 = vpop.permute.xlu1 %2462 }
 0x2f8   : > { %v2483_v53 = vsel %vm586_vm5, %v2461_v58, %v2463_v14 }
 0x2f9   : > { %3709 = vmatprep.subr.mxu0 %v2483_v53 }
 0x2fa   : > { %v2701_v9 = vpop.permute.xlu0 %2700  ;;  %3710 = vmatpush1.msra.mxu0 %v2482_v61 }
 0x2fb   : > { %v2720_v38 = vsel %vm838_vm3, %v2699_v17, %v2701_v9  ;;  %v5478_v34 = vpop.permute.xlu1 %2702 }
 0x2fc   : > { %v2721_v19 = vsel %vm838_vm3, %v2701_v9, %v5478_v34 }
 0x2fd   : > { %3782 = vmatprep.subr.mxu1 %v2721_v19 }
 0x2fe   : > { %v2343_v18 = vpop.permute.xlu0 %2342  ;;  %3783 = vmatpush1.msra.mxu1 %v2720_v38 }
 0x2ff   : > { %v2364_v23 = vsel %vm460_vm6, %v5423_v21, %v2343_v18  ;;  %v2345_v22 = vpop.permute.xlu1 %2344 }
 0x300   : > { %v2365_v41 = vsel %vm460_vm6, %v2343_v18, %v2345_v22 }
 0x301   : > { %3711 = vmatprep.subr.mxu0 %v2365_v41 }
 0x302   : > { %v2583_v52 = vpop.permute.xlu0 %2582  ;;  %3712 = vmatpush1.msra.mxu0 %v2364_v23 }
 0x303   : > { %v2602_v13 = vsel %vm712_vm4, %v2581_v36, %v2583_v52  ;;  %v5486_v33 = vpop.permute.xlu1 %2584 }
 0x304   : > { %v2603_v10 = vsel %vm712_vm4, %v2583_v52, %v5486_v33 }
 0x305   : > { %3784 = vmatprep.subr.mxu1 %v2603_v10 }
 0x306   : > { %v2225_v35 = vpop.permute.xlu0 %2224  ;;  %3785 = vmatpush1.msra.mxu1 %v2602_v13 }
 0x307   : > { %v2246_v40 = vsel %vm334_vm7, %v5431_v31, %v2225_v35  ;;  %v2227_v57 = vpop.permute.xlu1 %2226 }
 0x308   : > { %v2247_v0 = vsel %vm334_vm7, %v2225_v35, %v2227_v57 }
 0x309   : > { %3713 = vmatprep.subr.mxu0 %v2247_v0 }
 0x30a   : > { %v2465_v21 = vpop.permute.xlu0 %2464  ;;  %3714 = vmatpush1.msra.mxu0 %v2246_v40 }
 0x30b   : > { %v2484_v4 = vsel %vm586_vm5, %v2463_v14, %v2465_v21  ;;  %v5494_v2 = vpop.permute.xlu1 %2466  ;;  %3715 = vmatprep.subr.mxu0 %v3140_v1  ;;  %v4171_v1 = vld [vmem:[%s5652_s3] sm:$0xff] }
 0x30c   : > { %v2485_v42 = vsel %vm586_vm5, %v2465_v21, %v5494_v2  ;;  %3716 = vmatpush1.msra.mxu0 %v3139_v37  ;;  %v3143_v21 = vld [vmem:[#allocation4 + $0x70] sm:$0xff] }
 0x30d   : > { %4106 = vmatmul.mubr.msk.f32.vlgmr.msra.gmra.mxu0 %vm1454_vm8, %v5168_v20  ;;  %3786 = vmatprep.subr.mxu1 %v2485_v42 }
 0x30e   : > { %v2347_v31 = vpop.permute.xlu0 %2346  ;;  %3787 = vmatpush1.msra.mxu1 %v2484_v4  ;;  %3755 = vmatprep.mubr.f32.mxu0 %v4189_v5 }
 0x30f   : > { %v2366_v43 = vsel %vm460_vm6, %v2345_v22, %v2347_v31  ;;  %v5502_v32 = vpop.permute.xlu1 %2348 }
 0x310   : > { %v2367_v44 = vsel %vm460_vm6, %v2347_v31, %v5502_v32 }
 0x311   : > { %3788 = vmatprep.subr.mxu1 %v2367_v44  ;;  %4107 = vmatmul.mubr.msk.f32.gmra.mxu0 %vm1454_vm8, %v5184_v16 }
 0x312   : > { %v2229_v46 = vpop.permute.xlu0 %2228  ;;  %3789 = vmatpush1.msra.mxu1 %v2366_v43  ;;  %3903 = vmatprep.mubr.f32.mxu0 %v4189_v5  ;;  %v3145_v43 = vld [vmem:[#allocation4 + $0x80] sm:$0xff] }
 0x313   : > { %v2248_v39 = vsel %vm334_vm7, %v2227_v57, %v2229_v46  ;;  %v5510_v3 = vpop.permute.xlu1 %2230  ;;  %v3144_v57 = vld [vmem:[#allocation4 + $0x78] sm:$0xff] }
 0x314   : > { %v2249_v49 = vsel %vm334_vm7, %v2229_v46, %v5510_v3 }
 0x315   : > { %3790 = vmatprep.subr.mxu1 %v2249_v49 }
 0x316   : > { %v3071_v48 = vpop.permute.xlu0 %3070  ;;  %3791 = vmatpush1.msra.mxu1 %v2248_v39 }
 0x317   : > { %v3090_v15 = vsel %vm1230_vm0, %v5454_v50, %v3071_v48  ;;  %v3073_v54 = vpop.permute.xlu1 %3072  ;;  %3792 = vmatprep.subr.mxu1 %v3142_v60 }
 0x318   : > { %v3091_v47 = vsel %vm1230_vm0, %v3071_v48, %v3073_v54  ;;  %3793 = vmatpush1.msra.mxu1 %v3141_v56 }
 0x319   : > { %4108 = vmatmul.mubr.msk.f32.vlgmr.msra.gmra.mxu1 %vm1454_vm8, %v5168_v20  ;;  %3853 = vmatprep.subr.mxu0 %v3091_v47 }
 0x31a   : > { %v2948_v51 = vpop.permute.xlu0 %2947  ;;  %3854 = vmatpush1.msra.mxu0 %v3090_v15  ;;  %3832 = vmatprep.mubr.f32.mxu1 %v4189_v5 }
 0x31b   : > { %v2967_v55 = vsel %vm1099_vm1, %v5462_v6, %v2948_v51  ;;  %v2950_v29 = vpop.permute.xlu1 %2949 }
 0x31c   : > { %v2968_v50 = vsel %vm1099_vm1, %v2948_v51, %v2950_v29 }
 0x31d   : > { %3855 = vmatprep.subr.mxu0 %v2968_v50  ;;  %4109 = vmatmul.mubr.msk.f32.gmra.mxu1 %vm1454_vm8, %v5184_v16 }
 0x31e   : > { %v2825_v62 = vpop.permute.xlu0 %2824  ;;  %3856 = vmatpush1.msra.mxu0 %v2967_v55  ;;  %4145 = vmatprep.mubr.msk.f32.mxu1 %vm1454_vm8, %v5168_v20 }
 0x31f   : > { %v2844_v27 = vsel %vm968_vm2, %v5470_v26, %v2825_v62  ;;  %v2827_v59 = vpop.permute.xlu1 %2826 }
 0x320   : > { %v2845_v17 = vsel %vm968_vm2, %v2825_v62, %v2827_v59 }
 0x321   : > { %3857 = vmatprep.subr.mxu0 %v2845_v17  ;;  %v3366_v40 = vpop.f32.mrf.mxu1 }
 0x322   : > { %v3075_v24 = vpop.permute.xlu0 %3074  ;;  %3858 = vmatpush1.msra.mxu0 %v2844_v27 }
 0x323   : > { %v3092_v30 = vsel %vm1230_vm0, %v3073_v54, %v3075_v24  ;;  %v2705_v28 = vpop.permute.xlu1 %2704  ;;  %v3368_v4 = vpop.f32.mrf.mxu1 }
 0x324   : > { %3126 = vst.msk [vmem:[#allocation4 + $0x4c0] sm:$0xff] %vm2166_vm10, %v3092_v30  ;;  %v2722_v16 = vsel %vm838_vm3, %v5478_v34, %v2705_v28 }
 0x326   : > { %v2707_v6 = vpop.permute.xlu0 %2706 }
 0x327   : > { %v2723_v20 = vsel %vm838_vm3, %v2705_v28, %v2707_v6  ;;  %2757 = vst.msk [vmem:[#allocation4 + $0x328] sm:$0xff] %vm2166_vm10, %v2707_v6  ;;  %v2952_v63 = vpop.permute.xlu1 %2951 }
 0x328   : > { %v2969_v7 = vsel %vm1099_vm1, %v2950_v29, %v2952_v63  ;;  %3859 = vmatprep.subr.mxu0 %v2723_v20 }
 0x329   : > { %3003 = vst.msk [vmem:[#allocation4 + $0x438] sm:$0xff] %vm2166_vm10, %v2969_v7  ;;  %3860 = vmatpush1.msra.mxu0 %v2722_v16 }
 0x32a   : > { %v2587_v8 = vpop.permute.xlu0 %2586 }
 0x32b   : > { %v2604_v36 = vsel %vm712_vm4, %v5486_v33, %v2587_v8  ;;  %v2589_v11 = vpop.permute.xlu1 %2588  ;;  %v3281_v25 = vld [vmem:[#allocation4 + $0x4c0] sm:$0xff] }
 0x32c   : > { %v2605_v12 = vsel %vm712_vm4, %v2587_v8, %v2589_v11  ;;  %2639 = vst.msk [vmem:[#allocation4 + $0x2a0] sm:$0xff] %vm2166_vm10, %v2589_v11  ;;  %4127 = vmatprep.subr.mxu1 %v3281_v25 }
 0x32d   : > { %4128 = vmatpush3.msra.mxu1 %v3281_v25  ;;  %3861 = vmatprep.subr.mxu0 %v2605_v12 }
 0x32e   : > { %v2829_v26 = vpop.permute.xlu0 %2828  ;;  %3862 = vmatpush1.msra.mxu0 %v2604_v36  ;;  %v3230_v52 = vld [vmem:[#allocation4 + $0x328] sm:$0xff] }
 0x32f   : > { %v2846_v45 = vsel %vm968_vm2, %v2827_v59, %v2829_v26  ;;  %v2469_v58 = vpop.permute.xlu1 %2468 }
 0x330   : > { %2880 = vst.msk [vmem:[#allocation4 + $0x3b0] sm:$0xff] %vm2166_vm10, %v2846_v45  ;;  %v2486_v61 = vsel %vm586_vm5, %v5494_v2, %v2469_v58  ;;  %v3264_v14 = vld [vmem:[#allocation4 + $0x438] sm:$0xff] }
 0x331   : > { %4129 = vmatprep.subr.mxu1 %v3264_v14 }
 0x332   : > { %4130 = vmatpush3.msra.mxu1 %v3264_v14  ;;  %v2471_v53 = vpop.permute.xlu0 %2470 }
 0x333   : > { %v2487_v9 = vsel %vm586_vm5, %v2469_v58, %v2471_v53  ;;  %2521 = vst.msk [vmem:[#allocation4 + $0x218] sm:$0xff] %vm2166_vm10, %v2471_v53  ;;  %v2351_v38 = vpop.permute.xlu1 %2350  ;;  %v3213_v10 = vld [vmem:[#allocation4 + $0x2a0] sm:$0xff] }
 0x334   : > { %v2368_v34 = vsel %vm460_vm6, %v5502_v32, %v2351_v38  ;;  %3863 = vmatprep.subr.mxu0 %v2487_v9  ;;  %v3372_v32 = vpop.f32.mrf.mxu1 }
 0x335   : > { %3864 = vmatpush1.msra.mxu0 %v2486_v61 }
 0x336   : > { %v2353_v19 = vpop.permute.xlu0 %2352  ;;  %v3374_v39 = vpop.f32.mrf.mxu1 }
 0x337   : > { %v2369_v18 = vsel %vm460_vm6, %v2351_v38, %v2353_v19  ;;  %2403 = vst.msk [vmem:[#allocation4 + $0x190] sm:$0xff] %vm2166_vm10, %v2353_v19  ;;  %v2233_v23 = vpop.permute.xlu1 %2232  ;;  %v3247_v22 = vld [vmem:[#allocation4 + $0x3b0] sm:$0xff] }
 0x338   : > { %v2250_v41 = vsel %vm334_vm7, %v5510_v3, %v2233_v23  ;;  %4131 = vmatprep.subr.mxu1 %v3247_v22  ;;  %3865 = vmatprep.subr.mxu0 %v2369_v18 }
 0x339   : > { %4132 = vmatpush3.msra.mxu1 %v3247_v22  ;;  %3866 = vmatpush1.msra.mxu0 %v2368_v34 }
 0x33a   : > { %v2235_v13 = vpop.permute.xlu0 %2234  ;;  %4133 = vmatprep.subr.mxu1 %v3230_v52  ;;  %v3196_v35 = vld [vmem:[#allocation4 + $0x218] sm:$0xff] }
 0x33b   : > { %v2251_v33 = vsel %vm334_vm7, %v2233_v23, %v2235_v13  ;;  %2285 = vst.msk [vmem:[#allocation4 + $0x108] sm:$0xff] %vm2166_vm10, %v2235_v13  ;;  %4134 = vmatpush3.msra.mxu1 %v3230_v52 }
 0x33c   : > { %4135 = vmatprep.subr.mxu1 %v3213_v10  ;;  %3867 = vmatprep.subr.mxu0 %v2251_v33 }
 0x33d   : > { %4136 = vmatpush3.msra.mxu1 %v3213_v10  ;;  %3868 = vmatpush1.msra.mxu0 %v2250_v41 }
 0x33e   : > { %4137 = vmatprep.subr.mxu1 %v3196_v35  ;;  %v3179_v0 = vld [vmem:[#allocation4 + $0x190] sm:$0xff]  ;;  %3869 = vmatprep.subr.mxu0 %v3144_v57 }
 0x33f   : > { %4138 = vmatpush3.msra.mxu1 %v3196_v35  ;;  %3870 = vmatpush1.msra.mxu0 %v3143_v21 }
 0x340   : > { %4139 = vmatprep.subr.mxu1 %v3179_v0  ;;  %4110 = vmatmul.mubr.msk.f32.vlgmr.msra.gmra.mxu0 %vm1454_vm8, %v4171_v1 }
 0x341   : > { %4140 = vmatpush3.msra.mxu1 %v3179_v0  ;;  %3909 = vmatprep.mubr.f32.mxu0 %v4189_v5  ;;  %v4172_v5 = vld [vmem:[%s5652_s3 + $0x8] sm:$0xff] }
 0x342   : > { %v3162_v2 = vld [vmem:[#allocation4 + $0x108] sm:$0xff] }
 0x343   : > { %v5567_v37 = vpop.permute.xlu1 %3286  ;;  %4141 = vmatprep.subr.mxu1 %v3162_v2 }
 0x344   : > { %v3367_v42 = vadd.f32 %v3366_v40, %v5567_v37  ;;  %v3369_v31 = vadd.f32 %v3368_v4, %v5567_v37  ;;  %4142 = vmatpush3.msra.mxu1 %v3162_v2  ;;  %4111 = vmatmul.mubr.msk.f32.gmra.mxu0 %vm1454_vm8, %v4172_v5 }
 0x345   : > { %4143 = vmatprep.subr.mxu1 %v3145_v43 }
 0x346   : > { %3991 = vst [vmem:[%s5565_s28] sm:$0xff] %v3367_v42  ;;  %3992 = vst [vmem:[%s5565_s28 + $0x8] sm:$0xff] %v3369_v31  ;;  %4144 = vmatpush3.msra.mxu1 %v3145_v43 }
 0x347   : > { %4146 = vmatmul.mubr.msk.f32.vlgmr.msra.gmra.mxu1 %vm1454_vm8, %v4172_v5  ;;  %v5579_v3 = vpop.permute.xlu0 %3291 }
 0x348   : > { %v3373_v48 = vadd.f32 %v3372_v32, %v5579_v3  ;;  %v3375_v60 = vadd.f32 %v3374_v39, %v5579_v3 }
 0x34a   : > { %4008 = vst [vmem:[%s5565_s28 + $0x88] sm:$0xff] %v3373_v48  ;;  %4009 = vst [vmem:[%s5565_s28 + $0x90] sm:$0xff] %v3375_v60 }
 0x34e   : > { %v3443_v44 = vpop.f32.mrf.mxu0 }
 0x34f   : > { %v3444_v46 = vadd.f32 %v3443_v44, %v5567_v37 }
 0x350   : > { %v3445_v49 = vpop.f32.mrf.mxu0 }
 0x351   : > { %3993 = vst [vmem:[%s5565_s28 + $0x10] sm:$0xff] %v3444_v46  ;;  %v3446_v15 = vadd.f32 %v3445_v49, %v5567_v37 }
 0x352   : > { %v3449_v54 = vpop.f32.mrf.mxu0 }
 0x353   : > { %3994 = vst [vmem:[%s5565_s28 + $0x18] sm:$0xff] %v3446_v15  ;;  %v3450_v56 = vadd.f32 %v3449_v54, %v5579_v3 }
 0x354   : > { %v3451_v47 = vpop.f32.mrf.mxu0 }
 0x355   : > { %v3452_v51 = vadd.f32 %v3451_v47, %v5579_v3  ;;  %4010 = vst [vmem:[%s5565_s28 + $0x98] sm:$0xff] %v3450_v56 }
 0x357   : > { %4011 = vst [vmem:[%s5565_s28 + $0xa0] sm:$0xff] %v3452_v51 }
 0x35a   : > { %v3520_v55 = vpop.f32.mrf.mxu1 }
 0x35b   : > { %v3521_v29 = vadd.f32 %v3520_v55, %v5567_v37 }
 0x35c   : > { %v3522_v50 = vpop.f32.mrf.mxu1 }
 0x35d   : > { %3995 = vst [vmem:[%s5565_s28 + $0x20] sm:$0xff] %v3521_v29  ;;  %v3523_v62 = vadd.f32 %v3522_v50, %v5567_v37 }
 0x35e   : > { %v3526_v27 = vpop.f32.mrf.mxu1 }
 0x35f   : > { %3996 = vst [vmem:[%s5565_s28 + $0x28] sm:$0xff] %v3523_v62  ;;  %v3527_v59 = vadd.f32 %v3526_v27, %v5579_v3 }
 0x360   : > { %v3528_v17 = vpop.f32.mrf.mxu1 }
 0x361   : > { %v3529_v24 = vadd.f32 %v3528_v17, %v5579_v3  ;;  %4012 = vst [vmem:[%s5565_s28 + $0xa8] sm:$0xff] %v3527_v59 }
 0x363   : > { %4013 = vst [vmem:[%s5565_s28 + $0xb0] sm:$0xff] %v3529_v24 }
 0x38d   : > { %v3597_v30 = vpop.f32.mrf.mxu0 }
 0x38e   : > { %v3598_v28 = vadd.f32 %v3597_v30, %v5567_v37 }
 0x38f   : > { %v3599_v16 = vpop.f32.mrf.mxu0 }
 0x390   : > { %3997 = vst [vmem:[%s5565_s28 + $0x30] sm:$0xff] %v3598_v28  ;;  %v3600_v6 = vadd.f32 %v3599_v16, %v5567_v37 }
 0x391   : > { %v3603_v20 = vpop.f32.mrf.mxu0 }
 0x392   : > { %3998 = vst [vmem:[%s5565_s28 + $0x38] sm:$0xff] %v3600_v6  ;;  %v3604_v63 = vadd.f32 %v3603_v20, %v5579_v3 }
 0x393   : > { %v3605_v7 = vpop.f32.mrf.mxu0 }
 0x394   : > { %v3606_v8 = vadd.f32 %v3605_v7, %v5579_v3  ;;  %4014 = vst [vmem:[%s5565_s28 + $0xb8] sm:$0xff] %v3604_v63 }
 0x396   : > { %4015 = vst [vmem:[%s5565_s28 + $0xc0] sm:$0xff] %v3606_v8 }
 0x399   : > { %v3674_v36 = vpop.f32.mrf.mxu1 }
 0x39a   : > { %v3675_v11 = vadd.f32 %v3674_v36, %v5567_v37 }
 0x39b   : > { %v3676_v25 = vpop.f32.mrf.mxu1 }
 0x39c   : > { %3999 = vst [vmem:[%s5565_s28 + $0x40] sm:$0xff] %v3675_v11  ;;  %v3677_v12 = vadd.f32 %v3676_v25, %v5567_v37 }
 0x39d   : > { %v3680_v26 = vpop.f32.mrf.mxu1 }
 0x39e   : > { %4000 = vst [vmem:[%s5565_s28 + $0x48] sm:$0xff] %v3677_v12  ;;  %v3681_v45 = vadd.f32 %v3680_v26, %v5579_v3 }
 0x39f   : > { %v3682_v58 = vpop.f32.mrf.mxu1 }
 0x3a0   : > { %4016 = vst [vmem:[%s5565_s28 + $0xc8] sm:$0xff] %v3681_v45  ;;  %v3683_v61 = vadd.f32 %v3682_v58, %v5579_v3 }
 0x3a2   : > { %4017 = vst [vmem:[%s5565_s28 + $0xd0] sm:$0xff] %v3683_v61 }
 0x3cd   : > { %v3751_v14 = vpop.f32.mrf.mxu0 }
 0x3ce   : > { %v3752_v53 = vadd.f32 %v3751_v14, %v5567_v37 }
 0x3cf   : > { %v3753_v9 = vpop.f32.mrf.mxu0 }
 0x3d0   : > { %4001 = vst [vmem:[%s5565_s28 + $0x50] sm:$0xff] %v3752_v53  ;;  %v3754_v38 = vadd.f32 %v3753_v9, %v5567_v37 }
 0x3d1   : > { %v3757_v34 = vpop.f32.mrf.mxu0 }
 0x3d2   : > { %4002 = vst [vmem:[%s5565_s28 + $0x58] sm:$0xff] %v3754_v38  ;;  %v3758_v19 = vadd.f32 %v3757_v34, %v5579_v3 }
 0x3d3   : > { %v3759_v18 = vpop.f32.mrf.mxu0 }
 0x3d4   : > { %4018 = vst [vmem:[%s5565_s28 + $0xd8] sm:$0xff] %v3758_v19  ;;  %v3760_v23 = vadd.f32 %v3759_v18, %v5579_v3 }
 0x3d6   : > { %4019 = vst [vmem:[%s5565_s28 + $0xe0] sm:$0xff] %v3760_v23 }
 0x3d9   : > { %v3828_v22 = vpop.f32.mrf.mxu1 }
 0x3da   : > { %v3829_v41 = vadd.f32 %v3828_v22, %v5567_v37 }
 0x3db   : > { %v3830_v52 = vpop.f32.mrf.mxu1 }
 0x3dc   : > { %4003 = vst [vmem:[%s5565_s28 + $0x60] sm:$0xff] %v3829_v41  ;;  %v3831_v13 = vadd.f32 %v3830_v52, %v5567_v37 }
 0x3dd   : > { %v3834_v33 = vpop.f32.mrf.mxu1 }
 0x3de   : > { %4004 = vst [vmem:[%s5565_s28 + $0x68] sm:$0xff] %v3831_v13  ;;  %v3835_v10 = vadd.f32 %v3834_v33, %v5579_v3 }
 0x3df   : > { %v3836_v35 = vpop.f32.mrf.mxu1 }
 0x3e0   : > { %4020 = vst [vmem:[%s5565_s28 + $0xe8] sm:$0xff] %v3835_v10  ;;  %v3837_v40 = vadd.f32 %v3836_v35, %v5579_v3 }
 0x3e2   : > { %4021 = vst [vmem:[%s5565_s28 + $0xf0] sm:$0xff] %v3837_v40 }
 0x400   : > { %v3905_v57 = vpop.f32.mrf.mxu0 }
 0x401   : > { %v3906_v0 = vadd.f32 %v3905_v57, %v5567_v37 }
 0x402   : > { %v3907_v21 = vpop.f32.mrf.mxu0 }
 0x403   : > { %4005 = vst [vmem:[%s5565_s28 + $0x70] sm:$0xff] %v3906_v0  ;;  %v3908_v1 = vadd.f32 %v3907_v21, %v5567_v37 }
 0x404   : > { %v3911_v4 = vpop.f32.mrf.mxu0 }
 0x405   : > { %4006 = vst [vmem:[%s5565_s28 + $0x78] sm:$0xff] %v3908_v1  ;;  %v3912_v2 = vadd.f32 %v3911_v4, %v5579_v3 }
 0x406   : > { %v3913_v42 = vpop.f32.mrf.mxu0 }
 0x407   : > { %v4147_v31 = vpop.f32.mrf.mxu1  ;;  %4022 = vst [vmem:[%s5565_s28 + $0xf8] sm:$0xff] %v3912_v2  ;;  %v3914_v43 = vadd.f32 %v3913_v42, %v5579_v3 }
 0x408   : > { %v3988_v5 = vadd.f32 %v4147_v31, %v5579_v3 }
 0x409   : > { %v3982_v32 = vpop.f32.mrf.mxu1  ;;  %4023 = vst [vmem:[%s5565_s28 + $0x100] sm:$0xff] %v3914_v43 }
 0x40a   : > { %4024 = vst.msk [vmem:[%s5565_s28 + $0x108] sm:$0xff] %vm2166_vm10, %v3988_v5  ;;  %v3983_v44 = vadd.f32 %v3982_v32, %v5567_v37 }
 0x40c   : > { %4007 = vst.msk [vmem:[%s5565_s28 + $0x80] sm:$0xff] %vm2166_vm10, %v3983_v44 }
 0x40d PF: > { %s15_s18 = sadd.s32 1, %s4179_s18  }
 0x40e   : > { %p12_p4 = scmp.ge.s32.totalorder %s15_s18, 4  }
 0x410   :  { %14 = sbr.rel (!%p12_p4) target bundleno = 1 (0x1), region = 70 }

// kernel: cnn_forward.3
= control target key start
LH: loop header
LB: loop body
LE: loop exit
PB: predicated region body
PF: predicated region fallthrough
CT: control target
= control target key end

     0   :  { %10 = vsyncpa [#allocation4], 0  ;;  %s23476_s0 = inlined_call_operand.vmem [shape: f32[2,30976], index: 0, kind: input, shape index: {}]   ;;  %s23477_s1 = inlined_call_operand.hbm [shape: bf16[30976,256], index: 1, kind: input, shape index: {}]   ;;  %s23478_s2 = inlined_call_operand.hbm [shape: f32[1,256], index: 2, kind: input, shape index: {}]   ;;  %s23479_s3 = inlined_call_operand.vmem [shape: f32[256,13], index: 3, kind: input, shape index: {}]   ;;  %s23480_s4 = inlined_call_operand.hbm [shape: f32[1,13], index: 4, kind: input, shape index: {}]   ;;  %s23481_s5 = inlined_call_operand.hbm [shape: f32[2,13], index: 5, kind: output, shape index: {}]  }
   0x1   :  { %12 = vsyncpa [#allocation4 + $0x1], 0 }
   0x2   :  { %13 = vsyncpa [#allocation7], 0 }
   0x3   :  { %14 = vsyncpa [#allocation5], 0  ;;  %s20677_s18 = smov 0   ;;  %s20679_s19 = smov 0  }
   0x4   :  { %s20681_s20 = smov 0   ;;  %s20683_s21 = smov 0  }
   0x5 LB: > { %s20696_s22 = sadd.s32 4294967295, %s20636_s21   ;;  %s20699_s23 = sadd.s32 1, %s20636_s21   ;;  %s20636_s21 = sphi %s20683_s21, %s23498_s21   ;;  %s20632_s20 = sphi %s20681_s20, %s23497_s20   ;;  %s20628_s19 = sphi %s20679_s19, %s23496_s19   ;;  %s20624_s18 = sphi %s20677_s18, %s23495_s18  }
   0x6   : > { %s50_s24 = ssub.s32 %s20636_s21, %s20699_s23  ;;  %s53_s25 = sadd.s32 1, %s20632_s20 }
   0x7   : > { %p51_p0 = scmp.eq.s32.totalorder %s50_s24, 0  ;;  %p60_p1 = scmp.ne.s32.totalorder %s20632_s20, %s20628_s19 }
   0x8   : > { %p61_p2 = scmp.eq.s32.totalorder %s20636_s21, 0  ;;  %p66_p3 = scmp.ne.s32.totalorder %s20628_s19, %s20624_s18 }
   0x9   : > { %s20709_s26 = scalar_select %p51_p0, %s20632_s20, %s53_s25  }
   0xa   : > { %p20711_p4 = por %p61_p2, %p60_p1  ;;  %p23482_p5 = scmp.eq.s32.totalorder %s20696_s22, 0 }
   0xb   : > { %p15486_p6 = scmp.ge.s32.totalorder %s20636_s21, 1  ;;  %p161_p7 = scmp.lt.s32.totalorder %s20636_s21, 3 }
   0xc   : > { %p20720_p8 = por %p23482_p5, %p66_p3  ;;  %s20638_s30 = smov [#allocation6]  }
   0xd   : > { %p20725_p10 = pnand %p15486_p6, %p161_p7  ;;  %s174_s6 = sshll.u32 %s20638_s30, 4  ;;  %s175_s6 = int_to_ptr.vmem [resolvable:$true] %s174_s6 }
   0xe   : > { %s23486_s28 = scalar_select %p20720_p8, 1, 0 }
   0xf   : > { %s23487_s29 = scalar_select %p20725_p10, 1, 0 }
  0x10   : > { %p17494_p11 = pneg %p20725_p10  ;;  %p17507_p12 = scmp.lt.s32.totalorder %s20636_s21, 2 }
  0x11   : > { %s20639_s8 = smov [#allocation8]   ;;  %s208_s11 = sand.u32 1, %s20632_s20  }
  0x12   : > { %p20734_p13 = pnand %p17494_p11, %p23482_p5  ;;  %s188_s9 = sshll.u32 %s20639_s8, 4  ;;  %s189_s9 = int_to_ptr.vmem [resolvable:$true] %s188_s9 }
  0x13   : > { %p20740_p0 = pnand %p17507_p12, %p20711_p4  ;;  %s20501_s12 = scalar_lea.vmem %s175_s6, 32 }
  0x14   : > { %p20492_p1 = pneg %p20734_p13  ;;  %p20502_p2 = scmp.ne.s32.totalorder %s175_s6, %s20501_s12 }
  0x15   : > { %p20509_p7 = scmp.lt.s32.totalorder %s175_s6, %s175_s6  ;;  %p20510_p11 = scmp.lt.s32.totalorder %s20501_s12, %s20501_s12 }
  0x16   : > { %p20504_p3 = pnand %p20502_p2, %p20492_p1 }
  0x17   : > { %p20511_p9 = por %p20510_p11, %p20509_p7 }
  0x18   : > { %p20505_p6 = pneg %p20504_p3 }
  0x1a   : > { %p20512_p5 = pnand %p20511_p9, %p20505_p6 }
  0x1c   : > { %20515 = shalt.err (!%p20512_p5)
}
  0x1d   : > { %17497 = dma.hbm_to_vmem [thread:$0]  (!%p20734_p13), %s23478_s2, 32, %s175_s6, [#allocation7]  }
  0x1e   : > { %s20527_s15 = scalar_lea.vmem %s189_s9, 16  ;;  %s20534_s16 = scalar_lea.vmem %s189_s9, 32 }
  0x1f   : > { %p20528_p4 = scmp.ne.s32.totalorder %s189_s9, %s20527_s15  ;;  %p20535_p2 = scmp.lt.s32.totalorder %s189_s9, %s189_s9 }
  0x20   : > { %p20536_p3 = scmp.lt.s32.totalorder %s20534_s16, %s20527_s15 }
  0x21   : > { %p20530_p12 = pnand %p20528_p4, %p20492_p1 }
  0x22   : > { %p20537_p10 = por %p20536_p3, %p20535_p2 }
  0x23   : > { %p20531_p8 = pneg %p20530_p12 }
  0x25   : > { %p20538_p7 = pnand %p20537_p10, %p20531_p8 }
  0x27   : > { %20541 = shalt.err (!%p20538_p7)
}
  0x28   : > { %17500 = dma.hbm_to_vmem [thread:$0]  (!%p20734_p13), %s23480_s4, 16, %s189_s9, [#allocation7]  }
  0x29   : > { %s17478_s24 = smul.u32 15488, %s208_s11  ;;  %s20771_s7 = scalar_lea.sflag [#allocation4], %s208_s11 }
  0x2a   : > { %s17442_s25 = smul.u32 247808, %s20636_s21  ;;  %p20544_p8 = pneg %p20740_p0 }
  0x2b   : > { %s212_s8 = scalar_lea.vmem [#allocation3], %s17478_s24  ;;  %s20547_s14 = scalar_lea.hbm %s23477_s1, 495616 }
  0x2c   : > { %s20767_s6 = scalar_lea.hbm %s23477_s1, %s17442_s25  ;;  %s220_s12 = sshll.u32 %s212_s8, 4  ;;  %s20769_s12 = int_to_ptr.vmem [resolvable:$true] %s220_s12 }
  0x2d   : > { %s20542_s13 = scalar_lea.hbm %s20767_s6, 247808  ;;  %p20548_p13 = scmp.lt.s32.totalorder %s20767_s6, %s23477_s1 }
  0x2e   : > { %p20543_p5 = scmp.ne.s32.totalorder %s20767_s6, %s20542_s13  ;;  %p20549_p1 = scmp.lt.s32.totalorder %s20547_s14, %s20542_s13 }
  0x30   : > { %p20545_p9 = pnand %p20544_p8, %p20543_p5  ;;  %p20550_p6 = por %p20549_p1, %p20548_p13 }
  0x32   : > { %p20546_p10 = pneg %p20545_p9 }
  0x34   : > { %p20551_p11 = pnand %p20550_p6, %p20546_p10 }
  0x36   : > { %20554 = shalt.err (!%p20551_p11)
}
  0x37   : > { %s20555_s11 = scalar_lea.vmem %s20769_s12, 247808  ;;  %s20640_s17 = smov [#allocation3]  }
  0x38   : > { %p20556_p4 = scmp.ne.s32.totalorder %s20769_s12, %s20555_s11  ;;  %s20560_s18 = sshll.u32 %s20640_s17, 4  ;;  %s20561_s18 = int_to_ptr.vmem [resolvable:$false] %s20560_s18 }
  0x39   : > { %s20562_s24 = scalar_lea.vmem %s20561_s18, 495616  ;;  %p20563_p3 = scmp.lt.s32.totalorder %s20769_s12, %s20561_s18 }
  0x3a   : > { %p20558_p12 = pnand %p20556_p4, %p20544_p8  ;;  %p20564_p7 = scmp.lt.s32.totalorder %s20562_s24, %s20555_s11 }
  0x3c   : > { %p20559_p2 = pneg %p20558_p12  ;;  %p20565_p5 = por %p20564_p7, %p20563_p3 }
  0x3e   : > { %p20566_p9 = pnand %p20565_p5, %p20559_p2 }
  0x40   : > { %20569 = shalt.err (!%p20566_p9)
}
  0x41   : > { %s20641_s25 = smov 128   ;;  %s20642_s27 = smov 8  }
  0x42   : > { %17504 = dma.hbm_to_vmem [thread:$0]  (!%p20740_p0), %s20767_s6, 247808, %s20769_s12, %s20771_s7, %s20641_s25, %s20641_s25, %s20642_s27  }
  0x43   : > { %p23490_p8 = scmp.ne.s32.totalorder %s23487_s29, 0 }
  0x44   : > { %s234_s30 = sand.u32 (!%p23490_p8), 1, %s20628_s19   ;;  %p23491_p10 = scmp.ne.s32.totalorder (!%p23490_p8), %s23486_s28, 0 }
  0x45   : > { %232 = sbr.rel (%p23490_p8) target bundleno = 2804 (0xaf4), region = 40  ;;  %s235_s13 = scalar_lea.sflag (!%p23490_p8), [#allocation4], %s234_s30 }
  0x46   : > { %s17479_s8 = smul.u32 (!%p23490_p8), 15488, %s234_s30 }
  0x48   : > { %s20795_s21 = scalar_lea.vmem (!%p23490_p8), [#allocation3], %s17479_s8 }
  0x4a   : > { %20611 = dma.done.wait (%p23491_p10), %s235_s13, 247808  }
  0x4b   : > { %20613 = vsyncadd (%p23491_p10), %s235_s13, 4294719488  ;;  %p23492_p13 = scmp.eq.s32.totalorder %s20696_s22, 0 }
  0x4d   : > { %20615 = dma.done.wait (%p23492_p13), [#allocation7], 48   ;;  %p23493_p0 = pmov %p23492_p13 }
  0x4e   : > { %s273_s29 = smul.u32 121, %s20696_s22  ;;  %p23494_p6 = scmp.ne.s32.totalorder %s20696_s22, 0 }
  0x4f   : > { %20617 = vsyncadd (%p23493_p0), [#allocation7], 4294967248 }
  0x50   : > { %p274_p1 = scmp.lt.s32.totalorder %s273_s29, 241  ;;  %284 = sbr.rel (%p23494_p6) target bundleno = 87 (0x57), region = 56 }
  0x52   : > { %s23500_s29 = smov (!%p274_p1, %s273_s29), 241 }
  0x53   : > { %s15495_s10 = sshll.u32 %s23500_s29, 1 }
  0x54   : > { %s20809_s7 = scalar_lea.vmem %s23476_s0, %s15495_s10 }
  0x55   : > { %v20643_v0 = vmov 0.0  }
  0x56   : > { %285 = vst [vmem:[#allocation2] sm:$0xf] %v20643_v0 }
  0x57 PF: > { %v17552_v1 = vld [vmem:[%s20795_s21 + $0x74] ss:$8 sps:$4 sm:$0xff]   ;;  %v17556_v3 = vld [vmem:[%s20795_s21 + $0x70] ss:$8 sps:$4 sm:$0xff]   ;;  %v17558_v5 = vld [vmem:[%s20795_s21 + $0x64] ss:$8 sps:$4 sm:$0xff]   ;;  %v353_v39 = vlaneseq }
  0x58   : > { %v17554_v2 = vld [vmem:[%s20795_s21 + $0x174] ss:$8 sps:$4 sm:$0xff]   ;;  %12724 = vmatprep.subr.bf16.mxu0 %v17552_v1  ;;  %v17557_v4 = vld [vmem:[%s20795_s21 + $0x170] ss:$8 sps:$4 sm:$0xff]   ;;  %v17560_v6 = vld [vmem:[%s20795_s21 + $0x164] ss:$8 sps:$4 sm:$0xff]  }
  0x59   : > { %12765 = vmatprep.subr.bf16.mxu1 %v17554_v2  ;;  %12725 = vmatpush1.bf16.msra.mxu0 %v17556_v3  ;;  %v17562_v7 = vld [vmem:[%s20795_s21 + $0x60] ss:$8 sps:$4 sm:$0xff]   ;;  %v17564_v9 = vld [vmem:[%s20795_s21 + $0x54] ss:$8 sps:$4 sm:$0xff]   ;;  %v17568_v11 = vld [vmem:[%s20795_s21 + $0x50] ss:$8 sps:$4 sm:$0xff]  }
  0x5a   : > { %12766 = vmatpush1.bf16.msra.mxu1 %v17557_v4  ;;  %12726 = vmatprep.subr.bf16.mxu0 %v17558_v5  ;;  %v17563_v8 = vld [vmem:[%s20795_s21 + $0x160] ss:$8 sps:$4 sm:$0xff]   ;;  %v17566_v10 = vld [vmem:[%s20795_s21 + $0x154] ss:$8 sps:$4 sm:$0xff]   ;;  %v17569_v12 = vld [vmem:[%s20795_s21 + $0x150] ss:$8 sps:$4 sm:$0xff]  }
  0x5b   : > { %12767 = vmatprep.subr.bf16.mxu1 %v17560_v6  ;;  %v17570_v13 = vld [vmem:[%s20795_s21 + $0x44] ss:$8 sps:$4 sm:$0xff]   ;;  %v17574_v15 = vld [vmem:[%s20795_s21 + $0x40] ss:$8 sps:$4 sm:$0xff]   ;;  %v17576_v17 = vld [vmem:[%s20795_s21 + $0x34] ss:$8 sps:$4 sm:$0xff]  }
  0x5c   : > { %v17572_v14 = vld [vmem:[%s20795_s21 + $0x144] ss:$8 sps:$4 sm:$0xff]   ;;  %v17575_v16 = vld [vmem:[%s20795_s21 + $0x140] ss:$8 sps:$4 sm:$0xff]   ;;  %v17578_v18 = vld [vmem:[%s20795_s21 + $0x134] ss:$8 sps:$4 sm:$0xff]  }
  0x5d   : > { %12727 = vmatpush1.bf16.msra.mxu0 %v17562_v7  ;;  %v17580_v19 = vld [vmem:[%s20795_s21 + $0x30] ss:$8 sps:$4 sm:$0xff]   ;;  %v17582_v21 = vld [vmem:[%s20795_s21 + $0x24] ss:$8 sps:$4 sm:$0xff]   ;;  %v17586_v23 = vld [vmem:[%s20795_s21 + $0x20] ss:$8 sps:$4 sm:$0xff]  }
  0x5e   : > { %12768 = vmatpush1.bf16.msra.mxu1 %v17563_v8  ;;  %12728 = vmatprep.subr.bf16.mxu0 %v17564_v9  ;;  %v17581_v20 = vld [vmem:[%s20795_s21 + $0x130] ss:$8 sps:$4 sm:$0xff]   ;;  %v17584_v22 = vld [vmem:[%s20795_s21 + $0x124] ss:$8 sps:$4 sm:$0xff]   ;;  %v17587_v24 = vld [vmem:[%s20795_s21 + $0x120] ss:$8 sps:$4 sm:$0xff]  }
  0x5f   : > { %12769 = vmatprep.subr.bf16.mxu1 %v17566_v10  ;;  %v17588_v25 = vld [vmem:[%s20795_s21 + $0x14] ss:$8 sps:$4 sm:$0xff]   ;;  %v17592_v27 = vld [vmem:[%s20795_s21 + $0x10] ss:$8 sps:$4 sm:$0xff]   ;;  %v17594_v29 = vld [vmem:[%s20795_s21 + $0x4] ss:$8 sps:$4 sm:$0xff]  }
  0x60   : > { %v17590_v26 = vld [vmem:[%s20795_s21 + $0x114] ss:$8 sps:$4 sm:$0xff]   ;;  %v17593_v28 = vld [vmem:[%s20795_s21 + $0x110] ss:$8 sps:$4 sm:$0xff]   ;;  %v17596_v30 = vld [vmem:[%s20795_s21 + $0x104] ss:$8 sps:$4 sm:$0xff]  }
  0x61   : > { %12729 = vmatpush1.bf16.msra.mxu0 %v17568_v11  ;;  %v17598_v31 = vld [vmem:[%s20795_s21] ss:$8 sps:$4 sm:$0xff]   ;;  %v17600_v33 = vld [vmem:[%s20795_s21 + $0xf4] ss:$8 sps:$4 sm:$0xff]   ;;  %v17604_v35 = vld [vmem:[%s20795_s21 + $0xf0] ss:$8 sps:$4 sm:$0xff]  }
  0x62   : > { %12770 = vmatpush1.bf16.msra.mxu1 %v17569_v12  ;;  %12730 = vmatprep.subr.bf16.mxu0 %v17570_v13  ;;  %v17599_v32 = vld [vmem:[%s20795_s21 + $0x100] ss:$8 sps:$4 sm:$0xff]   ;;  %v17602_v34 = vld [vmem:[%s20795_s21 + $0x1f4] ss:$8 sps:$4 sm:$0xff]   ;;  %v17605_v36 = vld [vmem:[%s20795_s21 + $0x1f0] ss:$8 sps:$4 sm:$0xff]  }
  0x63   : > { %12771 = vmatprep.subr.bf16.mxu1 %v17572_v14  ;;  %v20644_v37 = vmov 1983009808   ;;  %v17606_v40 = vld [vmem:[%s20795_s21 + $0xe4] ss:$8 sps:$4 sm:$0xff]   ;;  %v17610_v42 = vld [vmem:[%s20795_s21 + $0xe0] ss:$8 sps:$4 sm:$0xff]  }
  0x64   : > { %v351_v38 = vunpack.c.l.s4 %v20644_v37  ;;  %v17608_v41 = vld [vmem:[%s20795_s21 + $0x1e4] ss:$8 sps:$4 sm:$0xff]   ;;  %v20852_v44 = vshrl.u32 %v353_v39, 7  ;;  %v17611_v45 = vld [vmem:[%s20795_s21 + $0x1e0] ss:$8 sps:$4 sm:$0xff]   ;;  %p17434_p11 = scmp.ne.s32.totalorder %s20696_s22, 1 }
  0x65   : > { %12731 = vmatpush1.bf16.msra.mxu0 %v17574_v15  ;;  %v17612_v46 = vld [vmem:[%s20795_s21 + $0xd4] ss:$8 sps:$4 sm:$0xff]   ;;  %v17616_v48 = vld [vmem:[%s20795_s21 + $0xd0] ss:$8 sps:$4 sm:$0xff]   ;;  %v17618_v51 = vld [vmem:[%s20795_s21 + $0xc4] ss:$8 sps:$4 sm:$0xff]  }
  0x66   : > { %12772 = vmatpush1.bf16.msra.mxu1 %v17575_v16  ;;  %12732 = vmatprep.subr.bf16.mxu0 %v17576_v17  ;;  %v352_v43 = vunpack.c.0.s8 %v351_v38  ;;  %v17614_v47 = vld [vmem:[%s20795_s21 + $0x1d4] ss:$8 sps:$4 sm:$0xff]   ;;  %v17617_v49 = vld [vmem:[%s20795_s21 + $0x1d0] ss:$8 sps:$4 sm:$0xff]   ;;  %v17620_v52 = vld [vmem:[%s20795_s21 + $0x1c4] ss:$8 sps:$4 sm:$0xff]  }
  0x67   : > { %12773 = vmatprep.subr.bf16.mxu1 %v17578_v18  ;;  %v287_v53 = vld [vmem:[%s20809_s7] sm:$0xff]  ;;  %v17628_v62 = vld [vmem:[%s20795_s21 + $0xb0] ss:$8 sps:$4 sm:$0xff]   ;;  %v17630_v2 = vld [vmem:[%s20795_s21 + $0xa4] ss:$8 sps:$4 sm:$0xff]  }
  0x68   : > { %v20860_v50 = vsub.s32 %v352_v43, %v20852_v44  ;;  %v17622_v54 = vld [vmem:[%s20795_s21 + $0xc0] ss:$8 sps:$4 sm:$0xff]   ;;  %v349_v56 = vcombine.high %v287_v53, %v287_v53  ;;  %v17624_v58 = vld [vmem:[%s20795_s21 + $0xb4] ss:$8 sps:$4 sm:$0xff]   ;;  %v17629_v1 = vld [vmem:[%s20795_s21 + $0x1b0] ss:$8 sps:$4 sm:$0xff]  }
  0x69   : > { %12733 = vmatpush1.bf16.msra.mxu0 %v17580_v19  ;;  %v17623_v57 = vld [vmem:[%s20795_s21 + $0x1c0] ss:$8 sps:$4 sm:$0xff]   ;;  %v17626_v59 = vld [vmem:[%s20795_s21 + $0x1b4] ss:$8 sps:$4 sm:$0xff]   ;;  %v17632_v3 = vld [vmem:[%s20795_s21 + $0x1a4] ss:$8 sps:$4 sm:$0xff]  }
  0x6a   : > { %12774 = vmatpush1.bf16.msra.mxu1 %v17581_v20  ;;  %12734 = vmatprep.subr.bf16.mxu0 %v17582_v21  ;;  %v356_v55 = vrot.slane %v287_v53, %v20860_v50  ;;  %v363_v61 = vrot.slane %v349_v56, %v20860_v50  ;;  %v17634_v5 = vld [vmem:[%s20795_s21 + $0xa0] ss:$8 sps:$4 sm:$0xff]   ;;  %v17636_v7 = vld [vmem:[%s20795_s21 + $0x94] ss:$8 sps:$4 sm:$0xff]   ;;  %v17640_v9 = vld [vmem:[%s20795_s21 + $0x90] ss:$8 sps:$4 sm:$0xff]  }
  0x6b   : > { %12775 = vmatprep.subr.bf16.mxu1 %v17584_v22  ;;  %v17635_v6 = vld [vmem:[%s20795_s21 + $0x1a0] ss:$8 sps:$4 sm:$0xff]   ;;  %v17638_v8 = vld [vmem:[%s20795_s21 + $0x194] ss:$8 sps:$4 sm:$0xff]   ;;  %v17641_v10 = vld [vmem:[%s20795_s21 + $0x190] ss:$8 sps:$4 sm:$0xff]  }
  0x6c   : > { %v364_v60 = vcombine.high %v356_v55, %v356_v55  ;;  %v365_v0 = vcombine.high %v363_v61, %v363_v61  ;;  %v17642_v11 = vld [vmem:[%s20795_s21 + $0x84] ss:$8 sps:$4 sm:$0xff]   ;;  %v17646_v13 = vld [vmem:[%s20795_s21 + $0x80] ss:$8 sps:$4 sm:$0xff]   ;;  %v17651_v15 = vld [vmem:[%s20795_s21 + $0x274] ss:$8 sps:$4 sm:$0xff]   ;;  %v987_v17 = vpack.c.bf16 %v356_v55, %v356_v55  ;;  %v989_v18 = vpack.c.bf16 %v363_v61, %v363_v61 }
  0x6d   : > { %12735 = vmatpush1.bf16.msra.mxu0 %v17586_v23  ;;  %v17644_v12 = vld [vmem:[%s20795_s21 + $0x184] ss:$8 sps:$4 sm:$0xff]   ;;  %v17647_v14 = vld [vmem:[%s20795_s21 + $0x180] ss:$8 sps:$4 sm:$0xff]   ;;  %v17654_v16 = vld [vmem:[%s20795_s21 + $0x374] ss:$8 sps:$4 sm:$0xff]  }
  0x6e   : > { %12776 = vmatpush1.bf16.msra.mxu1 %v17587_v24  ;;  %12736 = vmatprep.subr.bf16.mxu0 %v17588_v25  ;;  %v988_v63 = vpack.c.bf16 %v364_v60, %v364_v60  ;;  %v990_v4 = vpack.c.bf16 %v365_v0, %v365_v0  ;;  %v17649_v19 = vld [vmem:[%s20795_s21 + $0x270] ss:$8 sps:$4 sm:$0xff]   ;;  %v17657_v21 = vld [vmem:[%s20795_s21 + $0x264] ss:$8 sps:$4 sm:$0xff]   ;;  %v17655_v23 = vld [vmem:[%s20795_s21 + $0x260] ss:$8 sps:$4 sm:$0xff]  }
  0x6f   : > { %12777 = vmatprep.subr.bf16.mxu1 %v17590_v26  ;;  %v17652_v20 = vld [vmem:[%s20795_s21 + $0x370] ss:$8 sps:$4 sm:$0xff]   ;;  %v17660_v22 = vld [vmem:[%s20795_s21 + $0x364] ss:$8 sps:$4 sm:$0xff]   ;;  %v17658_v24 = vld [vmem:[%s20795_s21 + $0x360] ss:$8 sps:$4 sm:$0xff]  }
  0x70   : > { %12756 = vmatprep.mubr.bf16.mxu0 %v988_v63  ;;  %12797 = vmatprep.mubr.bf16.mxu1 %v990_v4  ;;  %v17663_v25 = vld [vmem:[%s20795_s21 + $0x254] ss:$8 sps:$4 sm:$0xff]   ;;  %v17681_v37 = vld [vmem:[%s20795_s21 + $0x224] ss:$8 sps:$4 sm:$0xff]   ;;  %v17679_v39 = vld [vmem:[%s20795_s21 + $0x220] ss:$8 sps:$4 sm:$0xff]  }
  0x71   : > { %12737 = vmatpush1.bf16.msra.mxu0 %v17592_v27  ;;  %v17666_v26 = vld [vmem:[%s20795_s21 + $0x354] ss:$8 sps:$4 sm:$0xff]   ;;  %v17661_v27 = vld [vmem:[%s20795_s21 + $0x250] ss:$8 sps:$4 sm:$0xff]   ;;  %v17684_v38 = vld [vmem:[%s20795_s21 + $0x324] ss:$8 sps:$4 sm:$0xff]  }
  0x72   : > { %12778 = vmatpush1.bf16.msra.mxu1 %v17593_v28  ;;  %12738 = vmatprep.subr.bf16.mxu0 %v17594_v29  ;;  %v17664_v28 = vld [vmem:[%s20795_s21 + $0x350] ss:$8 sps:$4 sm:$0xff]   ;;  %v17669_v29 = vld [vmem:[%s20795_s21 + $0x244] ss:$8 sps:$4 sm:$0xff]   ;;  %v17691_v56 = vld [vmem:[%s20795_s21 + $0x200] ss:$8 sps:$4 sm:$0xff]  }
  0x73   : > { %12779 = vmatprep.subr.bf16.mxu1 %v17596_v30  ;;  %v17672_v30 = vld [vmem:[%s20795_s21 + $0x344] ss:$8 sps:$4 sm:$0xff]   ;;  %v17702_v60 = vld [vmem:[%s20795_s21 + $0x3f4] ss:$8 sps:$4 sm:$0xff]   ;;  %v17697_v61 = vld [vmem:[%s20795_s21 + $0x2f0] ss:$8 sps:$4 sm:$0xff]  }
  0x74   : > { %v288_v43 = vld [vmem:[%s20809_s7 + $0x8] sm:$0xff]  ;;  %v17714_v4 = vld [vmem:[%s20795_s21 + $0x3d4] ss:$8 sps:$4 sm:$0xff]  }
  0x75   : > { %12739 = vmatpush1.bf16.msra.mxu0 %v17598_v31  ;;  %v17667_v31 = vld [vmem:[%s20795_s21 + $0x240] ss:$8 sps:$4 sm:$0xff]   ;;  %v17696_v53 = vld [vmem:[%s20795_s21 + $0x304] ss:$8 sps:$4 sm:$0xff]  }
  0x76   : > { %12780 = vmatpush1.bf16.msra.mxu1 %v17599_v32  ;;  %12740 = vmatprep.subr.bf16.mxu0 %v17600_v33  ;;  %v17670_v32 = vld [vmem:[%s20795_s21 + $0x340] ss:$8 sps:$4 sm:$0xff]   ;;  %v17675_v33 = vld [vmem:[%s20795_s21 + $0x234] ss:$8 sps:$4 sm:$0xff]   ;;  %v17705_v63 = vld [vmem:[%s20795_s21 + $0x2e4] ss:$8 sps:$4 sm:$0xff]  }
  0x77   : > { %12781 = vmatprep.subr.bf16.mxu1 %v17602_v34  ;;  %v17678_v34 = vld [vmem:[%s20795_s21 + $0x334] ss:$8 sps:$4 sm:$0xff]   ;;  %v17708_v0 = vld [vmem:[%s20795_s21 + $0x3e4] ss:$8 sps:$4 sm:$0xff]  }
  0x79   : > { %12741 = vmatpush2.bf16.msra.mxu0 %v17604_v35  ;;  %v17673_v35 = vld [vmem:[%s20795_s21 + $0x230] ss:$8 sps:$4 sm:$0xff]  }
  0x7a   : > { %12782 = vmatpush2.bf16.msra.mxu1 %v17605_v36  ;;  %12742 = vmatprep.subr.bf16.mxu0 %v17606_v40  ;;  %v17676_v36 = vld [vmem:[%s20795_s21 + $0x330] ss:$8 sps:$4 sm:$0xff]   ;;  %v17682_v40 = vld [vmem:[%s20795_s21 + $0x320] ss:$8 sps:$4 sm:$0xff]  }
  0x7b   : > { %12783 = vmatprep.subr.bf16.mxu1 %v17608_v41  ;;  %v17687_v41 = vld [vmem:[%s20795_s21 + $0x214] ss:$8 sps:$4 sm:$0xff]  }
  0x7d   : > { %12743 = vmatpush2.bf16.msra.mxu0 %v17610_v42  ;;  %v17690_v42 = vld [vmem:[%s20795_s21 + $0x314] ss:$8 sps:$4 sm:$0xff]  }
  0x7e   : > { %12784 = vmatpush2.bf16.msra.mxu1 %v17611_v45  ;;  %12744 = vmatprep.subr.bf16.mxu0 %v17612_v46  ;;  %v20913_v45 = vrot.slane %v288_v43, %v20860_v50  ;;  %v366_v46 = vcombine.high %v288_v43, %v288_v43  ;;  %v17763_v43 = vld [vmem:[%s20795_s21 + $0x554] ss:$8 sps:$4 sm:$0xff]  }
  0x7f   : > { %12785 = vmatprep.subr.bf16.mxu1 %v17614_v47  ;;  %v17685_v47 = vld [vmem:[%s20795_s21 + $0x210] ss:$8 sps:$4 sm:$0xff]  }
  0x81   : > { %12745 = vmatpush2.bf16.msra.mxu0 %v17616_v48  ;;  %v17688_v48 = vld [vmem:[%s20795_s21 + $0x310] ss:$8 sps:$4 sm:$0xff]  }
  0x82   : > { %12786 = vmatpush2.bf16.msra.mxu1 %v17617_v49  ;;  %12746 = vmatprep.subr.bf16.mxu0 %v17618_v51  ;;  %v381_v49 = vcombine.high %v20913_v45, %v20913_v45  ;;  %v20920_v51 = vrot.slane %v366_v46, %v20860_v50 }
  0x83   : > { %12787 = vmatprep.subr.bf16.mxu1 %v17620_v52  ;;  %v17693_v52 = vld [vmem:[%s20795_s21 + $0x204] ss:$8 sps:$4 sm:$0xff]  }
  0x84   : > { %v382_v55 = vcombine.high %v20920_v51, %v20920_v51 }
  0x85   : > { %12747 = vmatpush2.bf16.msra.mxu0 %v17622_v54  ;;  %v992_v54 = vpack.c.bf16 %v381_v49, %v381_v49  ;;  %v17761_v49 = vld [vmem:[%s20795_s21 + $0x550] ss:$8 sps:$4 sm:$0xff]  }
  0x86   : > { %12788 = vmatpush2.bf16.msra.mxu1 %v17623_v57  ;;  %12748 = vmatprep.subr.bf16.mxu0 %v17624_v58  ;;  %v17694_v57 = vld [vmem:[%s20795_s21 + $0x300] ss:$8 sps:$4 sm:$0xff]   ;;  %v994_v58 = vpack.c.bf16 %v382_v55, %v382_v55  ;;  %v17772_v55 = vld [vmem:[%s20795_s21 + $0x434] ss:$8 sps:$4 sm:$0xff]  }
  0x87   : > { %12789 = vmatprep.subr.bf16.mxu1 %v17626_v59  ;;  %v17699_v59 = vld [vmem:[%s20795_s21 + $0x2f4] ss:$8 sps:$4 sm:$0xff]  }
  0x89   : > { %12749 = vmatpush2.bf16.msra.mxu0 %v17628_v62  ;;  %v17700_v62 = vld [vmem:[%s20795_s21 + $0x3f0] ss:$8 sps:$4 sm:$0xff]  }
  0x8a   : > { %12790 = vmatpush2.bf16.msra.mxu1 %v17629_v1  ;;  %12750 = vmatprep.subr.bf16.mxu0 %v17630_v2  ;;  %v17703_v1 = vld [vmem:[%s20795_s21 + $0x2e0] ss:$8 sps:$4 sm:$0xff]  }
  0x8b   : > { %12791 = vmatprep.subr.bf16.mxu1 %v17632_v3  ;;  %v17706_v2 = vld [vmem:[%s20795_s21 + $0x3e0] ss:$8 sps:$4 sm:$0xff]   ;;  %v17711_v3 = vld [vmem:[%s20795_s21 + $0x2d4] ss:$8 sps:$4 sm:$0xff]  }
  0x8d   : > { %12751 = vmatpush2.bf16.msra.mxu0 %v17634_v5  ;;  %v17709_v5 = vld [vmem:[%s20795_s21 + $0x2d0] ss:$8 sps:$4 sm:$0xff]  }
  0x8e   : > { %12792 = vmatpush2.bf16.msra.mxu1 %v17635_v6  ;;  %12752 = vmatprep.subr.bf16.mxu0 %v17636_v7  ;;  %v17712_v6 = vld [vmem:[%s20795_s21 + $0x3d0] ss:$8 sps:$4 sm:$0xff]   ;;  %v17717_v7 = vld [vmem:[%s20795_s21 + $0x2c4] ss:$8 sps:$4 sm:$0xff]  }
  0x8f   : > { %12793 = vmatprep.subr.bf16.mxu1 %v17638_v8  ;;  %v17720_v8 = vld [vmem:[%s20795_s21 + $0x3c4] ss:$8 sps:$4 sm:$0xff]  }
  0x91   : > { %12753 = vmatpush2.bf16.msra.mxu0 %v17640_v9  ;;  %v17715_v9 = vld [vmem:[%s20795_s21 + $0x2c0] ss:$8 sps:$4 sm:$0xff]  }
  0x92   : > { %12794 = vmatpush2.bf16.msra.mxu1 %v17641_v10  ;;  %12754 = vmatprep.subr.bf16.mxu0 %v17642_v11  ;;  %v17718_v10 = vld [vmem:[%s20795_s21 + $0x3c0] ss:$8 sps:$4 sm:$0xff]   ;;  %v17723_v11 = vld [vmem:[%s20795_s21 + $0x2b4] ss:$8 sps:$4 sm:$0xff]  }
  0x93   : > { %12795 = vmatprep.subr.bf16.mxu1 %v17644_v12  ;;  %v17726_v12 = vld [vmem:[%s20795_s21 + $0x3b4] ss:$8 sps:$4 sm:$0xff]  }
  0x95   : > { %12755 = vmatpush2.bf16.msra.mxu0 %v17646_v13  ;;  %v17721_v13 = vld [vmem:[%s20795_s21 + $0x2b0] ss:$8 sps:$4 sm:$0xff]  }
  0x96   : > { %12796 = vmatpush2.bf16.msra.mxu1 %v17647_v14  ;;  %12806 = vmatprep.subr.bf16.mxu0 %v17651_v15  ;;  %v17724_v14 = vld [vmem:[%s20795_s21 + $0x3b0] ss:$8 sps:$4 sm:$0xff]   ;;  %v17729_v15 = vld [vmem:[%s20795_s21 + $0x2a4] ss:$8 sps:$4 sm:$0xff]  }
  0x97   : > { %12847 = vmatprep.subr.bf16.mxu1 %v17654_v16  ;;  %v17732_v16 = vld [vmem:[%s20795_s21 + $0x3a4] ss:$8 sps:$4 sm:$0xff]  }
  0x98   : > { %12757 = vmatmul.mubr.bf16.vlgmr.msra.gmra.mxu0 %v987_v17  ;;  %v17727_v17 = vld [vmem:[%s20795_s21 + $0x2a0] ss:$8 sps:$4 sm:$0xff]  }
  0x99   : > { %12798 = vmatmul.mubr.bf16.vlgmr.msra.gmra.mxu1 %v989_v18  ;;  %12807 = vmatpush1.bf16.msra.mxu0 %v17649_v19  ;;  %v17730_v18 = vld [vmem:[%s20795_s21 + $0x3a0] ss:$8 sps:$4 sm:$0xff]   ;;  %v17735_v19 = vld [vmem:[%s20795_s21 + $0x294] ss:$8 sps:$4 sm:$0xff]  }
  0x9a   : > { %12848 = vmatpush1.bf16.msra.mxu1 %v17652_v20  ;;  %12808 = vmatprep.subr.bf16.mxu0 %v17657_v21  ;;  %v17738_v20 = vld [vmem:[%s20795_s21 + $0x394] ss:$8 sps:$4 sm:$0xff]   ;;  %v17733_v21 = vld [vmem:[%s20795_s21 + $0x290] ss:$8 sps:$4 sm:$0xff]  }
  0x9b   : > { %12849 = vmatprep.subr.bf16.mxu1 %v17660_v22  ;;  %12838 = vmatprep.mubr.bf16.mxu0 %v992_v54  ;;  %v17736_v22 = vld [vmem:[%s20795_s21 + $0x390] ss:$8 sps:$4 sm:$0xff]   ;;  %v17767_v54 = vld [vmem:[%s20795_s21 + $0x540] ss:$8 sps:$4 sm:$0xff]  }
  0x9c   : > { %12879 = vmatprep.mubr.bf16.mxu1 %v994_v58  ;;  %v17773_v58 = vld [vmem:[%s20795_s21 + $0x530] ss:$8 sps:$4 sm:$0xff]  }
  0x9d   : > { %12809 = vmatpush1.bf16.msra.mxu0 %v17655_v23  ;;  %v17741_v23 = vld [vmem:[%s20795_s21 + $0x284] ss:$8 sps:$4 sm:$0xff]  }
  0x9e   : > { %12850 = vmatpush1.bf16.msra.mxu1 %v17658_v24  ;;  %12810 = vmatprep.subr.bf16.mxu0 %v17663_v25  ;;  %v17744_v24 = vld [vmem:[%s20795_s21 + $0x384] ss:$8 sps:$4 sm:$0xff]   ;;  %v17739_v25 = vld [vmem:[%s20795_s21 + $0x280] ss:$8 sps:$4 sm:$0xff]  }
  0x9f   : > { %12851 = vmatprep.subr.bf16.mxu1 %v17666_v26  ;;  %v17742_v26 = vld [vmem:[%s20795_s21 + $0x380] ss:$8 sps:$4 sm:$0xff]  }
  0xa1   : > { %12811 = vmatpush1.bf16.msra.mxu0 %v17661_v27  ;;  %v17747_v27 = vld [vmem:[%s20795_s21 + $0x474] ss:$8 sps:$4 sm:$0xff]  }
  0xa2   : > { %12852 = vmatpush1.bf16.msra.mxu1 %v17664_v28  ;;  %12812 = vmatprep.subr.bf16.mxu0 %v17669_v29  ;;  %v17751_v28 = vld [vmem:[%s20795_s21 + $0x574] ss:$8 sps:$4 sm:$0xff]   ;;  %v991_v29 = vpack.c.bf16 %v20913_v45, %v20913_v45 }
  0xa3   : > { %12853 = vmatprep.subr.bf16.mxu1 %v17672_v30  ;;  %v17745_v30 = vld [vmem:[%s20795_s21 + $0x470] ss:$8 sps:$4 sm:$0xff]  }
  0xa5   : > { %12813 = vmatpush1.bf16.msra.mxu0 %v17667_v31  ;;  %v993_v31 = vpack.c.bf16 %v20920_v51, %v20920_v51  ;;  %v17766_v51 = vld [vmem:[%s20795_s21 + $0x444] ss:$8 sps:$4 sm:$0xff]  }
  0xa6   : > { %12854 = vmatpush1.bf16.msra.mxu1 %v17670_v32  ;;  %12814 = vmatprep.subr.bf16.mxu0 %v17675_v33  ;;  %v17749_v32 = vld [vmem:[%s20795_s21 + $0x570] ss:$8 sps:$4 sm:$0xff]   ;;  %v17754_v33 = vld [vmem:[%s20795_s21 + $0x464] ss:$8 sps:$4 sm:$0xff]  }
  0xa7   : > { %12855 = vmatprep.subr.bf16.mxu1 %v17678_v34  ;;  %v289_v34 = vld [vmem:[%s20809_s7 + $0x10] sm:$0xff] }
  0xa9   : > { %12815 = vmatpush1.bf16.msra.mxu0 %v17673_v35  ;;  %v17757_v35 = vld [vmem:[%s20795_s21 + $0x564] ss:$8 sps:$4 sm:$0xff]  }
  0xaa   : > { %12856 = vmatpush1.bf16.msra.mxu1 %v17676_v36  ;;  %12816 = vmatprep.subr.bf16.mxu0 %v17681_v37  ;;  %v20972_v36 = vrot.slane %v289_v34, %v20860_v50  ;;  %v383_v37 = vcombine.high %v289_v34, %v289_v34 }
  0xab   : > { %12857 = vmatprep.subr.bf16.mxu1 %v17684_v38  ;;  %v17752_v38 = vld [vmem:[%s20795_s21 + $0x460] ss:$8 sps:$4 sm:$0xff]  }
  0xad   : > { %12817 = vmatpush1.bf16.msra.mxu0 %v17679_v39  ;;  %v398_v39 = vcombine.high %v20972_v36, %v20972_v36 }
  0xae   : > { %12858 = vmatpush1.bf16.msra.mxu1 %v17682_v40  ;;  %12818 = vmatprep.subr.bf16.mxu0 %v17687_v41  ;;  %v20978_v40 = vrot.slane %v383_v37, %v20860_v50  ;;  %v17755_v41 = vld [vmem:[%s20795_s21 + $0x560] ss:$8 sps:$4 sm:$0xff]   ;;  %v17833_v37 = vld [vmem:[%s20795_s21 + $0x590] ss:$8 sps:$4 sm:$0xff]  }
  0xaf   : > { %12859 = vmatprep.subr.bf16.mxu1 %v17690_v42  ;;  %v17760_v42 = vld [vmem:[%s20795_s21 + $0x454] ss:$8 sps:$4 sm:$0xff]   ;;  %v996_v45 = vpack.c.bf16 %v398_v39, %v398_v39  ;;  %v17841_v39 = vld [vmem:[%s20795_s21 + $0x584] ss:$8 sps:$4 sm:$0xff]  }
  0xb0   : > { %v399_v46 = vcombine.high %v20978_v40, %v20978_v40 }
  0xb1   : > { %12819 = vmatpush1.bf16.msra.mxu0 %v17685_v47  ;;  %v17758_v47 = vld [vmem:[%s20795_s21 + $0x450] ss:$8 sps:$4 sm:$0xff]  }
  0xb2   : > { %12860 = vmatpush1.bf16.msra.mxu1 %v17688_v48  ;;  %12820 = vmatprep.subr.bf16.mxu0 %v17693_v52  ;;  %v998_v48 = vpack.c.bf16 %v399_v46, %v399_v46  ;;  %v17769_v52 = vld [vmem:[%s20795_s21 + $0x544] ss:$8 sps:$4 sm:$0xff]   ;;  %v17844_v46 = vld [vmem:[%s20795_s21 + $0x674] ss:$8 sps:$4 sm:$0xff]  }
  0xb3   : > { %12861 = vmatprep.subr.bf16.mxu1 %v17696_v53  ;;  %v17764_v53 = vld [vmem:[%s20795_s21 + $0x440] ss:$8 sps:$4 sm:$0xff]  }
  0xb5   : > { %12821 = vmatpush1.bf16.msra.mxu0 %v17691_v56  ;;  %v17775_v56 = vld [vmem:[%s20795_s21 + $0x534] ss:$8 sps:$4 sm:$0xff]  }
  0xb6   : > { %12862 = vmatpush1.bf16.msra.mxu1 %v17694_v57  ;;  %12822 = vmatprep.subr.bf16.mxu0 %v17699_v59  ;;  %v17770_v57 = vld [vmem:[%s20795_s21 + $0x430] ss:$8 sps:$4 sm:$0xff]   ;;  %v17778_v59 = vld [vmem:[%s20795_s21 + $0x424] ss:$8 sps:$4 sm:$0xff]  }
  0xb7   : > { %12863 = vmatprep.subr.bf16.mxu1 %v17702_v60  ;;  %v17781_v60 = vld [vmem:[%s20795_s21 + $0x524] ss:$8 sps:$4 sm:$0xff]  }
  0xb9   : > { %12823 = vmatpush2.bf16.msra.mxu0 %v17697_v61  ;;  %v17776_v61 = vld [vmem:[%s20795_s21 + $0x420] ss:$8 sps:$4 sm:$0xff]  }
  0xba   : > { %12864 = vmatpush2.bf16.msra.mxu1 %v17700_v62  ;;  %12824 = vmatprep.subr.bf16.mxu0 %v17705_v63  ;;  %v17779_v62 = vld [vmem:[%s20795_s21 + $0x520] ss:$8 sps:$4 sm:$0xff]   ;;  %v17784_v63 = vld [vmem:[%s20795_s21 + $0x414] ss:$8 sps:$4 sm:$0xff]  }
  0xbb   : > { %12865 = vmatprep.subr.bf16.mxu1 %v17708_v0  ;;  %v17787_v0 = vld [vmem:[%s20795_s21 + $0x514] ss:$8 sps:$4 sm:$0xff]  }
  0xbd   : > { %12825 = vmatpush2.bf16.msra.mxu0 %v17703_v1  ;;  %v17782_v1 = vld [vmem:[%s20795_s21 + $0x410] ss:$8 sps:$4 sm:$0xff]  }
  0xbe   : > { %12866 = vmatpush2.bf16.msra.mxu1 %v17706_v2  ;;  %12826 = vmatprep.subr.bf16.mxu0 %v17711_v3  ;;  %v17785_v2 = vld [vmem:[%s20795_s21 + $0x510] ss:$8 sps:$4 sm:$0xff]   ;;  %v17790_v3 = vld [vmem:[%s20795_s21 + $0x404] ss:$8 sps:$4 sm:$0xff]  }
  0xbf   : > { %12867 = vmatprep.subr.bf16.mxu1 %v17714_v4  ;;  %v17793_v4 = vld [vmem:[%s20795_s21 + $0x504] ss:$8 sps:$4 sm:$0xff]  }
  0xc1   : > { %12827 = vmatpush2.bf16.msra.mxu0 %v17709_v5  ;;  %v17788_v5 = vld [vmem:[%s20795_s21 + $0x400] ss:$8 sps:$4 sm:$0xff]  }
  0xc2   : > { %12868 = vmatpush2.bf16.msra.mxu1 %v17712_v6  ;;  %12828 = vmatprep.subr.bf16.mxu0 %v17717_v7  ;;  %v17791_v6 = vld [vmem:[%s20795_s21 + $0x500] ss:$8 sps:$4 sm:$0xff]   ;;  %v17796_v7 = vld [vmem:[%s20795_s21 + $0x4f4] ss:$8 sps:$4 sm:$0xff]  }
  0xc3   : > { %12869 = vmatprep.subr.bf16.mxu1 %v17720_v8  ;;  %v17799_v8 = vld [vmem:[%s20795_s21 + $0x5f4] ss:$8 sps:$4 sm:$0xff]  }
  0xc5   : > { %12829 = vmatpush2.bf16.msra.mxu0 %v17715_v9  ;;  %v17794_v9 = vld [vmem:[%s20795_s21 + $0x4f0] ss:$8 sps:$4 sm:$0xff]  }
  0xc6   : > { %12870 = vmatpush2.bf16.msra.mxu1 %v17718_v10  ;;  %12830 = vmatprep.subr.bf16.mxu0 %v17723_v11  ;;  %v17797_v10 = vld [vmem:[%s20795_s21 + $0x5f0] ss:$8 sps:$4 sm:$0xff]   ;;  %v17802_v11 = vld [vmem:[%s20795_s21 + $0x4e4] ss:$8 sps:$4 sm:$0xff]  }
  0xc7   : > { %12871 = vmatprep.subr.bf16.mxu1 %v17726_v12  ;;  %v17805_v12 = vld [vmem:[%s20795_s21 + $0x5e4] ss:$8 sps:$4 sm:$0xff]  }
  0xc9   : > { %12831 = vmatpush2.bf16.msra.mxu0 %v17721_v13  ;;  %v17800_v13 = vld [vmem:[%s20795_s21 + $0x4e0] ss:$8 sps:$4 sm:$0xff]  }
  0xca   : > { %12872 = vmatpush2.bf16.msra.mxu1 %v17724_v14  ;;  %12832 = vmatprep.subr.bf16.mxu0 %v17729_v15  ;;  %v17803_v14 = vld [vmem:[%s20795_s21 + $0x5e0] ss:$8 sps:$4 sm:$0xff]   ;;  %v17808_v15 = vld [vmem:[%s20795_s21 + $0x4d4] ss:$8 sps:$4 sm:$0xff]  }
  0xcb   : > { %12873 = vmatprep.subr.bf16.mxu1 %v17732_v16  ;;  %v17811_v16 = vld [vmem:[%s20795_s21 + $0x5d4] ss:$8 sps:$4 sm:$0xff]  }
  0xcd   : > { %12833 = vmatpush2.bf16.msra.mxu0 %v17727_v17  ;;  %v17806_v17 = vld [vmem:[%s20795_s21 + $0x4d0] ss:$8 sps:$4 sm:$0xff]  }
  0xce   : > { %12874 = vmatpush2.bf16.msra.mxu1 %v17730_v18  ;;  %12834 = vmatprep.subr.bf16.mxu0 %v17735_v19  ;;  %v17809_v18 = vld [vmem:[%s20795_s21 + $0x5d0] ss:$8 sps:$4 sm:$0xff]   ;;  %v17814_v19 = vld [vmem:[%s20795_s21 + $0x4c4] ss:$8 sps:$4 sm:$0xff]  }
  0xcf   : > { %12875 = vmatprep.subr.bf16.mxu1 %v17738_v20  ;;  %v17817_v20 = vld [vmem:[%s20795_s21 + $0x5c4] ss:$8 sps:$4 sm:$0xff]  }
  0xd1   : > { %12835 = vmatpush2.bf16.msra.mxu0 %v17733_v21  ;;  %v17812_v21 = vld [vmem:[%s20795_s21 + $0x4c0] ss:$8 sps:$4 sm:$0xff]  }
  0xd2   : > { %12876 = vmatpush2.bf16.msra.mxu1 %v17736_v22  ;;  %12836 = vmatprep.subr.bf16.mxu0 %v17741_v23  ;;  %v17815_v22 = vld [vmem:[%s20795_s21 + $0x5c0] ss:$8 sps:$4 sm:$0xff]   ;;  %v17820_v23 = vld [vmem:[%s20795_s21 + $0x4b4] ss:$8 sps:$4 sm:$0xff]  }
  0xd3   : > { %12877 = vmatprep.subr.bf16.mxu1 %v17744_v24  ;;  %v17823_v24 = vld [vmem:[%s20795_s21 + $0x5b4] ss:$8 sps:$4 sm:$0xff]  }
  0xd5   : > { %12837 = vmatpush2.bf16.msra.mxu0 %v17739_v25  ;;  %v17818_v25 = vld [vmem:[%s20795_s21 + $0x4b0] ss:$8 sps:$4 sm:$0xff]  }
  0xd6   : > { %12878 = vmatpush2.bf16.msra.mxu1 %v17742_v26  ;;  %12888 = vmatprep.subr.bf16.mxu0 %v17747_v27  ;;  %v17821_v26 = vld [vmem:[%s20795_s21 + $0x5b0] ss:$8 sps:$4 sm:$0xff]   ;;  %v17826_v27 = vld [vmem:[%s20795_s21 + $0x4a4] ss:$8 sps:$4 sm:$0xff]  }
  0xd7   : > { %12929 = vmatprep.subr.bf16.mxu1 %v17751_v28  ;;  %v17829_v28 = vld [vmem:[%s20795_s21 + $0x5a4] ss:$8 sps:$4 sm:$0xff]  }
  0xd8   : > { %12839 = vmatmul.mubr.bf16.vlgmr.msra.gmra.mxu0 %v991_v29  ;;  %v17824_v29 = vld [vmem:[%s20795_s21 + $0x4a0] ss:$8 sps:$4 sm:$0xff]  }
  0xd9   : > { %12880 = vmatmul.mubr.bf16.vlgmr.msra.gmra.mxu1 %v993_v31  ;;  %12889 = vmatpush1.bf16.msra.mxu0 %v17745_v30  ;;  %v17827_v30 = vld [vmem:[%s20795_s21 + $0x5a0] ss:$8 sps:$4 sm:$0xff]   ;;  %v290_v31 = vld [vmem:[%s20809_s7 + $0x18] sm:$0xff] }
  0xda   : > { %12930 = vmatpush1.bf16.msra.mxu1 %v17749_v32  ;;  %12890 = vmatprep.subr.bf16.mxu0 %v17754_v33  ;;  %v17832_v32 = vld [vmem:[%s20795_s21 + $0x494] ss:$8 sps:$4 sm:$0xff]   ;;  %v400_v34 = vcombine.high %v290_v31, %v290_v31 }
  0xdb   : > { %12931 = vmatprep.subr.bf16.mxu1 %v17757_v35  ;;  %12920 = vmatprep.mubr.bf16.mxu0 %v996_v45  ;;  %v17835_v33 = vld [vmem:[%s20795_s21 + $0x594] ss:$8 sps:$4 sm:$0xff]   ;;  %v17830_v35 = vld [vmem:[%s20795_s21 + $0x490] ss:$8 sps:$4 sm:$0xff]   ;;  %v17839_v45 = vld [vmem:[%s20795_s21 + $0x580] ss:$8 sps:$4 sm:$0xff]  }
  0xdc   : > { %12961 = vmatprep.mubr.bf16.mxu1 %v998_v48 }
  0xdd   : > { %12891 = vmatpush1.bf16.msra.mxu0 %v17752_v38  ;;  %v17838_v38 = vld [vmem:[%s20795_s21 + $0x484] ss:$8 sps:$4 sm:$0xff]  }
  0xde   : > { %12932 = vmatpush1.bf16.msra.mxu1 %v17755_v41  ;;  %12892 = vmatprep.subr.bf16.mxu0 %v17760_v42  ;;  %v21039_v41 = vrot.slane %v290_v31, %v20860_v50  ;;  %v21042_v42 = vrot.slane %v400_v34, %v20860_v50  ;;  %v17911_v31 = vld [vmem:[%s20795_s21 + $0x6c4] ss:$8 sps:$4 sm:$0xff]   ;;  %v17912_v34 = vld [vmem:[%s20795_s21 + $0x7c0] ss:$8 sps:$4 sm:$0xff]  }
  0xdf   : > { %12933 = vmatprep.subr.bf16.mxu1 %v17763_v43  ;;  %v17836_v43 = vld [vmem:[%s20795_s21 + $0x480] ss:$8 sps:$4 sm:$0xff]  }
  0xe0   : > { %v415_v48 = vcombine.high %v21039_v41, %v21039_v41 }
  0xe1   : > { %12893 = vmatpush1.bf16.msra.mxu0 %v17758_v47  ;;  %v17848_v47 = vld [vmem:[%s20795_s21 + $0x774] ss:$8 sps:$4 sm:$0xff]  }
  0xe2   : > { %12934 = vmatpush1.bf16.msra.mxu1 %v17761_v49  ;;  %12894 = vmatprep.subr.bf16.mxu0 %v17766_v51  ;;  %v416_v49 = vcombine.high %v21042_v42, %v21042_v42  ;;  %v995_v51 = vpack.c.bf16 %v20972_v36, %v20972_v36  ;;  %v17849_v36 = vld [vmem:[%s20795_s21 + $0x660] ss:$8 sps:$4 sm:$0xff]  }
  0xe3   : > { %12935 = vmatprep.subr.bf16.mxu1 %v17769_v52  ;;  %v17842_v52 = vld [vmem:[%s20795_s21 + $0x670] ss:$8 sps:$4 sm:$0xff]  }
  0xe5   : > { %12895 = vmatpush1.bf16.msra.mxu0 %v17764_v53  ;;  %v997_v53 = vpack.c.bf16 %v20978_v40, %v20978_v40  ;;  %v17857_v40 = vld [vmem:[%s20795_s21 + $0x654] ss:$8 sps:$4 sm:$0xff]  }
  0xe6   : > { %12936 = vmatpush1.bf16.msra.mxu1 %v17767_v54  ;;  %12896 = vmatprep.subr.bf16.mxu0 %v17772_v55  ;;  %v17846_v54 = vld [vmem:[%s20795_s21 + $0x770] ss:$8 sps:$4 sm:$0xff]   ;;  %v17851_v55 = vld [vmem:[%s20795_s21 + $0x664] ss:$8 sps:$4 sm:$0xff]  }
  0xe7   : > { %12937 = vmatprep.subr.bf16.mxu1 %v17775_v56  ;;  %v17854_v56 = vld [vmem:[%s20795_s21 + $0x764] ss:$8 sps:$4 sm:$0xff]  }
  0xe9   : > { %12897 = vmatpush1.bf16.msra.mxu0 %v17770_v57  ;;  %v1000_v57 = vpack.c.bf16 %v415_v48, %v415_v48  ;;  %v17924_v48 = vld [vmem:[%s20795_s21 + $0x7a0] ss:$8 sps:$4 sm:$0xff]  }
  0xea   : > { %12938 = vmatpush1.bf16.msra.mxu1 %v17773_v58  ;;  %12898 = vmatprep.subr.bf16.mxu0 %v17778_v59  ;;  %v1002_v58 = vpack.c.bf16 %v416_v49, %v416_v49  ;;  %v17852_v59 = vld [vmem:[%s20795_s21 + $0x760] ss:$8 sps:$4 sm:$0xff]   ;;  %v17929_v49 = vld [vmem:[%s20795_s21 + $0x694] ss:$8 sps:$4 sm:$0xff]  }
  0xeb   : > { %12939 = vmatprep.subr.bf16.mxu1 %v17781_v60  ;;  %v17860_v60 = vld [vmem:[%s20795_s21 + $0x754] ss:$8 sps:$4 sm:$0xff]  }
  0xed   : > { %12899 = vmatpush1.bf16.msra.mxu0 %v17776_v61  ;;  %v17855_v61 = vld [vmem:[%s20795_s21 + $0x650] ss:$8 sps:$4 sm:$0xff]  }
  0xee   : > { %12940 = vmatpush1.bf16.msra.mxu1 %v17779_v62  ;;  %12900 = vmatprep.subr.bf16.mxu0 %v17784_v63  ;;  %v17858_v62 = vld [vmem:[%s20795_s21 + $0x750] ss:$8 sps:$4 sm:$0xff]   ;;  %v17863_v63 = vld [vmem:[%s20795_s21 + $0x644] ss:$8 sps:$4 sm:$0xff]  }
  0xef   : > { %12941 = vmatprep.subr.bf16.mxu1 %v17787_v0  ;;  %v17866_v0 = vld [vmem:[%s20795_s21 + $0x744] ss:$8 sps:$4 sm:$0xff]  }
  0xf1   : > { %12901 = vmatpush1.bf16.msra.mxu0 %v17782_v1  ;;  %v17861_v1 = vld [vmem:[%s20795_s21 + $0x640] ss:$8 sps:$4 sm:$0xff]  }
  0xf2   : > { %12942 = vmatpush1.bf16.msra.mxu1 %v17785_v2  ;;  %12902 = vmatprep.subr.bf16.mxu0 %v17790_v3  ;;  %v17864_v2 = vld [vmem:[%s20795_s21 + $0x740] ss:$8 sps:$4 sm:$0xff]   ;;  %v17869_v3 = vld [vmem:[%s20795_s21 + $0x634] ss:$8 sps:$4 sm:$0xff]  }
  0xf3   : > { %12943 = vmatprep.subr.bf16.mxu1 %v17793_v4  ;;  %v17872_v4 = vld [vmem:[%s20795_s21 + $0x734] ss:$8 sps:$4 sm:$0xff]  }
  0xf5   : > { %12903 = vmatpush1.bf16.msra.mxu0 %v17788_v5  ;;  %v17867_v5 = vld [vmem:[%s20795_s21 + $0x630] ss:$8 sps:$4 sm:$0xff]  }
  0xf6   : > { %12944 = vmatpush1.bf16.msra.mxu1 %v17791_v6  ;;  %12904 = vmatprep.subr.bf16.mxu0 %v17796_v7  ;;  %v17870_v6 = vld [vmem:[%s20795_s21 + $0x730] ss:$8 sps:$4 sm:$0xff]   ;;  %v17875_v7 = vld [vmem:[%s20795_s21 + $0x624] ss:$8 sps:$4 sm:$0xff]  }
  0xf7   : > { %12945 = vmatprep.subr.bf16.mxu1 %v17799_v8  ;;  %v17878_v8 = vld [vmem:[%s20795_s21 + $0x724] ss:$8 sps:$4 sm:$0xff]  }
  0xf9   : > { %12905 = vmatpush2.bf16.msra.mxu0 %v17794_v9  ;;  %v17873_v9 = vld [vmem:[%s20795_s21 + $0x620] ss:$8 sps:$4 sm:$0xff]  }
  0xfa   : > { %12946 = vmatpush2.bf16.msra.mxu1 %v17797_v10  ;;  %12906 = vmatprep.subr.bf16.mxu0 %v17802_v11  ;;  %v17876_v10 = vld [vmem:[%s20795_s21 + $0x720] ss:$8 sps:$4 sm:$0xff]   ;;  %v17881_v11 = vld [vmem:[%s20795_s21 + $0x614] ss:$8 sps:$4 sm:$0xff]  }
  0xfb   : > { %12947 = vmatprep.subr.bf16.mxu1 %v17805_v12  ;;  %v17884_v12 = vld [vmem:[%s20795_s21 + $0x714] ss:$8 sps:$4 sm:$0xff]  }
  0xfd   : > { %12907 = vmatpush2.bf16.msra.mxu0 %v17800_v13  ;;  %v17879_v13 = vld [vmem:[%s20795_s21 + $0x610] ss:$8 sps:$4 sm:$0xff]  }
  0xfe   : > { %12948 = vmatpush2.bf16.msra.mxu1 %v17803_v14  ;;  %12908 = vmatprep.subr.bf16.mxu0 %v17808_v15  ;;  %v17882_v14 = vld [vmem:[%s20795_s21 + $0x710] ss:$8 sps:$4 sm:$0xff]   ;;  %v17887_v15 = vld [vmem:[%s20795_s21 + $0x604] ss:$8 sps:$4 sm:$0xff]  }
  0xff   : > { %12949 = vmatprep.subr.bf16.mxu1 %v17811_v16  ;;  %v17890_v16 = vld [vmem:[%s20795_s21 + $0x704] ss:$8 sps:$4 sm:$0xff]  }
 0x101   : > { %12909 = vmatpush2.bf16.msra.mxu0 %v17806_v17  ;;  %v17885_v17 = vld [vmem:[%s20795_s21 + $0x600] ss:$8 sps:$4 sm:$0xff]  }
 0x102   : > { %12950 = vmatpush2.bf16.msra.mxu1 %v17809_v18  ;;  %12910 = vmatprep.subr.bf16.mxu0 %v17814_v19  ;;  %v17888_v18 = vld [vmem:[%s20795_s21 + $0x700] ss:$8 sps:$4 sm:$0xff]   ;;  %v17893_v19 = vld [vmem:[%s20795_s21 + $0x6f4] ss:$8 sps:$4 sm:$0xff]  }
 0x103   : > { %12951 = vmatprep.subr.bf16.mxu1 %v17817_v20  ;;  %v17896_v20 = vld [vmem:[%s20795_s21 + $0x7f4] ss:$8 sps:$4 sm:$0xff]  }
 0x105   : > { %12911 = vmatpush2.bf16.msra.mxu0 %v17812_v21  ;;  %v17891_v21 = vld [vmem:[%s20795_s21 + $0x6f0] ss:$8 sps:$4 sm:$0xff]  }
 0x106   : > { %12952 = vmatpush2.bf16.msra.mxu1 %v17815_v22  ;;  %12912 = vmatprep.subr.bf16.mxu0 %v17820_v23  ;;  %v17894_v22 = vld [vmem:[%s20795_s21 + $0x7f0] ss:$8 sps:$4 sm:$0xff]   ;;  %v17899_v23 = vld [vmem:[%s20795_s21 + $0x6e4] ss:$8 sps:$4 sm:$0xff]  }
 0x107   : > { %12953 = vmatprep.subr.bf16.mxu1 %v17823_v24  ;;  %v17902_v24 = vld [vmem:[%s20795_s21 + $0x7e4] ss:$8 sps:$4 sm:$0xff]  }
 0x109   : > { %12913 = vmatpush2.bf16.msra.mxu0 %v17818_v25  ;;  %v17897_v25 = vld [vmem:[%s20795_s21 + $0x6e0] ss:$8 sps:$4 sm:$0xff]  }
 0x10a   : > { %12954 = vmatpush2.bf16.msra.mxu1 %v17821_v26  ;;  %12914 = vmatprep.subr.bf16.mxu0 %v17826_v27  ;;  %v17900_v26 = vld [vmem:[%s20795_s21 + $0x7e0] ss:$8 sps:$4 sm:$0xff]   ;;  %v17905_v27 = vld [vmem:[%s20795_s21 + $0x6d4] ss:$8 sps:$4 sm:$0xff]  }
 0x10b   : > { %12955 = vmatprep.subr.bf16.mxu1 %v17829_v28  ;;  %v17908_v28 = vld [vmem:[%s20795_s21 + $0x7d4] ss:$8 sps:$4 sm:$0xff]  }
 0x10d   : > { %12915 = vmatpush2.bf16.msra.mxu0 %v17824_v29  ;;  %v17903_v29 = vld [vmem:[%s20795_s21 + $0x6d0] ss:$8 sps:$4 sm:$0xff]  }
 0x10e   : > { %12956 = vmatpush2.bf16.msra.mxu1 %v17827_v30  ;;  %12916 = vmatprep.subr.bf16.mxu0 %v17832_v32  ;;  %v17906_v30 = vld [vmem:[%s20795_s21 + $0x7d0] ss:$8 sps:$4 sm:$0xff]   ;;  %v17914_v32 = vld [vmem:[%s20795_s21 + $0x7c4] ss:$8 sps:$4 sm:$0xff]  }
 0x10f   : > { %12957 = vmatprep.subr.bf16.mxu1 %v17835_v33  ;;  %v17909_v33 = vld [vmem:[%s20795_s21 + $0x6c0] ss:$8 sps:$4 sm:$0xff]  }
 0x111   : > { %12917 = vmatpush2.bf16.msra.mxu0 %v17830_v35  ;;  %v17917_v35 = vld [vmem:[%s20795_s21 + $0x6b4] ss:$8 sps:$4 sm:$0xff]  }
 0x112   : > { %12958 = vmatpush2.bf16.msra.mxu1 %v17833_v37  ;;  %12918 = vmatprep.subr.bf16.mxu0 %v17838_v38  ;;  %v17920_v37 = vld [vmem:[%s20795_s21 + $0x7b4] ss:$8 sps:$4 sm:$0xff]   ;;  %v17915_v38 = vld [vmem:[%s20795_s21 + $0x6b0] ss:$8 sps:$4 sm:$0xff]  }
 0x113   : > { %12959 = vmatprep.subr.bf16.mxu1 %v17841_v39  ;;  %v17918_v39 = vld [vmem:[%s20795_s21 + $0x7b0] ss:$8 sps:$4 sm:$0xff]  }
 0x115   : > { %12919 = vmatpush2.bf16.msra.mxu0 %v17836_v43  ;;  %v17923_v43 = vld [vmem:[%s20795_s21 + $0x6a4] ss:$8 sps:$4 sm:$0xff]  }
 0x116   : > { %12960 = vmatpush2.bf16.msra.mxu1 %v17839_v45  ;;  %12970 = vmatprep.subr.bf16.mxu0 %v17844_v46  ;;  %v17926_v45 = vld [vmem:[%s20795_s21 + $0x7a4] ss:$8 sps:$4 sm:$0xff]   ;;  %v17921_v46 = vld [vmem:[%s20795_s21 + $0x6a0] ss:$8 sps:$4 sm:$0xff]  }
 0x117   : > { %13011 = vmatprep.subr.bf16.mxu1 %v17848_v47  ;;  %v291_v47 = vld [vmem:[%s20809_s7 + $0x20] sm:$0xff] }
 0x118   : > { %12921 = vmatmul.mubr.bf16.vlgmr.msra.gmra.mxu0 %v995_v51  ;;  %v17932_v51 = vld [vmem:[%s20795_s21 + $0x794] ss:$8 sps:$4 sm:$0xff]  }
 0x119   : > { %12962 = vmatmul.mubr.bf16.vlgmr.msra.gmra.mxu1 %v997_v53  ;;  %12971 = vmatpush1.bf16.msra.mxu0 %v17842_v52  ;;  %v417_v52 = vcombine.high %v291_v47, %v291_v47  ;;  %v17927_v53 = vld [vmem:[%s20795_s21 + $0x690] ss:$8 sps:$4 sm:$0xff]  }
 0x11a   : > { %13012 = vmatpush1.bf16.msra.mxu1 %v17846_v54  ;;  %12972 = vmatprep.subr.bf16.mxu0 %v17851_v55  ;;  %v17930_v54 = vld [vmem:[%s20795_s21 + $0x790] ss:$8 sps:$4 sm:$0xff]   ;;  %v17935_v55 = vld [vmem:[%s20795_s21 + $0x684] ss:$8 sps:$4 sm:$0xff]  }
 0x11b   : > { %13013 = vmatprep.subr.bf16.mxu1 %v17854_v56  ;;  %13002 = vmatprep.mubr.bf16.mxu0 %v1000_v57  ;;  %v17938_v56 = vld [vmem:[%s20795_s21 + $0x784] ss:$8 sps:$4 sm:$0xff]   ;;  %v21118_v57 = vrot.slane %v291_v47, %v20860_v50  ;;  %v17993_v47 = vld [vmem:[%s20795_s21 + $0x9f4] ss:$8 sps:$4 sm:$0xff]  }
 0x11c   : > { %13043 = vmatprep.mubr.bf16.mxu1 %v1002_v58  ;;  %v21121_v58 = vrot.slane %v417_v52, %v20860_v50  ;;  %v17999_v52 = vld [vmem:[%s20795_s21 + $0x9e4] ss:$8 sps:$4 sm:$0xff]  }
 0x11d   : > { %12973 = vmatpush1.bf16.msra.mxu0 %v17849_v36  ;;  %v17933_v36 = vld [vmem:[%s20795_s21 + $0x680] ss:$8 sps:$4 sm:$0xff]  }
 0x11e   : > { %13014 = vmatpush1.bf16.msra.mxu1 %v17852_v59  ;;  %12974 = vmatprep.subr.bf16.mxu0 %v17857_v40  ;;  %v17936_v59 = vld [vmem:[%s20795_s21 + $0x780] ss:$8 sps:$4 sm:$0xff]   ;;  %v17941_v40 = vld [vmem:[%s20795_s21 + $0x874] ss:$8 sps:$4 sm:$0xff]  }
 0x11f   : > { %13015 = vmatprep.subr.bf16.mxu1 %v17860_v60  ;;  %v17945_v60 = vld [vmem:[%s20795_s21 + $0x974] ss:$8 sps:$4 sm:$0xff]  }
 0x121   : > { %12975 = vmatpush1.bf16.msra.mxu0 %v17855_v61  ;;  %v432_v61 = vcombine.high %v21118_v57, %v21118_v57 }
 0x122   : > { %13016 = vmatpush1.bf16.msra.mxu1 %v17858_v62  ;;  %12976 = vmatprep.subr.bf16.mxu0 %v17863_v63  ;;  %v433_v62 = vcombine.high %v21121_v58, %v21121_v58  ;;  %v999_v63 = vpack.c.bf16 %v21039_v41, %v21039_v41  ;;  %v17946_v41 = vld [vmem:[%s20795_s21 + $0x860] ss:$8 sps:$4 sm:$0xff]  }
 0x123   : > { %13017 = vmatprep.subr.bf16.mxu1 %v17866_v0  ;;  %v17939_v0 = vld [vmem:[%s20795_s21 + $0x870] ss:$8 sps:$4 sm:$0xff]  }
 0x125   : > { %12977 = vmatpush1.bf16.msra.mxu0 %v17861_v1  ;;  %v1001_v1 = vpack.c.bf16 %v21042_v42, %v21042_v42  ;;  %v17949_v42 = vld [vmem:[%s20795_s21 + $0x960] ss:$8 sps:$4 sm:$0xff]  }
 0x126   : > { %13018 = vmatpush1.bf16.msra.mxu1 %v17864_v2  ;;  %12978 = vmatprep.subr.bf16.mxu0 %v17869_v3  ;;  %v17943_v2 = vld [vmem:[%s20795_s21 + $0x970] ss:$8 sps:$4 sm:$0xff]   ;;  %v17948_v3 = vld [vmem:[%s20795_s21 + $0x864] ss:$8 sps:$4 sm:$0xff]  }
 0x127   : > { %13019 = vmatprep.subr.bf16.mxu1 %v17872_v4  ;;  %v17951_v4 = vld [vmem:[%s20795_s21 + $0x964] ss:$8 sps:$4 sm:$0xff]  }
 0x129   : > { %12979 = vmatpush1.bf16.msra.mxu0 %v17867_v5  ;;  %v1004_v5 = vpack.c.bf16 %v432_v61, %v432_v61  ;;  %v18006_v61 = vld [vmem:[%s20795_s21 + $0x8c0] ss:$8 sps:$4 sm:$0xff]  }
 0x12a   : > { %13020 = vmatpush1.bf16.msra.mxu1 %v17870_v6  ;;  %12980 = vmatprep.subr.bf16.mxu0 %v17875_v7  ;;  %v1006_v6 = vpack.c.bf16 %v433_v62, %v433_v62  ;;  %v18009_v62 = vld [vmem:[%s20795_s21 + $0x9c0] ss:$8 sps:$4 sm:$0xff]  }
 0x12b   : > { %13021 = vmatprep.subr.bf16.mxu1 %v17878_v8 }
 0x12d   : > { %12981 = vmatpush1.bf16.msra.mxu0 %v17873_v9 }
 0x12e   : > { %13022 = vmatpush1.bf16.msra.mxu1 %v17876_v10  ;;  %12982 = vmatprep.subr.bf16.mxu0 %v17881_v11  ;;  %v17954_v10 = vld [vmem:[%s20795_s21 + $0x854] ss:$8 sps:$4 sm:$0xff]  }
 0x12f   : > { %13023 = vmatprep.subr.bf16.mxu1 %v17884_v12 }
 0x131   : > { %12983 = vmatpush1.bf16.msra.mxu0 %v17879_v13  ;;  %v17957_v13 = vld [vmem:[%s20795_s21 + $0x954] ss:$8 sps:$4 sm:$0xff]  }
 0x132   : > { %13024 = vmatpush1.bf16.msra.mxu1 %v17882_v14  ;;  %12984 = vmatprep.subr.bf16.mxu0 %v17887_v15 }
 0x133   : > { %13025 = vmatprep.subr.bf16.mxu1 %v17890_v16  ;;  %v17952_v16 = vld [vmem:[%s20795_s21 + $0x850] ss:$8 sps:$4 sm:$0xff]  }
 0x135   : > { %12985 = vmatpush1.bf16.msra.mxu0 %v17885_v17 }
 0x136   : > { %13026 = vmatpush1.bf16.msra.mxu1 %v17888_v18  ;;  %12986 = vmatprep.subr.bf16.mxu0 %v17893_v19  ;;  %v17955_v18 = vld [vmem:[%s20795_s21 + $0x950] ss:$8 sps:$4 sm:$0xff]  }
 0x137   : > { %13027 = vmatprep.subr.bf16.mxu1 %v17896_v20  ;;  %v17960_v20 = vld [vmem:[%s20795_s21 + $0x844] ss:$8 sps:$4 sm:$0xff]  }
 0x139   : > { %12987 = vmatpush2.bf16.msra.mxu0 %v17891_v21  ;;  %v17963_v21 = vld [vmem:[%s20795_s21 + $0x944] ss:$8 sps:$4 sm:$0xff]  }
 0x13a   : > { %13028 = vmatpush2.bf16.msra.mxu1 %v17894_v22  ;;  %12988 = vmatprep.subr.bf16.mxu0 %v17899_v23  ;;  %v17958_v23 = vld [vmem:[%s20795_s21 + $0x840] ss:$8 sps:$4 sm:$0xff]  }
 0x13b   : > { %13029 = vmatprep.subr.bf16.mxu1 %v17902_v24  ;;  %v17961_v24 = vld [vmem:[%s20795_s21 + $0x940] ss:$8 sps:$4 sm:$0xff]  }
 0x13d   : > { %12989 = vmatpush2.bf16.msra.mxu0 %v17897_v25  ;;  %v17966_v25 = vld [vmem:[%s20795_s21 + $0x834] ss:$8 sps:$4 sm:$0xff]  }
 0x13e   : > { %13030 = vmatpush2.bf16.msra.mxu1 %v17900_v26  ;;  %12990 = vmatprep.subr.bf16.mxu0 %v17905_v27  ;;  %v17969_v26 = vld [vmem:[%s20795_s21 + $0x934] ss:$8 sps:$4 sm:$0xff]   ;;  %v17964_v27 = vld [vmem:[%s20795_s21 + $0x830] ss:$8 sps:$4 sm:$0xff]  }
 0x13f   : > { %13031 = vmatprep.subr.bf16.mxu1 %v17908_v28  ;;  %v17967_v28 = vld [vmem:[%s20795_s21 + $0x930] ss:$8 sps:$4 sm:$0xff]  }
 0x141   : > { %12991 = vmatpush2.bf16.msra.mxu0 %v17903_v29  ;;  %v17972_v29 = vld [vmem:[%s20795_s21 + $0x824] ss:$8 sps:$4 sm:$0xff]  }
 0x142   : > { %13032 = vmatpush2.bf16.msra.mxu1 %v17906_v30  ;;  %12992 = vmatprep.subr.bf16.mxu0 %v17911_v31  ;;  %v17975_v30 = vld [vmem:[%s20795_s21 + $0x924] ss:$8 sps:$4 sm:$0xff]   ;;  %v17970_v31 = vld [vmem:[%s20795_s21 + $0x820] ss:$8 sps:$4 sm:$0xff]  }
 0x143   : > { %13033 = vmatprep.subr.bf16.mxu1 %v17914_v32  ;;  %v17973_v32 = vld [vmem:[%s20795_s21 + $0x920] ss:$8 sps:$4 sm:$0xff]  }
 0x145   : > { %12993 = vmatpush2.bf16.msra.mxu0 %v17909_v33  ;;  %v17978_v33 = vld [vmem:[%s20795_s21 + $0x814] ss:$8 sps:$4 sm:$0xff]  }
 0x146   : > { %13034 = vmatpush2.bf16.msra.mxu1 %v17912_v34  ;;  %12994 = vmatprep.subr.bf16.mxu0 %v17917_v35  ;;  %v17981_v34 = vld [vmem:[%s20795_s21 + $0x914] ss:$8 sps:$4 sm:$0xff]   ;;  %v17976_v35 = vld [vmem:[%s20795_s21 + $0x810] ss:$8 sps:$4 sm:$0xff]  }
 0x147   : > { %13035 = vmatprep.subr.bf16.mxu1 %v17920_v37  ;;  %v17979_v37 = vld [vmem:[%s20795_s21 + $0x910] ss:$8 sps:$4 sm:$0xff]  }
 0x149   : > { %12995 = vmatpush2.bf16.msra.mxu0 %v17915_v38  ;;  %v17984_v38 = vld [vmem:[%s20795_s21 + $0x804] ss:$8 sps:$4 sm:$0xff]  }
 0x14a   : > { %13036 = vmatpush2.bf16.msra.mxu1 %v17918_v39  ;;  %12996 = vmatprep.subr.bf16.mxu0 %v17923_v43  ;;  %v17987_v39 = vld [vmem:[%s20795_s21 + $0x904] ss:$8 sps:$4 sm:$0xff]   ;;  %v17982_v43 = vld [vmem:[%s20795_s21 + $0x800] ss:$8 sps:$4 sm:$0xff]  }
 0x14b   : > { %13037 = vmatprep.subr.bf16.mxu1 %v17926_v45  ;;  %v17985_v45 = vld [vmem:[%s20795_s21 + $0x900] ss:$8 sps:$4 sm:$0xff]  }
 0x14d   : > { %12997 = vmatpush2.bf16.msra.mxu0 %v17921_v46  ;;  %v17990_v46 = vld [vmem:[%s20795_s21 + $0x8f4] ss:$8 sps:$4 sm:$0xff]  }
 0x14e   : > { %13038 = vmatpush2.bf16.msra.mxu1 %v17924_v48  ;;  %12998 = vmatprep.subr.bf16.mxu0 %v17929_v49  ;;  %v17988_v48 = vld [vmem:[%s20795_s21 + $0x8f0] ss:$8 sps:$4 sm:$0xff]  }
 0x14f   : > { %13039 = vmatprep.subr.bf16.mxu1 %v17932_v51  ;;  %v17991_v49 = vld [vmem:[%s20795_s21 + $0x9f0] ss:$8 sps:$4 sm:$0xff]   ;;  %v17996_v51 = vld [vmem:[%s20795_s21 + $0x8e4] ss:$8 sps:$4 sm:$0xff]  }
 0x151   : > { %12999 = vmatpush2.bf16.msra.mxu0 %v17927_v53  ;;  %v17994_v53 = vld [vmem:[%s20795_s21 + $0x8e0] ss:$8 sps:$4 sm:$0xff]  }
 0x152   : > { %13040 = vmatpush2.bf16.msra.mxu1 %v17930_v54  ;;  %13000 = vmatprep.subr.bf16.mxu0 %v17935_v55  ;;  %v17997_v54 = vld [vmem:[%s20795_s21 + $0x9e0] ss:$8 sps:$4 sm:$0xff]   ;;  %v18002_v55 = vld [vmem:[%s20795_s21 + $0x8d4] ss:$8 sps:$4 sm:$0xff]  }
 0x153   : > { %13041 = vmatprep.subr.bf16.mxu1 %v17938_v56  ;;  %v18005_v56 = vld [vmem:[%s20795_s21 + $0x9d4] ss:$8 sps:$4 sm:$0xff]  }
 0x155   : > { %13001 = vmatpush2.bf16.msra.mxu0 %v17933_v36  ;;  %v18000_v36 = vld [vmem:[%s20795_s21 + $0x8d0] ss:$8 sps:$4 sm:$0xff]  }
 0x156   : > { %13042 = vmatpush2.bf16.msra.mxu1 %v17936_v59  ;;  %13052 = vmatprep.subr.bf16.mxu0 %v17941_v40  ;;  %v18003_v59 = vld [vmem:[%s20795_s21 + $0x9d0] ss:$8 sps:$4 sm:$0xff]   ;;  %v18008_v40 = vld [vmem:[%s20795_s21 + $0x8c4] ss:$8 sps:$4 sm:$0xff]  }
 0x157   : > { %13093 = vmatprep.subr.bf16.mxu1 %v17945_v60  ;;  %v18011_v60 = vld [vmem:[%s20795_s21 + $0x9c4] ss:$8 sps:$4 sm:$0xff]  }
 0x158   : > { %v12758_v7 = vpop.f32.mrf.mxu0  ;;  %13003 = vmatmul.mubr.bf16.vlgmr.msra.gmra.mxu0 %v999_v63  ;;  %v18014_v63 = vld [vmem:[%s20795_s21 + $0x8b4] ss:$8 sps:$4 sm:$0xff]  }
 0x159   : > { %v12799_v8 = vpop.f32.mrf.mxu1  ;;  %13044 = vmatmul.mubr.bf16.vlgmr.msra.gmra.mxu1 %v1001_v1  ;;  %13053 = vmatpush1.bf16.msra.mxu0 %v17939_v0  ;;  %v18017_v0 = vld [vmem:[%s20795_s21 + $0x9b4] ss:$8 sps:$4 sm:$0xff]   ;;  %v18012_v1 = vld [vmem:[%s20795_s21 + $0x8b0] ss:$8 sps:$4 sm:$0xff]  }
 0x15a   : > { %v21140_v9 = vadd.f32 %v12799_v8, %v12758_v7  ;;  %13094 = vmatpush1.bf16.msra.mxu1 %v17943_v2  ;;  %v12760_v11 = vpop.f32.mrf.mxu0  ;;  %13054 = vmatprep.subr.bf16.mxu0 %v17948_v3  ;;  %v18015_v2 = vld [vmem:[%s20795_s21 + $0x9b0] ss:$8 sps:$4 sm:$0xff]   ;;  %v18020_v3 = vld [vmem:[%s20795_s21 + $0x8a4] ss:$8 sps:$4 sm:$0xff]   ;;  %v18021_v7 = vld [vmem:[%s20795_s21 + $0x9a0] ss:$8 sps:$4 sm:$0xff]  }
 0x15b   : > { %v12801_v12 = vpop.f32.mrf.mxu1  ;;  %13095 = vmatprep.subr.bf16.mxu1 %v17951_v4  ;;  %13084 = vmatprep.mubr.bf16.mxu0 %v1004_v5  ;;  %v18023_v4 = vld [vmem:[%s20795_s21 + $0x9a4] ss:$8 sps:$4 sm:$0xff]   ;;  %v18018_v5 = vld [vmem:[%s20795_s21 + $0x8a0] ss:$8 sps:$4 sm:$0xff]   ;;  %v18026_v8 = vld [vmem:[%s20795_s21 + $0x894] ss:$8 sps:$4 sm:$0xff]  }
 0x15c   : > { %v21145_v14 = vadd.f32 %v12801_v12, %v12760_v11  ;;  %13125 = vmatprep.mubr.bf16.mxu1 %v1006_v6  ;;  %v12762_v15 = vpop.f32.mrf.mxu0  ;;  %v292_v6 = vld [vmem:[%s20809_s7 + $0x28] sm:$0xff]  ;;  %v18027_v11 = vld [vmem:[%s20795_s21 + $0x990] ss:$8 sps:$4 sm:$0xff]  }
 0x15d   : > { %v12803_v17 = vpop.f32.mrf.mxu1  ;;  %13055 = vmatpush1.bf16.msra.mxu0 %v17946_v41  ;;  %v18029_v41 = vld [vmem:[%s20795_s21 + $0x994] ss:$8 sps:$4 sm:$0xff]   ;;  %v18032_v12 = vld [vmem:[%s20795_s21 + $0x884] ss:$8 sps:$4 sm:$0xff]   ;;  %v21201_v15 = vrot.slane %v292_v6, %v20860_v50 }
 0x15e   : > { %13096 = vmatpush1.bf16.msra.mxu1 %v17949_v42  ;;  %v12763_v19 = vpop.f32.mrf.mxu0  ;;  %13056 = vmatprep.subr.bf16.mxu0 %v17954_v10  ;;  %v434_v42 = vcombine.high %v292_v6, %v292_v6  ;;  %v18024_v10 = vld [vmem:[%s20795_s21 + $0x890] ss:$8 sps:$4 sm:$0xff]   ;;  %v18030_v17 = vld [vmem:[%s20795_s21 + $0x880] ss:$8 sps:$4 sm:$0xff]  }
 0x15f   : > { %13097 = vmatprep.subr.bf16.mxu1 %v17957_v13  ;;  %v12804_v22 = vpop.f32.mrf.mxu1  ;;  %v18035_v13 = vld [vmem:[%s20795_s21 + $0x984] ss:$8 sps:$4 sm:$0xff]   ;;  %v18038_v19 = vld [vmem:[%s20795_s21 + $0xa74] ss:$8 sps:$4 sm:$0xff]   ;;  %v18082_v6 = vld [vmem:[%s20795_s21 + $0xb00] ss:$8 sps:$4 sm:$0xff]  }
 0x160   : > { %v449_v22 = vcombine.high %v21201_v15, %v21201_v15 }
 0x161   : > { %13057 = vmatpush1.bf16.msra.mxu0 %v17952_v16  ;;  %v21204_v16 = vrot.slane %v434_v42, %v20860_v50  ;;  %v18088_v42 = vld [vmem:[%s20795_s21 + $0xbf0] ss:$8 sps:$4 sm:$0xff]  }
 0x162   : > { %13098 = vmatpush1.bf16.msra.mxu1 %v17955_v18  ;;  %13058 = vmatprep.subr.bf16.mxu0 %v17960_v20  ;;  %v18033_v18 = vld [vmem:[%s20795_s21 + $0x980] ss:$8 sps:$4 sm:$0xff]   ;;  %v18042_v20 = vld [vmem:[%s20795_s21 + $0xb74] ss:$8 sps:$4 sm:$0xff]  }
 0x163   : > { %13099 = vmatprep.subr.bf16.mxu1 %v17963_v21  ;;  %v18036_v21 = vld [vmem:[%s20795_s21 + $0xa70] ss:$8 sps:$4 sm:$0xff]  }
 0x165   : > { %13059 = vmatpush1.bf16.msra.mxu0 %v17958_v23  ;;  %v450_v23 = vcombine.high %v21204_v16, %v21204_v16 }
 0x166   : > { %13100 = vmatpush1.bf16.msra.mxu1 %v17961_v24  ;;  %13060 = vmatprep.subr.bf16.mxu0 %v17966_v25  ;;  %v1003_v24 = vpack.c.bf16 %v21118_v57, %v21118_v57  ;;  %v1005_v25 = vpack.c.bf16 %v21121_v58, %v21121_v58  ;;  %v18046_v57 = vld [vmem:[%s20795_s21 + $0xb60] ss:$8 sps:$4 sm:$0xff]  }
 0x167   : > { %13101 = vmatprep.subr.bf16.mxu1 %v17969_v26  ;;  %v18040_v26 = vld [vmem:[%s20795_s21 + $0xb70] ss:$8 sps:$4 sm:$0xff]  }
 0x169   : > { %13061 = vmatpush1.bf16.msra.mxu0 %v17964_v27  ;;  %v18045_v27 = vld [vmem:[%s20795_s21 + $0xa64] ss:$8 sps:$4 sm:$0xff]  }
 0x16a   : > { %13102 = vmatpush1.bf16.msra.mxu1 %v17967_v28  ;;  %13062 = vmatprep.subr.bf16.mxu0 %v17972_v29  ;;  %v18048_v28 = vld [vmem:[%s20795_s21 + $0xb64] ss:$8 sps:$4 sm:$0xff]   ;;  %v18043_v29 = vld [vmem:[%s20795_s21 + $0xa60] ss:$8 sps:$4 sm:$0xff]  }
 0x16b   : > { %13103 = vmatprep.subr.bf16.mxu1 %v17975_v30  ;;  %v1008_v30 = vpack.c.bf16 %v449_v22, %v449_v22  ;;  %v18108_v22 = vld [vmem:[%s20795_s21 + $0xbc4] ss:$8 sps:$4 sm:$0xff]  }
 0x16d   : > { %13063 = vmatpush1.bf16.msra.mxu0 %v17970_v31  ;;  %v1010_v31 = vpack.c.bf16 %v450_v23, %v450_v23  ;;  %v18103_v23 = vld [vmem:[%s20795_s21 + $0xac0] ss:$8 sps:$4 sm:$0xff]  }
 0x16e   : > { %13104 = vmatpush1.bf16.msra.mxu1 %v17973_v32  ;;  %13064 = vmatprep.subr.bf16.mxu0 %v17978_v33 }
 0x16f   : > { %13105 = vmatprep.subr.bf16.mxu1 %v17981_v34  ;;  %v18051_v34 = vld [vmem:[%s20795_s21 + $0xa54] ss:$8 sps:$4 sm:$0xff]  }
 0x171   : > { %13065 = vmatpush1.bf16.msra.mxu0 %v17976_v35 }
 0x172   : > { %13106 = vmatpush1.bf16.msra.mxu1 %v17979_v37  ;;  %13066 = vmatprep.subr.bf16.mxu0 %v17984_v38  ;;  %v18054_v38 = vld [vmem:[%s20795_s21 + $0xb54] ss:$8 sps:$4 sm:$0xff]  }
 0x173   : > { %13107 = vmatprep.subr.bf16.mxu1 %v17987_v39 }
 0x175   : > { %13067 = vmatpush1.bf16.msra.mxu0 %v17982_v43 }
 0x176   : > { %13108 = vmatpush1.bf16.msra.mxu1 %v17985_v45  ;;  %13068 = vmatprep.subr.bf16.mxu0 %v17990_v46 }
 0x177   : > { %13109 = vmatprep.subr.bf16.mxu1 %v17993_v47 }
 0x179   : > { %13069 = vmatpush2.bf16.msra.mxu0 %v17988_v48  ;;  %v18052_v48 = vld [vmem:[%s20795_s21 + $0xb50] ss:$8 sps:$4 sm:$0xff]  }
 0x17a   : > { %13110 = vmatpush2.bf16.msra.mxu1 %v17991_v49  ;;  %13070 = vmatprep.subr.bf16.mxu0 %v17996_v51  ;;  %v18060_v51 = vld [vmem:[%s20795_s21 + $0xb44] ss:$8 sps:$4 sm:$0xff]  }
 0x17b   : > { %13111 = vmatprep.subr.bf16.mxu1 %v17999_v52 }
 0x17d   : > { %13071 = vmatpush2.bf16.msra.mxu0 %v17994_v53  ;;  %v18055_v53 = vld [vmem:[%s20795_s21 + $0xa40] ss:$8 sps:$4 sm:$0xff]  }
 0x17e   : > { %13112 = vmatpush2.bf16.msra.mxu1 %v17997_v54  ;;  %13072 = vmatprep.subr.bf16.mxu0 %v18002_v55  ;;  %v18058_v54 = vld [vmem:[%s20795_s21 + $0xb40] ss:$8 sps:$4 sm:$0xff]   ;;  %v18063_v55 = vld [vmem:[%s20795_s21 + $0xa34] ss:$8 sps:$4 sm:$0xff]  }
 0x17f   : > { %13113 = vmatprep.subr.bf16.mxu1 %v18005_v56  ;;  %v18066_v56 = vld [vmem:[%s20795_s21 + $0xb34] ss:$8 sps:$4 sm:$0xff]  }
 0x181   : > { %13073 = vmatpush2.bf16.msra.mxu0 %v18000_v36  ;;  %v18061_v36 = vld [vmem:[%s20795_s21 + $0xa30] ss:$8 sps:$4 sm:$0xff]  }
 0x182   : > { %13114 = vmatpush2.bf16.msra.mxu1 %v18003_v59  ;;  %13074 = vmatprep.subr.bf16.mxu0 %v18008_v40  ;;  %v18064_v59 = vld [vmem:[%s20795_s21 + $0xb30] ss:$8 sps:$4 sm:$0xff]   ;;  %v18069_v40 = vld [vmem:[%s20795_s21 + $0xa24] ss:$8 sps:$4 sm:$0xff]  }
 0x183   : > { %13115 = vmatprep.subr.bf16.mxu1 %v18011_v60  ;;  %v18072_v60 = vld [vmem:[%s20795_s21 + $0xb24] ss:$8 sps:$4 sm:$0xff]  }
 0x185   : > { %13075 = vmatpush2.bf16.msra.mxu0 %v18006_v61  ;;  %v18067_v61 = vld [vmem:[%s20795_s21 + $0xa20] ss:$8 sps:$4 sm:$0xff]  }
 0x186   : > { %13116 = vmatpush2.bf16.msra.mxu1 %v18009_v62  ;;  %13076 = vmatprep.subr.bf16.mxu0 %v18014_v63  ;;  %v18070_v62 = vld [vmem:[%s20795_s21 + $0xb20] ss:$8 sps:$4 sm:$0xff]   ;;  %v18075_v63 = vld [vmem:[%s20795_s21 + $0xa14] ss:$8 sps:$4 sm:$0xff]  }
 0x187   : > { %13117 = vmatprep.subr.bf16.mxu1 %v18017_v0  ;;  %v18078_v0 = vld [vmem:[%s20795_s21 + $0xb14] ss:$8 sps:$4 sm:$0xff]  }
 0x189   : > { %13077 = vmatpush2.bf16.msra.mxu0 %v18012_v1  ;;  %v18073_v1 = vld [vmem:[%s20795_s21 + $0xa10] ss:$8 sps:$4 sm:$0xff]  }
 0x18a   : > { %13118 = vmatpush2.bf16.msra.mxu1 %v18015_v2  ;;  %13078 = vmatprep.subr.bf16.mxu0 %v18020_v3  ;;  %v18076_v2 = vld [vmem:[%s20795_s21 + $0xb10] ss:$8 sps:$4 sm:$0xff]   ;;  %v18081_v3 = vld [vmem:[%s20795_s21 + $0xa04] ss:$8 sps:$4 sm:$0xff]  }
 0x18b   : > { %13119 = vmatprep.subr.bf16.mxu1 %v18023_v4  ;;  %v18084_v4 = vld [vmem:[%s20795_s21 + $0xb04] ss:$8 sps:$4 sm:$0xff]  }
 0x18d   : > { %13079 = vmatpush2.bf16.msra.mxu0 %v18018_v5  ;;  %v18079_v5 = vld [vmem:[%s20795_s21 + $0xa00] ss:$8 sps:$4 sm:$0xff]  }
 0x18e   : > { %13120 = vmatpush2.bf16.msra.mxu1 %v18021_v7  ;;  %13080 = vmatprep.subr.bf16.mxu0 %v18026_v8  ;;  %v18087_v7 = vld [vmem:[%s20795_s21 + $0xaf4] ss:$8 sps:$4 sm:$0xff]  }
 0x18f   : > { %13121 = vmatprep.subr.bf16.mxu1 %v18029_v41  ;;  %v18090_v8 = vld [vmem:[%s20795_s21 + $0xbf4] ss:$8 sps:$4 sm:$0xff]   ;;  %v18085_v41 = vld [vmem:[%s20795_s21 + $0xaf0] ss:$8 sps:$4 sm:$0xff]  }
 0x191   : > { %13081 = vmatpush2.bf16.msra.mxu0 %v18024_v10  ;;  %v18093_v10 = vld [vmem:[%s20795_s21 + $0xae4] ss:$8 sps:$4 sm:$0xff]  }
 0x192   : > { %13122 = vmatpush2.bf16.msra.mxu1 %v18027_v11  ;;  %13082 = vmatprep.subr.bf16.mxu0 %v18032_v12  ;;  %v18096_v11 = vld [vmem:[%s20795_s21 + $0xbe4] ss:$8 sps:$4 sm:$0xff]   ;;  %v18091_v12 = vld [vmem:[%s20795_s21 + $0xae0] ss:$8 sps:$4 sm:$0xff]  }
 0x193   : > { %13123 = vmatprep.subr.bf16.mxu1 %v18035_v13  ;;  %v18094_v13 = vld [vmem:[%s20795_s21 + $0xbe0] ss:$8 sps:$4 sm:$0xff]  }
 0x195   : > { %13083 = vmatpush2.bf16.msra.mxu0 %v18030_v17  ;;  %v18099_v17 = vld [vmem:[%s20795_s21 + $0xad4] ss:$8 sps:$4 sm:$0xff]  }
 0x196   : > { %13124 = vmatpush2.bf16.msra.mxu1 %v18033_v18  ;;  %13134 = vmatprep.subr.bf16.mxu0 %v18038_v19  ;;  %v18102_v18 = vld [vmem:[%s20795_s21 + $0xbd4] ss:$8 sps:$4 sm:$0xff]   ;;  %v18097_v19 = vld [vmem:[%s20795_s21 + $0xad0] ss:$8 sps:$4 sm:$0xff]  }
 0x197   : > { %13175 = vmatprep.subr.bf16.mxu1 %v18042_v20  ;;  %v18100_v20 = vld [vmem:[%s20795_s21 + $0xbd0] ss:$8 sps:$4 sm:$0xff]  }
 0x198   : > { %v12840_v32 = vpop.f32.mrf.mxu0  ;;  %13085 = vmatmul.mubr.bf16.vlgmr.msra.gmra.mxu0 %v1003_v24  ;;  %v18106_v24 = vld [vmem:[%s20795_s21 + $0xbc0] ss:$8 sps:$4 sm:$0xff]  }
 0x199   : > { %v12881_v33 = vpop.f32.mrf.mxu1  ;;  %13126 = vmatmul.mubr.bf16.vlgmr.msra.gmra.mxu1 %v1005_v25  ;;  %v12841_v58 = vadd.f32 %v12840_v32, %v21140_v9  ;;  %13135 = vmatpush1.bf16.msra.mxu0 %v18036_v21  ;;  %v18049_v9 = vld [vmem:[%s20795_s21 + $0xa50] ss:$8 sps:$4 sm:$0xff]   ;;  %v18105_v21 = vld [vmem:[%s20795_s21 + $0xac4] ss:$8 sps:$4 sm:$0xff]   ;;  %v18111_v25 = vld [vmem:[%s20795_s21 + $0xab4] ss:$8 sps:$4 sm:$0xff]  }
 0x19a   : > { %13176 = vmatpush1.bf16.msra.mxu1 %v18040_v26  ;;  %v12842_v35 = vpop.f32.mrf.mxu0  ;;  %13136 = vmatprep.subr.bf16.mxu0 %v18045_v27  ;;  %v18114_v26 = vld [vmem:[%s20795_s21 + $0xbb4] ss:$8 sps:$4 sm:$0xff]   ;;  %v18109_v27 = vld [vmem:[%s20795_s21 + $0xab0] ss:$8 sps:$4 sm:$0xff]  }
 0x19b   : > { %v12883_v37 = vpop.f32.mrf.mxu1  ;;  %13177 = vmatprep.subr.bf16.mxu1 %v18048_v28  ;;  %v12843_v39 = vadd.f32 %v12842_v35, %v21145_v14  ;;  %v21228_v43 = vadd.f32 %v12881_v33, %v12841_v58  ;;  %13166 = vmatprep.mubr.bf16.mxu0 %v1008_v30  ;;  %v18057_v14 = vld [vmem:[%s20795_s21 + $0xa44] ss:$8 sps:$4 sm:$0xff]   ;;  %v18112_v28 = vld [vmem:[%s20795_s21 + $0xbb0] ss:$8 sps:$4 sm:$0xff]   ;;  %v18118_v33 = vld [vmem:[%s20795_s21 + $0xba0] ss:$8 sps:$4 sm:$0xff]  }
 0x19c   : > { %13207 = vmatprep.mubr.bf16.mxu1 %v1010_v31  ;;  %v12844_v45 = vpop.f32.mrf.mxu0  ;;  %v18120_v30 = vld [vmem:[%s20795_s21 + $0xba4] ss:$8 sps:$4 sm:$0xff]   ;;  %v18115_v31 = vld [vmem:[%s20795_s21 + $0xaa0] ss:$8 sps:$4 sm:$0xff]   ;;  %v18126_v58 = vld [vmem:[%s20795_s21 + $0xb94] ss:$8 sps:$4 sm:$0xff]  }
 0x19d   : > { %v12885_v46 = vpop.f32.mrf.mxu1  ;;  %v21231_v47 = vadd.f32 %v12883_v37, %v12843_v39  ;;  %13137 = vmatpush1.bf16.msra.mxu0 %v18043_v29  ;;  %v18117_v29 = vld [vmem:[%s20795_s21 + $0xaa4] ss:$8 sps:$4 sm:$0xff]   ;;  %v18121_v35 = vld [vmem:[%s20795_s21 + $0xa90] ss:$8 sps:$4 sm:$0xff]  }
 0x19e   : > { %13178 = vmatpush1.bf16.msra.mxu1 %v18046_v57  ;;  %v12845_v49 = vpop.f32.mrf.mxu0  ;;  %13138 = vmatprep.subr.bf16.mxu0 %v18051_v34  ;;  %v293_v32 = vld [vmem:[%s20809_s7 + $0x30] sm:$0xff]  ;;  %v18123_v57 = vld [vmem:[%s20795_s21 + $0xa94] ss:$8 sps:$4 sm:$0xff]   ;;  %v18127_v46 = vld [vmem:[%s20795_s21 + $0xa80] ss:$8 sps:$4 sm:$0xff]  }
 0x19f   : > { %13179 = vmatprep.subr.bf16.mxu1 %v18054_v38  ;;  %v12886_v52 = vpop.f32.mrf.mxu1  ;;  %v451_v34 = vcombine.high %v293_v32, %v293_v32  ;;  %v18124_v37 = vld [vmem:[%s20795_s21 + $0xb90] ss:$8 sps:$4 sm:$0xff]   ;;  %v18129_v38 = vld [vmem:[%s20795_s21 + $0xa84] ss:$8 sps:$4 sm:$0xff]   ;;  %v21286_v45 = vrot.slane %v293_v32, %v20860_v50  ;;  %v18135_v49 = vld [vmem:[%s20795_s21 + $0xc74] ss:$8 sps:$4 sm:$0xff]  }
 0x1a0   : > { %v18132_v39 = vld [vmem:[%s20795_s21 + $0xb84] ss:$8 sps:$4 sm:$0xff]   ;;  %v18179_v32 = vld [vmem:[%s20795_s21 + $0xd00] ss:$8 sps:$4 sm:$0xff]  }
 0x1a1   : > { %13139 = vmatpush1.bf16.msra.mxu0 %v18049_v9  ;;  %v21289_v9 = vrot.slane %v451_v34, %v20860_v50  ;;  %v466_v52 = vcombine.high %v21286_v45, %v21286_v45  ;;  %v18185_v34 = vld [vmem:[%s20795_s21 + $0xdf0] ss:$8 sps:$4 sm:$0xff]  }
 0x1a2   : > { %13180 = vmatpush1.bf16.msra.mxu1 %v18052_v48  ;;  %13140 = vmatprep.subr.bf16.mxu0 %v18057_v14  ;;  %v18130_v48 = vld [vmem:[%s20795_s21 + $0xb80] ss:$8 sps:$4 sm:$0xff]   ;;  %v18139_v14 = vld [vmem:[%s20795_s21 + $0xd74] ss:$8 sps:$4 sm:$0xff]  }
 0x1a3   : > { %13181 = vmatprep.subr.bf16.mxu1 %v18060_v51  ;;  %v18133_v51 = vld [vmem:[%s20795_s21 + $0xc70] ss:$8 sps:$4 sm:$0xff]  }
 0x1a5   : > { %13141 = vmatpush1.bf16.msra.mxu0 %v18055_v53  ;;  %v467_v53 = vcombine.high %v21289_v9, %v21289_v9 }
 0x1a6   : > { %13182 = vmatpush1.bf16.msra.mxu1 %v18058_v54  ;;  %13142 = vmatprep.subr.bf16.mxu0 %v18063_v55  ;;  %v1007_v54 = vpack.c.bf16 %v21201_v15, %v21201_v15  ;;  %v1009_v55 = vpack.c.bf16 %v21204_v16, %v21204_v16  ;;  %v18143_v15 = vld [vmem:[%s20795_s21 + $0xd60] ss:$8 sps:$4 sm:$0xff]  }
 0x1a7   : > { %13183 = vmatprep.subr.bf16.mxu1 %v18066_v56  ;;  %v18137_v56 = vld [vmem:[%s20795_s21 + $0xd70] ss:$8 sps:$4 sm:$0xff]  }
 0x1a9   : > { %13143 = vmatpush1.bf16.msra.mxu0 %v18061_v36  ;;  %v18142_v36 = vld [vmem:[%s20795_s21 + $0xc64] ss:$8 sps:$4 sm:$0xff]  }
 0x1aa   : > { %13184 = vmatpush1.bf16.msra.mxu1 %v18064_v59  ;;  %13144 = vmatprep.subr.bf16.mxu0 %v18069_v40  ;;  %v18145_v59 = vld [vmem:[%s20795_s21 + $0xd64] ss:$8 sps:$4 sm:$0xff]   ;;  %v18140_v40 = vld [vmem:[%s20795_s21 + $0xc60] ss:$8 sps:$4 sm:$0xff]  }
 0x1ab   : > { %13185 = vmatprep.subr.bf16.mxu1 %v18072_v60  ;;  %v1012_v60 = vpack.c.bf16 %v466_v52, %v466_v52  ;;  %v18205_v52 = vld [vmem:[%s20795_s21 + $0xdc4] ss:$8 sps:$4 sm:$0xff]  }
 0x1ad   : > { %13145 = vmatpush1.bf16.msra.mxu0 %v18067_v61  ;;  %v1014_v61 = vpack.c.bf16 %v467_v53, %v467_v53  ;;  %v18200_v53 = vld [vmem:[%s20795_s21 + $0xcc0] ss:$8 sps:$4 sm:$0xff]  }
 0x1ae   : > { %13186 = vmatpush1.bf16.msra.mxu1 %v18070_v62  ;;  %13146 = vmatprep.subr.bf16.mxu0 %v18075_v63 }
 0x1af   : > { %13187 = vmatprep.subr.bf16.mxu1 %v18078_v0  ;;  %v18148_v0 = vld [vmem:[%s20795_s21 + $0xc54] ss:$8 sps:$4 sm:$0xff]  }
 0x1b1   : > { %13147 = vmatpush1.bf16.msra.mxu0 %v18073_v1 }
 0x1b2   : > { %13188 = vmatpush1.bf16.msra.mxu1 %v18076_v2  ;;  %13148 = vmatprep.subr.bf16.mxu0 %v18081_v3  ;;  %v18151_v3 = vld [vmem:[%s20795_s21 + $0xd54] ss:$8 sps:$4 sm:$0xff]  }
 0x1b3   : > { %13189 = vmatprep.subr.bf16.mxu1 %v18084_v4 }
 0x1b5   : > { %13149 = vmatpush1.bf16.msra.mxu0 %v18079_v5 }
 0x1b6   : > { %13190 = vmatpush1.bf16.msra.mxu1 %v18082_v6  ;;  %13150 = vmatprep.subr.bf16.mxu0 %v18087_v7 }
 0x1b7   : > { %13191 = vmatprep.subr.bf16.mxu1 %v18090_v8 }
 0x1b9   : > { %13151 = vmatpush2.bf16.msra.mxu0 %v18085_v41  ;;  %v18149_v41 = vld [vmem:[%s20795_s21 + $0xd50] ss:$8 sps:$4 sm:$0xff]  }
 0x1ba   : > { %13192 = vmatpush2.bf16.msra.mxu1 %v18088_v42  ;;  %13152 = vmatprep.subr.bf16.mxu0 %v18093_v10  ;;  %v18157_v10 = vld [vmem:[%s20795_s21 + $0xd44] ss:$8 sps:$4 sm:$0xff]  }
 0x1bb   : > { %13193 = vmatprep.subr.bf16.mxu1 %v18096_v11 }
 0x1bd   : > { %13153 = vmatpush2.bf16.msra.mxu0 %v18091_v12  ;;  %v18152_v12 = vld [vmem:[%s20795_s21 + $0xc40] ss:$8 sps:$4 sm:$0xff]  }
 0x1be   : > { %13194 = vmatpush2.bf16.msra.mxu1 %v18094_v13  ;;  %13154 = vmatprep.subr.bf16.mxu0 %v18099_v17  ;;  %v18155_v13 = vld [vmem:[%s20795_s21 + $0xd40] ss:$8 sps:$4 sm:$0xff]   ;;  %v18160_v17 = vld [vmem:[%s20795_s21 + $0xc34] ss:$8 sps:$4 sm:$0xff]  }
 0x1bf   : > { %13195 = vmatprep.subr.bf16.mxu1 %v18102_v18  ;;  %v18163_v18 = vld [vmem:[%s20795_s21 + $0xd34] ss:$8 sps:$4 sm:$0xff]  }
 0x1c1   : > { %13155 = vmatpush2.bf16.msra.mxu0 %v18097_v19  ;;  %v18158_v19 = vld [vmem:[%s20795_s21 + $0xc30] ss:$8 sps:$4 sm:$0xff]  }
 0x1c2   : > { %13196 = vmatpush2.bf16.msra.mxu1 %v18100_v20  ;;  %13156 = vmatprep.subr.bf16.mxu0 %v18105_v21  ;;  %v18161_v20 = vld [vmem:[%s20795_s21 + $0xd30] ss:$8 sps:$4 sm:$0xff]   ;;  %v18166_v21 = vld [vmem:[%s20795_s21 + $0xc24] ss:$8 sps:$4 sm:$0xff]  }
 0x1c3   : > { %13197 = vmatprep.subr.bf16.mxu1 %v18108_v22  ;;  %v18169_v22 = vld [vmem:[%s20795_s21 + $0xd24] ss:$8 sps:$4 sm:$0xff]  }
 0x1c5   : > { %13157 = vmatpush2.bf16.msra.mxu0 %v18103_v23  ;;  %v18164_v23 = vld [vmem:[%s20795_s21 + $0xc20] ss:$8 sps:$4 sm:$0xff]  }
 0x1c6   : > { %13198 = vmatpush2.bf16.msra.mxu1 %v18106_v24  ;;  %13158 = vmatprep.subr.bf16.mxu0 %v18111_v25  ;;  %v18167_v24 = vld [vmem:[%s20795_s21 + $0xd20] ss:$8 sps:$4 sm:$0xff]   ;;  %v18172_v25 = vld [vmem:[%s20795_s21 + $0xc14] ss:$8 sps:$4 sm:$0xff]  }
 0x1c7   : > { %13199 = vmatprep.subr.bf16.mxu1 %v18114_v26  ;;  %v18175_v26 = vld [vmem:[%s20795_s21 + $0xd14] ss:$8 sps:$4 sm:$0xff]  }
 0x1c9   : > { %13159 = vmatpush2.bf16.msra.mxu0 %v18109_v27  ;;  %v18170_v27 = vld [vmem:[%s20795_s21 + $0xc10] ss:$8 sps:$4 sm:$0xff]  }
 0x1ca   : > { %13200 = vmatpush2.bf16.msra.mxu1 %v18112_v28  ;;  %13160 = vmatprep.subr.bf16.mxu0 %v18117_v29  ;;  %v18173_v28 = vld [vmem:[%s20795_s21 + $0xd10] ss:$8 sps:$4 sm:$0xff]   ;;  %v18178_v29 = vld [vmem:[%s20795_s21 + $0xc04] ss:$8 sps:$4 sm:$0xff]  }
 0x1cb   : > { %13201 = vmatprep.subr.bf16.mxu1 %v18120_v30  ;;  %v18181_v30 = vld [vmem:[%s20795_s21 + $0xd04] ss:$8 sps:$4 sm:$0xff]  }
 0x1cd   : > { %13161 = vmatpush2.bf16.msra.mxu0 %v18115_v31  ;;  %v18176_v31 = vld [vmem:[%s20795_s21 + $0xc00] ss:$8 sps:$4 sm:$0xff]  }
 0x1ce   : > { %13202 = vmatpush2.bf16.msra.mxu1 %v18118_v33  ;;  %13162 = vmatprep.subr.bf16.mxu0 %v18123_v57  ;;  %v18184_v33 = vld [vmem:[%s20795_s21 + $0xcf4] ss:$8 sps:$4 sm:$0xff]  }
 0x1cf   : > { %13203 = vmatprep.subr.bf16.mxu1 %v18126_v58  ;;  %v18187_v57 = vld [vmem:[%s20795_s21 + $0xdf4] ss:$8 sps:$4 sm:$0xff]   ;;  %v18182_v58 = vld [vmem:[%s20795_s21 + $0xcf0] ss:$8 sps:$4 sm:$0xff]  }
 0x1d1   : > { %13163 = vmatpush2.bf16.msra.mxu0 %v18121_v35  ;;  %v18190_v35 = vld [vmem:[%s20795_s21 + $0xce4] ss:$8 sps:$4 sm:$0xff]  }
 0x1d2   : > { %13204 = vmatpush2.bf16.msra.mxu1 %v18124_v37  ;;  %13164 = vmatprep.subr.bf16.mxu0 %v18129_v38  ;;  %v18193_v37 = vld [vmem:[%s20795_s21 + $0xde4] ss:$8 sps:$4 sm:$0xff]   ;;  %v18188_v38 = vld [vmem:[%s20795_s21 + $0xce0] ss:$8 sps:$4 sm:$0xff]  }
 0x1d3   : > { %13205 = vmatprep.subr.bf16.mxu1 %v18132_v39  ;;  %v18191_v39 = vld [vmem:[%s20795_s21 + $0xde0] ss:$8 sps:$4 sm:$0xff]  }
 0x1d5   : > { %13165 = vmatpush2.bf16.msra.mxu0 %v18127_v46  ;;  %v18196_v46 = vld [vmem:[%s20795_s21 + $0xcd4] ss:$8 sps:$4 sm:$0xff]  }
 0x1d6   : > { %13206 = vmatpush2.bf16.msra.mxu1 %v18130_v48  ;;  %13216 = vmatprep.subr.bf16.mxu0 %v18135_v49  ;;  %v18199_v48 = vld [vmem:[%s20795_s21 + $0xdd4] ss:$8 sps:$4 sm:$0xff]   ;;  %v18194_v49 = vld [vmem:[%s20795_s21 + $0xcd0] ss:$8 sps:$4 sm:$0xff]  }
 0x1d7   : > { %13257 = vmatprep.subr.bf16.mxu1 %v18139_v14  ;;  %v18197_v14 = vld [vmem:[%s20795_s21 + $0xdd0] ss:$8 sps:$4 sm:$0xff]  }
 0x1d8   : > { %v12922_v62 = vpop.f32.mrf.mxu0  ;;  %13167 = vmatmul.mubr.bf16.vlgmr.msra.gmra.mxu0 %v1007_v54  ;;  %v18203_v54 = vld [vmem:[%s20795_s21 + $0xdc0] ss:$8 sps:$4 sm:$0xff]  }
 0x1d9   : > { %v12963_v63 = vpop.f32.mrf.mxu1  ;;  %13208 = vmatmul.mubr.bf16.vlgmr.msra.gmra.mxu1 %v1009_v55  ;;  %v12923_v16 = vadd.f32 %v12922_v62, %v21228_v43  ;;  %13217 = vmatpush1.bf16.msra.mxu0 %v18133_v51  ;;  %v18146_v43 = vld [vmem:[%s20795_s21 + $0xc50] ss:$8 sps:$4 sm:$0xff]   ;;  %v18202_v51 = vld [vmem:[%s20795_s21 + $0xcc4] ss:$8 sps:$4 sm:$0xff]   ;;  %v18208_v55 = vld [vmem:[%s20795_s21 + $0xcb4] ss:$8 sps:$4 sm:$0xff]  }
 0x1da   : > { %13258 = vmatpush1.bf16.msra.mxu1 %v18137_v56  ;;  %v12924_v1 = vpop.f32.mrf.mxu0  ;;  %13218 = vmatprep.subr.bf16.mxu0 %v18142_v36  ;;  %v18211_v56 = vld [vmem:[%s20795_s21 + $0xdb4] ss:$8 sps:$4 sm:$0xff]   ;;  %v18206_v36 = vld [vmem:[%s20795_s21 + $0xcb0] ss:$8 sps:$4 sm:$0xff]  }
 0x1db   : > { %v12965_v2 = vpop.f32.mrf.mxu1  ;;  %13259 = vmatprep.subr.bf16.mxu1 %v18145_v59  ;;  %v12925_v4 = vadd.f32 %v12924_v1, %v21231_v47  ;;  %v21313_v5 = vadd.f32 %v12963_v63, %v12923_v16  ;;  %13248 = vmatprep.mubr.bf16.mxu0 %v1012_v60  ;;  %v18154_v47 = vld [vmem:[%s20795_s21 + $0xc44] ss:$8 sps:$4 sm:$0xff]   ;;  %v18209_v59 = vld [vmem:[%s20795_s21 + $0xdb0] ss:$8 sps:$4 sm:$0xff]   ;;  %v18215_v63 = vld [vmem:[%s20795_s21 + $0xda0] ss:$8 sps:$4 sm:$0xff]  }
 0x1dc   : > { %13289 = vmatprep.mubr.bf16.mxu1 %v1014_v61  ;;  %v12926_v6 = vpop.f32.mrf.mxu0  ;;  %v18217_v60 = vld [vmem:[%s20795_s21 + $0xda4] ss:$8 sps:$4 sm:$0xff]   ;;  %v18212_v61 = vld [vmem:[%s20795_s21 + $0xca0] ss:$8 sps:$4 sm:$0xff]   ;;  %v294_v62 = vld [vmem:[%s20809_s7 + $0x38] sm:$0xff] }
 0x1dd   : > { %v12967_v7 = vpop.f32.mrf.mxu1  ;;  %v21316_v8 = vadd.f32 %v12965_v2, %v12925_v4  ;;  %13219 = vmatpush1.bf16.msra.mxu0 %v18140_v40  ;;  %v18214_v40 = vld [vmem:[%s20795_s21 + $0xca4] ss:$8 sps:$4 sm:$0xff]   ;;  %v18223_v16 = vld [vmem:[%s20795_s21 + $0xd94] ss:$8 sps:$4 sm:$0xff]   ;;  %v18218_v1 = vld [vmem:[%s20795_s21 + $0xc90] ss:$8 sps:$4 sm:$0xff]   ;;  %v21371_v6 = vrot.slane %v294_v62, %v20860_v50 }
 0x1de   : > { %13260 = vmatpush1.bf16.msra.mxu1 %v18143_v15  ;;  %v12927_v42 = vpop.f32.mrf.mxu0  ;;  %13220 = vmatprep.subr.bf16.mxu0 %v18148_v0  ;;  %v18220_v15 = vld [vmem:[%s20795_s21 + $0xc94] ss:$8 sps:$4 sm:$0xff]   ;;  %v468_v0 = vcombine.high %v294_v62, %v294_v62  ;;  %v18221_v2 = vld [vmem:[%s20795_s21 + $0xd90] ss:$8 sps:$4 sm:$0xff]   ;;  %v18229_v4 = vld [vmem:[%s20795_s21 + $0xd84] ss:$8 sps:$4 sm:$0xff]  }
 0x1df   : > { %13261 = vmatprep.subr.bf16.mxu1 %v18151_v3  ;;  %v12968_v11 = vpop.f32.mrf.mxu1  ;;  %v18226_v3 = vld [vmem:[%s20795_s21 + $0xc84] ss:$8 sps:$4 sm:$0xff]   ;;  %v18224_v7 = vld [vmem:[%s20795_s21 + $0xc80] ss:$8 sps:$4 sm:$0xff]   ;;  %v18232_v42 = vld [vmem:[%s20795_s21 + $0xe74] ss:$8 sps:$4 sm:$0xff]  }
 0x1e0   : > { %v483_v11 = vcombine.high %v21371_v6, %v21371_v6  ;;  %v18276_v62 = vld [vmem:[%s20795_s21 + $0xf00] ss:$8 sps:$4 sm:$0xff]  }
 0x1e1   : > { %13221 = vmatpush1.bf16.msra.mxu0 %v18146_v43  ;;  %v21374_v43 = vrot.slane %v468_v0, %v20860_v50  ;;  %v18282_v0 = vld [vmem:[%s20795_s21 + $0xff0] ss:$8 sps:$4 sm:$0xff]  }
 0x1e2   : > { %13262 = vmatpush1.bf16.msra.mxu1 %v18149_v41  ;;  %13222 = vmatprep.subr.bf16.mxu0 %v18154_v47  ;;  %v18227_v41 = vld [vmem:[%s20795_s21 + $0xd80] ss:$8 sps:$4 sm:$0xff]   ;;  %v18236_v47 = vld [vmem:[%s20795_s21 + $0xf74] ss:$8 sps:$4 sm:$0xff]  }
 0x1e3   : > { %13263 = vmatprep.subr.bf16.mxu1 %v18157_v10  ;;  %v18230_v10 = vld [vmem:[%s20795_s21 + $0xe70] ss:$8 sps:$4 sm:$0xff]  }
 0x1e5   : > { %13223 = vmatpush1.bf16.msra.mxu0 %v18152_v12  ;;  %v484_v12 = vcombine.high %v21374_v43, %v21374_v43 }
 0x1e6   : > { %13264 = vmatpush1.bf16.msra.mxu1 %v18155_v13  ;;  %13224 = vmatprep.subr.bf16.mxu0 %v18160_v17  ;;  %v1011_v13 = vpack.c.bf16 %v21286_v45, %v21286_v45  ;;  %v1013_v17 = vpack.c.bf16 %v21289_v9, %v21289_v9  ;;  %v18240_v45 = vld [vmem:[%s20795_s21 + $0xf60] ss:$8 sps:$4 sm:$0xff]  }
 0x1e7   : > { %13265 = vmatprep.subr.bf16.mxu1 %v18163_v18  ;;  %v18234_v18 = vld [vmem:[%s20795_s21 + $0xf70] ss:$8 sps:$4 sm:$0xff]  }
 0x1e9   : > { %13225 = vmatpush1.bf16.msra.mxu0 %v18158_v19  ;;  %v18239_v19 = vld [vmem:[%s20795_s21 + $0xe64] ss:$8 sps:$4 sm:$0xff]  }
 0x1ea   : > { %13266 = vmatpush1.bf16.msra.mxu1 %v18161_v20  ;;  %13226 = vmatprep.subr.bf16.mxu0 %v18166_v21  ;;  %v18242_v20 = vld [vmem:[%s20795_s21 + $0xf64] ss:$8 sps:$4 sm:$0xff]   ;;  %v18237_v21 = vld [vmem:[%s20795_s21 + $0xe60] ss:$8 sps:$4 sm:$0xff]  }
 0x1eb   : > { %13267 = vmatprep.subr.bf16.mxu1 %v18169_v22  ;;  %v1016_v22 = vpack.c.bf16 %v483_v11, %v483_v11  ;;  %v18302_v11 = vld [vmem:[%s20795_s21 + $0xfc4] ss:$8 sps:$4 sm:$0xff]  }
 0x1ed   : > { %13227 = vmatpush1.bf16.msra.mxu0 %v18164_v23  ;;  %v1018_v23 = vpack.c.bf16 %v484_v12, %v484_v12  ;;  %v18297_v12 = vld [vmem:[%s20795_s21 + $0xec0] ss:$8 sps:$4 sm:$0xff]  }
 0x1ee   : > { %13268 = vmatpush1.bf16.msra.mxu1 %v18167_v24  ;;  %13228 = vmatprep.subr.bf16.mxu0 %v18172_v25 }
 0x1ef   : > { %13269 = vmatprep.subr.bf16.mxu1 %v18175_v26  ;;  %v18245_v26 = vld [vmem:[%s20795_s21 + $0xe54] ss:$8 sps:$4 sm:$0xff]  }
 0x1f1   : > { %13229 = vmatpush1.bf16.msra.mxu0 %v18170_v27 }
 0x1f2   : > { %13270 = vmatpush1.bf16.msra.mxu1 %v18173_v28  ;;  %13230 = vmatprep.subr.bf16.mxu0 %v18178_v29  ;;  %v18248_v29 = vld [vmem:[%s20795_s21 + $0xf54] ss:$8 sps:$4 sm:$0xff]  }
 0x1f3   : > { %13271 = vmatprep.subr.bf16.mxu1 %v18181_v30 }
 0x1f5   : > { %13231 = vmatpush1.bf16.msra.mxu0 %v18176_v31 }
 0x1f6   : > { %13272 = vmatpush1.bf16.msra.mxu1 %v18179_v32  ;;  %13232 = vmatprep.subr.bf16.mxu0 %v18184_v33 }
 0x1f7   : > { %13273 = vmatprep.subr.bf16.mxu1 %v18187_v57 }
 0x1f9   : > { %13233 = vmatpush2.bf16.msra.mxu0 %v18182_v58  ;;  %v18246_v58 = vld [vmem:[%s20795_s21 + $0xf50] ss:$8 sps:$4 sm:$0xff]  }
 0x1fa   : > { %13274 = vmatpush2.bf16.msra.mxu1 %v18185_v34  ;;  %13234 = vmatprep.subr.bf16.mxu0 %v18190_v35  ;;  %v18254_v35 = vld [vmem:[%s20795_s21 + $0xf44] ss:$8 sps:$4 sm:$0xff]  }
 0x1fb   : > { %13275 = vmatprep.subr.bf16.mxu1 %v18193_v37 }
 0x1fd   : > { %13235 = vmatpush2.bf16.msra.mxu0 %v18188_v38  ;;  %v18249_v38 = vld [vmem:[%s20795_s21 + $0xe40] ss:$8 sps:$4 sm:$0xff]  }
 0x1fe   : > { %13276 = vmatpush2.bf16.msra.mxu1 %v18191_v39  ;;  %13236 = vmatprep.subr.bf16.mxu0 %v18196_v46  ;;  %v18252_v39 = vld [vmem:[%s20795_s21 + $0xf40] ss:$8 sps:$4 sm:$0xff]   ;;  %v18257_v46 = vld [vmem:[%s20795_s21 + $0xe34] ss:$8 sps:$4 sm:$0xff]  }
 0x1ff   : > { %13277 = vmatprep.subr.bf16.mxu1 %v18199_v48  ;;  %v18260_v48 = vld [vmem:[%s20795_s21 + $0xf34] ss:$8 sps:$4 sm:$0xff]  }
 0x201   : > { %13237 = vmatpush2.bf16.msra.mxu0 %v18194_v49  ;;  %v18255_v49 = vld [vmem:[%s20795_s21 + $0xe30] ss:$8 sps:$4 sm:$0xff]  }
 0x202   : > { %13278 = vmatpush2.bf16.msra.mxu1 %v18197_v14  ;;  %13238 = vmatprep.subr.bf16.mxu0 %v18202_v51  ;;  %v18258_v14 = vld [vmem:[%s20795_s21 + $0xf30] ss:$8 sps:$4 sm:$0xff]   ;;  %v18263_v51 = vld [vmem:[%s20795_s21 + $0xe24] ss:$8 sps:$4 sm:$0xff]  }
 0x203   : > { %13279 = vmatprep.subr.bf16.mxu1 %v18205_v52  ;;  %v18266_v52 = vld [vmem:[%s20795_s21 + $0xf24] ss:$8 sps:$4 sm:$0xff]  }
 0x205   : > { %13239 = vmatpush2.bf16.msra.mxu0 %v18200_v53  ;;  %v18261_v53 = vld [vmem:[%s20795_s21 + $0xe20] ss:$8 sps:$4 sm:$0xff]  }
 0x206   : > { %13280 = vmatpush2.bf16.msra.mxu1 %v18203_v54  ;;  %13240 = vmatprep.subr.bf16.mxu0 %v18208_v55  ;;  %v18264_v54 = vld [vmem:[%s20795_s21 + $0xf20] ss:$8 sps:$4 sm:$0xff]   ;;  %v18269_v55 = vld [vmem:[%s20795_s21 + $0xe14] ss:$8 sps:$4 sm:$0xff]  }
 0x207   : > { %13281 = vmatprep.subr.bf16.mxu1 %v18211_v56  ;;  %v18272_v56 = vld [vmem:[%s20795_s21 + $0xf14] ss:$8 sps:$4 sm:$0xff]  }
 0x209   : > { %13241 = vmatpush2.bf16.msra.mxu0 %v18206_v36  ;;  %v18267_v36 = vld [vmem:[%s20795_s21 + $0xe10] ss:$8 sps:$4 sm:$0xff]  }
 0x20a   : > { %13282 = vmatpush2.bf16.msra.mxu1 %v18209_v59  ;;  %13242 = vmatprep.subr.bf16.mxu0 %v18214_v40  ;;  %v18270_v59 = vld [vmem:[%s20795_s21 + $0xf10] ss:$8 sps:$4 sm:$0xff]   ;;  %v18275_v40 = vld [vmem:[%s20795_s21 + $0xe04] ss:$8 sps:$4 sm:$0xff]  }
 0x20b   : > { %13283 = vmatprep.subr.bf16.mxu1 %v18217_v60  ;;  %v18278_v60 = vld [vmem:[%s20795_s21 + $0xf04] ss:$8 sps:$4 sm:$0xff]  }
 0x20d   : > { %13243 = vmatpush2.bf16.msra.mxu0 %v18212_v61  ;;  %v18273_v61 = vld [vmem:[%s20795_s21 + $0xe00] ss:$8 sps:$4 sm:$0xff]  }
 0x20e   : > { %13284 = vmatpush2.bf16.msra.mxu1 %v18215_v63  ;;  %13244 = vmatprep.subr.bf16.mxu0 %v18220_v15  ;;  %v18281_v63 = vld [vmem:[%s20795_s21 + $0xef4] ss:$8 sps:$4 sm:$0xff]  }
 0x20f   : > { %13285 = vmatprep.subr.bf16.mxu1 %v18223_v16  ;;  %v18284_v15 = vld [vmem:[%s20795_s21 + $0xff4] ss:$8 sps:$4 sm:$0xff]   ;;  %v18279_v16 = vld [vmem:[%s20795_s21 + $0xef0] ss:$8 sps:$4 sm:$0xff]  }
 0x211   : > { %13245 = vmatpush2.bf16.msra.mxu0 %v18218_v1  ;;  %v18287_v1 = vld [vmem:[%s20795_s21 + $0xee4] ss:$8 sps:$4 sm:$0xff]  }
 0x212   : > { %13286 = vmatpush2.bf16.msra.mxu1 %v18221_v2  ;;  %13246 = vmatprep.subr.bf16.mxu0 %v18226_v3  ;;  %v18290_v2 = vld [vmem:[%s20795_s21 + $0xfe4] ss:$8 sps:$4 sm:$0xff]   ;;  %v18285_v3 = vld [vmem:[%s20795_s21 + $0xee0] ss:$8 sps:$4 sm:$0xff]  }
 0x213   : > { %13287 = vmatprep.subr.bf16.mxu1 %v18229_v4  ;;  %v18288_v4 = vld [vmem:[%s20795_s21 + $0xfe0] ss:$8 sps:$4 sm:$0xff]  }
 0x215   : > { %13247 = vmatpush2.bf16.msra.mxu0 %v18224_v7  ;;  %v18293_v7 = vld [vmem:[%s20795_s21 + $0xed4] ss:$8 sps:$4 sm:$0xff]  }
 0x216   : > { %13288 = vmatpush2.bf16.msra.mxu1 %v18227_v41  ;;  %13298 = vmatprep.subr.bf16.mxu0 %v18232_v42  ;;  %v18296_v41 = vld [vmem:[%s20795_s21 + $0xfd4] ss:$8 sps:$4 sm:$0xff]   ;;  %v18291_v42 = vld [vmem:[%s20795_s21 + $0xed0] ss:$8 sps:$4 sm:$0xff]  }
 0x217   : > { %13339 = vmatprep.subr.bf16.mxu1 %v18236_v47  ;;  %v18294_v47 = vld [vmem:[%s20795_s21 + $0xfd0] ss:$8 sps:$4 sm:$0xff]  }
 0x218   : > { %v13004_v24 = vpop.f32.mrf.mxu0  ;;  %13249 = vmatmul.mubr.bf16.vlgmr.msra.gmra.mxu0 %v1011_v13  ;;  %v18300_v13 = vld [vmem:[%s20795_s21 + $0xfc0] ss:$8 sps:$4 sm:$0xff]  }
 0x219   : > { %v13045_v25 = vpop.f32.mrf.mxu1  ;;  %13290 = vmatmul.mubr.bf16.vlgmr.msra.gmra.mxu1 %v1013_v17  ;;  %v13005_v9 = vadd.f32 %v13004_v24, %v21313_v5  ;;  %13299 = vmatpush1.bf16.msra.mxu0 %v18230_v10  ;;  %v18243_v5 = vld [vmem:[%s20795_s21 + $0xe50] ss:$8 sps:$4 sm:$0xff]   ;;  %v18299_v10 = vld [vmem:[%s20795_s21 + $0xec4] ss:$8 sps:$4 sm:$0xff]   ;;  %v18305_v17 = vld [vmem:[%s20795_s21 + $0xeb4] ss:$8 sps:$4 sm:$0xff]  }
 0x21a   : > { %13340 = vmatpush1.bf16.msra.mxu1 %v18234_v18  ;;  %v13006_v27 = vpop.f32.mrf.mxu0  ;;  %13300 = vmatprep.subr.bf16.mxu0 %v18239_v19  ;;  %v18308_v18 = vld [vmem:[%s20795_s21 + $0xfb4] ss:$8 sps:$4 sm:$0xff]   ;;  %v18303_v19 = vld [vmem:[%s20795_s21 + $0xeb0] ss:$8 sps:$4 sm:$0xff]  }
 0x21b   : > { %v13047_v28 = vpop.f32.mrf.mxu1  ;;  %13341 = vmatprep.subr.bf16.mxu1 %v18242_v20  ;;  %v13007_v30 = vadd.f32 %v13006_v27, %v21316_v8  ;;  %v21398_v31 = vadd.f32 %v13045_v25, %v13005_v9  ;;  %13330 = vmatprep.mubr.bf16.mxu0 %v1016_v22  ;;  %v18251_v8 = vld [vmem:[%s20795_s21 + $0xe44] ss:$8 sps:$4 sm:$0xff]   ;;  %v18306_v20 = vld [vmem:[%s20795_s21 + $0xfb0] ss:$8 sps:$4 sm:$0xff]   ;;  %v295_v24 = vld [vmem:[%s20809_s7 + $0x40] sm:$0xff] }
 0x21c   : > { %13371 = vmatprep.mubr.bf16.mxu1 %v1018_v23  ;;  %v13008_v32 = vpop.f32.mrf.mxu0  ;;  %v18314_v22 = vld [vmem:[%s20795_s21 + $0xfa4] ss:$8 sps:$4 sm:$0xff]   ;;  %v18309_v23 = vld [vmem:[%s20795_s21 + $0xea0] ss:$8 sps:$4 sm:$0xff]   ;;  %v18320_v9 = vld [vmem:[%s20795_s21 + $0xf94] ss:$8 sps:$4 sm:$0xff]  }
 0x21d   : > { %v13049_v33 = vpop.f32.mrf.mxu1  ;;  %v21401_v57 = vadd.f32 %v13047_v28, %v13007_v30  ;;  %13301 = vmatpush1.bf16.msra.mxu0 %v18237_v21  ;;  %v18311_v21 = vld [vmem:[%s20795_s21 + $0xea4] ss:$8 sps:$4 sm:$0xff]   ;;  %v18312_v25 = vld [vmem:[%s20795_s21 + $0xfa0] ss:$8 sps:$4 sm:$0xff]   ;;  %v18315_v27 = vld [vmem:[%s20795_s21 + $0xe90] ss:$8 sps:$4 sm:$0xff]   ;;  %v21456_v32 = vrot.slane %v295_v24, %v20860_v50 }
 0x21e   : > { %13342 = vmatpush1.bf16.msra.mxu1 %v18240_v45  ;;  %v13009_v34 = vpop.f32.mrf.mxu0  ;;  %13302 = vmatprep.subr.bf16.mxu0 %v18245_v26  ;;  %v18317_v45 = vld [vmem:[%s20795_s21 + $0xe94] ss:$8 sps:$4 sm:$0xff]   ;;  %v485_v26 = vcombine.high %v295_v24, %v295_v24  ;;  %v18318_v28 = vld [vmem:[%s20795_s21 + $0xf90] ss:$8 sps:$4 sm:$0xff]   ;;  %v18326_v30 = vld [vmem:[%s20795_s21 + $0xf84] ss:$8 sps:$4 sm:$0xff]  }
 0x21f   : > { %13343 = vmatprep.subr.bf16.mxu1 %v18248_v29  ;;  %v13050_v37 = vpop.f32.mrf.mxu1  ;;  %v18323_v29 = vld [vmem:[%s20795_s21 + $0xe84] ss:$8 sps:$4 sm:$0xff]   ;;  %v18321_v33 = vld [vmem:[%s20795_s21 + $0xe80] ss:$8 sps:$4 sm:$0xff]   ;;  %v18329_v34 = vld [vmem:[%s20795_s21 + $0x1074] ss:$8 sps:$4 sm:$0xff]  }
 0x220   : > { %v500_v37 = vcombine.high %v21456_v32, %v21456_v32  ;;  %v18373_v24 = vld [vmem:[%s20795_s21 + $0x1100] ss:$8 sps:$4 sm:$0xff]  }
 0x221   : > { %13303 = vmatpush1.bf16.msra.mxu0 %v18243_v5  ;;  %v21459_v5 = vrot.slane %v485_v26, %v20860_v50  ;;  %v18379_v26 = vld [vmem:[%s20795_s21 + $0x11f0] ss:$8 sps:$4 sm:$0xff]  }
 0x222   : > { %13344 = vmatpush1.bf16.msra.mxu1 %v18246_v58  ;;  %13304 = vmatprep.subr.bf16.mxu0 %v18251_v8  ;;  %v18324_v58 = vld [vmem:[%s20795_s21 + $0xf80] ss:$8 sps:$4 sm:$0xff]   ;;  %v18333_v8 = vld [vmem:[%s20795_s21 + $0x1174] ss:$8 sps:$4 sm:$0xff]  }
 0x223   : > { %13345 = vmatprep.subr.bf16.mxu1 %v18254_v35  ;;  %v18327_v35 = vld [vmem:[%s20795_s21 + $0x1070] ss:$8 sps:$4 sm:$0xff]  }
 0x225   : > { %13305 = vmatpush1.bf16.msra.mxu0 %v18249_v38  ;;  %v501_v38 = vcombine.high %v21459_v5, %v21459_v5 }
 0x226   : > { %13346 = vmatpush1.bf16.msra.mxu1 %v18252_v39  ;;  %13306 = vmatprep.subr.bf16.mxu0 %v18257_v46  ;;  %v1015_v39 = vpack.c.bf16 %v21371_v6, %v21371_v6  ;;  %v1017_v46 = vpack.c.bf16 %v21374_v43, %v21374_v43  ;;  %v18337_v6 = vld [vmem:[%s20795_s21 + $0x1160] ss:$8 sps:$4 sm:$0xff]  }
 0x227   : > { %13347 = vmatprep.subr.bf16.mxu1 %v18260_v48  ;;  %v18331_v48 = vld [vmem:[%s20795_s21 + $0x1170] ss:$8 sps:$4 sm:$0xff]  }
 0x229   : > { %13307 = vmatpush1.bf16.msra.mxu0 %v18255_v49  ;;  %v18336_v49 = vld [vmem:[%s20795_s21 + $0x1064] ss:$8 sps:$4 sm:$0xff]  }
 0x22a   : > { %13348 = vmatpush1.bf16.msra.mxu1 %v18258_v14  ;;  %13308 = vmatprep.subr.bf16.mxu0 %v18263_v51  ;;  %v18339_v14 = vld [vmem:[%s20795_s21 + $0x1164] ss:$8 sps:$4 sm:$0xff]   ;;  %v18334_v51 = vld [vmem:[%s20795_s21 + $0x1060] ss:$8 sps:$4 sm:$0xff]  }
 0x22b   : > { %13349 = vmatprep.subr.bf16.mxu1 %v18266_v52  ;;  %v1020_v52 = vpack.c.bf16 %v500_v37, %v500_v37  ;;  %v18399_v37 = vld [vmem:[%s20795_s21 + $0x11c4] ss:$8 sps:$4 sm:$0xff]  }
 0x22d   : > { %13309 = vmatpush1.bf16.msra.mxu0 %v18261_v53  ;;  %v1022_v53 = vpack.c.bf16 %v501_v38, %v501_v38  ;;  %v18394_v38 = vld [vmem:[%s20795_s21 + $0x10c0] ss:$8 sps:$4 sm:$0xff]  }
 0x22e   : > { %13350 = vmatpush1.bf16.msra.mxu1 %v18264_v54  ;;  %13310 = vmatprep.subr.bf16.mxu0 %v18269_v55 }
 0x22f   : > { %13351 = vmatprep.subr.bf16.mxu1 %v18272_v56  ;;  %v18342_v56 = vld [vmem:[%s20795_s21 + $0x1054] ss:$8 sps:$4 sm:$0xff]  }
 0x231   : > { %13311 = vmatpush1.bf16.msra.mxu0 %v18267_v36 }
 0x232   : > { %13352 = vmatpush1.bf16.msra.mxu1 %v18270_v59  ;;  %13312 = vmatprep.subr.bf16.mxu0 %v18275_v40  ;;  %v18345_v40 = vld [vmem:[%s20795_s21 + $0x1154] ss:$8 sps:$4 sm:$0xff]  }
 0x233   : > { %13353 = vmatprep.subr.bf16.mxu1 %v18278_v60 }
 0x235   : > { %13313 = vmatpush1.bf16.msra.mxu0 %v18273_v61 }
 0x236   : > { %13354 = vmatpush1.bf16.msra.mxu1 %v18276_v62  ;;  %13314 = vmatprep.subr.bf16.mxu0 %v18281_v63 }
 0x237   : > { %13355 = vmatprep.subr.bf16.mxu1 %v18284_v15 }
 0x239   : > { %13315 = vmatpush2.bf16.msra.mxu0 %v18279_v16  ;;  %v18343_v16 = vld [vmem:[%s20795_s21 + $0x1150] ss:$8 sps:$4 sm:$0xff]  }
 0x23a   : > { %13356 = vmatpush2.bf16.msra.mxu1 %v18282_v0  ;;  %13316 = vmatprep.subr.bf16.mxu0 %v18287_v1  ;;  %v18351_v1 = vld [vmem:[%s20795_s21 + $0x1144] ss:$8 sps:$4 sm:$0xff]  }
 0x23b   : > { %13357 = vmatprep.subr.bf16.mxu1 %v18290_v2 }
 0x23d   : > { %13317 = vmatpush2.bf16.msra.mxu0 %v18285_v3  ;;  %v18346_v3 = vld [vmem:[%s20795_s21 + $0x1040] ss:$8 sps:$4 sm:$0xff]  }
 0x23e   : > { %13358 = vmatpush2.bf16.msra.mxu1 %v18288_v4  ;;  %13318 = vmatprep.subr.bf16.mxu0 %v18293_v7  ;;  %v18349_v4 = vld [vmem:[%s20795_s21 + $0x1140] ss:$8 sps:$4 sm:$0xff]   ;;  %v18354_v7 = vld [vmem:[%s20795_s21 + $0x1034] ss:$8 sps:$4 sm:$0xff]  }
 0x23f   : > { %13359 = vmatprep.subr.bf16.mxu1 %v18296_v41  ;;  %v18357_v41 = vld [vmem:[%s20795_s21 + $0x1134] ss:$8 sps:$4 sm:$0xff]  }
 0x241   : > { %13319 = vmatpush2.bf16.msra.mxu0 %v18291_v42  ;;  %v18352_v42 = vld [vmem:[%s20795_s21 + $0x1030] ss:$8 sps:$4 sm:$0xff]  }
 0x242   : > { %13360 = vmatpush2.bf16.msra.mxu1 %v18294_v47  ;;  %13320 = vmatprep.subr.bf16.mxu0 %v18299_v10  ;;  %v18355_v47 = vld [vmem:[%s20795_s21 + $0x1130] ss:$8 sps:$4 sm:$0xff]   ;;  %v18360_v10 = vld [vmem:[%s20795_s21 + $0x1024] ss:$8 sps:$4 sm:$0xff]  }
 0x243   : > { %13361 = vmatprep.subr.bf16.mxu1 %v18302_v11  ;;  %v18363_v11 = vld [vmem:[%s20795_s21 + $0x1124] ss:$8 sps:$4 sm:$0xff]  }
 0x245   : > { %13321 = vmatpush2.bf16.msra.mxu0 %v18297_v12  ;;  %v18358_v12 = vld [vmem:[%s20795_s21 + $0x1020] ss:$8 sps:$4 sm:$0xff]  }
 0x246   : > { %13362 = vmatpush2.bf16.msra.mxu1 %v18300_v13  ;;  %13322 = vmatprep.subr.bf16.mxu0 %v18305_v17  ;;  %v18361_v13 = vld [vmem:[%s20795_s21 + $0x1120] ss:$8 sps:$4 sm:$0xff]   ;;  %v18366_v17 = vld [vmem:[%s20795_s21 + $0x1014] ss:$8 sps:$4 sm:$0xff]  }
 0x247   : > { %13363 = vmatprep.subr.bf16.mxu1 %v18308_v18  ;;  %v18369_v18 = vld [vmem:[%s20795_s21 + $0x1114] ss:$8 sps:$4 sm:$0xff]  }
 0x249   : > { %13323 = vmatpush2.bf16.msra.mxu0 %v18303_v19  ;;  %v18364_v19 = vld [vmem:[%s20795_s21 + $0x1010] ss:$8 sps:$4 sm:$0xff]  }
 0x24a   : > { %13364 = vmatpush2.bf16.msra.mxu1 %v18306_v20  ;;  %13324 = vmatprep.subr.bf16.mxu0 %v18311_v21  ;;  %v18367_v20 = vld [vmem:[%s20795_s21 + $0x1110] ss:$8 sps:$4 sm:$0xff]   ;;  %v18372_v21 = vld [vmem:[%s20795_s21 + $0x1004] ss:$8 sps:$4 sm:$0xff]  }
 0x24b   : > { %13365 = vmatprep.subr.bf16.mxu1 %v18314_v22  ;;  %v18375_v22 = vld [vmem:[%s20795_s21 + $0x1104] ss:$8 sps:$4 sm:$0xff]  }
 0x24d   : > { %13325 = vmatpush2.bf16.msra.mxu0 %v18309_v23  ;;  %v18370_v23 = vld [vmem:[%s20795_s21 + $0x1000] ss:$8 sps:$4 sm:$0xff]  }
 0x24e   : > { %13366 = vmatpush2.bf16.msra.mxu1 %v18312_v25  ;;  %13326 = vmatprep.subr.bf16.mxu0 %v18317_v45  ;;  %v18378_v25 = vld [vmem:[%s20795_s21 + $0x10f4] ss:$8 sps:$4 sm:$0xff]  }
 0x24f   : > { %13367 = vmatprep.subr.bf16.mxu1 %v18320_v9  ;;  %v18381_v45 = vld [vmem:[%s20795_s21 + $0x11f4] ss:$8 sps:$4 sm:$0xff]   ;;  %v18376_v9 = vld [vmem:[%s20795_s21 + $0x10f0] ss:$8 sps:$4 sm:$0xff]  }
 0x251   : > { %13327 = vmatpush2.bf16.msra.mxu0 %v18315_v27  ;;  %v18384_v27 = vld [vmem:[%s20795_s21 + $0x10e4] ss:$8 sps:$4 sm:$0xff]  }
 0x252   : > { %13368 = vmatpush2.bf16.msra.mxu1 %v18318_v28  ;;  %13328 = vmatprep.subr.bf16.mxu0 %v18323_v29  ;;  %v18387_v28 = vld [vmem:[%s20795_s21 + $0x11e4] ss:$8 sps:$4 sm:$0xff]   ;;  %v18382_v29 = vld [vmem:[%s20795_s21 + $0x10e0] ss:$8 sps:$4 sm:$0xff]  }
 0x253   : > { %13369 = vmatprep.subr.bf16.mxu1 %v18326_v30  ;;  %v18385_v30 = vld [vmem:[%s20795_s21 + $0x11e0] ss:$8 sps:$4 sm:$0xff]  }
 0x255   : > { %13329 = vmatpush2.bf16.msra.mxu0 %v18321_v33  ;;  %v18390_v33 = vld [vmem:[%s20795_s21 + $0x10d4] ss:$8 sps:$4 sm:$0xff]  }
 0x256   : > { %13370 = vmatpush2.bf16.msra.mxu1 %v18324_v58  ;;  %13380 = vmatprep.subr.bf16.mxu0 %v18329_v34  ;;  %v18393_v58 = vld [vmem:[%s20795_s21 + $0x11d4] ss:$8 sps:$4 sm:$0xff]   ;;  %v18388_v34 = vld [vmem:[%s20795_s21 + $0x10d0] ss:$8 sps:$4 sm:$0xff]  }
 0x257   : > { %13421 = vmatprep.subr.bf16.mxu1 %v18333_v8  ;;  %v18391_v8 = vld [vmem:[%s20795_s21 + $0x11d0] ss:$8 sps:$4 sm:$0xff]  }
 0x258   : > { %v13086_v54 = vpop.f32.mrf.mxu0  ;;  %13331 = vmatmul.mubr.bf16.vlgmr.msra.gmra.mxu0 %v1015_v39  ;;  %v18397_v39 = vld [vmem:[%s20795_s21 + $0x11c0] ss:$8 sps:$4 sm:$0xff]  }
 0x259   : > { %v13127_v55 = vpop.f32.mrf.mxu1  ;;  %13372 = vmatmul.mubr.bf16.vlgmr.msra.gmra.mxu1 %v1017_v46  ;;  %v13087_v43 = vadd.f32 %v13086_v54, %v21398_v31  ;;  %13381 = vmatpush1.bf16.msra.mxu0 %v18327_v35  ;;  %v18340_v31 = vld [vmem:[%s20795_s21 + $0x1050] ss:$8 sps:$4 sm:$0xff]   ;;  %v18396_v35 = vld [vmem:[%s20795_s21 + $0x10c4] ss:$8 sps:$4 sm:$0xff]   ;;  %v18402_v46 = vld [vmem:[%s20795_s21 + $0x10b4] ss:$8 sps:$4 sm:$0xff]  }
 0x25a   : > { %13422 = vmatpush1.bf16.msra.mxu1 %v18331_v48  ;;  %v13088_v36 = vpop.f32.mrf.mxu0  ;;  %13382 = vmatprep.subr.bf16.mxu0 %v18336_v49  ;;  %v18405_v48 = vld [vmem:[%s20795_s21 + $0x11b4] ss:$8 sps:$4 sm:$0xff]   ;;  %v18400_v49 = vld [vmem:[%s20795_s21 + $0x10b0] ss:$8 sps:$4 sm:$0xff]   ;;  %v296_v54 = vld [vmem:[%s20809_s7 + $0x48] sm:$0xff] }
 0x25b   : > { %v13129_v59 = vpop.f32.mrf.mxu1  ;;  %13423 = vmatprep.subr.bf16.mxu1 %v18339_v14  ;;  %v13089_v60 = vadd.f32 %v13088_v36, %v21401_v57  ;;  %v21483_v61 = vadd.f32 %v13127_v55, %v13087_v43  ;;  %13412 = vmatprep.mubr.bf16.mxu0 %v1020_v52  ;;  %v18348_v57 = vld [vmem:[%s20795_s21 + $0x1044] ss:$8 sps:$4 sm:$0xff]   ;;  %v18403_v14 = vld [vmem:[%s20795_s21 + $0x11b0] ss:$8 sps:$4 sm:$0xff]   ;;  %v18409_v55 = vld [vmem:[%s20795_s21 + $0x11a0] ss:$8 sps:$4 sm:$0xff]  }
 0x25c   : > { %13453 = vmatprep.mubr.bf16.mxu1 %v1022_v53  ;;  %v13090_v62 = vpop.f32.mrf.mxu0  ;;  %v18411_v52 = vld [vmem:[%s20795_s21 + $0x11a4] ss:$8 sps:$4 sm:$0xff]   ;;  %v18406_v53 = vld [vmem:[%s20795_s21 + $0x10a0] ss:$8 sps:$4 sm:$0xff]   ;;  %v18417_v43 = vld [vmem:[%s20795_s21 + $0x1194] ss:$8 sps:$4 sm:$0xff]  }
 0x25d   : > { %v13131_v63 = vpop.f32.mrf.mxu1  ;;  %v21486_v15 = vadd.f32 %v13129_v59, %v13089_v60  ;;  %13383 = vmatpush1.bf16.msra.mxu0 %v18334_v51  ;;  %v18408_v51 = vld [vmem:[%s20795_s21 + $0x10a4] ss:$8 sps:$4 sm:$0xff]   ;;  %v18412_v36 = vld [vmem:[%s20795_s21 + $0x1090] ss:$8 sps:$4 sm:$0xff]   ;;  %v21541_v62 = vrot.slane %v296_v54, %v20860_v50 }
 0x25e   : > { %13424 = vmatpush1.bf16.msra.mxu1 %v18337_v6  ;;  %v13091_v0 = vpop.f32.mrf.mxu0  ;;  %13384 = vmatprep.subr.bf16.mxu0 %v18342_v56  ;;  %v18414_v6 = vld [vmem:[%s20795_s21 + $0x1094] ss:$8 sps:$4 sm:$0xff]   ;;  %v502_v56 = vcombine.high %v296_v54, %v296_v54  ;;  %v18415_v59 = vld [vmem:[%s20795_s21 + $0x1190] ss:$8 sps:$4 sm:$0xff]   ;;  %v18423_v60 = vld [vmem:[%s20795_s21 + $0x1184] ss:$8 sps:$4 sm:$0xff]  }
 0x25f   : > { %13425 = vmatprep.subr.bf16.mxu1 %v18345_v40  ;;  %v13132_v2 = vpop.f32.mrf.mxu1  ;;  %v18420_v40 = vld [vmem:[%s20795_s21 + $0x1084] ss:$8 sps:$4 sm:$0xff]   ;;  %v18418_v63 = vld [vmem:[%s20795_s21 + $0x1080] ss:$8 sps:$4 sm:$0xff]   ;;  %v18426_v0 = vld [vmem:[%s20795_s21 + $0x1274] ss:$8 sps:$4 sm:$0xff]  }
 0x260   : > { %v517_v2 = vcombine.high %v21541_v62, %v21541_v62  ;;  %v18470_v54 = vld [vmem:[%s20795_s21 + $0x1300] ss:$8 sps:$4 sm:$0xff]  }
 0x261   : > { %13385 = vmatpush1.bf16.msra.mxu0 %v18340_v31  ;;  %v21544_v31 = vrot.slane %v502_v56, %v20860_v50  ;;  %v18476_v56 = vld [vmem:[%s20795_s21 + $0x13f0] ss:$8 sps:$4 sm:$0xff]  }
 0x262   : > { %13426 = vmatpush1.bf16.msra.mxu1 %v18343_v16  ;;  %13386 = vmatprep.subr.bf16.mxu0 %v18348_v57  ;;  %v18421_v16 = vld [vmem:[%s20795_s21 + $0x1180] ss:$8 sps:$4 sm:$0xff]   ;;  %v18430_v57 = vld [vmem:[%s20795_s21 + $0x1374] ss:$8 sps:$4 sm:$0xff]  }
 0x263   : > { %13427 = vmatprep.subr.bf16.mxu1 %v18351_v1  ;;  %v18424_v1 = vld [vmem:[%s20795_s21 + $0x1270] ss:$8 sps:$4 sm:$0xff]  }
 0x265   : > { %13387 = vmatpush1.bf16.msra.mxu0 %v18346_v3  ;;  %v518_v3 = vcombine.high %v21544_v31, %v21544_v31 }
 0x266   : > { %13428 = vmatpush1.bf16.msra.mxu1 %v18349_v4  ;;  %13388 = vmatprep.subr.bf16.mxu0 %v18354_v7  ;;  %v1019_v4 = vpack.c.bf16 %v21456_v32, %v21456_v32  ;;  %v1021_v7 = vpack.c.bf16 %v21459_v5, %v21459_v5  ;;  %v18434_v32 = vld [vmem:[%s20795_s21 + $0x1360] ss:$8 sps:$4 sm:$0xff]  }
 0x267   : > { %13429 = vmatprep.subr.bf16.mxu1 %v18357_v41  ;;  %v18428_v41 = vld [vmem:[%s20795_s21 + $0x1370] ss:$8 sps:$4 sm:$0xff]  }
 0x269   : > { %13389 = vmatpush1.bf16.msra.mxu0 %v18352_v42  ;;  %v18433_v42 = vld [vmem:[%s20795_s21 + $0x1264] ss:$8 sps:$4 sm:$0xff]  }
 0x26a   : > { %13430 = vmatpush1.bf16.msra.mxu1 %v18355_v47  ;;  %13390 = vmatprep.subr.bf16.mxu0 %v18360_v10  ;;  %v18436_v47 = vld [vmem:[%s20795_s21 + $0x1364] ss:$8 sps:$4 sm:$0xff]   ;;  %v18431_v10 = vld [vmem:[%s20795_s21 + $0x1260] ss:$8 sps:$4 sm:$0xff]  }
 0x26b   : > { %13431 = vmatprep.subr.bf16.mxu1 %v18363_v11  ;;  %v1024_v11 = vpack.c.bf16 %v517_v2, %v517_v2  ;;  %v18496_v2 = vld [vmem:[%s20795_s21 + $0x13c4] ss:$8 sps:$4 sm:$0xff]  }
 0x26d   : > { %13391 = vmatpush1.bf16.msra.mxu0 %v18358_v12  ;;  %v1026_v12 = vpack.c.bf16 %v518_v3, %v518_v3  ;;  %v18491_v3 = vld [vmem:[%s20795_s21 + $0x12c0] ss:$8 sps:$4 sm:$0xff]  }
 0x26e   : > { %13432 = vmatpush1.bf16.msra.mxu1 %v18361_v13  ;;  %13392 = vmatprep.subr.bf16.mxu0 %v18366_v17 }
 0x26f   : > { %13433 = vmatprep.subr.bf16.mxu1 %v18369_v18  ;;  %v18439_v18 = vld [vmem:[%s20795_s21 + $0x1254] ss:$8 sps:$4 sm:$0xff]  }
 0x271   : > { %13393 = vmatpush1.bf16.msra.mxu0 %v18364_v19 }
 0x272   : > { %13434 = vmatpush1.bf16.msra.mxu1 %v18367_v20  ;;  %13394 = vmatprep.subr.bf16.mxu0 %v18372_v21  ;;  %v18442_v21 = vld [vmem:[%s20795_s21 + $0x1354] ss:$8 sps:$4 sm:$0xff]  }
 0x273   : > { %13435 = vmatprep.subr.bf16.mxu1 %v18375_v22 }
 0x275   : > { %13395 = vmatpush1.bf16.msra.mxu0 %v18370_v23 }
 0x276   : > { %13436 = vmatpush1.bf16.msra.mxu1 %v18373_v24  ;;  %13396 = vmatprep.subr.bf16.mxu0 %v18378_v25 }
 0x277   : > { %13437 = vmatprep.subr.bf16.mxu1 %v18381_v45 }
 0x279   : > { %13397 = vmatpush2.bf16.msra.mxu0 %v18376_v9  ;;  %v18440_v9 = vld [vmem:[%s20795_s21 + $0x1350] ss:$8 sps:$4 sm:$0xff]  }
 0x27a   : > { %13438 = vmatpush2.bf16.msra.mxu1 %v18379_v26  ;;  %13398 = vmatprep.subr.bf16.mxu0 %v18384_v27  ;;  %v18448_v27 = vld [vmem:[%s20795_s21 + $0x1344] ss:$8 sps:$4 sm:$0xff]  }
 0x27b   : > { %13439 = vmatprep.subr.bf16.mxu1 %v18387_v28 }
 0x27d   : > { %13399 = vmatpush2.bf16.msra.mxu0 %v18382_v29  ;;  %v18443_v29 = vld [vmem:[%s20795_s21 + $0x1240] ss:$8 sps:$4 sm:$0xff]  }
 0x27e   : > { %13440 = vmatpush2.bf16.msra.mxu1 %v18385_v30  ;;  %13400 = vmatprep.subr.bf16.mxu0 %v18390_v33  ;;  %v18446_v30 = vld [vmem:[%s20795_s21 + $0x1340] ss:$8 sps:$4 sm:$0xff]   ;;  %v18451_v33 = vld [vmem:[%s20795_s21 + $0x1234] ss:$8 sps:$4 sm:$0xff]  }
 0x27f   : > { %13441 = vmatprep.subr.bf16.mxu1 %v18393_v58  ;;  %v18454_v58 = vld [vmem:[%s20795_s21 + $0x1334] ss:$8 sps:$4 sm:$0xff]  }
 0x281   : > { %13401 = vmatpush2.bf16.msra.mxu0 %v18388_v34  ;;  %v18449_v34 = vld [vmem:[%s20795_s21 + $0x1230] ss:$8 sps:$4 sm:$0xff]  }
 0x282   : > { %13442 = vmatpush2.bf16.msra.mxu1 %v18391_v8  ;;  %13402 = vmatprep.subr.bf16.mxu0 %v18396_v35  ;;  %v18452_v8 = vld [vmem:[%s20795_s21 + $0x1330] ss:$8 sps:$4 sm:$0xff]   ;;  %v18457_v35 = vld [vmem:[%s20795_s21 + $0x1224] ss:$8 sps:$4 sm:$0xff]  }
 0x283   : > { %13443 = vmatprep.subr.bf16.mxu1 %v18399_v37  ;;  %v18460_v37 = vld [vmem:[%s20795_s21 + $0x1324] ss:$8 sps:$4 sm:$0xff]  }
 0x285   : > { %13403 = vmatpush2.bf16.msra.mxu0 %v18394_v38  ;;  %v18455_v38 = vld [vmem:[%s20795_s21 + $0x1220] ss:$8 sps:$4 sm:$0xff]  }
 0x286   : > { %13444 = vmatpush2.bf16.msra.mxu1 %v18397_v39  ;;  %13404 = vmatprep.subr.bf16.mxu0 %v18402_v46  ;;  %v18458_v39 = vld [vmem:[%s20795_s21 + $0x1320] ss:$8 sps:$4 sm:$0xff]   ;;  %v18463_v46 = vld [vmem:[%s20795_s21 + $0x1214] ss:$8 sps:$4 sm:$0xff]  }
 0x287   : > { %13445 = vmatprep.subr.bf16.mxu1 %v18405_v48  ;;  %v18466_v48 = vld [vmem:[%s20795_s21 + $0x1314] ss:$8 sps:$4 sm:$0xff]  }
 0x289   : > { %13405 = vmatpush2.bf16.msra.mxu0 %v18400_v49  ;;  %v18461_v49 = vld [vmem:[%s20795_s21 + $0x1210] ss:$8 sps:$4 sm:$0xff]  }
 0x28a   : > { %13446 = vmatpush2.bf16.msra.mxu1 %v18403_v14  ;;  %13406 = vmatprep.subr.bf16.mxu0 %v18408_v51  ;;  %v18464_v14 = vld [vmem:[%s20795_s21 + $0x1310] ss:$8 sps:$4 sm:$0xff]   ;;  %v18469_v51 = vld [vmem:[%s20795_s21 + $0x1204] ss:$8 sps:$4 sm:$0xff]  }
 0x28b   : > { %13447 = vmatprep.subr.bf16.mxu1 %v18411_v52  ;;  %v18472_v52 = vld [vmem:[%s20795_s21 + $0x1304] ss:$8 sps:$4 sm:$0xff]  }
 0x28d   : > { %13407 = vmatpush2.bf16.msra.mxu0 %v18406_v53  ;;  %v18467_v53 = vld [vmem:[%s20795_s21 + $0x1200] ss:$8 sps:$4 sm:$0xff]  }
 0x28e   : > { %13448 = vmatpush2.bf16.msra.mxu1 %v18409_v55  ;;  %13408 = vmatprep.subr.bf16.mxu0 %v18414_v6  ;;  %v18475_v55 = vld [vmem:[%s20795_s21 + $0x12f4] ss:$8 sps:$4 sm:$0xff]  }
 0x28f   : > { %13449 = vmatprep.subr.bf16.mxu1 %v18417_v43  ;;  %v18478_v6 = vld [vmem:[%s20795_s21 + $0x13f4] ss:$8 sps:$4 sm:$0xff]   ;;  %v18473_v43 = vld [vmem:[%s20795_s21 + $0x12f0] ss:$8 sps:$4 sm:$0xff]  }
 0x291   : > { %13409 = vmatpush2.bf16.msra.mxu0 %v18412_v36  ;;  %v18481_v36 = vld [vmem:[%s20795_s21 + $0x12e4] ss:$8 sps:$4 sm:$0xff]  }
 0x292   : > { %13450 = vmatpush2.bf16.msra.mxu1 %v18415_v59  ;;  %13410 = vmatprep.subr.bf16.mxu0 %v18420_v40  ;;  %v18484_v59 = vld [vmem:[%s20795_s21 + $0x13e4] ss:$8 sps:$4 sm:$0xff]   ;;  %v18479_v40 = vld [vmem:[%s20795_s21 + $0x12e0] ss:$8 sps:$4 sm:$0xff]  }
 0x293   : > { %13451 = vmatprep.subr.bf16.mxu1 %v18423_v60  ;;  %v18482_v60 = vld [vmem:[%s20795_s21 + $0x13e0] ss:$8 sps:$4 sm:$0xff]  }
 0x295   : > { %13411 = vmatpush2.bf16.msra.mxu0 %v18418_v63  ;;  %v18487_v63 = vld [vmem:[%s20795_s21 + $0x12d4] ss:$8 sps:$4 sm:$0xff]  }
 0x296   : > { %13452 = vmatpush2.bf16.msra.mxu1 %v18421_v16  ;;  %13462 = vmatprep.subr.bf16.mxu0 %v18426_v0  ;;  %v18490_v16 = vld [vmem:[%s20795_s21 + $0x13d4] ss:$8 sps:$4 sm:$0xff]   ;;  %v18485_v0 = vld [vmem:[%s20795_s21 + $0x12d0] ss:$8 sps:$4 sm:$0xff]  }
 0x297   : > { %13503 = vmatprep.subr.bf16.mxu1 %v18430_v57  ;;  %v18488_v57 = vld [vmem:[%s20795_s21 + $0x13d0] ss:$8 sps:$4 sm:$0xff]  }
 0x298   : > { %v13168_v13 = vpop.f32.mrf.mxu0  ;;  %13413 = vmatmul.mubr.bf16.vlgmr.msra.gmra.mxu0 %v1019_v4  ;;  %v18494_v4 = vld [vmem:[%s20795_s21 + $0x13c0] ss:$8 sps:$4 sm:$0xff]  }
 0x299   : > { %v13209_v17 = vpop.f32.mrf.mxu1  ;;  %13454 = vmatmul.mubr.bf16.vlgmr.msra.gmra.mxu1 %v1021_v7  ;;  %v13169_v5 = vadd.f32 %v13168_v13, %v21483_v61  ;;  %13463 = vmatpush1.bf16.msra.mxu0 %v18424_v1  ;;  %v18437_v61 = vld [vmem:[%s20795_s21 + $0x1250] ss:$8 sps:$4 sm:$0xff]   ;;  %v18493_v1 = vld [vmem:[%s20795_s21 + $0x12c4] ss:$8 sps:$4 sm:$0xff]   ;;  %v18499_v7 = vld [vmem:[%s20795_s21 + $0x12b4] ss:$8 sps:$4 sm:$0xff]  }
 0x29a   : > { %13504 = vmatpush1.bf16.msra.mxu1 %v18428_v41  ;;  %v13170_v19 = vpop.f32.mrf.mxu0  ;;  %13464 = vmatprep.subr.bf16.mxu0 %v18433_v42  ;;  %v18502_v41 = vld [vmem:[%s20795_s21 + $0x13b4] ss:$8 sps:$4 sm:$0xff]   ;;  %v18497_v42 = vld [vmem:[%s20795_s21 + $0x12b0] ss:$8 sps:$4 sm:$0xff]  }
 0x29b   : > { %v13211_v20 = vpop.f32.mrf.mxu1  ;;  %13505 = vmatprep.subr.bf16.mxu1 %v18436_v47  ;;  %v13171_v22 = vadd.f32 %v13170_v19, %v21486_v15  ;;  %v21568_v23 = vadd.f32 %v13209_v17, %v13169_v5  ;;  %13494 = vmatprep.mubr.bf16.mxu0 %v1024_v11  ;;  %v18445_v15 = vld [vmem:[%s20795_s21 + $0x1244] ss:$8 sps:$4 sm:$0xff]   ;;  %v18500_v47 = vld [vmem:[%s20795_s21 + $0x13b0] ss:$8 sps:$4 sm:$0xff]   ;;  %v18506_v17 = vld [vmem:[%s20795_s21 + $0x13a0] ss:$8 sps:$4 sm:$0xff]  }
 0x29c   : > { %13535 = vmatprep.mubr.bf16.mxu1 %v1026_v12  ;;  %v13172_v24 = vpop.f32.mrf.mxu0  ;;  %v18508_v11 = vld [vmem:[%s20795_s21 + $0x13a4] ss:$8 sps:$4 sm:$0xff]   ;;  %v18503_v12 = vld [vmem:[%s20795_s21 + $0x12a0] ss:$8 sps:$4 sm:$0xff]   ;;  %v18514_v5 = vld [vmem:[%s20795_s21 + $0x1394] ss:$8 sps:$4 sm:$0xff]  }
 0x29d   : > { %v13213_v25 = vpop.f32.mrf.mxu1  ;;  %v21571_v45 = vadd.f32 %v13211_v20, %v13171_v22  ;;  %13465 = vmatpush1.bf16.msra.mxu0 %v18431_v10  ;;  %v18505_v10 = vld [vmem:[%s20795_s21 + $0x12a4] ss:$8 sps:$4 sm:$0xff]   ;;  %v18509_v19 = vld [vmem:[%s20795_s21 + $0x1290] ss:$8 sps:$4 sm:$0xff]  }
 0x29e   : > { %13506 = vmatpush1.bf16.msra.mxu1 %v18434_v32  ;;  %v13173_v26 = vpop.f32.mrf.mxu0  ;;  %13466 = vmatprep.subr.bf16.mxu0 %v18439_v18  ;;  %v297_v13 = vld [vmem:[%s20809_s7 + $0x50] sm:$0xff]  ;;  %v18511_v32 = vld [vmem:[%s20795_s21 + $0x1294] ss:$8 sps:$4 sm:$0xff]   ;;  %v18515_v25 = vld [vmem:[%s20795_s21 + $0x1280] ss:$8 sps:$4 sm:$0xff]  }
 0x29f   : > { %13507 = vmatprep.subr.bf16.mxu1 %v18442_v21  ;;  %v13214_v28 = vpop.f32.mrf.mxu1  ;;  %v519_v18 = vcombine.high %v297_v13, %v297_v13  ;;  %v18512_v20 = vld [vmem:[%s20795_s21 + $0x1390] ss:$8 sps:$4 sm:$0xff]   ;;  %v18517_v21 = vld [vmem:[%s20795_s21 + $0x1284] ss:$8 sps:$4 sm:$0xff]   ;;  %v21626_v24 = vrot.slane %v297_v13, %v20860_v50  ;;  %v18523_v26 = vld [vmem:[%s20795_s21 + $0x1474] ss:$8 sps:$4 sm:$0xff]  }
 0x2a0   : > { %v18520_v22 = vld [vmem:[%s20795_s21 + $0x1384] ss:$8 sps:$4 sm:$0xff]   ;;  %v18567_v13 = vld [vmem:[%s20795_s21 + $0x1500] ss:$8 sps:$4 sm:$0xff]  }
 0x2a1   : > { %13467 = vmatpush1.bf16.msra.mxu0 %v18437_v61  ;;  %v21629_v61 = vrot.slane %v519_v18, %v20860_v50  ;;  %v534_v28 = vcombine.high %v21626_v24, %v21626_v24  ;;  %v18573_v18 = vld [vmem:[%s20795_s21 + $0x15f0] ss:$8 sps:$4 sm:$0xff]  }
 0x2a2   : > { %13508 = vmatpush1.bf16.msra.mxu1 %v18440_v9  ;;  %13468 = vmatprep.subr.bf16.mxu0 %v18445_v15  ;;  %v18518_v9 = vld [vmem:[%s20795_s21 + $0x1380] ss:$8 sps:$4 sm:$0xff]   ;;  %v18527_v15 = vld [vmem:[%s20795_s21 + $0x1574] ss:$8 sps:$4 sm:$0xff]  }
 0x2a3   : > { %13509 = vmatprep.subr.bf16.mxu1 %v18448_v27  ;;  %v18521_v27 = vld [vmem:[%s20795_s21 + $0x1470] ss:$8 sps:$4 sm:$0xff]  }
 0x2a5   : > { %13469 = vmatpush1.bf16.msra.mxu0 %v18443_v29  ;;  %v535_v29 = vcombine.high %v21629_v61, %v21629_v61 }
 0x2a6   : > { %13510 = vmatpush1.bf16.msra.mxu1 %v18446_v30  ;;  %13470 = vmatprep.subr.bf16.mxu0 %v18451_v33  ;;  %v1023_v30 = vpack.c.bf16 %v21541_v62, %v21541_v62  ;;  %v1025_v33 = vpack.c.bf16 %v21544_v31, %v21544_v31  ;;  %v18531_v62 = vld [vmem:[%s20795_s21 + $0x1560] ss:$8 sps:$4 sm:$0xff]  }
 0x2a7   : > { %13511 = vmatprep.subr.bf16.mxu1 %v18454_v58  ;;  %v18525_v58 = vld [vmem:[%s20795_s21 + $0x1570] ss:$8 sps:$4 sm:$0xff]  }
 0x2a9   : > { %13471 = vmatpush1.bf16.msra.mxu0 %v18449_v34  ;;  %v18530_v34 = vld [vmem:[%s20795_s21 + $0x1464] ss:$8 sps:$4 sm:$0xff]  }
 0x2aa   : > { %13512 = vmatpush1.bf16.msra.mxu1 %v18452_v8  ;;  %13472 = vmatprep.subr.bf16.mxu0 %v18457_v35  ;;  %v18533_v8 = vld [vmem:[%s20795_s21 + $0x1564] ss:$8 sps:$4 sm:$0xff]   ;;  %v18528_v35 = vld [vmem:[%s20795_s21 + $0x1460] ss:$8 sps:$4 sm:$0xff]  }
 0x2ab   : > { %13513 = vmatprep.subr.bf16.mxu1 %v18460_v37  ;;  %v1028_v37 = vpack.c.bf16 %v534_v28, %v534_v28  ;;  %v18593_v28 = vld [vmem:[%s20795_s21 + $0x15c4] ss:$8 sps:$4 sm:$0xff]  }
 0x2ad   : > { %13473 = vmatpush1.bf16.msra.mxu0 %v18455_v38  ;;  %v1030_v38 = vpack.c.bf16 %v535_v29, %v535_v29  ;;  %v18588_v29 = vld [vmem:[%s20795_s21 + $0x14c0] ss:$8 sps:$4 sm:$0xff]  }
 0x2ae   : > { %13514 = vmatpush1.bf16.msra.mxu1 %v18458_v39  ;;  %13474 = vmatprep.subr.bf16.mxu0 %v18463_v46 }
 0x2af   : > { %13515 = vmatprep.subr.bf16.mxu1 %v18466_v48  ;;  %v18536_v48 = vld [vmem:[%s20795_s21 + $0x1454] ss:$8 sps:$4 sm:$0xff]  }
 0x2b1   : > { %13475 = vmatpush1.bf16.msra.mxu0 %v18461_v49 }
 0x2b2   : > { %13516 = vmatpush1.bf16.msra.mxu1 %v18464_v14  ;;  %13476 = vmatprep.subr.bf16.mxu0 %v18469_v51  ;;  %v18539_v51 = vld [vmem:[%s20795_s21 + $0x1554] ss:$8 sps:$4 sm:$0xff]  }
 0x2b3   : > { %13517 = vmatprep.subr.bf16.mxu1 %v18472_v52 }
 0x2b5   : > { %13477 = vmatpush1.bf16.msra.mxu0 %v18467_v53 }
 0x2b6   : > { %13518 = vmatpush1.bf16.msra.mxu1 %v18470_v54  ;;  %13478 = vmatprep.subr.bf16.mxu0 %v18475_v55 }
 0x2b7   : > { %13519 = vmatprep.subr.bf16.mxu1 %v18478_v6 }
 0x2b9   : > { %13479 = vmatpush2.bf16.msra.mxu0 %v18473_v43  ;;  %v18537_v43 = vld [vmem:[%s20795_s21 + $0x1550] ss:$8 sps:$4 sm:$0xff]  }
 0x2ba   : > { %13520 = vmatpush2.bf16.msra.mxu1 %v18476_v56  ;;  %13480 = vmatprep.subr.bf16.mxu0 %v18481_v36  ;;  %v18545_v36 = vld [vmem:[%s20795_s21 + $0x1544] ss:$8 sps:$4 sm:$0xff]  }
 0x2bb   : > { %13521 = vmatprep.subr.bf16.mxu1 %v18484_v59 }
 0x2bd   : > { %13481 = vmatpush2.bf16.msra.mxu0 %v18479_v40  ;;  %v18540_v40 = vld [vmem:[%s20795_s21 + $0x1440] ss:$8 sps:$4 sm:$0xff]  }
 0x2be   : > { %13522 = vmatpush2.bf16.msra.mxu1 %v18482_v60  ;;  %13482 = vmatprep.subr.bf16.mxu0 %v18487_v63  ;;  %v18543_v60 = vld [vmem:[%s20795_s21 + $0x1540] ss:$8 sps:$4 sm:$0xff]   ;;  %v18548_v63 = vld [vmem:[%s20795_s21 + $0x1434] ss:$8 sps:$4 sm:$0xff]  }
 0x2bf   : > { %13523 = vmatprep.subr.bf16.mxu1 %v18490_v16  ;;  %v18551_v16 = vld [vmem:[%s20795_s21 + $0x1534] ss:$8 sps:$4 sm:$0xff]  }
 0x2c1   : > { %13483 = vmatpush2.bf16.msra.mxu0 %v18485_v0  ;;  %v18546_v0 = vld [vmem:[%s20795_s21 + $0x1430] ss:$8 sps:$4 sm:$0xff]  }
 0x2c2   : > { %13524 = vmatpush2.bf16.msra.mxu1 %v18488_v57  ;;  %13484 = vmatprep.subr.bf16.mxu0 %v18493_v1  ;;  %v18549_v57 = vld [vmem:[%s20795_s21 + $0x1530] ss:$8 sps:$4 sm:$0xff]   ;;  %v18554_v1 = vld [vmem:[%s20795_s21 + $0x1424] ss:$8 sps:$4 sm:$0xff]  }
 0x2c3   : > { %13525 = vmatprep.subr.bf16.mxu1 %v18496_v2  ;;  %v18557_v2 = vld [vmem:[%s20795_s21 + $0x1524] ss:$8 sps:$4 sm:$0xff]  }
 0x2c5   : > { %13485 = vmatpush2.bf16.msra.mxu0 %v18491_v3  ;;  %v18552_v3 = vld [vmem:[%s20795_s21 + $0x1420] ss:$8 sps:$4 sm:$0xff]  }
 0x2c6   : > { %13526 = vmatpush2.bf16.msra.mxu1 %v18494_v4  ;;  %13486 = vmatprep.subr.bf16.mxu0 %v18499_v7  ;;  %v18555_v4 = vld [vmem:[%s20795_s21 + $0x1520] ss:$8 sps:$4 sm:$0xff]   ;;  %v18560_v7 = vld [vmem:[%s20795_s21 + $0x1414] ss:$8 sps:$4 sm:$0xff]  }
 0x2c7   : > { %13527 = vmatprep.subr.bf16.mxu1 %v18502_v41  ;;  %v18563_v41 = vld [vmem:[%s20795_s21 + $0x1514] ss:$8 sps:$4 sm:$0xff]  }
 0x2c9   : > { %13487 = vmatpush2.bf16.msra.mxu0 %v18497_v42  ;;  %v18558_v42 = vld [vmem:[%s20795_s21 + $0x1410] ss:$8 sps:$4 sm:$0xff]  }
 0x2ca   : > { %13528 = vmatpush2.bf16.msra.mxu1 %v18500_v47  ;;  %13488 = vmatprep.subr.bf16.mxu0 %v18505_v10  ;;  %v18561_v47 = vld [vmem:[%s20795_s21 + $0x1510] ss:$8 sps:$4 sm:$0xff]   ;;  %v18566_v10 = vld [vmem:[%s20795_s21 + $0x1404] ss:$8 sps:$4 sm:$0xff]  }
 0x2cb   : > { %13529 = vmatprep.subr.bf16.mxu1 %v18508_v11  ;;  %v18569_v11 = vld [vmem:[%s20795_s21 + $0x1504] ss:$8 sps:$4 sm:$0xff]  }
 0x2cd   : > { %13489 = vmatpush2.bf16.msra.mxu0 %v18503_v12  ;;  %v18564_v12 = vld [vmem:[%s20795_s21 + $0x1400] ss:$8 sps:$4 sm:$0xff]  }
 0x2ce   : > { %13530 = vmatpush2.bf16.msra.mxu1 %v18506_v17  ;;  %13490 = vmatprep.subr.bf16.mxu0 %v18511_v32  ;;  %v18572_v17 = vld [vmem:[%s20795_s21 + $0x14f4] ss:$8 sps:$4 sm:$0xff]  }
 0x2cf   : > { %13531 = vmatprep.subr.bf16.mxu1 %v18514_v5  ;;  %v18575_v32 = vld [vmem:[%s20795_s21 + $0x15f4] ss:$8 sps:$4 sm:$0xff]   ;;  %v18570_v5 = vld [vmem:[%s20795_s21 + $0x14f0] ss:$8 sps:$4 sm:$0xff]  }
 0x2d1   : > { %13491 = vmatpush2.bf16.msra.mxu0 %v18509_v19  ;;  %v18578_v19 = vld [vmem:[%s20795_s21 + $0x14e4] ss:$8 sps:$4 sm:$0xff]  }
 0x2d2   : > { %13532 = vmatpush2.bf16.msra.mxu1 %v18512_v20  ;;  %13492 = vmatprep.subr.bf16.mxu0 %v18517_v21  ;;  %v18581_v20 = vld [vmem:[%s20795_s21 + $0x15e4] ss:$8 sps:$4 sm:$0xff]   ;;  %v18576_v21 = vld [vmem:[%s20795_s21 + $0x14e0] ss:$8 sps:$4 sm:$0xff]  }
 0x2d3   : > { %13533 = vmatprep.subr.bf16.mxu1 %v18520_v22  ;;  %v18579_v22 = vld [vmem:[%s20795_s21 + $0x15e0] ss:$8 sps:$4 sm:$0xff]  }
 0x2d5   : > { %13493 = vmatpush2.bf16.msra.mxu0 %v18515_v25  ;;  %v18584_v25 = vld [vmem:[%s20795_s21 + $0x14d4] ss:$8 sps:$4 sm:$0xff]  }
 0x2d6   : > { %13534 = vmatpush2.bf16.msra.mxu1 %v18518_v9  ;;  %13544 = vmatprep.subr.bf16.mxu0 %v18523_v26  ;;  %v18587_v9 = vld [vmem:[%s20795_s21 + $0x15d4] ss:$8 sps:$4 sm:$0xff]   ;;  %v18582_v26 = vld [vmem:[%s20795_s21 + $0x14d0] ss:$8 sps:$4 sm:$0xff]  }
 0x2d7   : > { %13585 = vmatprep.subr.bf16.mxu1 %v18527_v15  ;;  %v18585_v15 = vld [vmem:[%s20795_s21 + $0x15d0] ss:$8 sps:$4 sm:$0xff]  }
 0x2d8   : > { %v13250_v39 = vpop.f32.mrf.mxu0  ;;  %13495 = vmatmul.mubr.bf16.vlgmr.msra.gmra.mxu0 %v1023_v30  ;;  %v18591_v30 = vld [vmem:[%s20795_s21 + $0x15c0] ss:$8 sps:$4 sm:$0xff]  }
 0x2d9   : > { %v13291_v46 = vpop.f32.mrf.mxu1  ;;  %13536 = vmatmul.mubr.bf16.vlgmr.msra.gmra.mxu1 %v1025_v33  ;;  %v13251_v31 = vadd.f32 %v13250_v39, %v21568_v23  ;;  %13545 = vmatpush1.bf16.msra.mxu0 %v18521_v27  ;;  %v18534_v23 = vld [vmem:[%s20795_s21 + $0x1450] ss:$8 sps:$4 sm:$0xff]   ;;  %v18590_v27 = vld [vmem:[%s20795_s21 + $0x14c4] ss:$8 sps:$4 sm:$0xff]   ;;  %v18596_v33 = vld [vmem:[%s20795_s21 + $0x14b4] ss:$8 sps:$4 sm:$0xff]  }
 0x2da   : > { %13586 = vmatpush1.bf16.msra.mxu1 %v18525_v58  ;;  %v13252_v49 = vpop.f32.mrf.mxu0  ;;  %13546 = vmatprep.subr.bf16.mxu0 %v18530_v34  ;;  %v18599_v58 = vld [vmem:[%s20795_s21 + $0x15b4] ss:$8 sps:$4 sm:$0xff]   ;;  %v18594_v34 = vld [vmem:[%s20795_s21 + $0x14b0] ss:$8 sps:$4 sm:$0xff]  }
 0x2db   : > { %v13293_v14 = vpop.f32.mrf.mxu1  ;;  %13587 = vmatprep.subr.bf16.mxu1 %v18533_v8  ;;  %v13253_v52 = vadd.f32 %v13252_v49, %v21571_v45  ;;  %v21653_v53 = vadd.f32 %v13291_v46, %v13251_v31  ;;  %13576 = vmatprep.mubr.bf16.mxu0 %v1028_v37  ;;  %v18542_v45 = vld [vmem:[%s20795_s21 + $0x1444] ss:$8 sps:$4 sm:$0xff]   ;;  %v18597_v8 = vld [vmem:[%s20795_s21 + $0x15b0] ss:$8 sps:$4 sm:$0xff]   ;;  %v18603_v46 = vld [vmem:[%s20795_s21 + $0x15a0] ss:$8 sps:$4 sm:$0xff]  }
 0x2dc   : > { %13617 = vmatprep.mubr.bf16.mxu1 %v1030_v38  ;;  %v13254_v54 = vpop.f32.mrf.mxu0  ;;  %v18605_v37 = vld [vmem:[%s20795_s21 + $0x15a4] ss:$8 sps:$4 sm:$0xff]   ;;  %v18600_v38 = vld [vmem:[%s20795_s21 + $0x14a0] ss:$8 sps:$4 sm:$0xff]   ;;  %v298_v39 = vld [vmem:[%s20809_s7 + $0x58] sm:$0xff] }
 0x2dd   : > { %v13295_v55 = vpop.f32.mrf.mxu1  ;;  %v21656_v6 = vadd.f32 %v13293_v14, %v13253_v52  ;;  %13547 = vmatpush1.bf16.msra.mxu0 %v18528_v35  ;;  %v18602_v35 = vld [vmem:[%s20795_s21 + $0x14a4] ss:$8 sps:$4 sm:$0xff]   ;;  %v18611_v31 = vld [vmem:[%s20795_s21 + $0x1594] ss:$8 sps:$4 sm:$0xff]   ;;  %v18606_v49 = vld [vmem:[%s20795_s21 + $0x1490] ss:$8 sps:$4 sm:$0xff]   ;;  %v21711_v54 = vrot.slane %v298_v39, %v20860_v50 }
 0x2de   : > { %13588 = vmatpush1.bf16.msra.mxu1 %v18531_v62  ;;  %v13255_v56 = vpop.f32.mrf.mxu0  ;;  %13548 = vmatprep.subr.bf16.mxu0 %v18536_v48  ;;  %v18608_v62 = vld [vmem:[%s20795_s21 + $0x1494] ss:$8 sps:$4 sm:$0xff]   ;;  %v536_v48 = vcombine.high %v298_v39, %v298_v39  ;;  %v18609_v14 = vld [vmem:[%s20795_s21 + $0x1590] ss:$8 sps:$4 sm:$0xff]   ;;  %v18617_v52 = vld [vmem:[%s20795_s21 + $0x1584] ss:$8 sps:$4 sm:$0xff]  }
 0x2df   : > { %13589 = vmatprep.subr.bf16.mxu1 %v18539_v51  ;;  %v13296_v59 = vpop.f32.mrf.mxu1  ;;  %v18614_v51 = vld [vmem:[%s20795_s21 + $0x1484] ss:$8 sps:$4 sm:$0xff]   ;;  %v18612_v55 = vld [vmem:[%s20795_s21 + $0x1480] ss:$8 sps:$4 sm:$0xff]   ;;  %v18620_v56 = vld [vmem:[%s20795_s21 + $0x1674] ss:$8 sps:$4 sm:$0xff]  }
 0x2e0   : > { %v551_v59 = vcombine.high %v21711_v54, %v21711_v54  ;;  %v18664_v39 = vld [vmem:[%s20795_s21 + $0x1700] ss:$8 sps:$4 sm:$0xff]  }
 0x2e1   : > { %13549 = vmatpush1.bf16.msra.mxu0 %v18534_v23  ;;  %v21714_v23 = vrot.slane %v536_v48, %v20860_v50  ;;  %v18670_v48 = vld [vmem:[%s20795_s21 + $0x17f0] ss:$8 sps:$4 sm:$0xff]  }
 0x2e2   : > { %13590 = vmatpush1.bf16.msra.mxu1 %v18537_v43  ;;  %13550 = vmatprep.subr.bf16.mxu0 %v18542_v45  ;;  %v18615_v43 = vld [vmem:[%s20795_s21 + $0x1580] ss:$8 sps:$4 sm:$0xff]   ;;  %v18624_v45 = vld [vmem:[%s20795_s21 + $0x1774] ss:$8 sps:$4 sm:$0xff]  }
 0x2e3   : > { %13591 = vmatprep.subr.bf16.mxu1 %v18545_v36  ;;  %v18618_v36 = vld [vmem:[%s20795_s21 + $0x1670] ss:$8 sps:$4 sm:$0xff]  }
 0x2e5   : > { %13551 = vmatpush1.bf16.msra.mxu0 %v18540_v40  ;;  %v552_v40 = vcombine.high %v21714_v23, %v21714_v23 }
 0x2e6   : > { %13592 = vmatpush1.bf16.msra.mxu1 %v18543_v60  ;;  %13552 = vmatprep.subr.bf16.mxu0 %v18548_v63  ;;  %v1027_v60 = vpack.c.bf16 %v21626_v24, %v21626_v24  ;;  %v1029_v63 = vpack.c.bf16 %v21629_v61, %v21629_v61  ;;  %v18628_v24 = vld [vmem:[%s20795_s21 + $0x1760] ss:$8 sps:$4 sm:$0xff]  }
 0x2e7   : > { %13593 = vmatprep.subr.bf16.mxu1 %v18551_v16  ;;  %v18622_v16 = vld [vmem:[%s20795_s21 + $0x1770] ss:$8 sps:$4 sm:$0xff]  }
 0x2e9   : > { %13553 = vmatpush1.bf16.msra.mxu0 %v18546_v0  ;;  %v18627_v0 = vld [vmem:[%s20795_s21 + $0x1664] ss:$8 sps:$4 sm:$0xff]  }
 0x2ea   : > { %13594 = vmatpush1.bf16.msra.mxu1 %v18549_v57  ;;  %13554 = vmatprep.subr.bf16.mxu0 %v18554_v1  ;;  %v18630_v57 = vld [vmem:[%s20795_s21 + $0x1764] ss:$8 sps:$4 sm:$0xff]   ;;  %v18625_v1 = vld [vmem:[%s20795_s21 + $0x1660] ss:$8 sps:$4 sm:$0xff]  }
 0x2eb   : > { %13595 = vmatprep.subr.bf16.mxu1 %v18557_v2  ;;  %v1032_v2 = vpack.c.bf16 %v551_v59, %v551_v59  ;;  %v18690_v59 = vld [vmem:[%s20795_s21 + $0x17c4] ss:$8 sps:$4 sm:$0xff]  }
 0x2ed   : > { %13555 = vmatpush1.bf16.msra.mxu0 %v18552_v3  ;;  %v1034_v3 = vpack.c.bf16 %v552_v40, %v552_v40  ;;  %v18685_v40 = vld [vmem:[%s20795_s21 + $0x16c0] ss:$8 sps:$4 sm:$0xff]  }
 0x2ee   : > { %13596 = vmatpush1.bf16.msra.mxu1 %v18555_v4  ;;  %13556 = vmatprep.subr.bf16.mxu0 %v18560_v7 }
 0x2ef   : > { %13597 = vmatprep.subr.bf16.mxu1 %v18563_v41  ;;  %v18633_v41 = vld [vmem:[%s20795_s21 + $0x1654] ss:$8 sps:$4 sm:$0xff]  }
 0x2f1   : > { %13557 = vmatpush1.bf16.msra.mxu0 %v18558_v42 }
 0x2f2   : > { %13598 = vmatpush1.bf16.msra.mxu1 %v18561_v47  ;;  %13558 = vmatprep.subr.bf16.mxu0 %v18566_v10  ;;  %v18636_v10 = vld [vmem:[%s20795_s21 + $0x1754] ss:$8 sps:$4 sm:$0xff]  }
 0x2f3   : > { %13599 = vmatprep.subr.bf16.mxu1 %v18569_v11 }
 0x2f5   : > { %13559 = vmatpush1.bf16.msra.mxu0 %v18564_v12 }
 0x2f6   : > { %13600 = vmatpush1.bf16.msra.mxu1 %v18567_v13  ;;  %13560 = vmatprep.subr.bf16.mxu0 %v18572_v17 }
 0x2f7   : > { %13601 = vmatprep.subr.bf16.mxu1 %v18575_v32 }
 0x2f9   : > { %13561 = vmatpush2.bf16.msra.mxu0 %v18570_v5  ;;  %v18634_v5 = vld [vmem:[%s20795_s21 + $0x1750] ss:$8 sps:$4 sm:$0xff]  }
 0x2fa   : > { %13602 = vmatpush2.bf16.msra.mxu1 %v18573_v18  ;;  %13562 = vmatprep.subr.bf16.mxu0 %v18578_v19  ;;  %v18642_v19 = vld [vmem:[%s20795_s21 + $0x1744] ss:$8 sps:$4 sm:$0xff]  }
 0x2fb   : > { %13603 = vmatprep.subr.bf16.mxu1 %v18581_v20 }
 0x2fd   : > { %13563 = vmatpush2.bf16.msra.mxu0 %v18576_v21  ;;  %v18637_v21 = vld [vmem:[%s20795_s21 + $0x1640] ss:$8 sps:$4 sm:$0xff]  }
 0x2fe   : > { %13604 = vmatpush2.bf16.msra.mxu1 %v18579_v22  ;;  %13564 = vmatprep.subr.bf16.mxu0 %v18584_v25  ;;  %v18640_v22 = vld [vmem:[%s20795_s21 + $0x1740] ss:$8 sps:$4 sm:$0xff]   ;;  %v18645_v25 = vld [vmem:[%s20795_s21 + $0x1634] ss:$8 sps:$4 sm:$0xff]  }
 0x2ff   : > { %13605 = vmatprep.subr.bf16.mxu1 %v18587_v9  ;;  %v18648_v9 = vld [vmem:[%s20795_s21 + $0x1734] ss:$8 sps:$4 sm:$0xff]  }
 0x301   : > { %13565 = vmatpush2.bf16.msra.mxu0 %v18582_v26  ;;  %v18643_v26 = vld [vmem:[%s20795_s21 + $0x1630] ss:$8 sps:$4 sm:$0xff]  }
 0x302   : > { %13606 = vmatpush2.bf16.msra.mxu1 %v18585_v15  ;;  %13566 = vmatprep.subr.bf16.mxu0 %v18590_v27  ;;  %v18646_v15 = vld [vmem:[%s20795_s21 + $0x1730] ss:$8 sps:$4 sm:$0xff]   ;;  %v18651_v27 = vld [vmem:[%s20795_s21 + $0x1624] ss:$8 sps:$4 sm:$0xff]  }
 0x303   : > { %13607 = vmatprep.subr.bf16.mxu1 %v18593_v28  ;;  %v18654_v28 = vld [vmem:[%s20795_s21 + $0x1724] ss:$8 sps:$4 sm:$0xff]  }
 0x305   : > { %13567 = vmatpush2.bf16.msra.mxu0 %v18588_v29  ;;  %v18649_v29 = vld [vmem:[%s20795_s21 + $0x1620] ss:$8 sps:$4 sm:$0xff]  }
 0x306   : > { %13608 = vmatpush2.bf16.msra.mxu1 %v18591_v30  ;;  %13568 = vmatprep.subr.bf16.mxu0 %v18596_v33  ;;  %v18652_v30 = vld [vmem:[%s20795_s21 + $0x1720] ss:$8 sps:$4 sm:$0xff]   ;;  %v18657_v33 = vld [vmem:[%s20795_s21 + $0x1614] ss:$8 sps:$4 sm:$0xff]  }
 0x307   : > { %13609 = vmatprep.subr.bf16.mxu1 %v18599_v58  ;;  %v18660_v58 = vld [vmem:[%s20795_s21 + $0x1714] ss:$8 sps:$4 sm:$0xff]  }
 0x309   : > { %13569 = vmatpush2.bf16.msra.mxu0 %v18594_v34  ;;  %v18655_v34 = vld [vmem:[%s20795_s21 + $0x1610] ss:$8 sps:$4 sm:$0xff]  }
 0x30a   : > { %13610 = vmatpush2.bf16.msra.mxu1 %v18597_v8  ;;  %13570 = vmatprep.subr.bf16.mxu0 %v18602_v35  ;;  %v18658_v8 = vld [vmem:[%s20795_s21 + $0x1710] ss:$8 sps:$4 sm:$0xff]   ;;  %v18663_v35 = vld [vmem:[%s20795_s21 + $0x1604] ss:$8 sps:$4 sm:$0xff]  }
 0x30b   : > { %13611 = vmatprep.subr.bf16.mxu1 %v18605_v37  ;;  %v18666_v37 = vld [vmem:[%s20795_s21 + $0x1704] ss:$8 sps:$4 sm:$0xff]  }
 0x30d   : > { %13571 = vmatpush2.bf16.msra.mxu0 %v18600_v38  ;;  %v18661_v38 = vld [vmem:[%s20795_s21 + $0x1600] ss:$8 sps:$4 sm:$0xff]  }
 0x30e   : > { %13612 = vmatpush2.bf16.msra.mxu1 %v18603_v46  ;;  %13572 = vmatprep.subr.bf16.mxu0 %v18608_v62  ;;  %v18669_v46 = vld [vmem:[%s20795_s21 + $0x16f4] ss:$8 sps:$4 sm:$0xff]  }
 0x30f   : > { %13613 = vmatprep.subr.bf16.mxu1 %v18611_v31  ;;  %v18672_v62 = vld [vmem:[%s20795_s21 + $0x17f4] ss:$8 sps:$4 sm:$0xff]   ;;  %v18667_v31 = vld [vmem:[%s20795_s21 + $0x16f0] ss:$8 sps:$4 sm:$0xff]  }
 0x311   : > { %13573 = vmatpush2.bf16.msra.mxu0 %v18606_v49  ;;  %v18675_v49 = vld [vmem:[%s20795_s21 + $0x16e4] ss:$8 sps:$4 sm:$0xff]  }
 0x312   : > { %13614 = vmatpush2.bf16.msra.mxu1 %v18609_v14  ;;  %13574 = vmatprep.subr.bf16.mxu0 %v18614_v51  ;;  %v18678_v14 = vld [vmem:[%s20795_s21 + $0x17e4] ss:$8 sps:$4 sm:$0xff]   ;;  %v18673_v51 = vld [vmem:[%s20795_s21 + $0x16e0] ss:$8 sps:$4 sm:$0xff]  }
 0x313   : > { %13615 = vmatprep.subr.bf16.mxu1 %v18617_v52  ;;  %v18676_v52 = vld [vmem:[%s20795_s21 + $0x17e0] ss:$8 sps:$4 sm:$0xff]  }
 0x315   : > { %13575 = vmatpush2.bf16.msra.mxu0 %v18612_v55  ;;  %v18681_v55 = vld [vmem:[%s20795_s21 + $0x16d4] ss:$8 sps:$4 sm:$0xff]  }
 0x316   : > { %13616 = vmatpush2.bf16.msra.mxu1 %v18615_v43  ;;  %13626 = vmatprep.subr.bf16.mxu0 %v18620_v56  ;;  %v18684_v43 = vld [vmem:[%s20795_s21 + $0x17d4] ss:$8 sps:$4 sm:$0xff]   ;;  %v18679_v56 = vld [vmem:[%s20795_s21 + $0x16d0] ss:$8 sps:$4 sm:$0xff]  }
 0x317   : > { %13667 = vmatprep.subr.bf16.mxu1 %v18624_v45  ;;  %v18682_v45 = vld [vmem:[%s20795_s21 + $0x17d0] ss:$8 sps:$4 sm:$0xff]  }
 0x318   : > { %v13332_v4 = vpop.f32.mrf.mxu0  ;;  %13577 = vmatmul.mubr.bf16.vlgmr.msra.gmra.mxu0 %v1027_v60  ;;  %v18688_v60 = vld [vmem:[%s20795_s21 + $0x17c0] ss:$8 sps:$4 sm:$0xff]  }
 0x319   : > { %v13373_v7 = vpop.f32.mrf.mxu1  ;;  %13618 = vmatmul.mubr.bf16.vlgmr.msra.gmra.mxu1 %v1029_v63  ;;  %v13333_v61 = vadd.f32 %v13332_v4, %v21653_v53  ;;  %13627 = vmatpush1.bf16.msra.mxu0 %v18618_v36  ;;  %v18631_v53 = vld [vmem:[%s20795_s21 + $0x1650] ss:$8 sps:$4 sm:$0xff]   ;;  %v18687_v36 = vld [vmem:[%s20795_s21 + $0x16c4] ss:$8 sps:$4 sm:$0xff]   ;;  %v18693_v63 = vld [vmem:[%s20795_s21 + $0x16b4] ss:$8 sps:$4 sm:$0xff]  }
 0x31a   : > { %13668 = vmatpush1.bf16.msra.mxu1 %v18622_v16  ;;  %v13334_v42 = vpop.f32.mrf.mxu0  ;;  %13628 = vmatprep.subr.bf16.mxu0 %v18627_v0  ;;  %v18696_v16 = vld [vmem:[%s20795_s21 + $0x17b4] ss:$8 sps:$4 sm:$0xff]   ;;  %v18691_v0 = vld [vmem:[%s20795_s21 + $0x16b0] ss:$8 sps:$4 sm:$0xff]  }
 0x31b   : > { %v13375_v47 = vpop.f32.mrf.mxu1  ;;  %13669 = vmatprep.subr.bf16.mxu1 %v18630_v57  ;;  %v13335_v11 = vadd.f32 %v13334_v42, %v21656_v6  ;;  %v21738_v12 = vadd.f32 %v13373_v7, %v13333_v61  ;;  %13658 = vmatprep.mubr.bf16.mxu0 %v1032_v2  ;;  %v18639_v6 = vld [vmem:[%s20795_s21 + $0x1644] ss:$8 sps:$4 sm:$0xff]   ;;  %v18694_v57 = vld [vmem:[%s20795_s21 + $0x17b0] ss:$8 sps:$4 sm:$0xff]   ;;  %v299_v4 = vld [vmem:[%s20809_s7 + $0x60] sm:$0xff] }
 0x31c   : > { %13699 = vmatprep.mubr.bf16.mxu1 %v1034_v3  ;;  %v13336_v13 = vpop.f32.mrf.mxu0  ;;  %v18702_v2 = vld [vmem:[%s20795_s21 + $0x17a4] ss:$8 sps:$4 sm:$0xff]   ;;  %v18697_v3 = vld [vmem:[%s20795_s21 + $0x16a0] ss:$8 sps:$4 sm:$0xff]   ;;  %v18708_v61 = vld [vmem:[%s20795_s21 + $0x1794] ss:$8 sps:$4 sm:$0xff]  }
 0x31d   : > { %v13377_v17 = vpop.f32.mrf.mxu1  ;;  %v21741_v32 = vadd.f32 %v13375_v47, %v13335_v11  ;;  %13629 = vmatpush1.bf16.msra.mxu0 %v18625_v1  ;;  %v18699_v1 = vld [vmem:[%s20795_s21 + $0x16a4] ss:$8 sps:$4 sm:$0xff]   ;;  %v18700_v7 = vld [vmem:[%s20795_s21 + $0x17a0] ss:$8 sps:$4 sm:$0xff]   ;;  %v18703_v42 = vld [vmem:[%s20795_s21 + $0x1690] ss:$8 sps:$4 sm:$0xff]   ;;  %v21796_v13 = vrot.slane %v299_v4, %v20860_v50 }
 0x31e   : > { %13670 = vmatpush1.bf16.msra.mxu1 %v18628_v24  ;;  %v13337_v18 = vpop.f32.mrf.mxu0  ;;  %13630 = vmatprep.subr.bf16.mxu0 %v18633_v41  ;;  %v18705_v24 = vld [vmem:[%s20795_s21 + $0x1694] ss:$8 sps:$4 sm:$0xff]   ;;  %v553_v41 = vcombine.high %v299_v4, %v299_v4  ;;  %v18706_v47 = vld [vmem:[%s20795_s21 + $0x1790] ss:$8 sps:$4 sm:$0xff]   ;;  %v18714_v11 = vld [vmem:[%s20795_s21 + $0x1784] ss:$8 sps:$4 sm:$0xff]  }
 0x31f   : > { %13671 = vmatprep.subr.bf16.mxu1 %v18636_v10  ;;  %v13378_v20 = vpop.f32.mrf.mxu1  ;;  %v18711_v10 = vld [vmem:[%s20795_s21 + $0x1684] ss:$8 sps:$4 sm:$0xff]   ;;  %v18709_v17 = vld [vmem:[%s20795_s21 + $0x1680] ss:$8 sps:$4 sm:$0xff]   ;;  %v18717_v18 = vld [vmem:[%s20795_s21 + $0x1874] ss:$8 sps:$4 sm:$0xff]  }
 0x320   : > { %v568_v20 = vcombine.high %v21796_v13, %v21796_v13  ;;  %v18761_v4 = vld [vmem:[%s20795_s21 + $0x1900] ss:$8 sps:$4 sm:$0xff]  }
 0x321   : > { %13631 = vmatpush1.bf16.msra.mxu0 %v18631_v53  ;;  %v21799_v53 = vrot.slane %v553_v41, %v20860_v50  ;;  %v18767_v41 = vld [vmem:[%s20795_s21 + $0x19f0] ss:$8 sps:$4 sm:$0xff]  }
 0x322   : > { %13672 = vmatpush1.bf16.msra.mxu1 %v18634_v5  ;;  %13632 = vmatprep.subr.bf16.mxu0 %v18639_v6  ;;  %v18712_v5 = vld [vmem:[%s20795_s21 + $0x1780] ss:$8 sps:$4 sm:$0xff]   ;;  %v18721_v6 = vld [vmem:[%s20795_s21 + $0x1974] ss:$8 sps:$4 sm:$0xff]  }
 0x323   : > { %13673 = vmatprep.subr.bf16.mxu1 %v18642_v19  ;;  %v18715_v19 = vld [vmem:[%s20795_s21 + $0x1870] ss:$8 sps:$4 sm:$0xff]  }
 0x325   : > { %13633 = vmatpush1.bf16.msra.mxu0 %v18637_v21  ;;  %v569_v21 = vcombine.high %v21799_v53, %v21799_v53 }
 0x326   : > { %13674 = vmatpush1.bf16.msra.mxu1 %v18640_v22  ;;  %13634 = vmatprep.subr.bf16.mxu0 %v18645_v25  ;;  %v1031_v22 = vpack.c.bf16 %v21711_v54, %v21711_v54  ;;  %v1033_v25 = vpack.c.bf16 %v21714_v23, %v21714_v23  ;;  %v18725_v54 = vld [vmem:[%s20795_s21 + $0x1960] ss:$8 sps:$4 sm:$0xff]  }
 0x327   : > { %13675 = vmatprep.subr.bf16.mxu1 %v18648_v9  ;;  %v18719_v9 = vld [vmem:[%s20795_s21 + $0x1970] ss:$8 sps:$4 sm:$0xff]  }
 0x329   : > { %13635 = vmatpush1.bf16.msra.mxu0 %v18643_v26  ;;  %v18724_v26 = vld [vmem:[%s20795_s21 + $0x1864] ss:$8 sps:$4 sm:$0xff]  }
 0x32a   : > { %13676 = vmatpush1.bf16.msra.mxu1 %v18646_v15  ;;  %13636 = vmatprep.subr.bf16.mxu0 %v18651_v27  ;;  %v18727_v15 = vld [vmem:[%s20795_s21 + $0x1964] ss:$8 sps:$4 sm:$0xff]   ;;  %v18722_v27 = vld [vmem:[%s20795_s21 + $0x1860] ss:$8 sps:$4 sm:$0xff]  }
 0x32b   : > { %13677 = vmatprep.subr.bf16.mxu1 %v18654_v28  ;;  %v1036_v28 = vpack.c.bf16 %v568_v20, %v568_v20  ;;  %v18787_v20 = vld [vmem:[%s20795_s21 + $0x19c4] ss:$8 sps:$4 sm:$0xff]  }
 0x32d   : > { %13637 = vmatpush1.bf16.msra.mxu0 %v18649_v29  ;;  %v1038_v29 = vpack.c.bf16 %v569_v21, %v569_v21  ;;  %v18782_v21 = vld [vmem:[%s20795_s21 + $0x18c0] ss:$8 sps:$4 sm:$0xff]  }
 0x32e   : > { %13678 = vmatpush1.bf16.msra.mxu1 %v18652_v30  ;;  %13638 = vmatprep.subr.bf16.mxu0 %v18657_v33 }
 0x32f   : > { %13679 = vmatprep.subr.bf16.mxu1 %v18660_v58  ;;  %v18730_v58 = vld [vmem:[%s20795_s21 + $0x1854] ss:$8 sps:$4 sm:$0xff]  }
 0x331   : > { %13639 = vmatpush1.bf16.msra.mxu0 %v18655_v34 }
 0x332   : > { %13680 = vmatpush1.bf16.msra.mxu1 %v18658_v8  ;;  %13640 = vmatprep.subr.bf16.mxu0 %v18663_v35  ;;  %v18733_v35 = vld [vmem:[%s20795_s21 + $0x1954] ss:$8 sps:$4 sm:$0xff]  }
 0x333   : > { %13681 = vmatprep.subr.bf16.mxu1 %v18666_v37 }
 0x335   : > { %13641 = vmatpush1.bf16.msra.mxu0 %v18661_v38 }
 0x336   : > { %13682 = vmatpush1.bf16.msra.mxu1 %v18664_v39  ;;  %13642 = vmatprep.subr.bf16.mxu0 %v18669_v46 }
 0x337   : > { %13683 = vmatprep.subr.bf16.mxu1 %v18672_v62 }
 0x339   : > { %13643 = vmatpush2.bf16.msra.mxu0 %v18667_v31  ;;  %v18731_v31 = vld [vmem:[%s20795_s21 + $0x1950] ss:$8 sps:$4 sm:$0xff]  }
 0x33a   : > { %13684 = vmatpush2.bf16.msra.mxu1 %v18670_v48  ;;  %13644 = vmatprep.subr.bf16.mxu0 %v18675_v49  ;;  %v18739_v49 = vld [vmem:[%s20795_s21 + $0x1944] ss:$8 sps:$4 sm:$0xff]  }
 0x33b   : > { %13685 = vmatprep.subr.bf16.mxu1 %v18678_v14 }
 0x33d   : > { %13645 = vmatpush2.bf16.msra.mxu0 %v18673_v51  ;;  %v18734_v51 = vld [vmem:[%s20795_s21 + $0x1840] ss:$8 sps:$4 sm:$0xff]  }
 0x33e   : > { %13686 = vmatpush2.bf16.msra.mxu1 %v18676_v52  ;;  %13646 = vmatprep.subr.bf16.mxu0 %v18681_v55  ;;  %v18737_v52 = vld [vmem:[%s20795_s21 + $0x1940] ss:$8 sps:$4 sm:$0xff]   ;;  %v18742_v55 = vld [vmem:[%s20795_s21 + $0x1834] ss:$8 sps:$4 sm:$0xff]  }
 0x33f   : > { %13687 = vmatprep.subr.bf16.mxu1 %v18684_v43  ;;  %v18745_v43 = vld [vmem:[%s20795_s21 + $0x1934] ss:$8 sps:$4 sm:$0xff]  }
 0x341   : > { %13647 = vmatpush2.bf16.msra.mxu0 %v18679_v56  ;;  %v18740_v56 = vld [vmem:[%s20795_s21 + $0x1830] ss:$8 sps:$4 sm:$0xff]  }
 0x342   : > { %13688 = vmatpush2.bf16.msra.mxu1 %v18682_v45  ;;  %13648 = vmatprep.subr.bf16.mxu0 %v18687_v36  ;;  %v18743_v45 = vld [vmem:[%s20795_s21 + $0x1930] ss:$8 sps:$4 sm:$0xff]   ;;  %v18748_v36 = vld [vmem:[%s20795_s21 + $0x1824] ss:$8 sps:$4 sm:$0xff]  }
 0x343   : > { %13689 = vmatprep.subr.bf16.mxu1 %v18690_v59  ;;  %v18751_v59 = vld [vmem:[%s20795_s21 + $0x1924] ss:$8 sps:$4 sm:$0xff]  }
 0x345   : > { %13649 = vmatpush2.bf16.msra.mxu0 %v18685_v40  ;;  %v18746_v40 = vld [vmem:[%s20795_s21 + $0x1820] ss:$8 sps:$4 sm:$0xff]  }
 0x346   : > { %13690 = vmatpush2.bf16.msra.mxu1 %v18688_v60  ;;  %13650 = vmatprep.subr.bf16.mxu0 %v18693_v63  ;;  %v18749_v60 = vld [vmem:[%s20795_s21 + $0x1920] ss:$8 sps:$4 sm:$0xff]   ;;  %v18754_v63 = vld [vmem:[%s20795_s21 + $0x1814] ss:$8 sps:$4 sm:$0xff]  }
 0x347   : > { %13691 = vmatprep.subr.bf16.mxu1 %v18696_v16  ;;  %v18757_v16 = vld [vmem:[%s20795_s21 + $0x1914] ss:$8 sps:$4 sm:$0xff]  }
 0x349   : > { %13651 = vmatpush2.bf16.msra.mxu0 %v18691_v0  ;;  %v18752_v0 = vld [vmem:[%s20795_s21 + $0x1810] ss:$8 sps:$4 sm:$0xff]  }
 0x34a   : > { %13692 = vmatpush2.bf16.msra.mxu1 %v18694_v57  ;;  %13652 = vmatprep.subr.bf16.mxu0 %v18699_v1  ;;  %v18755_v57 = vld [vmem:[%s20795_s21 + $0x1910] ss:$8 sps:$4 sm:$0xff]   ;;  %v18760_v1 = vld [vmem:[%s20795_s21 + $0x1804] ss:$8 sps:$4 sm:$0xff]  }
 0x34b   : > { %13693 = vmatprep.subr.bf16.mxu1 %v18702_v2  ;;  %v18763_v2 = vld [vmem:[%s20795_s21 + $0x1904] ss:$8 sps:$4 sm:$0xff]  }
 0x34d   : > { %13653 = vmatpush2.bf16.msra.mxu0 %v18697_v3  ;;  %v18758_v3 = vld [vmem:[%s20795_s21 + $0x1800] ss:$8 sps:$4 sm:$0xff]  }
 0x34e   : > { %13694 = vmatpush2.bf16.msra.mxu1 %v18700_v7  ;;  %13654 = vmatprep.subr.bf16.mxu0 %v18705_v24  ;;  %v18766_v7 = vld [vmem:[%s20795_s21 + $0x18f4] ss:$8 sps:$4 sm:$0xff]  }
 0x34f   : > { %13695 = vmatprep.subr.bf16.mxu1 %v18708_v61  ;;  %v18769_v24 = vld [vmem:[%s20795_s21 + $0x19f4] ss:$8 sps:$4 sm:$0xff]   ;;  %v18764_v61 = vld [vmem:[%s20795_s21 + $0x18f0] ss:$8 sps:$4 sm:$0xff]  }
 0x351   : > { %13655 = vmatpush2.bf16.msra.mxu0 %v18703_v42  ;;  %v18772_v42 = vld [vmem:[%s20795_s21 + $0x18e4] ss:$8 sps:$4 sm:$0xff]  }
 0x352   : > { %13696 = vmatpush2.bf16.msra.mxu1 %v18706_v47  ;;  %13656 = vmatprep.subr.bf16.mxu0 %v18711_v10  ;;  %v18775_v47 = vld [vmem:[%s20795_s21 + $0x19e4] ss:$8 sps:$4 sm:$0xff]   ;;  %v18770_v10 = vld [vmem:[%s20795_s21 + $0x18e0] ss:$8 sps:$4 sm:$0xff]  }
 0x353   : > { %13697 = vmatprep.subr.bf16.mxu1 %v18714_v11  ;;  %v18773_v11 = vld [vmem:[%s20795_s21 + $0x19e0] ss:$8 sps:$4 sm:$0xff]  }
 0x355   : > { %13657 = vmatpush2.bf16.msra.mxu0 %v18709_v17  ;;  %v18778_v17 = vld [vmem:[%s20795_s21 + $0x18d4] ss:$8 sps:$4 sm:$0xff]  }
 0x356   : > { %13698 = vmatpush2.bf16.msra.mxu1 %v18712_v5  ;;  %13708 = vmatprep.subr.bf16.mxu0 %v18717_v18  ;;  %v18781_v5 = vld [vmem:[%s20795_s21 + $0x19d4] ss:$8 sps:$4 sm:$0xff]   ;;  %v18776_v18 = vld [vmem:[%s20795_s21 + $0x18d0] ss:$8 sps:$4 sm:$0xff]  }
 0x357   : > { %13749 = vmatprep.subr.bf16.mxu1 %v18721_v6  ;;  %v18779_v6 = vld [vmem:[%s20795_s21 + $0x19d0] ss:$8 sps:$4 sm:$0xff]  }
 0x358   : > { %v13414_v30 = vpop.f32.mrf.mxu0  ;;  %13659 = vmatmul.mubr.bf16.vlgmr.msra.gmra.mxu0 %v1031_v22  ;;  %v18785_v22 = vld [vmem:[%s20795_s21 + $0x19c0] ss:$8 sps:$4 sm:$0xff]  }
 0x359   : > { %v13455_v33 = vpop.f32.mrf.mxu1  ;;  %13700 = vmatmul.mubr.bf16.vlgmr.msra.gmra.mxu1 %v1033_v25  ;;  %v13415_v23 = vadd.f32 %v13414_v30, %v21738_v12  ;;  %13709 = vmatpush1.bf16.msra.mxu0 %v18715_v19  ;;  %v18728_v12 = vld [vmem:[%s20795_s21 + $0x1850] ss:$8 sps:$4 sm:$0xff]   ;;  %v18784_v19 = vld [vmem:[%s20795_s21 + $0x18c4] ss:$8 sps:$4 sm:$0xff]   ;;  %v18790_v25 = vld [vmem:[%s20795_s21 + $0x18b4] ss:$8 sps:$4 sm:$0xff]  }
 0x35a   : > { %13750 = vmatpush1.bf16.msra.mxu1 %v18719_v9  ;;  %v13416_v34 = vpop.f32.mrf.mxu0  ;;  %13710 = vmatprep.subr.bf16.mxu0 %v18724_v26  ;;  %v18793_v9 = vld [vmem:[%s20795_s21 + $0x19b4] ss:$8 sps:$4 sm:$0xff]   ;;  %v18788_v26 = vld [vmem:[%s20795_s21 + $0x18b0] ss:$8 sps:$4 sm:$0xff]   ;;  %v300_v30 = vld [vmem:[%s20809_s7 + $0x68] sm:$0xff] }
 0x35b   : > { %v13457_v8 = vpop.f32.mrf.mxu1  ;;  %13751 = vmatprep.subr.bf16.mxu1 %v18727_v15  ;;  %v13417_v37 = vadd.f32 %v13416_v34, %v21741_v32  ;;  %v21823_v38 = vadd.f32 %v13455_v33, %v13415_v23  ;;  %13740 = vmatprep.mubr.bf16.mxu0 %v1036_v28  ;;  %v18736_v32 = vld [vmem:[%s20795_s21 + $0x1844] ss:$8 sps:$4 sm:$0xff]   ;;  %v18791_v15 = vld [vmem:[%s20795_s21 + $0x19b0] ss:$8 sps:$4 sm:$0xff]   ;;  %v18797_v33 = vld [vmem:[%s20795_s21 + $0x19a0] ss:$8 sps:$4 sm:$0xff]  }
 0x35c   : > { %13781 = vmatprep.mubr.bf16.mxu1 %v1038_v29  ;;  %v13418_v39 = vpop.f32.mrf.mxu0  ;;  %v18799_v28 = vld [vmem:[%s20795_s21 + $0x19a4] ss:$8 sps:$4 sm:$0xff]   ;;  %v18794_v29 = vld [vmem:[%s20795_s21 + $0x18a0] ss:$8 sps:$4 sm:$0xff]   ;;  %v18805_v23 = vld [vmem:[%s20795_s21 + $0x1994] ss:$8 sps:$4 sm:$0xff]  }
 0x35d   : > { %v13459_v46 = vpop.f32.mrf.mxu1  ;;  %v21826_v62 = vadd.f32 %v13457_v8, %v13417_v37  ;;  %13711 = vmatpush1.bf16.msra.mxu0 %v18722_v27  ;;  %v18796_v27 = vld [vmem:[%s20795_s21 + $0x18a4] ss:$8 sps:$4 sm:$0xff]   ;;  %v18800_v34 = vld [vmem:[%s20795_s21 + $0x1890] ss:$8 sps:$4 sm:$0xff]   ;;  %v21881_v39 = vrot.slane %v300_v30, %v20860_v50 }
 0x35e   : > { %13752 = vmatpush1.bf16.msra.mxu1 %v18725_v54  ;;  %v13419_v48 = vpop.f32.mrf.mxu0  ;;  %13712 = vmatprep.subr.bf16.mxu0 %v18730_v58  ;;  %v18802_v54 = vld [vmem:[%s20795_s21 + $0x1894] ss:$8 sps:$4 sm:$0xff]   ;;  %v570_v58 = vcombine.high %v300_v30, %v300_v30  ;;  %v18803_v8 = vld [vmem:[%s20795_s21 + $0x1990] ss:$8 sps:$4 sm:$0xff]   ;;  %v18811_v37 = vld [vmem:[%s20795_s21 + $0x1984] ss:$8 sps:$4 sm:$0xff]  }
 0x35f   : > { %13753 = vmatprep.subr.bf16.mxu1 %v18733_v35  ;;  %v13460_v14 = vpop.f32.mrf.mxu1  ;;  %v18808_v35 = vld [vmem:[%s20795_s21 + $0x1884] ss:$8 sps:$4 sm:$0xff]   ;;  %v18806_v46 = vld [vmem:[%s20795_s21 + $0x1880] ss:$8 sps:$4 sm:$0xff]   ;;  %v18814_v48 = vld [vmem:[%s20795_s21 + $0x1a74] ss:$8 sps:$4 sm:$0xff]  }
 0x360   : > { %v585_v14 = vcombine.high %v21881_v39, %v21881_v39  ;;  %v18858_v30 = vld [vmem:[%s20795_s21 + $0x1b00] ss:$8 sps:$4 sm:$0xff]  }
 0x361   : > { %13713 = vmatpush1.bf16.msra.mxu0 %v18728_v12  ;;  %v21884_v12 = vrot.slane %v570_v58, %v20860_v50  ;;  %v18864_v58 = vld [vmem:[%s20795_s21 + $0x1bf0] ss:$8 sps:$4 sm:$0xff]  }
 0x362   : > { %13754 = vmatpush1.bf16.msra.mxu1 %v18731_v31  ;;  %13714 = vmatprep.subr.bf16.mxu0 %v18736_v32  ;;  %v18809_v31 = vld [vmem:[%s20795_s21 + $0x1980] ss:$8 sps:$4 sm:$0xff]   ;;  %v18818_v32 = vld [vmem:[%s20795_s21 + $0x1b74] ss:$8 sps:$4 sm:$0xff]  }
 0x363   : > { %13755 = vmatprep.subr.bf16.mxu1 %v18739_v49  ;;  %v18812_v49 = vld [vmem:[%s20795_s21 + $0x1a70] ss:$8 sps:$4 sm:$0xff]  }
 0x365   : > { %13715 = vmatpush1.bf16.msra.mxu0 %v18734_v51  ;;  %v586_v51 = vcombine.high %v21884_v12, %v21884_v12 }
 0x366   : > { %13756 = vmatpush1.bf16.msra.mxu1 %v18737_v52  ;;  %13716 = vmatprep.subr.bf16.mxu0 %v18742_v55  ;;  %v1035_v52 = vpack.c.bf16 %v21796_v13, %v21796_v13  ;;  %v1037_v55 = vpack.c.bf16 %v21799_v53, %v21799_v53  ;;  %v18822_v13 = vld [vmem:[%s20795_s21 + $0x1b60] ss:$8 sps:$4 sm:$0xff]  }
 0x367   : > { %13757 = vmatprep.subr.bf16.mxu1 %v18745_v43  ;;  %v18816_v43 = vld [vmem:[%s20795_s21 + $0x1b70] ss:$8 sps:$4 sm:$0xff]  }
 0x369   : > { %13717 = vmatpush1.bf16.msra.mxu0 %v18740_v56  ;;  %v18821_v56 = vld [vmem:[%s20795_s21 + $0x1a64] ss:$8 sps:$4 sm:$0xff]  }
 0x36a   : > { %13758 = vmatpush1.bf16.msra.mxu1 %v18743_v45  ;;  %13718 = vmatprep.subr.bf16.mxu0 %v18748_v36  ;;  %v18824_v45 = vld [vmem:[%s20795_s21 + $0x1b64] ss:$8 sps:$4 sm:$0xff]   ;;  %v18819_v36 = vld [vmem:[%s20795_s21 + $0x1a60] ss:$8 sps:$4 sm:$0xff]  }
 0x36b   : > { %13759 = vmatprep.subr.bf16.mxu1 %v18751_v59  ;;  %v1040_v59 = vpack.c.bf16 %v585_v14, %v585_v14  ;;  %v18884_v14 = vld [vmem:[%s20795_s21 + $0x1bc4] ss:$8 sps:$4 sm:$0xff]  }
 0x36d   : > { %13719 = vmatpush1.bf16.msra.mxu0 %v18746_v40  ;;  %v1042_v40 = vpack.c.bf16 %v586_v51, %v586_v51  ;;  %v18879_v51 = vld [vmem:[%s20795_s21 + $0x1ac0] ss:$8 sps:$4 sm:$0xff]  }
 0x36e   : > { %13760 = vmatpush1.bf16.msra.mxu1 %v18749_v60  ;;  %13720 = vmatprep.subr.bf16.mxu0 %v18754_v63 }
 0x36f   : > { %13761 = vmatprep.subr.bf16.mxu1 %v18757_v16  ;;  %v18827_v16 = vld [vmem:[%s20795_s21 + $0x1a54] ss:$8 sps:$4 sm:$0xff]  }
 0x371   : > { %13721 = vmatpush1.bf16.msra.mxu0 %v18752_v0 }
 0x372   : > { %13762 = vmatpush1.bf16.msra.mxu1 %v18755_v57  ;;  %13722 = vmatprep.subr.bf16.mxu0 %v18760_v1  ;;  %v18830_v1 = vld [vmem:[%s20795_s21 + $0x1b54] ss:$8 sps:$4 sm:$0xff]  }
 0x373   : > { %13763 = vmatprep.subr.bf16.mxu1 %v18763_v2 }
 0x375   : > { %13723 = vmatpush1.bf16.msra.mxu0 %v18758_v3 }
 0x376   : > { %13764 = vmatpush1.bf16.msra.mxu1 %v18761_v4  ;;  %13724 = vmatprep.subr.bf16.mxu0 %v18766_v7 }
 0x377   : > { %13765 = vmatprep.subr.bf16.mxu1 %v18769_v24 }
 0x379   : > { %13725 = vmatpush2.bf16.msra.mxu0 %v18764_v61  ;;  %v18828_v61 = vld [vmem:[%s20795_s21 + $0x1b50] ss:$8 sps:$4 sm:$0xff]  }
 0x37a   : > { %13766 = vmatpush2.bf16.msra.mxu1 %v18767_v41  ;;  %13726 = vmatprep.subr.bf16.mxu0 %v18772_v42  ;;  %v18836_v42 = vld [vmem:[%s20795_s21 + $0x1b44] ss:$8 sps:$4 sm:$0xff]  }
 0x37b   : > { %13767 = vmatprep.subr.bf16.mxu1 %v18775_v47 }
 0x37d   : > { %13727 = vmatpush2.bf16.msra.mxu0 %v18770_v10  ;;  %v18831_v10 = vld [vmem:[%s20795_s21 + $0x1a40] ss:$8 sps:$4 sm:$0xff]  }
 0x37e   : > { %13768 = vmatpush2.bf16.msra.mxu1 %v18773_v11  ;;  %13728 = vmatprep.subr.bf16.mxu0 %v18778_v17  ;;  %v18834_v11 = vld [vmem:[%s20795_s21 + $0x1b40] ss:$8 sps:$4 sm:$0xff]   ;;  %v18839_v17 = vld [vmem:[%s20795_s21 + $0x1a34] ss:$8 sps:$4 sm:$0xff]  }
 0x37f   : > { %13769 = vmatprep.subr.bf16.mxu1 %v18781_v5  ;;  %v18842_v5 = vld [vmem:[%s20795_s21 + $0x1b34] ss:$8 sps:$4 sm:$0xff]  }
 0x381   : > { %13729 = vmatpush2.bf16.msra.mxu0 %v18776_v18  ;;  %v18837_v18 = vld [vmem:[%s20795_s21 + $0x1a30] ss:$8 sps:$4 sm:$0xff]  }
 0x382   : > { %13770 = vmatpush2.bf16.msra.mxu1 %v18779_v6  ;;  %13730 = vmatprep.subr.bf16.mxu0 %v18784_v19  ;;  %v18840_v6 = vld [vmem:[%s20795_s21 + $0x1b30] ss:$8 sps:$4 sm:$0xff]   ;;  %v18845_v19 = vld [vmem:[%s20795_s21 + $0x1a24] ss:$8 sps:$4 sm:$0xff]  }
 0x383   : > { %13771 = vmatprep.subr.bf16.mxu1 %v18787_v20  ;;  %v18848_v20 = vld [vmem:[%s20795_s21 + $0x1b24] ss:$8 sps:$4 sm:$0xff]  }
 0x385   : > { %13731 = vmatpush2.bf16.msra.mxu0 %v18782_v21  ;;  %v18843_v21 = vld [vmem:[%s20795_s21 + $0x1a20] ss:$8 sps:$4 sm:$0xff]  }
 0x386   : > { %13772 = vmatpush2.bf16.msra.mxu1 %v18785_v22  ;;  %13732 = vmatprep.subr.bf16.mxu0 %v18790_v25  ;;  %v18846_v22 = vld [vmem:[%s20795_s21 + $0x1b20] ss:$8 sps:$4 sm:$0xff]   ;;  %v18851_v25 = vld [vmem:[%s20795_s21 + $0x1a14] ss:$8 sps:$4 sm:$0xff]  }
 0x387   : > { %13773 = vmatprep.subr.bf16.mxu1 %v18793_v9  ;;  %v18854_v9 = vld [vmem:[%s20795_s21 + $0x1b14] ss:$8 sps:$4 sm:$0xff]  }
 0x389   : > { %13733 = vmatpush2.bf16.msra.mxu0 %v18788_v26  ;;  %v18849_v26 = vld [vmem:[%s20795_s21 + $0x1a10] ss:$8 sps:$4 sm:$0xff]  }
 0x38a   : > { %13774 = vmatpush2.bf16.msra.mxu1 %v18791_v15  ;;  %13734 = vmatprep.subr.bf16.mxu0 %v18796_v27  ;;  %v18852_v15 = vld [vmem:[%s20795_s21 + $0x1b10] ss:$8 sps:$4 sm:$0xff]   ;;  %v18857_v27 = vld [vmem:[%s20795_s21 + $0x1a04] ss:$8 sps:$4 sm:$0xff]  }
 0x38b   : > { %13775 = vmatprep.subr.bf16.mxu1 %v18799_v28  ;;  %v18860_v28 = vld [vmem:[%s20795_s21 + $0x1b04] ss:$8 sps:$4 sm:$0xff]  }
 0x38d   : > { %13735 = vmatpush2.bf16.msra.mxu0 %v18794_v29  ;;  %v18855_v29 = vld [vmem:[%s20795_s21 + $0x1a00] ss:$8 sps:$4 sm:$0xff]  }
 0x38e   : > { %13776 = vmatpush2.bf16.msra.mxu1 %v18797_v33  ;;  %13736 = vmatprep.subr.bf16.mxu0 %v18802_v54  ;;  %v18863_v33 = vld [vmem:[%s20795_s21 + $0x1af4] ss:$8 sps:$4 sm:$0xff]  }
 0x38f   : > { %13777 = vmatprep.subr.bf16.mxu1 %v18805_v23  ;;  %v18866_v54 = vld [vmem:[%s20795_s21 + $0x1bf4] ss:$8 sps:$4 sm:$0xff]   ;;  %v18861_v23 = vld [vmem:[%s20795_s21 + $0x1af0] ss:$8 sps:$4 sm:$0xff]  }
 0x391   : > { %13737 = vmatpush2.bf16.msra.mxu0 %v18800_v34  ;;  %v18869_v34 = vld [vmem:[%s20795_s21 + $0x1ae4] ss:$8 sps:$4 sm:$0xff]  }
 0x392   : > { %13778 = vmatpush2.bf16.msra.mxu1 %v18803_v8  ;;  %13738 = vmatprep.subr.bf16.mxu0 %v18808_v35  ;;  %v18872_v8 = vld [vmem:[%s20795_s21 + $0x1be4] ss:$8 sps:$4 sm:$0xff]   ;;  %v18867_v35 = vld [vmem:[%s20795_s21 + $0x1ae0] ss:$8 sps:$4 sm:$0xff]  }
 0x393   : > { %13779 = vmatprep.subr.bf16.mxu1 %v18811_v37  ;;  %v18870_v37 = vld [vmem:[%s20795_s21 + $0x1be0] ss:$8 sps:$4 sm:$0xff]  }
 0x395   : > { %13739 = vmatpush2.bf16.msra.mxu0 %v18806_v46  ;;  %v18875_v46 = vld [vmem:[%s20795_s21 + $0x1ad4] ss:$8 sps:$4 sm:$0xff]  }
 0x396   : > { %13780 = vmatpush2.bf16.msra.mxu1 %v18809_v31  ;;  %13790 = vmatprep.subr.bf16.mxu0 %v18814_v48  ;;  %v18878_v31 = vld [vmem:[%s20795_s21 + $0x1bd4] ss:$8 sps:$4 sm:$0xff]   ;;  %v18873_v48 = vld [vmem:[%s20795_s21 + $0x1ad0] ss:$8 sps:$4 sm:$0xff]  }
 0x397   : > { %13831 = vmatprep.subr.bf16.mxu1 %v18818_v32  ;;  %v18876_v32 = vld [vmem:[%s20795_s21 + $0x1bd0] ss:$8 sps:$4 sm:$0xff]  }
 0x398   : > { %v13496_v60 = vpop.f32.mrf.mxu0  ;;  %13741 = vmatmul.mubr.bf16.vlgmr.msra.gmra.mxu0 %v1035_v52  ;;  %v18882_v52 = vld [vmem:[%s20795_s21 + $0x1bc0] ss:$8 sps:$4 sm:$0xff]  }
 0x399   : > { %v13537_v63 = vpop.f32.mrf.mxu1  ;;  %13782 = vmatmul.mubr.bf16.vlgmr.msra.gmra.mxu1 %v1037_v55  ;;  %v13497_v53 = vadd.f32 %v13496_v60, %v21823_v38  ;;  %13791 = vmatpush1.bf16.msra.mxu0 %v18812_v49  ;;  %v18825_v38 = vld [vmem:[%s20795_s21 + $0x1a50] ss:$8 sps:$4 sm:$0xff]   ;;  %v18881_v49 = vld [vmem:[%s20795_s21 + $0x1ac4] ss:$8 sps:$4 sm:$0xff]   ;;  %v18887_v55 = vld [vmem:[%s20795_s21 + $0x1ab4] ss:$8 sps:$4 sm:$0xff]  }
 0x39a   : > { %13832 = vmatpush1.bf16.msra.mxu1 %v18816_v43  ;;  %v13498_v0 = vpop.f32.mrf.mxu0  ;;  %13792 = vmatprep.subr.bf16.mxu0 %v18821_v56  ;;  %v18890_v43 = vld [vmem:[%s20795_s21 + $0x1bb4] ss:$8 sps:$4 sm:$0xff]   ;;  %v18885_v56 = vld [vmem:[%s20795_s21 + $0x1ab0] ss:$8 sps:$4 sm:$0xff]  }
 0x39b   : > { %v13539_v57 = vpop.f32.mrf.mxu1  ;;  %13833 = vmatprep.subr.bf16.mxu1 %v18824_v45  ;;  %v13499_v2 = vadd.f32 %v13498_v0, %v21826_v62  ;;  %v21908_v3 = vadd.f32 %v13537_v63, %v13497_v53  ;;  %13822 = vmatprep.mubr.bf16.mxu0 %v1040_v59  ;;  %v18833_v62 = vld [vmem:[%s20795_s21 + $0x1a44] ss:$8 sps:$4 sm:$0xff]   ;;  %v18888_v45 = vld [vmem:[%s20795_s21 + $0x1bb0] ss:$8 sps:$4 sm:$0xff]   ;;  %v18894_v63 = vld [vmem:[%s20795_s21 + $0x1ba0] ss:$8 sps:$4 sm:$0xff]  }
 0x39c   : > { %13863 = vmatprep.mubr.bf16.mxu1 %v1042_v40  ;;  %v13500_v4 = vpop.f32.mrf.mxu0  ;;  %v18896_v59 = vld [vmem:[%s20795_s21 + $0x1ba4] ss:$8 sps:$4 sm:$0xff]   ;;  %v18891_v40 = vld [vmem:[%s20795_s21 + $0x1aa0] ss:$8 sps:$4 sm:$0xff]   ;;  %v18902_v53 = vld [vmem:[%s20795_s21 + $0x1b94] ss:$8 sps:$4 sm:$0xff]  }
 0x39d   : > { %v13541_v7 = vpop.f32.mrf.mxu1  ;;  %v21911_v24 = vadd.f32 %v13539_v57, %v13499_v2  ;;  %13793 = vmatpush1.bf16.msra.mxu0 %v18819_v36  ;;  %v18893_v36 = vld [vmem:[%s20795_s21 + $0x1aa4] ss:$8 sps:$4 sm:$0xff]   ;;  %v18897_v0 = vld [vmem:[%s20795_s21 + $0x1a90] ss:$8 sps:$4 sm:$0xff]  }
 0x39e   : > { %13834 = vmatpush1.bf16.msra.mxu1 %v18822_v13  ;;  %v13501_v41 = vpop.f32.mrf.mxu0  ;;  %13794 = vmatprep.subr.bf16.mxu0 %v18827_v16  ;;  %v301_v60 = vld [vmem:[%s20809_s7 + $0x70] sm:$0xff]  ;;  %v18899_v13 = vld [vmem:[%s20795_s21 + $0x1a94] ss:$8 sps:$4 sm:$0xff]   ;;  %v18903_v7 = vld [vmem:[%s20795_s21 + $0x1a80] ss:$8 sps:$4 sm:$0xff]  }
 0x39f   : > { %13835 = vmatprep.subr.bf16.mxu1 %v18830_v1  ;;  %v13542_v47 = vpop.f32.mrf.mxu1  ;;  %v587_v16 = vcombine.high %v301_v60, %v301_v60  ;;  %v18900_v57 = vld [vmem:[%s20795_s21 + $0x1b90] ss:$8 sps:$4 sm:$0xff]   ;;  %v18905_v1 = vld [vmem:[%s20795_s21 + $0x1a84] ss:$8 sps:$4 sm:$0xff]   ;;  %v21966_v4 = vrot.slane %v301_v60, %v20860_v50  ;;  %v18911_v41 = vld [vmem:[%s20795_s21 + $0x1c74] ss:$8 sps:$4 sm:$0xff]  }
 0x3a0   : > { %v18908_v2 = vld [vmem:[%s20795_s21 + $0x1b84] ss:$8 sps:$4 sm:$0xff]   ;;  %v18955_v60 = vld [vmem:[%s20795_s21 + $0x1d00] ss:$8 sps:$4 sm:$0xff]  }
 0x3a1   : > { %13795 = vmatpush1.bf16.msra.mxu0 %v18825_v38  ;;  %v21969_v38 = vrot.slane %v587_v16, %v20860_v50  ;;  %v602_v47 = vcombine.high %v21966_v4, %v21966_v4  ;;  %v18961_v16 = vld [vmem:[%s20795_s21 + $0x1df0] ss:$8 sps:$4 sm:$0xff]  }
 0x3a2   : > { %13836 = vmatpush1.bf16.msra.mxu1 %v18828_v61  ;;  %13796 = vmatprep.subr.bf16.mxu0 %v18833_v62  ;;  %v18906_v61 = vld [vmem:[%s20795_s21 + $0x1b80] ss:$8 sps:$4 sm:$0xff]   ;;  %v18915_v62 = vld [vmem:[%s20795_s21 + $0x1d74] ss:$8 sps:$4 sm:$0xff]  }
 0x3a3   : > { %13837 = vmatprep.subr.bf16.mxu1 %v18836_v42  ;;  %v18909_v42 = vld [vmem:[%s20795_s21 + $0x1c70] ss:$8 sps:$4 sm:$0xff]  }
 0x3a5   : > { %13797 = vmatpush1.bf16.msra.mxu0 %v18831_v10  ;;  %v603_v10 = vcombine.high %v21969_v38, %v21969_v38 }
 0x3a6   : > { %13838 = vmatpush1.bf16.msra.mxu1 %v18834_v11  ;;  %13798 = vmatprep.subr.bf16.mxu0 %v18839_v17  ;;  %v1039_v11 = vpack.c.bf16 %v21881_v39, %v21881_v39  ;;  %v1041_v17 = vpack.c.bf16 %v21884_v12, %v21884_v12  ;;  %v18919_v39 = vld [vmem:[%s20795_s21 + $0x1d60] ss:$8 sps:$4 sm:$0xff]  }
 0x3a7   : > { %13839 = vmatprep.subr.bf16.mxu1 %v18842_v5  ;;  %v18913_v5 = vld [vmem:[%s20795_s21 + $0x1d70] ss:$8 sps:$4 sm:$0xff]  }
 0x3a9   : > { %13799 = vmatpush1.bf16.msra.mxu0 %v18837_v18  ;;  %v18918_v18 = vld [vmem:[%s20795_s21 + $0x1c64] ss:$8 sps:$4 sm:$0xff]  }
 0x3aa   : > { %13840 = vmatpush1.bf16.msra.mxu1 %v18840_v6  ;;  %13800 = vmatprep.subr.bf16.mxu0 %v18845_v19  ;;  %v18921_v6 = vld [vmem:[%s20795_s21 + $0x1d64] ss:$8 sps:$4 sm:$0xff]   ;;  %v18916_v19 = vld [vmem:[%s20795_s21 + $0x1c60] ss:$8 sps:$4 sm:$0xff]  }
 0x3ab   : > { %13841 = vmatprep.subr.bf16.mxu1 %v18848_v20  ;;  %v1044_v20 = vpack.c.bf16 %v602_v47, %v602_v47  ;;  %v18981_v47 = vld [vmem:[%s20795_s21 + $0x1dc4] ss:$8 sps:$4 sm:$0xff]  }
 0x3ad   : > { %13801 = vmatpush1.bf16.msra.mxu0 %v18843_v21  ;;  %v1046_v21 = vpack.c.bf16 %v603_v10, %v603_v10  ;;  %v18976_v10 = vld [vmem:[%s20795_s21 + $0x1cc0] ss:$8 sps:$4 sm:$0xff]  }
 0x3ae   : > { %13842 = vmatpush1.bf16.msra.mxu1 %v18846_v22  ;;  %13802 = vmatprep.subr.bf16.mxu0 %v18851_v25 }
 0x3af   : > { %13843 = vmatprep.subr.bf16.mxu1 %v18854_v9  ;;  %v18924_v9 = vld [vmem:[%s20795_s21 + $0x1c54] ss:$8 sps:$4 sm:$0xff]  }
 0x3b1   : > { %13803 = vmatpush1.bf16.msra.mxu0 %v18849_v26 }
 0x3b2   : > { %13844 = vmatpush1.bf16.msra.mxu1 %v18852_v15  ;;  %13804 = vmatprep.subr.bf16.mxu0 %v18857_v27  ;;  %v18927_v27 = vld [vmem:[%s20795_s21 + $0x1d54] ss:$8 sps:$4 sm:$0xff]  }
 0x3b3   : > { %13845 = vmatprep.subr.bf16.mxu1 %v18860_v28 }
 0x3b5   : > { %13805 = vmatpush1.bf16.msra.mxu0 %v18855_v29 }
 0x3b6   : > { %13846 = vmatpush1.bf16.msra.mxu1 %v18858_v30  ;;  %13806 = vmatprep.subr.bf16.mxu0 %v18863_v33 }
 0x3b7   : > { %13847 = vmatprep.subr.bf16.mxu1 %v18866_v54 }
 0x3b9   : > { %13807 = vmatpush2.bf16.msra.mxu0 %v18861_v23  ;;  %v18925_v23 = vld [vmem:[%s20795_s21 + $0x1d50] ss:$8 sps:$4 sm:$0xff]  }
 0x3ba   : > { %13848 = vmatpush2.bf16.msra.mxu1 %v18864_v58  ;;  %13808 = vmatprep.subr.bf16.mxu0 %v18869_v34  ;;  %v18933_v34 = vld [vmem:[%s20795_s21 + $0x1d44] ss:$8 sps:$4 sm:$0xff]  }
 0x3bb   : > { %13849 = vmatprep.subr.bf16.mxu1 %v18872_v8 }
 0x3bd   : > { %13809 = vmatpush2.bf16.msra.mxu0 %v18867_v35  ;;  %v18928_v35 = vld [vmem:[%s20795_s21 + $0x1c40] ss:$8 sps:$4 sm:$0xff]  }
 0x3be   : > { %13850 = vmatpush2.bf16.msra.mxu1 %v18870_v37  ;;  %13810 = vmatprep.subr.bf16.mxu0 %v18875_v46  ;;  %v18931_v37 = vld [vmem:[%s20795_s21 + $0x1d40] ss:$8 sps:$4 sm:$0xff]   ;;  %v18936_v46 = vld [vmem:[%s20795_s21 + $0x1c34] ss:$8 sps:$4 sm:$0xff]  }
 0x3bf   : > { %13851 = vmatprep.subr.bf16.mxu1 %v18878_v31  ;;  %v18939_v31 = vld [vmem:[%s20795_s21 + $0x1d34] ss:$8 sps:$4 sm:$0xff]  }
 0x3c1   : > { %13811 = vmatpush2.bf16.msra.mxu0 %v18873_v48  ;;  %v18934_v48 = vld [vmem:[%s20795_s21 + $0x1c30] ss:$8 sps:$4 sm:$0xff]  }
 0x3c2   : > { %13852 = vmatpush2.bf16.msra.mxu1 %v18876_v32  ;;  %13812 = vmatprep.subr.bf16.mxu0 %v18881_v49  ;;  %v18937_v32 = vld [vmem:[%s20795_s21 + $0x1d30] ss:$8 sps:$4 sm:$0xff]   ;;  %v18942_v49 = vld [vmem:[%s20795_s21 + $0x1c24] ss:$8 sps:$4 sm:$0xff]  }
 0x3c3   : > { %13853 = vmatprep.subr.bf16.mxu1 %v18884_v14  ;;  %v18945_v14 = vld [vmem:[%s20795_s21 + $0x1d24] ss:$8 sps:$4 sm:$0xff]  }
 0x3c5   : > { %13813 = vmatpush2.bf16.msra.mxu0 %v18879_v51  ;;  %v18940_v51 = vld [vmem:[%s20795_s21 + $0x1c20] ss:$8 sps:$4 sm:$0xff]  }
 0x3c6   : > { %13854 = vmatpush2.bf16.msra.mxu1 %v18882_v52  ;;  %13814 = vmatprep.subr.bf16.mxu0 %v18887_v55  ;;  %v18943_v52 = vld [vmem:[%s20795_s21 + $0x1d20] ss:$8 sps:$4 sm:$0xff]   ;;  %v18948_v55 = vld [vmem:[%s20795_s21 + $0x1c14] ss:$8 sps:$4 sm:$0xff]  }
 0x3c7   : > { %13855 = vmatprep.subr.bf16.mxu1 %v18890_v43  ;;  %v18951_v43 = vld [vmem:[%s20795_s21 + $0x1d14] ss:$8 sps:$4 sm:$0xff]  }
 0x3c9   : > { %13815 = vmatpush2.bf16.msra.mxu0 %v18885_v56  ;;  %v18946_v56 = vld [vmem:[%s20795_s21 + $0x1c10] ss:$8 sps:$4 sm:$0xff]  }
 0x3ca   : > { %13856 = vmatpush2.bf16.msra.mxu1 %v18888_v45  ;;  %13816 = vmatprep.subr.bf16.mxu0 %v18893_v36  ;;  %v18949_v45 = vld [vmem:[%s20795_s21 + $0x1d10] ss:$8 sps:$4 sm:$0xff]   ;;  %v18954_v36 = vld [vmem:[%s20795_s21 + $0x1c04] ss:$8 sps:$4 sm:$0xff]  }
 0x3cb   : > { %13857 = vmatprep.subr.bf16.mxu1 %v18896_v59  ;;  %v18957_v59 = vld [vmem:[%s20795_s21 + $0x1d04] ss:$8 sps:$4 sm:$0xff]  }
 0x3cd   : > { %13817 = vmatpush2.bf16.msra.mxu0 %v18891_v40  ;;  %v18952_v40 = vld [vmem:[%s20795_s21 + $0x1c00] ss:$8 sps:$4 sm:$0xff]  }
 0x3ce   : > { %13858 = vmatpush2.bf16.msra.mxu1 %v18894_v63  ;;  %13818 = vmatprep.subr.bf16.mxu0 %v18899_v13  ;;  %v18960_v63 = vld [vmem:[%s20795_s21 + $0x1cf4] ss:$8 sps:$4 sm:$0xff]  }
 0x3cf   : > { %13859 = vmatprep.subr.bf16.mxu1 %v18902_v53  ;;  %v18963_v13 = vld [vmem:[%s20795_s21 + $0x1df4] ss:$8 sps:$4 sm:$0xff]   ;;  %v18958_v53 = vld [vmem:[%s20795_s21 + $0x1cf0] ss:$8 sps:$4 sm:$0xff]  }
 0x3d1   : > { %13819 = vmatpush2.bf16.msra.mxu0 %v18897_v0  ;;  %v18966_v0 = vld [vmem:[%s20795_s21 + $0x1ce4] ss:$8 sps:$4 sm:$0xff]  }
 0x3d2   : > { %13860 = vmatpush2.bf16.msra.mxu1 %v18900_v57  ;;  %13820 = vmatprep.subr.bf16.mxu0 %v18905_v1  ;;  %v18969_v57 = vld [vmem:[%s20795_s21 + $0x1de4] ss:$8 sps:$4 sm:$0xff]   ;;  %v18964_v1 = vld [vmem:[%s20795_s21 + $0x1ce0] ss:$8 sps:$4 sm:$0xff]  }
 0x3d3   : > { %13861 = vmatprep.subr.bf16.mxu1 %v18908_v2  ;;  %v18967_v2 = vld [vmem:[%s20795_s21 + $0x1de0] ss:$8 sps:$4 sm:$0xff]  }
 0x3d5   : > { %13821 = vmatpush2.bf16.msra.mxu0 %v18903_v7  ;;  %v18972_v7 = vld [vmem:[%s20795_s21 + $0x1cd4] ss:$8 sps:$4 sm:$0xff]  }
 0x3d6   : > { %13862 = vmatpush2.bf16.msra.mxu1 %v18906_v61  ;;  %13872 = vmatprep.subr.bf16.mxu0 %v18911_v41  ;;  %v18975_v61 = vld [vmem:[%s20795_s21 + $0x1dd4] ss:$8 sps:$4 sm:$0xff]   ;;  %v18970_v41 = vld [vmem:[%s20795_s21 + $0x1cd0] ss:$8 sps:$4 sm:$0xff]  }
 0x3d7   : > { %13913 = vmatprep.subr.bf16.mxu1 %v18915_v62  ;;  %v18973_v62 = vld [vmem:[%s20795_s21 + $0x1dd0] ss:$8 sps:$4 sm:$0xff]  }
 0x3d8   : > { %v13578_v22 = vpop.f32.mrf.mxu0  ;;  %13823 = vmatmul.mubr.bf16.vlgmr.msra.gmra.mxu0 %v1039_v11  ;;  %v18979_v11 = vld [vmem:[%s20795_s21 + $0x1dc0] ss:$8 sps:$4 sm:$0xff]  }
 0x3d9   : > { %v13619_v25 = vpop.f32.mrf.mxu1  ;;  %13864 = vmatmul.mubr.bf16.vlgmr.msra.gmra.mxu1 %v1041_v17  ;;  %v13579_v12 = vadd.f32 %v13578_v22, %v21908_v3  ;;  %13873 = vmatpush1.bf16.msra.mxu0 %v18909_v42  ;;  %v18922_v3 = vld [vmem:[%s20795_s21 + $0x1c50] ss:$8 sps:$4 sm:$0xff]   ;;  %v18978_v42 = vld [vmem:[%s20795_s21 + $0x1cc4] ss:$8 sps:$4 sm:$0xff]   ;;  %v18984_v17 = vld [vmem:[%s20795_s21 + $0x1cb4] ss:$8 sps:$4 sm:$0xff]  }
 0x3da   : > { %13914 = vmatpush1.bf16.msra.mxu1 %v18913_v5  ;;  %v13580_v26 = vpop.f32.mrf.mxu0  ;;  %13874 = vmatprep.subr.bf16.mxu0 %v18918_v18  ;;  %v18987_v5 = vld [vmem:[%s20795_s21 + $0x1db4] ss:$8 sps:$4 sm:$0xff]   ;;  %v18982_v18 = vld [vmem:[%s20795_s21 + $0x1cb0] ss:$8 sps:$4 sm:$0xff]  }
 0x3db   : > { %v13621_v15 = vpop.f32.mrf.mxu1  ;;  %13915 = vmatprep.subr.bf16.mxu1 %v18921_v6  ;;  %v13581_v28 = vadd.f32 %v13580_v26, %v21911_v24  ;;  %v21993_v29 = vadd.f32 %v13619_v25, %v13579_v12  ;;  %13904 = vmatprep.mubr.bf16.mxu0 %v1044_v20  ;;  %v18930_v24 = vld [vmem:[%s20795_s21 + $0x1c44] ss:$8 sps:$4 sm:$0xff]   ;;  %v18985_v6 = vld [vmem:[%s20795_s21 + $0x1db0] ss:$8 sps:$4 sm:$0xff]   ;;  %v18991_v25 = vld [vmem:[%s20795_s21 + $0x1da0] ss:$8 sps:$4 sm:$0xff]  }
 0x3dc   : > { %13945 = vmatprep.mubr.bf16.mxu1 %v1046_v21  ;;  %v13582_v30 = vpop.f32.mrf.mxu0  ;;  %v18993_v20 = vld [vmem:[%s20795_s21 + $0x1da4] ss:$8 sps:$4 sm:$0xff]   ;;  %v18988_v21 = vld [vmem:[%s20795_s21 + $0x1ca0] ss:$8 sps:$4 sm:$0xff]   ;;  %v302_v22 = vld [vmem:[%s20809_s7 + $0x78] sm:$0xff] }
 0x3dd   : > { %v13623_v33 = vpop.f32.mrf.mxu1  ;;  %v21996_v54 = vadd.f32 %v13621_v15, %v13581_v28  ;;  %13875 = vmatpush1.bf16.msra.mxu0 %v18916_v19  ;;  %v18990_v19 = vld [vmem:[%s20795_s21 + $0x1ca4] ss:$8 sps:$4 sm:$0xff]   ;;  %v18999_v12 = vld [vmem:[%s20795_s21 + $0x1d94] ss:$8 sps:$4 sm:$0xff]   ;;  %v18994_v26 = vld [vmem:[%s20795_s21 + $0x1c90] ss:$8 sps:$4 sm:$0xff]   ;;  %v22051_v30 = vrot.slane %v302_v22, %v20860_v50 }
 0x3de   : > { %13916 = vmatpush1.bf16.msra.mxu1 %v18919_v39  ;;  %v13583_v58 = vpop.f32.mrf.mxu0  ;;  %13876 = vmatprep.subr.bf16.mxu0 %v18924_v9  ;;  %v18996_v39 = vld [vmem:[%s20795_s21 + $0x1c94] ss:$8 sps:$4 sm:$0xff]   ;;  %v604_v9 = vcombine.high %v302_v22, %v302_v22  ;;  %v18997_v15 = vld [vmem:[%s20795_s21 + $0x1d90] ss:$8 sps:$4 sm:$0xff]   ;;  %v19005_v28 = vld [vmem:[%s20795_s21 + $0x1d84] ss:$8 sps:$4 sm:$0xff]  }
 0x3df   : > { %13917 = vmatprep.subr.bf16.mxu1 %v18927_v27  ;;  %v13624_v8 = vpop.f32.mrf.mxu1  ;;  %v19002_v27 = vld [vmem:[%s20795_s21 + $0x1c84] ss:$8 sps:$4 sm:$0xff]   ;;  %v19000_v33 = vld [vmem:[%s20795_s21 + $0x1c80] ss:$8 sps:$4 sm:$0xff]   ;;  %v19008_v58 = vld [vmem:[%s20795_s21 + $0x1e74] ss:$8 sps:$4 sm:$0xff]  }
 0x3e0   : > { %v619_v8 = vcombine.high %v22051_v30, %v22051_v30  ;;  %v19052_v22 = vld [vmem:[%s20795_s21 + $0x1f00] ss:$8 sps:$4 sm:$0xff]  }
 0x3e1   : > { %13877 = vmatpush1.bf16.msra.mxu0 %v18922_v3  ;;  %v22054_v3 = vrot.slane %v604_v9, %v20860_v50  ;;  %v19058_v9 = vld [vmem:[%s20795_s21 + $0x1ff0] ss:$8 sps:$4 sm:$0xff]  }
 0x3e2   : > { %13918 = vmatpush1.bf16.msra.mxu1 %v18925_v23  ;;  %13878 = vmatprep.subr.bf16.mxu0 %v18930_v24  ;;  %v19003_v23 = vld [vmem:[%s20795_s21 + $0x1d80] ss:$8 sps:$4 sm:$0xff]   ;;  %v19012_v24 = vld [vmem:[%s20795_s21 + $0x1f74] ss:$8 sps:$4 sm:$0xff]  }
 0x3e3   : > { %13919 = vmatprep.subr.bf16.mxu1 %v18933_v34  ;;  %v19006_v34 = vld [vmem:[%s20795_s21 + $0x1e70] ss:$8 sps:$4 sm:$0xff]  }
 0x3e5   : > { %13879 = vmatpush1.bf16.msra.mxu0 %v18928_v35  ;;  %v620_v35 = vcombine.high %v22054_v3, %v22054_v3 }
 0x3e6   : > { %13920 = vmatpush1.bf16.msra.mxu1 %v18931_v37  ;;  %13880 = vmatprep.subr.bf16.mxu0 %v18936_v46  ;;  %v1043_v37 = vpack.c.bf16 %v21966_v4, %v21966_v4  ;;  %v1045_v46 = vpack.c.bf16 %v21969_v38, %v21969_v38  ;;  %v19016_v4 = vld [vmem:[%s20795_s21 + $0x1f60] ss:$8 sps:$4 sm:$0xff]  }
 0x3e7   : > { %13921 = vmatprep.subr.bf16.mxu1 %v18939_v31  ;;  %v19010_v31 = vld [vmem:[%s20795_s21 + $0x1f70] ss:$8 sps:$4 sm:$0xff]  }
 0x3e9   : > { %13881 = vmatpush1.bf16.msra.mxu0 %v18934_v48  ;;  %v19015_v48 = vld [vmem:[%s20795_s21 + $0x1e64] ss:$8 sps:$4 sm:$0xff]  }
 0x3ea   : > { %13922 = vmatpush1.bf16.msra.mxu1 %v18937_v32  ;;  %13882 = vmatprep.subr.bf16.mxu0 %v18942_v49  ;;  %v19018_v32 = vld [vmem:[%s20795_s21 + $0x1f64] ss:$8 sps:$4 sm:$0xff]   ;;  %v19013_v49 = vld [vmem:[%s20795_s21 + $0x1e60] ss:$8 sps:$4 sm:$0xff]  }
 0x3eb   : > { %13923 = vmatprep.subr.bf16.mxu1 %v18945_v14  ;;  %v1048_v14 = vpack.c.bf16 %v619_v8, %v619_v8  ;;  %v19078_v8 = vld [vmem:[%s20795_s21 + $0x1fc4] ss:$8 sps:$4 sm:$0xff]  }
 0x3ed   : > { %13883 = vmatpush1.bf16.msra.mxu0 %v18940_v51  ;;  %v1050_v51 = vpack.c.bf16 %v620_v35, %v620_v35  ;;  %v19073_v35 = vld [vmem:[%s20795_s21 + $0x1ec0] ss:$8 sps:$4 sm:$0xff]  }
 0x3ee   : > { %13924 = vmatpush1.bf16.msra.mxu1 %v18943_v52  ;;  %13884 = vmatprep.subr.bf16.mxu0 %v18948_v55 }
 0x3ef   : > { %13925 = vmatprep.subr.bf16.mxu1 %v18951_v43  ;;  %v19021_v43 = vld [vmem:[%s20795_s21 + $0x1e54] ss:$8 sps:$4 sm:$0xff]  }
 0x3f1   : > { %13885 = vmatpush1.bf16.msra.mxu0 %v18946_v56 }
 0x3f2   : > { %13926 = vmatpush1.bf16.msra.mxu1 %v18949_v45  ;;  %13886 = vmatprep.subr.bf16.mxu0 %v18954_v36  ;;  %v19024_v36 = vld [vmem:[%s20795_s21 + $0x1f54] ss:$8 sps:$4 sm:$0xff]  }
 0x3f3   : > { %13927 = vmatprep.subr.bf16.mxu1 %v18957_v59 }
 0x3f5   : > { %13887 = vmatpush1.bf16.msra.mxu0 %v18952_v40 }
 0x3f6   : > { %13928 = vmatpush1.bf16.msra.mxu1 %v18955_v60  ;;  %13888 = vmatprep.subr.bf16.mxu0 %v18960_v63 }
 0x3f7   : > { %13929 = vmatprep.subr.bf16.mxu1 %v18963_v13 }
 0x3f9   : > { %13889 = vmatpush2.bf16.msra.mxu0 %v18958_v53  ;;  %v19022_v53 = vld [vmem:[%s20795_s21 + $0x1f50] ss:$8 sps:$4 sm:$0xff]  }
 0x3fa   : > { %13930 = vmatpush2.bf16.msra.mxu1 %v18961_v16  ;;  %13890 = vmatprep.subr.bf16.mxu0 %v18966_v0  ;;  %v19030_v0 = vld [vmem:[%s20795_s21 + $0x1f44] ss:$8 sps:$4 sm:$0xff]  }
 0x3fb   : > { %13931 = vmatprep.subr.bf16.mxu1 %v18969_v57 }
 0x3fd   : > { %13891 = vmatpush2.bf16.msra.mxu0 %v18964_v1  ;;  %v19025_v1 = vld [vmem:[%s20795_s21 + $0x1e40] ss:$8 sps:$4 sm:$0xff]  }
 0x3fe   : > { %13932 = vmatpush2.bf16.msra.mxu1 %v18967_v2  ;;  %13892 = vmatprep.subr.bf16.mxu0 %v18972_v7  ;;  %v19028_v2 = vld [vmem:[%s20795_s21 + $0x1f40] ss:$8 sps:$4 sm:$0xff]   ;;  %v19033_v7 = vld [vmem:[%s20795_s21 + $0x1e34] ss:$8 sps:$4 sm:$0xff]  }
 0x3ff   : > { %13933 = vmatprep.subr.bf16.mxu1 %v18975_v61  ;;  %v19036_v61 = vld [vmem:[%s20795_s21 + $0x1f34] ss:$8 sps:$4 sm:$0xff]  }
 0x401   : > { %13893 = vmatpush2.bf16.msra.mxu0 %v18970_v41  ;;  %v19031_v41 = vld [vmem:[%s20795_s21 + $0x1e30] ss:$8 sps:$4 sm:$0xff]  }
 0x402   : > { %13934 = vmatpush2.bf16.msra.mxu1 %v18973_v62  ;;  %13894 = vmatprep.subr.bf16.mxu0 %v18978_v42  ;;  %v19034_v62 = vld [vmem:[%s20795_s21 + $0x1f30] ss:$8 sps:$4 sm:$0xff]   ;;  %v19039_v42 = vld [vmem:[%s20795_s21 + $0x1e24] ss:$8 sps:$4 sm:$0xff]  }
 0x403   : > { %13935 = vmatprep.subr.bf16.mxu1 %v18981_v47  ;;  %v19042_v47 = vld [vmem:[%s20795_s21 + $0x1f24] ss:$8 sps:$4 sm:$0xff]  }
 0x405   : > { %13895 = vmatpush2.bf16.msra.mxu0 %v18976_v10  ;;  %v19037_v10 = vld [vmem:[%s20795_s21 + $0x1e20] ss:$8 sps:$4 sm:$0xff]  }
 0x406   : > { %13936 = vmatpush2.bf16.msra.mxu1 %v18979_v11  ;;  %13896 = vmatprep.subr.bf16.mxu0 %v18984_v17  ;;  %v19040_v11 = vld [vmem:[%s20795_s21 + $0x1f20] ss:$8 sps:$4 sm:$0xff]   ;;  %v19045_v17 = vld [vmem:[%s20795_s21 + $0x1e14] ss:$8 sps:$4 sm:$0xff]  }
 0x407   : > { %13937 = vmatprep.subr.bf16.mxu1 %v18987_v5  ;;  %v19048_v5 = vld [vmem:[%s20795_s21 + $0x1f14] ss:$8 sps:$4 sm:$0xff]  }
 0x409   : > { %13897 = vmatpush2.bf16.msra.mxu0 %v18982_v18  ;;  %v19043_v18 = vld [vmem:[%s20795_s21 + $0x1e10] ss:$8 sps:$4 sm:$0xff]  }
 0x40a   : > { %13938 = vmatpush2.bf16.msra.mxu1 %v18985_v6  ;;  %13898 = vmatprep.subr.bf16.mxu0 %v18990_v19  ;;  %v19046_v6 = vld [vmem:[%s20795_s21 + $0x1f10] ss:$8 sps:$4 sm:$0xff]   ;;  %v19051_v19 = vld [vmem:[%s20795_s21 + $0x1e04] ss:$8 sps:$4 sm:$0xff]  }
 0x40b   : > { %13939 = vmatprep.subr.bf16.mxu1 %v18993_v20  ;;  %v19054_v20 = vld [vmem:[%s20795_s21 + $0x1f04] ss:$8 sps:$4 sm:$0xff]  }
 0x40d   : > { %13899 = vmatpush2.bf16.msra.mxu0 %v18988_v21  ;;  %v19049_v21 = vld [vmem:[%s20795_s21 + $0x1e00] ss:$8 sps:$4 sm:$0xff]  }
 0x40e   : > { %13940 = vmatpush2.bf16.msra.mxu1 %v18991_v25  ;;  %13900 = vmatprep.subr.bf16.mxu0 %v18996_v39  ;;  %v19057_v25 = vld [vmem:[%s20795_s21 + $0x1ef4] ss:$8 sps:$4 sm:$0xff]  }
 0x40f   : > { %13941 = vmatprep.subr.bf16.mxu1 %v18999_v12  ;;  %v19060_v39 = vld [vmem:[%s20795_s21 + $0x1ff4] ss:$8 sps:$4 sm:$0xff]   ;;  %v19055_v12 = vld [vmem:[%s20795_s21 + $0x1ef0] ss:$8 sps:$4 sm:$0xff]  }
 0x411   : > { %13901 = vmatpush2.bf16.msra.mxu0 %v18994_v26  ;;  %v19063_v26 = vld [vmem:[%s20795_s21 + $0x1ee4] ss:$8 sps:$4 sm:$0xff]  }
 0x412   : > { %13942 = vmatpush2.bf16.msra.mxu1 %v18997_v15  ;;  %13902 = vmatprep.subr.bf16.mxu0 %v19002_v27  ;;  %v19066_v15 = vld [vmem:[%s20795_s21 + $0x1fe4] ss:$8 sps:$4 sm:$0xff]   ;;  %v19061_v27 = vld [vmem:[%s20795_s21 + $0x1ee0] ss:$8 sps:$4 sm:$0xff]  }
 0x413   : > { %13943 = vmatprep.subr.bf16.mxu1 %v19005_v28  ;;  %v19064_v28 = vld [vmem:[%s20795_s21 + $0x1fe0] ss:$8 sps:$4 sm:$0xff]  }
 0x415   : > { %13903 = vmatpush2.bf16.msra.mxu0 %v19000_v33  ;;  %v19069_v33 = vld [vmem:[%s20795_s21 + $0x1ed4] ss:$8 sps:$4 sm:$0xff]  }
 0x416   : > { %13944 = vmatpush2.bf16.msra.mxu1 %v19003_v23  ;;  %13954 = vmatprep.subr.bf16.mxu0 %v19008_v58  ;;  %v19072_v23 = vld [vmem:[%s20795_s21 + $0x1fd4] ss:$8 sps:$4 sm:$0xff]   ;;  %v19067_v58 = vld [vmem:[%s20795_s21 + $0x1ed0] ss:$8 sps:$4 sm:$0xff]  }
 0x417   : > { %13995 = vmatprep.subr.bf16.mxu1 %v19012_v24  ;;  %v19070_v24 = vld [vmem:[%s20795_s21 + $0x1fd0] ss:$8 sps:$4 sm:$0xff]  }
 0x418   : > { %v13660_v52 = vpop.f32.mrf.mxu0  ;;  %13905 = vmatmul.mubr.bf16.vlgmr.msra.gmra.mxu0 %v1043_v37  ;;  %v19076_v37 = vld [vmem:[%s20795_s21 + $0x1fc0] ss:$8 sps:$4 sm:$0xff]  }
 0x419   : > { %v13701_v55 = vpop.f32.mrf.mxu1  ;;  %13946 = vmatmul.mubr.bf16.vlgmr.msra.gmra.mxu1 %v1045_v46  ;;  %v13661_v38 = vadd.f32 %v13660_v52, %v21993_v29  ;;  %13955 = vmatpush1.bf16.msra.mxu0 %v19006_v34  ;;  %v19019_v29 = vld [vmem:[%s20795_s21 + $0x1e50] ss:$8 sps:$4 sm:$0xff]   ;;  %v19075_v34 = vld [vmem:[%s20795_s21 + $0x1ec4] ss:$8 sps:$4 sm:$0xff]   ;;  %v19081_v46 = vld [vmem:[%s20795_s21 + $0x1eb4] ss:$8 sps:$4 sm:$0xff]  }
 0x41a   : > { %13996 = vmatpush1.bf16.msra.mxu1 %v19010_v31  ;;  %v13662_v56 = vpop.f32.mrf.mxu0  ;;  %13956 = vmatprep.subr.bf16.mxu0 %v19015_v48  ;;  %v19084_v31 = vld [vmem:[%s20795_s21 + $0x1fb4] ss:$8 sps:$4 sm:$0xff]   ;;  %v19079_v48 = vld [vmem:[%s20795_s21 + $0x1eb0] ss:$8 sps:$4 sm:$0xff]  }
 0x41b   : > { %v13703_v45 = vpop.f32.mrf.mxu1  ;;  %13997 = vmatprep.subr.bf16.mxu1 %v19018_v32  ;;  %v13663_v59 = vadd.f32 %v13662_v56, %v21996_v54  ;;  %v22078_v40 = vadd.f32 %v13701_v55, %v13661_v38  ;;  %13986 = vmatprep.mubr.bf16.mxu0 %v1048_v14  ;;  %v19027_v54 = vld [vmem:[%s20795_s21 + $0x1e44] ss:$8 sps:$4 sm:$0xff]   ;;  %v19082_v32 = vld [vmem:[%s20795_s21 + $0x1fb0] ss:$8 sps:$4 sm:$0xff]   ;;  %v303_v52 = vld [vmem:[%s20809_s7 + $0x80] sm:$0xff] }
 0x41c   : > { %14027 = vmatprep.mubr.bf16.mxu1 %v1050_v51  ;;  %v13664_v60 = vpop.f32.mrf.mxu0  ;;  %v19090_v14 = vld [vmem:[%s20795_s21 + $0x1fa4] ss:$8 sps:$4 sm:$0xff]   ;;  %v19085_v51 = vld [vmem:[%s20795_s21 + $0x1ea0] ss:$8 sps:$4 sm:$0xff]   ;;  %v19096_v38 = vld [vmem:[%s20795_s21 + $0x1f94] ss:$8 sps:$4 sm:$0xff]  }
 0x41d   : > { %v13705_v63 = vpop.f32.mrf.mxu1  ;;  %v22081_v13 = vadd.f32 %v13703_v45, %v13663_v59  ;;  %13957 = vmatpush1.bf16.msra.mxu0 %v19013_v49  ;;  %v19087_v49 = vld [vmem:[%s20795_s21 + $0x1ea4] ss:$8 sps:$4 sm:$0xff]   ;;  %v19088_v55 = vld [vmem:[%s20795_s21 + $0x1fa0] ss:$8 sps:$4 sm:$0xff]   ;;  %v19091_v56 = vld [vmem:[%s20795_s21 + $0x1e90] ss:$8 sps:$4 sm:$0xff]   ;;  %v22136_v60 = vrot.slane %v303_v52, %v20860_v50 }
 0x41e   : > { %13998 = vmatpush1.bf16.msra.mxu1 %v19016_v4  ;;  %v13665_v16 = vpop.f32.mrf.mxu0  ;;  %13958 = vmatprep.subr.bf16.mxu0 %v19021_v43  ;;  %v19093_v4 = vld [vmem:[%s20795_s21 + $0x1e94] ss:$8 sps:$4 sm:$0xff]   ;;  %v621_v43 = vcombine.high %v303_v52, %v303_v52  ;;  %v19094_v45 = vld [vmem:[%s20795_s21 + $0x1f90] ss:$8 sps:$4 sm:$0xff]   ;;  %v19102_v59 = vld [vmem:[%s20795_s21 + $0x1f84] ss:$8 sps:$4 sm:$0xff]  }
 0x41f   : > { %13999 = vmatprep.subr.bf16.mxu1 %v19024_v36  ;;  %v13706_v57 = vpop.f32.mrf.mxu1  ;;  %v19099_v36 = vld [vmem:[%s20795_s21 + $0x1e84] ss:$8 sps:$4 sm:$0xff]   ;;  %v19097_v63 = vld [vmem:[%s20795_s21 + $0x1e80] ss:$8 sps:$4 sm:$0xff]   ;;  %v19105_v16 = vld [vmem:[%s20795_s21 + $0x2074] ss:$8 sps:$4 sm:$0xff]  }
 0x420   : > { %v636_v57 = vcombine.high %v22136_v60, %v22136_v60  ;;  %v19149_v52 = vld [vmem:[%s20795_s21 + $0x2100] ss:$8 sps:$4 sm:$0xff]  }
 0x421   : > { %13959 = vmatpush1.bf16.msra.mxu0 %v19019_v29  ;;  %v22139_v29 = vrot.slane %v621_v43, %v20860_v50  ;;  %v19155_v43 = vld [vmem:[%s20795_s21 + $0x21f0] ss:$8 sps:$4 sm:$0xff]  }
 0x422   : > { %14000 = vmatpush1.bf16.msra.mxu1 %v19022_v53  ;;  %13960 = vmatprep.subr.bf16.mxu0 %v19027_v54  ;;  %v19100_v53 = vld [vmem:[%s20795_s21 + $0x1f80] ss:$8 sps:$4 sm:$0xff]   ;;  %v19109_v54 = vld [vmem:[%s20795_s21 + $0x2174] ss:$8 sps:$4 sm:$0xff]  }
 0x423   : > { %14001 = vmatprep.subr.bf16.mxu1 %v19030_v0  ;;  %v19103_v0 = vld [vmem:[%s20795_s21 + $0x2070] ss:$8 sps:$4 sm:$0xff]  }
 0x425   : > { %13961 = vmatpush1.bf16.msra.mxu0 %v19025_v1  ;;  %v637_v1 = vcombine.high %v22139_v29, %v22139_v29 }
 0x426   : > { %14002 = vmatpush1.bf16.msra.mxu1 %v19028_v2  ;;  %13962 = vmatprep.subr.bf16.mxu0 %v19033_v7  ;;  %v1047_v2 = vpack.c.bf16 %v22051_v30, %v22051_v30  ;;  %v1049_v7 = vpack.c.bf16 %v22054_v3, %v22054_v3  ;;  %v19113_v30 = vld [vmem:[%s20795_s21 + $0x2160] ss:$8 sps:$4 sm:$0xff]  }
 0x427   : > { %14003 = vmatprep.subr.bf16.mxu1 %v19036_v61  ;;  %v19107_v61 = vld [vmem:[%s20795_s21 + $0x2170] ss:$8 sps:$4 sm:$0xff]  }
 0x429   : > { %13963 = vmatpush1.bf16.msra.mxu0 %v19031_v41  ;;  %v19112_v41 = vld [vmem:[%s20795_s21 + $0x2064] ss:$8 sps:$4 sm:$0xff]  }
 0x42a   : > { %14004 = vmatpush1.bf16.msra.mxu1 %v19034_v62  ;;  %13964 = vmatprep.subr.bf16.mxu0 %v19039_v42  ;;  %v19115_v62 = vld [vmem:[%s20795_s21 + $0x2164] ss:$8 sps:$4 sm:$0xff]   ;;  %v19110_v42 = vld [vmem:[%s20795_s21 + $0x2060] ss:$8 sps:$4 sm:$0xff]  }
 0x42b   : > { %14005 = vmatprep.subr.bf16.mxu1 %v19042_v47  ;;  %v1052_v47 = vpack.c.bf16 %v636_v57, %v636_v57  ;;  %v19175_v57 = vld [vmem:[%s20795_s21 + $0x21c4] ss:$8 sps:$4 sm:$0xff]  }
 0x42d   : > { %13965 = vmatpush1.bf16.msra.mxu0 %v19037_v10  ;;  %v1054_v10 = vpack.c.bf16 %v637_v1, %v637_v1  ;;  %v19170_v1 = vld [vmem:[%s20795_s21 + $0x20c0] ss:$8 sps:$4 sm:$0xff]  }
 0x42e   : > { %14006 = vmatpush1.bf16.msra.mxu1 %v19040_v11  ;;  %13966 = vmatprep.subr.bf16.mxu0 %v19045_v17 }
 0x42f   : > { %14007 = vmatprep.subr.bf16.mxu1 %v19048_v5  ;;  %v19118_v5 = vld [vmem:[%s20795_s21 + $0x2054] ss:$8 sps:$4 sm:$0xff]  }
 0x431   : > { %13967 = vmatpush1.bf16.msra.mxu0 %v19043_v18 }
 0x432   : > { %14008 = vmatpush1.bf16.msra.mxu1 %v19046_v6  ;;  %13968 = vmatprep.subr.bf16.mxu0 %v19051_v19  ;;  %v19121_v19 = vld [vmem:[%s20795_s21 + $0x2154] ss:$8 sps:$4 sm:$0xff]  }
 0x433   : > { %14009 = vmatprep.subr.bf16.mxu1 %v19054_v20 }
 0x435   : > { %13969 = vmatpush1.bf16.msra.mxu0 %v19049_v21 }
 0x436   : > { %14010 = vmatpush1.bf16.msra.mxu1 %v19052_v22  ;;  %13970 = vmatprep.subr.bf16.mxu0 %v19057_v25 }
 0x437   : > { %14011 = vmatprep.subr.bf16.mxu1 %v19060_v39 }
 0x439   : > { %13971 = vmatpush2.bf16.msra.mxu0 %v19055_v12  ;;  %v19119_v12 = vld [vmem:[%s20795_s21 + $0x2150] ss:$8 sps:$4 sm:$0xff]  }
 0x43a   : > { %14012 = vmatpush2.bf16.msra.mxu1 %v19058_v9  ;;  %13972 = vmatprep.subr.bf16.mxu0 %v19063_v26  ;;  %v19127_v26 = vld [vmem:[%s20795_s21 + $0x2144] ss:$8 sps:$4 sm:$0xff]  }
 0x43b   : > { %14013 = vmatprep.subr.bf16.mxu1 %v19066_v15 }
 0x43d   : > { %13973 = vmatpush2.bf16.msra.mxu0 %v19061_v27  ;;  %v19122_v27 = vld [vmem:[%s20795_s21 + $0x2040] ss:$8 sps:$4 sm:$0xff]  }
 0x43e   : > { %14014 = vmatpush2.bf16.msra.mxu1 %v19064_v28  ;;  %13974 = vmatprep.subr.bf16.mxu0 %v19069_v33  ;;  %v19125_v28 = vld [vmem:[%s20795_s21 + $0x2140] ss:$8 sps:$4 sm:$0xff]   ;;  %v19130_v33 = vld [vmem:[%s20795_s21 + $0x2034] ss:$8 sps:$4 sm:$0xff]  }
 0x43f   : > { %14015 = vmatprep.subr.bf16.mxu1 %v19072_v23  ;;  %v19133_v23 = vld [vmem:[%s20795_s21 + $0x2134] ss:$8 sps:$4 sm:$0xff]  }
 0x441   : > { %13975 = vmatpush2.bf16.msra.mxu0 %v19067_v58  ;;  %v19128_v58 = vld [vmem:[%s20795_s21 + $0x2030] ss:$8 sps:$4 sm:$0xff]  }
 0x442   : > { %14016 = vmatpush2.bf16.msra.mxu1 %v19070_v24  ;;  %13976 = vmatprep.subr.bf16.mxu0 %v19075_v34  ;;  %v19131_v24 = vld [vmem:[%s20795_s21 + $0x2130] ss:$8 sps:$4 sm:$0xff]   ;;  %v19136_v34 = vld [vmem:[%s20795_s21 + $0x2024] ss:$8 sps:$4 sm:$0xff]  }
 0x443   : > { %14017 = vmatprep.subr.bf16.mxu1 %v19078_v8  ;;  %v19139_v8 = vld [vmem:[%s20795_s21 + $0x2124] ss:$8 sps:$4 sm:$0xff]  }
 0x445   : > { %13977 = vmatpush2.bf16.msra.mxu0 %v19073_v35  ;;  %v19134_v35 = vld [vmem:[%s20795_s21 + $0x2020] ss:$8 sps:$4 sm:$0xff]  }
 0x446   : > { %14018 = vmatpush2.bf16.msra.mxu1 %v19076_v37  ;;  %13978 = vmatprep.subr.bf16.mxu0 %v19081_v46  ;;  %v19137_v37 = vld [vmem:[%s20795_s21 + $0x2120] ss:$8 sps:$4 sm:$0xff]   ;;  %v19142_v46 = vld [vmem:[%s20795_s21 + $0x2014] ss:$8 sps:$4 sm:$0xff]  }
 0x447   : > { %14019 = vmatprep.subr.bf16.mxu1 %v19084_v31  ;;  %v19145_v31 = vld [vmem:[%s20795_s21 + $0x2114] ss:$8 sps:$4 sm:$0xff]  }
 0x449   : > { %13979 = vmatpush2.bf16.msra.mxu0 %v19079_v48  ;;  %v19140_v48 = vld [vmem:[%s20795_s21 + $0x2010] ss:$8 sps:$4 sm:$0xff]  }
 0x44a   : > { %14020 = vmatpush2.bf16.msra.mxu1 %v19082_v32  ;;  %13980 = vmatprep.subr.bf16.mxu0 %v19087_v49  ;;  %v19143_v32 = vld [vmem:[%s20795_s21 + $0x2110] ss:$8 sps:$4 sm:$0xff]   ;;  %v19148_v49 = vld [vmem:[%s20795_s21 + $0x2004] ss:$8 sps:$4 sm:$0xff]  }
 0x44b   : > { %14021 = vmatprep.subr.bf16.mxu1 %v19090_v14  ;;  %v19151_v14 = vld [vmem:[%s20795_s21 + $0x2104] ss:$8 sps:$4 sm:$0xff]  }
 0x44d   : > { %13981 = vmatpush2.bf16.msra.mxu0 %v19085_v51  ;;  %v19146_v51 = vld [vmem:[%s20795_s21 + $0x2000] ss:$8 sps:$4 sm:$0xff]  }
 0x44e   : > { %14022 = vmatpush2.bf16.msra.mxu1 %v19088_v55  ;;  %13982 = vmatprep.subr.bf16.mxu0 %v19093_v4  ;;  %v19154_v55 = vld [vmem:[%s20795_s21 + $0x20f4] ss:$8 sps:$4 sm:$0xff]  }
 0x44f   : > { %14023 = vmatprep.subr.bf16.mxu1 %v19096_v38  ;;  %v19157_v4 = vld [vmem:[%s20795_s21 + $0x21f4] ss:$8 sps:$4 sm:$0xff]   ;;  %v19152_v38 = vld [vmem:[%s20795_s21 + $0x20f0] ss:$8 sps:$4 sm:$0xff]  }
 0x451   : > { %13983 = vmatpush2.bf16.msra.mxu0 %v19091_v56  ;;  %v19160_v56 = vld [vmem:[%s20795_s21 + $0x20e4] ss:$8 sps:$4 sm:$0xff]  }
 0x452   : > { %14024 = vmatpush2.bf16.msra.mxu1 %v19094_v45  ;;  %13984 = vmatprep.subr.bf16.mxu0 %v19099_v36  ;;  %v19163_v45 = vld [vmem:[%s20795_s21 + $0x21e4] ss:$8 sps:$4 sm:$0xff]   ;;  %v19158_v36 = vld [vmem:[%s20795_s21 + $0x20e0] ss:$8 sps:$4 sm:$0xff]  }
 0x453   : > { %14025 = vmatprep.subr.bf16.mxu1 %v19102_v59  ;;  %v19161_v59 = vld [vmem:[%s20795_s21 + $0x21e0] ss:$8 sps:$4 sm:$0xff]  }
 0x455   : > { %13985 = vmatpush2.bf16.msra.mxu0 %v19097_v63  ;;  %v19166_v63 = vld [vmem:[%s20795_s21 + $0x20d4] ss:$8 sps:$4 sm:$0xff]  }
 0x456   : > { %14026 = vmatpush2.bf16.msra.mxu1 %v19100_v53  ;;  %14036 = vmatprep.subr.bf16.mxu0 %v19105_v16  ;;  %v19169_v53 = vld [vmem:[%s20795_s21 + $0x21d4] ss:$8 sps:$4 sm:$0xff]   ;;  %v19164_v16 = vld [vmem:[%s20795_s21 + $0x20d0] ss:$8 sps:$4 sm:$0xff]  }
 0x457   : > { %14077 = vmatprep.subr.bf16.mxu1 %v19109_v54  ;;  %v19167_v54 = vld [vmem:[%s20795_s21 + $0x21d0] ss:$8 sps:$4 sm:$0xff]  }
 0x458   : > { %v13742_v11 = vpop.f32.mrf.mxu0  ;;  %13987 = vmatmul.mubr.bf16.vlgmr.msra.gmra.mxu0 %v1047_v2  ;;  %v19173_v2 = vld [vmem:[%s20795_s21 + $0x21c0] ss:$8 sps:$4 sm:$0xff]  }
 0x459   : > { %v13783_v17 = vpop.f32.mrf.mxu1  ;;  %14028 = vmatmul.mubr.bf16.vlgmr.msra.gmra.mxu1 %v1049_v7  ;;  %v13743_v3 = vadd.f32 %v13742_v11, %v22078_v40  ;;  %14037 = vmatpush1.bf16.msra.mxu0 %v19103_v0  ;;  %v19116_v40 = vld [vmem:[%s20795_s21 + $0x2050] ss:$8 sps:$4 sm:$0xff]   ;;  %v19172_v0 = vld [vmem:[%s20795_s21 + $0x20c4] ss:$8 sps:$4 sm:$0xff]   ;;  %v19178_v7 = vld [vmem:[%s20795_s21 + $0x20b4] ss:$8 sps:$4 sm:$0xff]  }
 0x45a   : > { %14078 = vmatpush1.bf16.msra.mxu1 %v19107_v61  ;;  %v13744_v18 = vpop.f32.mrf.mxu0  ;;  %14038 = vmatprep.subr.bf16.mxu0 %v19112_v41  ;;  %v19181_v61 = vld [vmem:[%s20795_s21 + $0x21b4] ss:$8 sps:$4 sm:$0xff]   ;;  %v19176_v41 = vld [vmem:[%s20795_s21 + $0x20b0] ss:$8 sps:$4 sm:$0xff]   ;;  %v19182_v11 = vld [vmem:[%s20795_s21 + $0x20a0] ss:$8 sps:$4 sm:$0xff]  }
 0x45b   : > { %v13785_v6 = vpop.f32.mrf.mxu1  ;;  %14079 = vmatprep.subr.bf16.mxu1 %v19115_v62  ;;  %v13745_v20 = vadd.f32 %v13744_v18, %v22081_v13  ;;  %v22163_v21 = vadd.f32 %v13783_v17, %v13743_v3  ;;  %14068 = vmatprep.mubr.bf16.mxu0 %v1052_v47  ;;  %v19124_v13 = vld [vmem:[%s20795_s21 + $0x2044] ss:$8 sps:$4 sm:$0xff]   ;;  %v19179_v62 = vld [vmem:[%s20795_s21 + $0x21b0] ss:$8 sps:$4 sm:$0xff]   ;;  %v19185_v17 = vld [vmem:[%s20795_s21 + $0x21a0] ss:$8 sps:$4 sm:$0xff]  }
 0x45c   : > { %14109 = vmatprep.mubr.bf16.mxu1 %v1054_v10  ;;  %v13746_v22 = vpop.f32.mrf.mxu0  ;;  %v19187_v47 = vld [vmem:[%s20795_s21 + $0x21a4] ss:$8 sps:$4 sm:$0xff]   ;;  %v19193_v3 = vld [vmem:[%s20795_s21 + $0x2194] ss:$8 sps:$4 sm:$0xff]   ;;  %v19188_v18 = vld [vmem:[%s20795_s21 + $0x2090] ss:$8 sps:$4 sm:$0xff]  }
 0x45d   : > { %v13787_v25 = vpop.f32.mrf.mxu1  ;;  %v22166_v39 = vadd.f32 %v13785_v6, %v13745_v20  ;;  %14039 = vmatpush1.bf16.msra.mxu0 %v19110_v42  ;;  %v19184_v42 = vld [vmem:[%s20795_s21 + $0x20a4] ss:$8 sps:$4 sm:$0xff]   ;;  %v19191_v6 = vld [vmem:[%s20795_s21 + $0x2190] ss:$8 sps:$4 sm:$0xff]  }
 0x45e   : > { %14080 = vmatpush1.bf16.msra.mxu1 %v19113_v30  ;;  %v13747_v9 = vpop.f32.mrf.mxu0  ;;  %14040 = vmatprep.subr.bf16.mxu0 %v19118_v5  ;;  %v304_v10 = vld [vmem:[%s20809_s7 + $0x88] sm:$0xff]  ;;  %v19190_v30 = vld [vmem:[%s20795_s21 + $0x2094] ss:$8 sps:$4 sm:$0xff]  }
 0x45f   : > { %14081 = vmatprep.subr.bf16.mxu1 %v19121_v19  ;;  %v13788_v15 = vpop.f32.mrf.mxu1  ;;  %v638_v5 = vcombine.high %v304_v10, %v304_v10  ;;  %v19196_v19 = vld [vmem:[%s20795_s21 + $0x2084] ss:$8 sps:$4 sm:$0xff]   ;;  %v22221_v22 = vrot.slane %v304_v10, %v20860_v50  ;;  %v19194_v25 = vld [vmem:[%s20795_s21 + $0x2080] ss:$8 sps:$4 sm:$0xff]   ;;  %v19202_v9 = vld [vmem:[%s20795_s21 + $0x2274] ss:$8 sps:$4 sm:$0xff]  }
 0x460   : > { %v19199_v20 = vld [vmem:[%s20795_s21 + $0x2184] ss:$8 sps:$4 sm:$0xff]   ;;  %v19243_v10 = vld [vmem:[%s20795_s21 + $0x2200] ss:$8 sps:$4 sm:$0xff]  }
 0x461   : > { %14041 = vmatpush1.bf16.msra.mxu0 %v19116_v40  ;;  %v22224_v40 = vrot.slane %v638_v5, %v20860_v50  ;;  %v19252_v5 = vld [vmem:[%s20795_s21 + $0x23f0] ss:$8 sps:$4 sm:$0xff]  }
 0x462   : > { %14082 = vmatpush1.bf16.msra.mxu1 %v19119_v12  ;;  %14042 = vmatprep.subr.bf16.mxu0 %v19124_v13  ;;  %v19197_v12 = vld [vmem:[%s20795_s21 + $0x2180] ss:$8 sps:$4 sm:$0xff]   ;;  %v19206_v13 = vld [vmem:[%s20795_s21 + $0x2374] ss:$8 sps:$4 sm:$0xff]  }
 0x463   : > { %14083 = vmatprep.subr.bf16.mxu1 %v19127_v26  ;;  %v653_v26 = vcombine.high %v22221_v22, %v22221_v22  ;;  %v654_v15 = vcombine.high %v22224_v40, %v22224_v40 }
 0x465   : > { %14043 = vmatpush1.bf16.msra.mxu0 %v19122_v27  ;;  %v1051_v27 = vpack.c.bf16 %v22136_v60, %v22136_v60 }
 0x466   : > { %14084 = vmatpush1.bf16.msra.mxu1 %v19125_v28  ;;  %14044 = vmatprep.subr.bf16.mxu0 %v19130_v33  ;;  %v1053_v28 = vpack.c.bf16 %v22139_v29, %v22139_v29  ;;  %v19200_v33 = vld [vmem:[%s20795_s21 + $0x2270] ss:$8 sps:$4 sm:$0xff]  }
 0x467   : > { %14085 = vmatprep.subr.bf16.mxu1 %v19133_v23  ;;  %v19204_v23 = vld [vmem:[%s20795_s21 + $0x2370] ss:$8 sps:$4 sm:$0xff]  }
 0x469   : > { %14045 = vmatpush1.bf16.msra.mxu0 %v19128_v58  ;;  %v19209_v58 = vld [vmem:[%s20795_s21 + $0x2264] ss:$8 sps:$4 sm:$0xff]  }
 0x46a   : > { %14086 = vmatpush1.bf16.msra.mxu1 %v19131_v24  ;;  %14046 = vmatprep.subr.bf16.mxu0 %v19136_v34  ;;  %v19212_v24 = vld [vmem:[%s20795_s21 + $0x2364] ss:$8 sps:$4 sm:$0xff]   ;;  %v1056_v34 = vpack.c.bf16 %v653_v26, %v653_v26 }
 0x46b   : > { %14087 = vmatprep.subr.bf16.mxu1 %v19139_v8  ;;  %v1058_v8 = vpack.c.bf16 %v654_v15, %v654_v15  ;;  %v19269_v26 = vld [vmem:[%s20795_s21 + $0x22c4] ss:$8 sps:$4 sm:$0xff]  }
 0x46c   : > { %v19272_v15 = vld [vmem:[%s20795_s21 + $0x23c4] ss:$8 sps:$4 sm:$0xff]  }
 0x46d   : > { %14047 = vmatpush1.bf16.msra.mxu0 %v19134_v35 }
 0x46e   : > { %14088 = vmatpush1.bf16.msra.mxu1 %v19137_v37  ;;  %14048 = vmatprep.subr.bf16.mxu0 %v19142_v46  ;;  %v19207_v37 = vld [vmem:[%s20795_s21 + $0x2260] ss:$8 sps:$4 sm:$0xff]  }
 0x46f   : > { %14089 = vmatprep.subr.bf16.mxu1 %v19145_v31  ;;  %v19210_v46 = vld [vmem:[%s20795_s21 + $0x2360] ss:$8 sps:$4 sm:$0xff]  }
 0x471   : > { %14049 = vmatpush1.bf16.msra.mxu0 %v19140_v48 }
 0x472   : > { %14090 = vmatpush1.bf16.msra.mxu1 %v19143_v32  ;;  %14050 = vmatprep.subr.bf16.mxu0 %v19148_v49  ;;  %v19215_v32 = vld [vmem:[%s20795_s21 + $0x2254] ss:$8 sps:$4 sm:$0xff]  }
 0x473   : > { %14091 = vmatprep.subr.bf16.mxu1 %v19151_v14  ;;  %v19218_v49 = vld [vmem:[%s20795_s21 + $0x2354] ss:$8 sps:$4 sm:$0xff]  }
 0x475   : > { %14051 = vmatpush1.bf16.msra.mxu0 %v19146_v51 }
 0x476   : > { %14092 = vmatpush1.bf16.msra.mxu1 %v19149_v52  ;;  %14052 = vmatprep.subr.bf16.mxu0 %v19154_v55 }
 0x477   : > { %14093 = vmatprep.subr.bf16.mxu1 %v19157_v4  ;;  %v19213_v4 = vld [vmem:[%s20795_s21 + $0x2250] ss:$8 sps:$4 sm:$0xff]  }
 0x479   : > { %14053 = vmatpush2.bf16.msra.mxu0 %v19152_v38  ;;  %v19216_v38 = vld [vmem:[%s20795_s21 + $0x2350] ss:$8 sps:$4 sm:$0xff]  }
 0x47a   : > { %14094 = vmatpush2.bf16.msra.mxu1 %v19155_v43  ;;  %14054 = vmatprep.subr.bf16.mxu0 %v19160_v56  ;;  %v19224_v56 = vld [vmem:[%s20795_s21 + $0x2344] ss:$8 sps:$4 sm:$0xff]  }
 0x47b   : > { %14095 = vmatprep.subr.bf16.mxu1 %v19163_v45 }
 0x47d   : > { %14055 = vmatpush2.bf16.msra.mxu0 %v19158_v36  ;;  %v19219_v36 = vld [vmem:[%s20795_s21 + $0x2240] ss:$8 sps:$4 sm:$0xff]  }
 0x47e   : > { %14096 = vmatpush2.bf16.msra.mxu1 %v19161_v59  ;;  %14056 = vmatprep.subr.bf16.mxu0 %v19166_v63  ;;  %v19222_v59 = vld [vmem:[%s20795_s21 + $0x2340] ss:$8 sps:$4 sm:$0xff]   ;;  %v19227_v63 = vld [vmem:[%s20795_s21 + $0x2234] ss:$8 sps:$4 sm:$0xff]  }
 0x47f   : > { %14097 = vmatprep.subr.bf16.mxu1 %v19169_v53  ;;  %v19230_v53 = vld [vmem:[%s20795_s21 + $0x2334] ss:$8 sps:$4 sm:$0xff]  }
 0x481   : > { %14057 = vmatpush2.bf16.msra.mxu0 %v19164_v16  ;;  %v19225_v16 = vld [vmem:[%s20795_s21 + $0x2230] ss:$8 sps:$4 sm:$0xff]  }
 0x482   : > { %14098 = vmatpush2.bf16.msra.mxu1 %v19167_v54  ;;  %14058 = vmatprep.subr.bf16.mxu0 %v19172_v0  ;;  %v19228_v54 = vld [vmem:[%s20795_s21 + $0x2330] ss:$8 sps:$4 sm:$0xff]   ;;  %v19233_v0 = vld [vmem:[%s20795_s21 + $0x2224] ss:$8 sps:$4 sm:$0xff]  }
 0x483   : > { %14099 = vmatprep.subr.bf16.mxu1 %v19175_v57  ;;  %v19236_v57 = vld [vmem:[%s20795_s21 + $0x2324] ss:$8 sps:$4 sm:$0xff]  }
 0x485   : > { %14059 = vmatpush2.bf16.msra.mxu0 %v19170_v1  ;;  %v19231_v1 = vld [vmem:[%s20795_s21 + $0x2220] ss:$8 sps:$4 sm:$0xff]  }
 0x486   : > { %14100 = vmatpush2.bf16.msra.mxu1 %v19173_v2  ;;  %14060 = vmatprep.subr.bf16.mxu0 %v19178_v7  ;;  %v19234_v2 = vld [vmem:[%s20795_s21 + $0x2320] ss:$8 sps:$4 sm:$0xff]   ;;  %v19239_v7 = vld [vmem:[%s20795_s21 + $0x2214] ss:$8 sps:$4 sm:$0xff]  }
 0x487   : > { %14101 = vmatprep.subr.bf16.mxu1 %v19181_v61  ;;  %v19242_v61 = vld [vmem:[%s20795_s21 + $0x2314] ss:$8 sps:$4 sm:$0xff]  }
 0x489   : > { %14061 = vmatpush2.bf16.msra.mxu0 %v19176_v41  ;;  %v19237_v41 = vld [vmem:[%s20795_s21 + $0x2210] ss:$8 sps:$4 sm:$0xff]  }
 0x48a   : > { %14102 = vmatpush2.bf16.msra.mxu1 %v19179_v62  ;;  %14062 = vmatprep.subr.bf16.mxu0 %v19184_v42  ;;  %v19240_v62 = vld [vmem:[%s20795_s21 + $0x2310] ss:$8 sps:$4 sm:$0xff]   ;;  %v19245_v42 = vld [vmem:[%s20795_s21 + $0x2204] ss:$8 sps:$4 sm:$0xff]  }
 0x48b   : > { %14103 = vmatprep.subr.bf16.mxu1 %v19187_v47  ;;  %v19248_v47 = vld [vmem:[%s20795_s21 + $0x2304] ss:$8 sps:$4 sm:$0xff]  }
 0x48d   : > { %14063 = vmatpush2.bf16.msra.mxu0 %v19182_v11  ;;  %v19246_v11 = vld [vmem:[%s20795_s21 + $0x2300] ss:$8 sps:$4 sm:$0xff]  }
 0x48e   : > { %14104 = vmatpush2.bf16.msra.mxu1 %v19185_v17  ;;  %14064 = vmatprep.subr.bf16.mxu0 %v19190_v30  ;;  %v19251_v17 = vld [vmem:[%s20795_s21 + $0x22f4] ss:$8 sps:$4 sm:$0xff]  }
 0x48f   : > { %14105 = vmatprep.subr.bf16.mxu1 %v19193_v3  ;;  %v19254_v30 = vld [vmem:[%s20795_s21 + $0x23f4] ss:$8 sps:$4 sm:$0xff]   ;;  %v19249_v3 = vld [vmem:[%s20795_s21 + $0x22f0] ss:$8 sps:$4 sm:$0xff]  }
 0x491   : > { %14065 = vmatpush2.bf16.msra.mxu0 %v19188_v18  ;;  %v19257_v18 = vld [vmem:[%s20795_s21 + $0x22e4] ss:$8 sps:$4 sm:$0xff]  }
 0x492   : > { %14106 = vmatpush2.bf16.msra.mxu1 %v19191_v6  ;;  %14066 = vmatprep.subr.bf16.mxu0 %v19196_v19  ;;  %v19260_v6 = vld [vmem:[%s20795_s21 + $0x23e4] ss:$8 sps:$4 sm:$0xff]   ;;  %v19255_v19 = vld [vmem:[%s20795_s21 + $0x22e0] ss:$8 sps:$4 sm:$0xff]  }
 0x493   : > { %14107 = vmatprep.subr.bf16.mxu1 %v19199_v20  ;;  %v19258_v20 = vld [vmem:[%s20795_s21 + $0x23e0] ss:$8 sps:$4 sm:$0xff]  }
 0x495   : > { %14067 = vmatpush2.bf16.msra.mxu0 %v19194_v25  ;;  %v19263_v25 = vld [vmem:[%s20795_s21 + $0x22d4] ss:$8 sps:$4 sm:$0xff]  }
 0x496   : > { %14108 = vmatpush2.bf16.msra.mxu1 %v19197_v12  ;;  %14118 = vmatprep.subr.bf16.mxu0 %v19202_v9  ;;  %v19266_v12 = vld [vmem:[%s20795_s21 + $0x23d4] ss:$8 sps:$4 sm:$0xff]   ;;  %v19261_v9 = vld [vmem:[%s20795_s21 + $0x22d0] ss:$8 sps:$4 sm:$0xff]  }
 0x497   : > { %14159 = vmatprep.subr.bf16.mxu1 %v19206_v13  ;;  %v19264_v13 = vld [vmem:[%s20795_s21 + $0x23d0] ss:$8 sps:$4 sm:$0xff]  }
 0x498   : > { %v13824_v35 = vpop.f32.mrf.mxu0  ;;  %14069 = vmatmul.mubr.bf16.vlgmr.msra.gmra.mxu0 %v1051_v27  ;;  %v19267_v27 = vld [vmem:[%s20795_s21 + $0x22c0] ss:$8 sps:$4 sm:$0xff]  }
 0x499   : > { %v13865_v60 = vpop.f32.mrf.mxu1  ;;  %14110 = vmatmul.mubr.bf16.vlgmr.msra.gmra.mxu1 %v1053_v28  ;;  %v13825_v29 = vadd.f32 %v13824_v35, %v22163_v21  ;;  %14119 = vmatpush1.bf16.msra.mxu0 %v19200_v33  ;;  %v19270_v28 = vld [vmem:[%s20795_s21 + $0x23c0] ss:$8 sps:$4 sm:$0xff]   ;;  %v19275_v33 = vld [vmem:[%s20795_s21 + $0x22b4] ss:$8 sps:$4 sm:$0xff]   ;;  %v305_v35 = vld [vmem:[%s20809_s7 + $0x90] sm:$0xff] }
 0x49a   : > { %14160 = vmatpush1.bf16.msra.mxu1 %v19204_v23  ;;  %v13826_v31 = vpop.f32.mrf.mxu0  ;;  %14120 = vmatprep.subr.bf16.mxu0 %v19209_v58  ;;  %v19278_v23 = vld [vmem:[%s20795_s21 + $0x23b4] ss:$8 sps:$4 sm:$0xff]   ;;  %v19273_v58 = vld [vmem:[%s20795_s21 + $0x22b0] ss:$8 sps:$4 sm:$0xff]  }
 0x49b   : > { %v13867_v48 = vpop.f32.mrf.mxu1  ;;  %14161 = vmatprep.subr.bf16.mxu1 %v19212_v24  ;;  %v13827_v14 = vadd.f32 %v13826_v31, %v22166_v39  ;;  %v22248_v51 = vadd.f32 %v13865_v60, %v13825_v29  ;;  %14150 = vmatprep.mubr.bf16.mxu0 %v1056_v34  ;;  %v19221_v39 = vld [vmem:[%s20795_s21 + $0x2244] ss:$8 sps:$4 sm:$0xff]   ;;  %v19276_v24 = vld [vmem:[%s20795_s21 + $0x23b0] ss:$8 sps:$4 sm:$0xff]   ;;  %v19279_v60 = vld [vmem:[%s20795_s21 + $0x22a0] ss:$8 sps:$4 sm:$0xff]   ;;  %v655_v31 = vcombine.high %v305_v35, %v305_v35 }
 0x49c   : > { %14191 = vmatprep.mubr.bf16.mxu1 %v1058_v8  ;;  %v13828_v21 = vpop.f32.mrf.mxu0  ;;  %v19281_v34 = vld [vmem:[%s20795_s21 + $0x22a4] ss:$8 sps:$4 sm:$0xff]   ;;  %v19282_v29 = vld [vmem:[%s20795_s21 + $0x23a0] ss:$8 sps:$4 sm:$0xff]  }
 0x49d   : > { %v13869_v52 = vpop.f32.mrf.mxu1  ;;  %v22250_v55 = vadd.f32 %v13867_v48, %v13827_v14  ;;  %14121 = vmatpush1.bf16.msra.mxu0 %v19207_v37  ;;  %v19284_v8 = vld [vmem:[%s20795_s21 + $0x23a4] ss:$8 sps:$4 sm:$0xff]   ;;  %v19287_v37 = vld [vmem:[%s20795_s21 + $0x2294] ss:$8 sps:$4 sm:$0xff]   ;;  %v19285_v48 = vld [vmem:[%s20795_s21 + $0x2290] ss:$8 sps:$4 sm:$0xff]   ;;  %v22306_v21 = vrot.slane %v305_v35, %v20860_v50 }
 0x49e   : > { %14162 = vmatpush1.bf16.msra.mxu1 %v19210_v46  ;;  %v13829_v43 = vpop.f32.mrf.mxu0  ;;  %14122 = vmatprep.subr.bf16.mxu0 %v19215_v32  ;;  %v19290_v46 = vld [vmem:[%s20795_s21 + $0x2394] ss:$8 sps:$4 sm:$0xff]   ;;  %v19288_v32 = vld [vmem:[%s20795_s21 + $0x2390] ss:$8 sps:$4 sm:$0xff]   ;;  %v19296_v14 = vld [vmem:[%s20795_s21 + $0x2384] ss:$8 sps:$4 sm:$0xff]   ;;  %v22309_v52 = vrot.slane %v655_v31, %v20860_v50 }
 0x49f   : > { %14163 = vmatprep.subr.bf16.mxu1 %v19218_v49  ;;  %v13870_v45 = vpop.f32.mrf.mxu1  ;;  %v19293_v49 = vld [vmem:[%s20795_s21 + $0x2284] ss:$8 sps:$4 sm:$0xff]   ;;  %v19299_v43 = vld [vmem:[%s20795_s21 + $0x2474] ss:$8 sps:$4 sm:$0xff]   ;;  %v19340_v35 = vld [vmem:[%s20795_s21 + $0x2400] ss:$8 sps:$4 sm:$0xff]  }
 0x4a0   : > { %v671_v45 = vcombine.high %v22309_v52, %v22309_v52  ;;  %v19349_v31 = vld [vmem:[%s20795_s21 + $0x25f0] ss:$8 sps:$4 sm:$0xff]  }
 0x4a1   : > { %14123 = vmatpush1.bf16.msra.mxu0 %v19213_v4  ;;  %v19291_v4 = vld [vmem:[%s20795_s21 + $0x2280] ss:$8 sps:$4 sm:$0xff]  }
 0x4a2   : > { %14164 = vmatpush1.bf16.msra.mxu1 %v19216_v38  ;;  %14124 = vmatprep.subr.bf16.mxu0 %v19221_v39  ;;  %v19294_v38 = vld [vmem:[%s20795_s21 + $0x2380] ss:$8 sps:$4 sm:$0xff]   ;;  %v19303_v39 = vld [vmem:[%s20795_s21 + $0x2574] ss:$8 sps:$4 sm:$0xff]  }
 0x4a3   : > { %14165 = vmatprep.subr.bf16.mxu1 %v19224_v56  ;;  %v670_v56 = vcombine.high %v22306_v21, %v22306_v21 }
 0x4a5   : > { %14125 = vmatpush1.bf16.msra.mxu0 %v19219_v36  ;;  %v1055_v36 = vpack.c.bf16 %v22221_v22, %v22221_v22 }
 0x4a6   : > { %14166 = vmatpush1.bf16.msra.mxu1 %v19222_v59  ;;  %14126 = vmatprep.subr.bf16.mxu0 %v19227_v63  ;;  %v1057_v59 = vpack.c.bf16 %v22224_v40, %v22224_v40  ;;  %v19297_v63 = vld [vmem:[%s20795_s21 + $0x2470] ss:$8 sps:$4 sm:$0xff]  }
 0x4a7   : > { %14167 = vmatprep.subr.bf16.mxu1 %v19230_v53  ;;  %v19301_v53 = vld [vmem:[%s20795_s21 + $0x2570] ss:$8 sps:$4 sm:$0xff]  }
 0x4a9   : > { %14127 = vmatpush1.bf16.msra.mxu0 %v19225_v16  ;;  %v19306_v16 = vld [vmem:[%s20795_s21 + $0x2464] ss:$8 sps:$4 sm:$0xff]  }
 0x4aa   : > { %14168 = vmatpush1.bf16.msra.mxu1 %v19228_v54  ;;  %14128 = vmatprep.subr.bf16.mxu0 %v19233_v0  ;;  %v19309_v54 = vld [vmem:[%s20795_s21 + $0x2564] ss:$8 sps:$4 sm:$0xff]   ;;  %v1060_v0 = vpack.c.bf16 %v670_v56, %v670_v56 }
 0x4ab   : > { %14169 = vmatprep.subr.bf16.mxu1 %v19236_v57  ;;  %v1062_v57 = vpack.c.bf16 %v671_v45, %v671_v45  ;;  %v19366_v56 = vld [vmem:[%s20795_s21 + $0x24c4] ss:$8 sps:$4 sm:$0xff]  }
 0x4ac   : > { %v19369_v45 = vld [vmem:[%s20795_s21 + $0x25c4] ss:$8 sps:$4 sm:$0xff]  }
 0x4ad   : > { %14129 = vmatpush1.bf16.msra.mxu0 %v19231_v1 }
 0x4ae   : > { %14170 = vmatpush1.bf16.msra.mxu1 %v19234_v2  ;;  %14130 = vmatprep.subr.bf16.mxu0 %v19239_v7  ;;  %v19304_v2 = vld [vmem:[%s20795_s21 + $0x2460] ss:$8 sps:$4 sm:$0xff]  }
 0x4af   : > { %14171 = vmatprep.subr.bf16.mxu1 %v19242_v61  ;;  %v19307_v7 = vld [vmem:[%s20795_s21 + $0x2560] ss:$8 sps:$4 sm:$0xff]  }
 0x4b1   : > { %14131 = vmatpush1.bf16.msra.mxu0 %v19237_v41 }
 0x4b2   : > { %14172 = vmatpush1.bf16.msra.mxu1 %v19240_v62  ;;  %14132 = vmatprep.subr.bf16.mxu0 %v19245_v42  ;;  %v19312_v62 = vld [vmem:[%s20795_s21 + $0x2454] ss:$8 sps:$4 sm:$0xff]  }
 0x4b3   : > { %14173 = vmatprep.subr.bf16.mxu1 %v19248_v47  ;;  %v19315_v42 = vld [vmem:[%s20795_s21 + $0x2554] ss:$8 sps:$4 sm:$0xff]  }
 0x4b5   : > { %14133 = vmatpush1.bf16.msra.mxu0 %v19243_v10 }
 0x4b6   : > { %14174 = vmatpush1.bf16.msra.mxu1 %v19246_v11  ;;  %14134 = vmatprep.subr.bf16.mxu0 %v19251_v17 }
 0x4b7   : > { %14175 = vmatprep.subr.bf16.mxu1 %v19254_v30  ;;  %v19310_v30 = vld [vmem:[%s20795_s21 + $0x2450] ss:$8 sps:$4 sm:$0xff]  }
 0x4b9   : > { %14135 = vmatpush2.bf16.msra.mxu0 %v19249_v3  ;;  %v19313_v3 = vld [vmem:[%s20795_s21 + $0x2550] ss:$8 sps:$4 sm:$0xff]  }
 0x4ba   : > { %14176 = vmatpush2.bf16.msra.mxu1 %v19252_v5  ;;  %14136 = vmatprep.subr.bf16.mxu0 %v19257_v18  ;;  %v19321_v18 = vld [vmem:[%s20795_s21 + $0x2544] ss:$8 sps:$4 sm:$0xff]  }
 0x4bb   : > { %14177 = vmatprep.subr.bf16.mxu1 %v19260_v6 }
 0x4bd   : > { %14137 = vmatpush2.bf16.msra.mxu0 %v19255_v19  ;;  %v19316_v19 = vld [vmem:[%s20795_s21 + $0x2440] ss:$8 sps:$4 sm:$0xff]  }
 0x4be   : > { %14178 = vmatpush2.bf16.msra.mxu1 %v19258_v20  ;;  %14138 = vmatprep.subr.bf16.mxu0 %v19263_v25  ;;  %v19319_v20 = vld [vmem:[%s20795_s21 + $0x2540] ss:$8 sps:$4 sm:$0xff]   ;;  %v19324_v25 = vld [vmem:[%s20795_s21 + $0x2434] ss:$8 sps:$4 sm:$0xff]  }
 0x4bf   : > { %14179 = vmatprep.subr.bf16.mxu1 %v19266_v12  ;;  %v19327_v12 = vld [vmem:[%s20795_s21 + $0x2534] ss:$8 sps:$4 sm:$0xff]  }
 0x4c1   : > { %14139 = vmatpush2.bf16.msra.mxu0 %v19261_v9  ;;  %v19322_v9 = vld [vmem:[%s20795_s21 + $0x2430] ss:$8 sps:$4 sm:$0xff]  }
 0x4c2   : > { %14180 = vmatpush2.bf16.msra.mxu1 %v19264_v13  ;;  %14140 = vmatprep.subr.bf16.mxu0 %v19269_v26  ;;  %v19325_v13 = vld [vmem:[%s20795_s21 + $0x2530] ss:$8 sps:$4 sm:$0xff]   ;;  %v19330_v26 = vld [vmem:[%s20795_s21 + $0x2424] ss:$8 sps:$4 sm:$0xff]  }
 0x4c3   : > { %14181 = vmatprep.subr.bf16.mxu1 %v19272_v15  ;;  %v19333_v15 = vld [vmem:[%s20795_s21 + $0x2524] ss:$8 sps:$4 sm:$0xff]  }
 0x4c5   : > { %14141 = vmatpush2.bf16.msra.mxu0 %v19267_v27  ;;  %v19328_v27 = vld [vmem:[%s20795_s21 + $0x2420] ss:$8 sps:$4 sm:$0xff]  }
 0x4c6   : > { %14182 = vmatpush2.bf16.msra.mxu1 %v19270_v28  ;;  %14142 = vmatprep.subr.bf16.mxu0 %v19275_v33  ;;  %v19331_v28 = vld [vmem:[%s20795_s21 + $0x2520] ss:$8 sps:$4 sm:$0xff]   ;;  %v19336_v33 = vld [vmem:[%s20795_s21 + $0x2414] ss:$8 sps:$4 sm:$0xff]  }
 0x4c7   : > { %14183 = vmatprep.subr.bf16.mxu1 %v19278_v23  ;;  %v19339_v23 = vld [vmem:[%s20795_s21 + $0x2514] ss:$8 sps:$4 sm:$0xff]  }
 0x4c9   : > { %14143 = vmatpush2.bf16.msra.mxu0 %v19273_v58  ;;  %v19334_v58 = vld [vmem:[%s20795_s21 + $0x2410] ss:$8 sps:$4 sm:$0xff]  }
 0x4ca   : > { %14184 = vmatpush2.bf16.msra.mxu1 %v19276_v24  ;;  %14144 = vmatprep.subr.bf16.mxu0 %v19281_v34  ;;  %v19337_v24 = vld [vmem:[%s20795_s21 + $0x2510] ss:$8 sps:$4 sm:$0xff]   ;;  %v19342_v34 = vld [vmem:[%s20795_s21 + $0x2404] ss:$8 sps:$4 sm:$0xff]  }
 0x4cb   : > { %14185 = vmatprep.subr.bf16.mxu1 %v19284_v8  ;;  %v19345_v8 = vld [vmem:[%s20795_s21 + $0x2504] ss:$8 sps:$4 sm:$0xff]  }
 0x4cd   : > { %14145 = vmatpush2.bf16.msra.mxu0 %v19279_v60  ;;  %v19343_v60 = vld [vmem:[%s20795_s21 + $0x2500] ss:$8 sps:$4 sm:$0xff]  }
 0x4ce   : > { %14186 = vmatpush2.bf16.msra.mxu1 %v19282_v29  ;;  %14146 = vmatprep.subr.bf16.mxu0 %v19287_v37  ;;  %v19348_v29 = vld [vmem:[%s20795_s21 + $0x24f4] ss:$8 sps:$4 sm:$0xff]  }
 0x4cf   : > { %14187 = vmatprep.subr.bf16.mxu1 %v19290_v46  ;;  %v19351_v37 = vld [vmem:[%s20795_s21 + $0x25f4] ss:$8 sps:$4 sm:$0xff]   ;;  %v19346_v46 = vld [vmem:[%s20795_s21 + $0x24f0] ss:$8 sps:$4 sm:$0xff]  }
 0x4d1   : > { %14147 = vmatpush2.bf16.msra.mxu0 %v19285_v48  ;;  %v19354_v48 = vld [vmem:[%s20795_s21 + $0x24e4] ss:$8 sps:$4 sm:$0xff]  }
 0x4d2   : > { %14188 = vmatpush2.bf16.msra.mxu1 %v19288_v32  ;;  %14148 = vmatprep.subr.bf16.mxu0 %v19293_v49  ;;  %v19357_v32 = vld [vmem:[%s20795_s21 + $0x25e4] ss:$8 sps:$4 sm:$0xff]   ;;  %v19352_v49 = vld [vmem:[%s20795_s21 + $0x24e0] ss:$8 sps:$4 sm:$0xff]  }
 0x4d3   : > { %14189 = vmatprep.subr.bf16.mxu1 %v19296_v14  ;;  %v19355_v14 = vld [vmem:[%s20795_s21 + $0x25e0] ss:$8 sps:$4 sm:$0xff]  }
 0x4d5   : > { %14149 = vmatpush2.bf16.msra.mxu0 %v19291_v4  ;;  %v19360_v4 = vld [vmem:[%s20795_s21 + $0x24d4] ss:$8 sps:$4 sm:$0xff]  }
 0x4d6   : > { %14190 = vmatpush2.bf16.msra.mxu1 %v19294_v38  ;;  %14200 = vmatprep.subr.bf16.mxu0 %v19299_v43  ;;  %v19363_v38 = vld [vmem:[%s20795_s21 + $0x25d4] ss:$8 sps:$4 sm:$0xff]   ;;  %v19358_v43 = vld [vmem:[%s20795_s21 + $0x24d0] ss:$8 sps:$4 sm:$0xff]  }
 0x4d7   : > { %14241 = vmatprep.subr.bf16.mxu1 %v19303_v39  ;;  %v19361_v39 = vld [vmem:[%s20795_s21 + $0x25d0] ss:$8 sps:$4 sm:$0xff]  }
 0x4d8   : > { %v13906_v1 = vpop.f32.mrf.mxu0  ;;  %14151 = vmatmul.mubr.bf16.vlgmr.msra.gmra.mxu0 %v1055_v36  ;;  %v19364_v36 = vld [vmem:[%s20795_s21 + $0x24c0] ss:$8 sps:$4 sm:$0xff]  }
 0x4d9   : > { %v13947_v22 = vpop.f32.mrf.mxu1  ;;  %14192 = vmatmul.mubr.bf16.vlgmr.msra.gmra.mxu1 %v1057_v59  ;;  %v13907_v40 = vadd.f32 %v13906_v1, %v22248_v51  ;;  %14201 = vmatpush1.bf16.msra.mxu0 %v19297_v63  ;;  %v19367_v59 = vld [vmem:[%s20795_s21 + $0x25c0] ss:$8 sps:$4 sm:$0xff]   ;;  %v19372_v63 = vld [vmem:[%s20795_s21 + $0x24b4] ss:$8 sps:$4 sm:$0xff]  }
 0x4da   : > { %14242 = vmatpush1.bf16.msra.mxu1 %v19301_v53  ;;  %v13908_v61 = vpop.f32.mrf.mxu0  ;;  %14202 = vmatprep.subr.bf16.mxu0 %v19306_v16  ;;  %v19375_v53 = vld [vmem:[%s20795_s21 + $0x25b4] ss:$8 sps:$4 sm:$0xff]   ;;  %v19370_v16 = vld [vmem:[%s20795_s21 + $0x24b0] ss:$8 sps:$4 sm:$0xff]  }
 0x4db   : > { %v13949_v41 = vpop.f32.mrf.mxu1  ;;  %14243 = vmatprep.subr.bf16.mxu1 %v19309_v54  ;;  %v13909_v47 = vadd.f32 %v13908_v61, %v22250_v55  ;;  %v22333_v10 = vadd.f32 %v13947_v22, %v13907_v40  ;;  %14232 = vmatprep.mubr.bf16.mxu0 %v1060_v0  ;;  %v19318_v55 = vld [vmem:[%s20795_s21 + $0x2444] ss:$8 sps:$4 sm:$0xff]   ;;  %v19373_v54 = vld [vmem:[%s20795_s21 + $0x25b0] ss:$8 sps:$4 sm:$0xff]   ;;  %v19376_v22 = vld [vmem:[%s20795_s21 + $0x24a0] ss:$8 sps:$4 sm:$0xff]  }
 0x4dc   : > { %14273 = vmatprep.mubr.bf16.mxu1 %v1062_v57  ;;  %v13910_v51 = vpop.f32.mrf.mxu0  ;;  %v19378_v0 = vld [vmem:[%s20795_s21 + $0x24a4] ss:$8 sps:$4 sm:$0xff]   ;;  %v306_v1 = vld [vmem:[%s20809_s7 + $0x98] sm:$0xff]  ;;  %v19379_v40 = vld [vmem:[%s20795_s21 + $0x25a0] ss:$8 sps:$4 sm:$0xff]  }
 0x4dd   : > { %v13951_v11 = vpop.f32.mrf.mxu1  ;;  %v22335_v17 = vadd.f32 %v13949_v41, %v13909_v47  ;;  %14203 = vmatpush1.bf16.msra.mxu0 %v19304_v2  ;;  %v19381_v57 = vld [vmem:[%s20795_s21 + $0x25a4] ss:$8 sps:$4 sm:$0xff]   ;;  %v19384_v2 = vld [vmem:[%s20795_s21 + $0x2494] ss:$8 sps:$4 sm:$0xff]   ;;  %v672_v61 = vcombine.high %v306_v1, %v306_v1  ;;  %v19382_v41 = vld [vmem:[%s20795_s21 + $0x2490] ss:$8 sps:$4 sm:$0xff]   ;;  %v22391_v51 = vrot.slane %v306_v1, %v20860_v50 }
 0x4de   : > { %14244 = vmatpush1.bf16.msra.mxu1 %v19307_v7  ;;  %v13911_v5 = vpop.f32.mrf.mxu0  ;;  %14204 = vmatprep.subr.bf16.mxu0 %v19312_v62  ;;  %v19387_v7 = vld [vmem:[%s20795_s21 + $0x2594] ss:$8 sps:$4 sm:$0xff]   ;;  %v19385_v62 = vld [vmem:[%s20795_s21 + $0x2590] ss:$8 sps:$4 sm:$0xff]   ;;  %v19393_v47 = vld [vmem:[%s20795_s21 + $0x2584] ss:$8 sps:$4 sm:$0xff]  }
 0x4df   : > { %14245 = vmatprep.subr.bf16.mxu1 %v19315_v42  ;;  %v13952_v6 = vpop.f32.mrf.mxu1  ;;  %v19390_v42 = vld [vmem:[%s20795_s21 + $0x2484] ss:$8 sps:$4 sm:$0xff]   ;;  %v22394_v11 = vrot.slane %v672_v61, %v20860_v50  ;;  %v19396_v5 = vld [vmem:[%s20795_s21 + $0x2674] ss:$8 sps:$4 sm:$0xff]   ;;  %v19437_v1 = vld [vmem:[%s20795_s21 + $0x2600] ss:$8 sps:$4 sm:$0xff]  }
 0x4e0   : > { %v19446_v61 = vld [vmem:[%s20795_s21 + $0x27f0] ss:$8 sps:$4 sm:$0xff]  }
 0x4e1   : > { %14205 = vmatpush1.bf16.msra.mxu0 %v19310_v30  ;;  %v19388_v30 = vld [vmem:[%s20795_s21 + $0x2480] ss:$8 sps:$4 sm:$0xff]   ;;  %v688_v6 = vcombine.high %v22394_v11, %v22394_v11 }
 0x4e2   : > { %14246 = vmatpush1.bf16.msra.mxu1 %v19313_v3  ;;  %14206 = vmatprep.subr.bf16.mxu0 %v19318_v55  ;;  %v19391_v3 = vld [vmem:[%s20795_s21 + $0x2580] ss:$8 sps:$4 sm:$0xff]   ;;  %v19400_v55 = vld [vmem:[%s20795_s21 + $0x2774] ss:$8 sps:$4 sm:$0xff]  }
 0x4e3   : > { %14247 = vmatprep.subr.bf16.mxu1 %v19321_v18  ;;  %v687_v18 = vcombine.high %v22391_v51, %v22391_v51 }
 0x4e5   : > { %14207 = vmatpush1.bf16.msra.mxu0 %v19316_v19  ;;  %v1059_v19 = vpack.c.bf16 %v22306_v21, %v22306_v21 }
 0x4e6   : > { %14248 = vmatpush1.bf16.msra.mxu1 %v19319_v20  ;;  %14208 = vmatprep.subr.bf16.mxu0 %v19324_v25  ;;  %v1061_v20 = vpack.c.bf16 %v22309_v52, %v22309_v52  ;;  %v19394_v25 = vld [vmem:[%s20795_s21 + $0x2670] ss:$8 sps:$4 sm:$0xff]  }
 0x4e7   : > { %14249 = vmatprep.subr.bf16.mxu1 %v19327_v12  ;;  %v19398_v12 = vld [vmem:[%s20795_s21 + $0x2770] ss:$8 sps:$4 sm:$0xff]  }
 0x4e9   : > { %14209 = vmatpush1.bf16.msra.mxu0 %v19322_v9  ;;  %v19403_v9 = vld [vmem:[%s20795_s21 + $0x2664] ss:$8 sps:$4 sm:$0xff]  }
 0x4ea   : > { %14250 = vmatpush1.bf16.msra.mxu1 %v19325_v13  ;;  %14210 = vmatprep.subr.bf16.mxu0 %v19330_v26  ;;  %v19406_v13 = vld [vmem:[%s20795_s21 + $0x2764] ss:$8 sps:$4 sm:$0xff]   ;;  %v1064_v26 = vpack.c.bf16 %v687_v18, %v687_v18 }
 0x4eb   : > { %14251 = vmatprep.subr.bf16.mxu1 %v19333_v15  ;;  %v1066_v15 = vpack.c.bf16 %v688_v6, %v688_v6  ;;  %v19463_v18 = vld [vmem:[%s20795_s21 + $0x26c4] ss:$8 sps:$4 sm:$0xff]  }
 0x4ec   : > { %v19466_v6 = vld [vmem:[%s20795_s21 + $0x27c4] ss:$8 sps:$4 sm:$0xff]  }
 0x4ed   : > { %14211 = vmatpush1.bf16.msra.mxu0 %v19328_v27 }
 0x4ee   : > { %14252 = vmatpush1.bf16.msra.mxu1 %v19331_v28  ;;  %14212 = vmatprep.subr.bf16.mxu0 %v19336_v33  ;;  %v19401_v28 = vld [vmem:[%s20795_s21 + $0x2660] ss:$8 sps:$4 sm:$0xff]  }
 0x4ef   : > { %14253 = vmatprep.subr.bf16.mxu1 %v19339_v23  ;;  %v19404_v33 = vld [vmem:[%s20795_s21 + $0x2760] ss:$8 sps:$4 sm:$0xff]  }
 0x4f1   : > { %14213 = vmatpush1.bf16.msra.mxu0 %v19334_v58 }
 0x4f2   : > { %14254 = vmatpush1.bf16.msra.mxu1 %v19337_v24  ;;  %14214 = vmatprep.subr.bf16.mxu0 %v19342_v34  ;;  %v19409_v24 = vld [vmem:[%s20795_s21 + $0x2654] ss:$8 sps:$4 sm:$0xff]  }
 0x4f3   : > { %14255 = vmatprep.subr.bf16.mxu1 %v19345_v8  ;;  %v19412_v34 = vld [vmem:[%s20795_s21 + $0x2754] ss:$8 sps:$4 sm:$0xff]  }
 0x4f5   : > { %14215 = vmatpush1.bf16.msra.mxu0 %v19340_v35 }
 0x4f6   : > { %14256 = vmatpush1.bf16.msra.mxu1 %v19343_v60  ;;  %14216 = vmatprep.subr.bf16.mxu0 %v19348_v29 }
 0x4f7   : > { %14257 = vmatprep.subr.bf16.mxu1 %v19351_v37  ;;  %v19407_v37 = vld [vmem:[%s20795_s21 + $0x2650] ss:$8 sps:$4 sm:$0xff]  }
 0x4f9   : > { %14217 = vmatpush2.bf16.msra.mxu0 %v19346_v46  ;;  %v19410_v46 = vld [vmem:[%s20795_s21 + $0x2750] ss:$8 sps:$4 sm:$0xff]  }
 0x4fa   : > { %14258 = vmatpush2.bf16.msra.mxu1 %v19349_v31  ;;  %14218 = vmatprep.subr.bf16.mxu0 %v19354_v48  ;;  %v19418_v48 = vld [vmem:[%s20795_s21 + $0x2744] ss:$8 sps:$4 sm:$0xff]  }
 0x4fb   : > { %14259 = vmatprep.subr.bf16.mxu1 %v19357_v32 }
 0x4fd   : > { %14219 = vmatpush2.bf16.msra.mxu0 %v19352_v49  ;;  %v19413_v49 = vld [vmem:[%s20795_s21 + $0x2640] ss:$8 sps:$4 sm:$0xff]  }
 0x4fe   : > { %14260 = vmatpush2.bf16.msra.mxu1 %v19355_v14  ;;  %14220 = vmatprep.subr.bf16.mxu0 %v19360_v4  ;;  %v19416_v14 = vld [vmem:[%s20795_s21 + $0x2740] ss:$8 sps:$4 sm:$0xff]   ;;  %v19421_v4 = vld [vmem:[%s20795_s21 + $0x2634] ss:$8 sps:$4 sm:$0xff]  }
 0x4ff   : > { %14261 = vmatprep.subr.bf16.mxu1 %v19363_v38  ;;  %v19424_v38 = vld [vmem:[%s20795_s21 + $0x2734] ss:$8 sps:$4 sm:$0xff]  }
 0x501   : > { %14221 = vmatpush2.bf16.msra.mxu0 %v19358_v43  ;;  %v19419_v43 = vld [vmem:[%s20795_s21 + $0x2630] ss:$8 sps:$4 sm:$0xff]  }
 0x502   : > { %14262 = vmatpush2.bf16.msra.mxu1 %v19361_v39  ;;  %14222 = vmatprep.subr.bf16.mxu0 %v19366_v56  ;;  %v19422_v39 = vld [vmem:[%s20795_s21 + $0x2730] ss:$8 sps:$4 sm:$0xff]   ;;  %v19427_v56 = vld [vmem:[%s20795_s21 + $0x2624] ss:$8 sps:$4 sm:$0xff]  }
 0x503   : > { %14263 = vmatprep.subr.bf16.mxu1 %v19369_v45  ;;  %v19430_v45 = vld [vmem:[%s20795_s21 + $0x2724] ss:$8 sps:$4 sm:$0xff]  }
 0x505   : > { %14223 = vmatpush2.bf16.msra.mxu0 %v19364_v36  ;;  %v19425_v36 = vld [vmem:[%s20795_s21 + $0x2620] ss:$8 sps:$4 sm:$0xff]  }
 0x506   : > { %14264 = vmatpush2.bf16.msra.mxu1 %v19367_v59  ;;  %14224 = vmatprep.subr.bf16.mxu0 %v19372_v63  ;;  %v19428_v59 = vld [vmem:[%s20795_s21 + $0x2720] ss:$8 sps:$4 sm:$0xff]   ;;  %v19433_v63 = vld [vmem:[%s20795_s21 + $0x2614] ss:$8 sps:$4 sm:$0xff]  }
 0x507   : > { %14265 = vmatprep.subr.bf16.mxu1 %v19375_v53  ;;  %v19436_v53 = vld [vmem:[%s20795_s21 + $0x2714] ss:$8 sps:$4 sm:$0xff]  }
 0x509   : > { %14225 = vmatpush2.bf16.msra.mxu0 %v19370_v16  ;;  %v19431_v16 = vld [vmem:[%s20795_s21 + $0x2610] ss:$8 sps:$4 sm:$0xff]  }
 0x50a   : > { %14266 = vmatpush2.bf16.msra.mxu1 %v19373_v54  ;;  %14226 = vmatprep.subr.bf16.mxu0 %v19378_v0  ;;  %v19434_v54 = vld [vmem:[%s20795_s21 + $0x2710] ss:$8 sps:$4 sm:$0xff]   ;;  %v19439_v0 = vld [vmem:[%s20795_s21 + $0x2604] ss:$8 sps:$4 sm:$0xff]  }
 0x50b   : > { %14267 = vmatprep.subr.bf16.mxu1 %v19381_v57  ;;  %v19442_v57 = vld [vmem:[%s20795_s21 + $0x2704] ss:$8 sps:$4 sm:$0xff]  }
 0x50d   : > { %14227 = vmatpush2.bf16.msra.mxu0 %v19376_v22  ;;  %v19440_v22 = vld [vmem:[%s20795_s21 + $0x2700] ss:$8 sps:$4 sm:$0xff]  }
 0x50e   : > { %14268 = vmatpush2.bf16.msra.mxu1 %v19379_v40  ;;  %14228 = vmatprep.subr.bf16.mxu0 %v19384_v2  ;;  %v19445_v40 = vld [vmem:[%s20795_s21 + $0x26f4] ss:$8 sps:$4 sm:$0xff]  }
 0x50f   : > { %14269 = vmatprep.subr.bf16.mxu1 %v19387_v7  ;;  %v19448_v2 = vld [vmem:[%s20795_s21 + $0x27f4] ss:$8 sps:$4 sm:$0xff]   ;;  %v19443_v7 = vld [vmem:[%s20795_s21 + $0x26f0] ss:$8 sps:$4 sm:$0xff]  }
 0x511   : > { %14229 = vmatpush2.bf16.msra.mxu0 %v19382_v41  ;;  %v19451_v41 = vld [vmem:[%s20795_s21 + $0x26e4] ss:$8 sps:$4 sm:$0xff]  }
 0x512   : > { %14270 = vmatpush2.bf16.msra.mxu1 %v19385_v62  ;;  %14230 = vmatprep.subr.bf16.mxu0 %v19390_v42  ;;  %v19454_v62 = vld [vmem:[%s20795_s21 + $0x27e4] ss:$8 sps:$4 sm:$0xff]   ;;  %v19449_v42 = vld [vmem:[%s20795_s21 + $0x26e0] ss:$8 sps:$4 sm:$0xff]  }
 0x513   : > { %14271 = vmatprep.subr.bf16.mxu1 %v19393_v47  ;;  %v19452_v47 = vld [vmem:[%s20795_s21 + $0x27e0] ss:$8 sps:$4 sm:$0xff]  }
 0x515   : > { %14231 = vmatpush2.bf16.msra.mxu0 %v19388_v30  ;;  %v19457_v30 = vld [vmem:[%s20795_s21 + $0x26d4] ss:$8 sps:$4 sm:$0xff]  }
 0x516   : > { %14272 = vmatpush2.bf16.msra.mxu1 %v19391_v3  ;;  %14282 = vmatprep.subr.bf16.mxu0 %v19396_v5  ;;  %v19460_v3 = vld [vmem:[%s20795_s21 + $0x27d4] ss:$8 sps:$4 sm:$0xff]   ;;  %v19455_v5 = vld [vmem:[%s20795_s21 + $0x26d0] ss:$8 sps:$4 sm:$0xff]  }
 0x517   : > { %14323 = vmatprep.subr.bf16.mxu1 %v19400_v55  ;;  %v19458_v55 = vld [vmem:[%s20795_s21 + $0x27d0] ss:$8 sps:$4 sm:$0xff]  }
 0x518   : > { %v13988_v27 = vpop.f32.mrf.mxu0  ;;  %14233 = vmatmul.mubr.bf16.vlgmr.msra.gmra.mxu0 %v1059_v19  ;;  %v19461_v19 = vld [vmem:[%s20795_s21 + $0x26c0] ss:$8 sps:$4 sm:$0xff]  }
 0x519   : > { %v14029_v21 = vpop.f32.mrf.mxu1  ;;  %14274 = vmatmul.mubr.bf16.vlgmr.msra.gmra.mxu1 %v1061_v20  ;;  %v13989_v52 = vadd.f32 %v13988_v27, %v22333_v10  ;;  %14283 = vmatpush1.bf16.msra.mxu0 %v19394_v25  ;;  %v19464_v20 = vld [vmem:[%s20795_s21 + $0x27c0] ss:$8 sps:$4 sm:$0xff]   ;;  %v19469_v25 = vld [vmem:[%s20795_s21 + $0x26b4] ss:$8 sps:$4 sm:$0xff]  }
 0x51a   : > { %14324 = vmatpush1.bf16.msra.mxu1 %v19398_v12  ;;  %v13990_v23 = vpop.f32.mrf.mxu0  ;;  %14284 = vmatprep.subr.bf16.mxu0 %v19403_v9  ;;  %v19472_v12 = vld [vmem:[%s20795_s21 + $0x27b4] ss:$8 sps:$4 sm:$0xff]   ;;  %v19467_v9 = vld [vmem:[%s20795_s21 + $0x26b0] ss:$8 sps:$4 sm:$0xff]  }
 0x51b   : > { %v14031_v58 = vpop.f32.mrf.mxu1  ;;  %14325 = vmatprep.subr.bf16.mxu1 %v19406_v13  ;;  %v13991_v8 = vadd.f32 %v13990_v23, %v22335_v17  ;;  %v22418_v35 = vadd.f32 %v14029_v21, %v13989_v52  ;;  %14314 = vmatprep.mubr.bf16.mxu0 %v1064_v26  ;;  %v19415_v17 = vld [vmem:[%s20795_s21 + $0x2644] ss:$8 sps:$4 sm:$0xff]   ;;  %v19470_v13 = vld [vmem:[%s20795_s21 + $0x27b0] ss:$8 sps:$4 sm:$0xff]   ;;  %v307_v27 = vld [vmem:[%s20809_s7 + $0xa0] sm:$0xff] }
 0x51c   : > { %14355 = vmatprep.mubr.bf16.mxu1 %v1066_v15  ;;  %v13992_v10 = vpop.f32.mrf.mxu0  ;;  %v19475_v26 = vld [vmem:[%s20795_s21 + $0x26a4] ss:$8 sps:$4 sm:$0xff]   ;;  %v19473_v21 = vld [vmem:[%s20795_s21 + $0x26a0] ss:$8 sps:$4 sm:$0xff]   ;;  %v689_v23 = vcombine.high %v307_v27, %v307_v27 }
 0x51d   : > { %v14033_v60 = vpop.f32.mrf.mxu1  ;;  %v22420_v29 = vadd.f32 %v14031_v58, %v13991_v8  ;;  %14285 = vmatpush1.bf16.msra.mxu0 %v19401_v28  ;;  %v19478_v15 = vld [vmem:[%s20795_s21 + $0x27a4] ss:$8 sps:$4 sm:$0xff]   ;;  %v19476_v52 = vld [vmem:[%s20795_s21 + $0x27a0] ss:$8 sps:$4 sm:$0xff]   ;;  %v19481_v28 = vld [vmem:[%s20795_s21 + $0x2694] ss:$8 sps:$4 sm:$0xff]   ;;  %v22476_v10 = vrot.slane %v307_v27, %v20860_v50 }
 0x51e   : > { %14326 = vmatpush1.bf16.msra.mxu1 %v19404_v33  ;;  %v13993_v31 = vpop.f32.mrf.mxu0  ;;  %14286 = vmatprep.subr.bf16.mxu0 %v19409_v24  ;;  %v19484_v33 = vld [vmem:[%s20795_s21 + $0x2794] ss:$8 sps:$4 sm:$0xff]   ;;  %v19479_v58 = vld [vmem:[%s20795_s21 + $0x2690] ss:$8 sps:$4 sm:$0xff]   ;;  %v19490_v8 = vld [vmem:[%s20795_s21 + $0x2784] ss:$8 sps:$4 sm:$0xff]   ;;  %v22479_v60 = vrot.slane %v689_v23, %v20860_v50 }
 0x51f   : > { %14327 = vmatprep.subr.bf16.mxu1 %v19412_v34  ;;  %v14034_v32 = vpop.f32.mrf.mxu1  ;;  %v19482_v24 = vld [vmem:[%s20795_s21 + $0x2790] ss:$8 sps:$4 sm:$0xff]   ;;  %v19487_v34 = vld [vmem:[%s20795_s21 + $0x2684] ss:$8 sps:$4 sm:$0xff]   ;;  %v19493_v31 = vld [vmem:[%s20795_s21 + $0x2874] ss:$8 sps:$4 sm:$0xff]  }
 0x520   : > { %v705_v32 = vcombine.high %v22479_v60, %v22479_v60  ;;  %v19534_v27 = vld [vmem:[%s20795_s21 + $0x2800] ss:$8 sps:$4 sm:$0xff]   ;;  %v19543_v23 = vld [vmem:[%s20795_s21 + $0x29f0] ss:$8 sps:$4 sm:$0xff]  }
 0x521   : > { %14287 = vmatpush1.bf16.msra.mxu0 %v19407_v37  ;;  %v19485_v37 = vld [vmem:[%s20795_s21 + $0x2680] ss:$8 sps:$4 sm:$0xff]  }
 0x522   : > { %14328 = vmatpush1.bf16.msra.mxu1 %v19410_v46  ;;  %14288 = vmatprep.subr.bf16.mxu0 %v19415_v17  ;;  %v19488_v46 = vld [vmem:[%s20795_s21 + $0x2780] ss:$8 sps:$4 sm:$0xff]   ;;  %v19497_v17 = vld [vmem:[%s20795_s21 + $0x2974] ss:$8 sps:$4 sm:$0xff]  }
 0x523   : > { %14329 = vmatprep.subr.bf16.mxu1 %v19418_v48  ;;  %v704_v48 = vcombine.high %v22476_v10, %v22476_v10 }
 0x525   : > { %14289 = vmatpush1.bf16.msra.mxu0 %v19413_v49  ;;  %v1063_v49 = vpack.c.bf16 %v22391_v51, %v22391_v51 }
 0x526   : > { %14330 = vmatpush1.bf16.msra.mxu1 %v19416_v14  ;;  %14290 = vmatprep.subr.bf16.mxu0 %v19421_v4  ;;  %v1065_v14 = vpack.c.bf16 %v22394_v11, %v22394_v11  ;;  %v19491_v4 = vld [vmem:[%s20795_s21 + $0x2870] ss:$8 sps:$4 sm:$0xff]  }
 0x527   : > { %14331 = vmatprep.subr.bf16.mxu1 %v19424_v38  ;;  %v19495_v38 = vld [vmem:[%s20795_s21 + $0x2970] ss:$8 sps:$4 sm:$0xff]  }
 0x529   : > { %14291 = vmatpush1.bf16.msra.mxu0 %v19419_v43  ;;  %v19500_v43 = vld [vmem:[%s20795_s21 + $0x2864] ss:$8 sps:$4 sm:$0xff]  }
 0x52a   : > { %14332 = vmatpush1.bf16.msra.mxu1 %v19422_v39  ;;  %14292 = vmatprep.subr.bf16.mxu0 %v19427_v56  ;;  %v19503_v39 = vld [vmem:[%s20795_s21 + $0x2964] ss:$8 sps:$4 sm:$0xff]   ;;  %v1068_v56 = vpack.c.bf16 %v704_v48, %v704_v48 }
 0x52b   : > { %14333 = vmatprep.subr.bf16.mxu1 %v19430_v45  ;;  %v1070_v45 = vpack.c.bf16 %v705_v32, %v705_v32  ;;  %v19560_v48 = vld [vmem:[%s20795_s21 + $0x28c4] ss:$8 sps:$4 sm:$0xff]  }
 0x52c   : > { %v19563_v32 = vld [vmem:[%s20795_s21 + $0x29c4] ss:$8 sps:$4 sm:$0xff]  }
 0x52d   : > { %14293 = vmatpush1.bf16.msra.mxu0 %v19425_v36 }
 0x52e   : > { %14334 = vmatpush1.bf16.msra.mxu1 %v19428_v59  ;;  %14294 = vmatprep.subr.bf16.mxu0 %v19433_v63  ;;  %v19498_v59 = vld [vmem:[%s20795_s21 + $0x2860] ss:$8 sps:$4 sm:$0xff]  }
 0x52f   : > { %14335 = vmatprep.subr.bf16.mxu1 %v19436_v53  ;;  %v19501_v63 = vld [vmem:[%s20795_s21 + $0x2960] ss:$8 sps:$4 sm:$0xff]  }
 0x531   : > { %14295 = vmatpush1.bf16.msra.mxu0 %v19431_v16 }
 0x532   : > { %14336 = vmatpush1.bf16.msra.mxu1 %v19434_v54  ;;  %14296 = vmatprep.subr.bf16.mxu0 %v19439_v0  ;;  %v19506_v54 = vld [vmem:[%s20795_s21 + $0x2854] ss:$8 sps:$4 sm:$0xff]  }
 0x533   : > { %14337 = vmatprep.subr.bf16.mxu1 %v19442_v57  ;;  %v19509_v0 = vld [vmem:[%s20795_s21 + $0x2954] ss:$8 sps:$4 sm:$0xff]  }
 0x535   : > { %14297 = vmatpush1.bf16.msra.mxu0 %v19437_v1 }
 0x536   : > { %14338 = vmatpush1.bf16.msra.mxu1 %v19440_v22  ;;  %14298 = vmatprep.subr.bf16.mxu0 %v19445_v40 }
 0x537   : > { %14339 = vmatprep.subr.bf16.mxu1 %v19448_v2  ;;  %v19504_v2 = vld [vmem:[%s20795_s21 + $0x2850] ss:$8 sps:$4 sm:$0xff]  }
 0x539   : > { %14299 = vmatpush2.bf16.msra.mxu0 %v19443_v7  ;;  %v19507_v7 = vld [vmem:[%s20795_s21 + $0x2950] ss:$8 sps:$4 sm:$0xff]  }
 0x53a   : > { %14340 = vmatpush2.bf16.msra.mxu1 %v19446_v61  ;;  %14300 = vmatprep.subr.bf16.mxu0 %v19451_v41  ;;  %v19515_v41 = vld [vmem:[%s20795_s21 + $0x2944] ss:$8 sps:$4 sm:$0xff]  }
 0x53b   : > { %14341 = vmatprep.subr.bf16.mxu1 %v19454_v62 }
 0x53d   : > { %14301 = vmatpush2.bf16.msra.mxu0 %v19449_v42  ;;  %v19510_v42 = vld [vmem:[%s20795_s21 + $0x2840] ss:$8 sps:$4 sm:$0xff]  }
 0x53e   : > { %14342 = vmatpush2.bf16.msra.mxu1 %v19452_v47  ;;  %14302 = vmatprep.subr.bf16.mxu0 %v19457_v30  ;;  %v19513_v47 = vld [vmem:[%s20795_s21 + $0x2940] ss:$8 sps:$4 sm:$0xff]   ;;  %v19518_v30 = vld [vmem:[%s20795_s21 + $0x2834] ss:$8 sps:$4 sm:$0xff]  }
 0x53f   : > { %14343 = vmatprep.subr.bf16.mxu1 %v19460_v3  ;;  %v19521_v3 = vld [vmem:[%s20795_s21 + $0x2934] ss:$8 sps:$4 sm:$0xff]  }
 0x541   : > { %14303 = vmatpush2.bf16.msra.mxu0 %v19455_v5  ;;  %v19516_v5 = vld [vmem:[%s20795_s21 + $0x2830] ss:$8 sps:$4 sm:$0xff]  }
 0x542   : > { %14344 = vmatpush2.bf16.msra.mxu1 %v19458_v55  ;;  %14304 = vmatprep.subr.bf16.mxu0 %v19463_v18  ;;  %v19519_v55 = vld [vmem:[%s20795_s21 + $0x2930] ss:$8 sps:$4 sm:$0xff]   ;;  %v19524_v18 = vld [vmem:[%s20795_s21 + $0x2824] ss:$8 sps:$4 sm:$0xff]  }
 0x543   : > { %14345 = vmatprep.subr.bf16.mxu1 %v19466_v6  ;;  %v19527_v6 = vld [vmem:[%s20795_s21 + $0x2924] ss:$8 sps:$4 sm:$0xff]  }
 0x545   : > { %14305 = vmatpush2.bf16.msra.mxu0 %v19461_v19  ;;  %v19522_v19 = vld [vmem:[%s20795_s21 + $0x2820] ss:$8 sps:$4 sm:$0xff]  }
 0x546   : > { %14346 = vmatpush2.bf16.msra.mxu1 %v19464_v20  ;;  %14306 = vmatprep.subr.bf16.mxu0 %v19469_v25  ;;  %v19525_v20 = vld [vmem:[%s20795_s21 + $0x2920] ss:$8 sps:$4 sm:$0xff]   ;;  %v19530_v25 = vld [vmem:[%s20795_s21 + $0x2814] ss:$8 sps:$4 sm:$0xff]  }
 0x547   : > { %14347 = vmatprep.subr.bf16.mxu1 %v19472_v12  ;;  %v19533_v12 = vld [vmem:[%s20795_s21 + $0x2914] ss:$8 sps:$4 sm:$0xff]  }
 0x549   : > { %14307 = vmatpush2.bf16.msra.mxu0 %v19467_v9  ;;  %v19528_v9 = vld [vmem:[%s20795_s21 + $0x2810] ss:$8 sps:$4 sm:$0xff]  }
 0x54a   : > { %14348 = vmatpush2.bf16.msra.mxu1 %v19470_v13  ;;  %14308 = vmatprep.subr.bf16.mxu0 %v19475_v26  ;;  %v19531_v13 = vld [vmem:[%s20795_s21 + $0x2910] ss:$8 sps:$4 sm:$0xff]   ;;  %v19536_v26 = vld [vmem:[%s20795_s21 + $0x2804] ss:$8 sps:$4 sm:$0xff]  }
 0x54b   : > { %14349 = vmatprep.subr.bf16.mxu1 %v19478_v15  ;;  %v19539_v15 = vld [vmem:[%s20795_s21 + $0x2904] ss:$8 sps:$4 sm:$0xff]  }
 0x54d   : > { %14309 = vmatpush2.bf16.msra.mxu0 %v19473_v21  ;;  %v19537_v21 = vld [vmem:[%s20795_s21 + $0x2900] ss:$8 sps:$4 sm:$0xff]  }
 0x54e   : > { %14350 = vmatpush2.bf16.msra.mxu1 %v19476_v52  ;;  %14310 = vmatprep.subr.bf16.mxu0 %v19481_v28  ;;  %v19542_v52 = vld [vmem:[%s20795_s21 + $0x28f4] ss:$8 sps:$4 sm:$0xff]  }
 0x54f   : > { %14351 = vmatprep.subr.bf16.mxu1 %v19484_v33  ;;  %v19545_v28 = vld [vmem:[%s20795_s21 + $0x29f4] ss:$8 sps:$4 sm:$0xff]   ;;  %v19540_v33 = vld [vmem:[%s20795_s21 + $0x28f0] ss:$8 sps:$4 sm:$0xff]  }
 0x551   : > { %14311 = vmatpush2.bf16.msra.mxu0 %v19479_v58  ;;  %v19548_v58 = vld [vmem:[%s20795_s21 + $0x28e4] ss:$8 sps:$4 sm:$0xff]  }
 0x552   : > { %14352 = vmatpush2.bf16.msra.mxu1 %v19482_v24  ;;  %14312 = vmatprep.subr.bf16.mxu0 %v19487_v34  ;;  %v19551_v24 = vld [vmem:[%s20795_s21 + $0x29e4] ss:$8 sps:$4 sm:$0xff]   ;;  %v19546_v34 = vld [vmem:[%s20795_s21 + $0x28e0] ss:$8 sps:$4 sm:$0xff]  }
 0x553   : > { %14353 = vmatprep.subr.bf16.mxu1 %v19490_v8  ;;  %v19549_v8 = vld [vmem:[%s20795_s21 + $0x29e0] ss:$8 sps:$4 sm:$0xff]  }
 0x555   : > { %14313 = vmatpush2.bf16.msra.mxu0 %v19485_v37  ;;  %v19554_v37 = vld [vmem:[%s20795_s21 + $0x28d4] ss:$8 sps:$4 sm:$0xff]  }
 0x556   : > { %14354 = vmatpush2.bf16.msra.mxu1 %v19488_v46  ;;  %14364 = vmatprep.subr.bf16.mxu0 %v19493_v31  ;;  %v19557_v46 = vld [vmem:[%s20795_s21 + $0x29d4] ss:$8 sps:$4 sm:$0xff]   ;;  %v19552_v31 = vld [vmem:[%s20795_s21 + $0x28d0] ss:$8 sps:$4 sm:$0xff]  }
 0x557   : > { %14405 = vmatprep.subr.bf16.mxu1 %v19497_v17  ;;  %v19555_v17 = vld [vmem:[%s20795_s21 + $0x29d0] ss:$8 sps:$4 sm:$0xff]  }
 0x558   : > { %v14070_v36 = vpop.f32.mrf.mxu0  ;;  %14315 = vmatmul.mubr.bf16.vlgmr.msra.gmra.mxu0 %v1063_v49  ;;  %v19558_v49 = vld [vmem:[%s20795_s21 + $0x28c0] ss:$8 sps:$4 sm:$0xff]  }
 0x559   : > { %v14111_v51 = vpop.f32.mrf.mxu1  ;;  %14356 = vmatmul.mubr.bf16.vlgmr.msra.gmra.mxu1 %v1065_v14  ;;  %v14071_v11 = vadd.f32 %v14070_v36, %v22418_v35  ;;  %14365 = vmatpush1.bf16.msra.mxu0 %v19491_v4  ;;  %v19561_v14 = vld [vmem:[%s20795_s21 + $0x29c0] ss:$8 sps:$4 sm:$0xff]   ;;  %v19566_v4 = vld [vmem:[%s20795_s21 + $0x28b4] ss:$8 sps:$4 sm:$0xff]  }
 0x55a   : > { %14406 = vmatpush1.bf16.msra.mxu1 %v19495_v38  ;;  %v14072_v53 = vpop.f32.mrf.mxu0  ;;  %14366 = vmatprep.subr.bf16.mxu0 %v19500_v43  ;;  %v19569_v38 = vld [vmem:[%s20795_s21 + $0x29b4] ss:$8 sps:$4 sm:$0xff]   ;;  %v19564_v43 = vld [vmem:[%s20795_s21 + $0x28b0] ss:$8 sps:$4 sm:$0xff]   ;;  %v308_v36 = vld [vmem:[%s20809_s7 + $0xa8] sm:$0xff] }
 0x55b   : > { %v14113_v16 = vpop.f32.mrf.mxu1  ;;  %14407 = vmatprep.subr.bf16.mxu1 %v19503_v39  ;;  %v14073_v57 = vadd.f32 %v14072_v53, %v22420_v29  ;;  %v22503_v1 = vadd.f32 %v14111_v51, %v14071_v11  ;;  %14396 = vmatprep.mubr.bf16.mxu0 %v1068_v56  ;;  %v19512_v29 = vld [vmem:[%s20795_s21 + $0x2844] ss:$8 sps:$4 sm:$0xff]   ;;  %v19567_v39 = vld [vmem:[%s20795_s21 + $0x29b0] ss:$8 sps:$4 sm:$0xff]   ;;  %v19570_v51 = vld [vmem:[%s20795_s21 + $0x28a0] ss:$8 sps:$4 sm:$0xff]   ;;  %v706_v53 = vcombine.high %v308_v36, %v308_v36 }
 0x55c   : > { %14437 = vmatprep.mubr.bf16.mxu1 %v1070_v45  ;;  %v14074_v35 = vpop.f32.mrf.mxu0  ;;  %v19572_v56 = vld [vmem:[%s20795_s21 + $0x28a4] ss:$8 sps:$4 sm:$0xff]   ;;  %v19573_v11 = vld [vmem:[%s20795_s21 + $0x29a0] ss:$8 sps:$4 sm:$0xff]  }
 0x55d   : > { %v14115_v22 = vpop.f32.mrf.mxu1  ;;  %v22505_v40 = vadd.f32 %v14113_v16, %v14073_v57  ;;  %14367 = vmatpush1.bf16.msra.mxu0 %v19498_v59  ;;  %v19575_v45 = vld [vmem:[%s20795_s21 + $0x29a4] ss:$8 sps:$4 sm:$0xff]   ;;  %v19578_v59 = vld [vmem:[%s20795_s21 + $0x2894] ss:$8 sps:$4 sm:$0xff]   ;;  %v19576_v16 = vld [vmem:[%s20795_s21 + $0x2890] ss:$8 sps:$4 sm:$0xff]   ;;  %v22561_v35 = vrot.slane %v308_v36, %v20860_v50 }
 0x55e   : > { %14408 = vmatpush1.bf16.msra.mxu1 %v19501_v63  ;;  %v14075_v61 = vpop.f32.mrf.mxu0  ;;  %14368 = vmatprep.subr.bf16.mxu0 %v19506_v54  ;;  %v19581_v63 = vld [vmem:[%s20795_s21 + $0x2994] ss:$8 sps:$4 sm:$0xff]   ;;  %v19579_v54 = vld [vmem:[%s20795_s21 + $0x2990] ss:$8 sps:$4 sm:$0xff]   ;;  %v19587_v57 = vld [vmem:[%s20795_s21 + $0x2984] ss:$8 sps:$4 sm:$0xff]   ;;  %v22564_v22 = vrot.slane %v706_v53, %v20860_v50 }
 0x55f   : > { %14409 = vmatprep.subr.bf16.mxu1 %v19509_v0  ;;  %v14116_v62 = vpop.f32.mrf.mxu1  ;;  %v19584_v0 = vld [vmem:[%s20795_s21 + $0x2884] ss:$8 sps:$4 sm:$0xff]   ;;  %v19590_v61 = vld [vmem:[%s20795_s21 + $0x2a74] ss:$8 sps:$4 sm:$0xff]   ;;  %v19631_v36 = vld [vmem:[%s20795_s21 + $0x2a00] ss:$8 sps:$4 sm:$0xff]  }
 0x560   : > { %v722_v62 = vcombine.high %v22564_v22, %v22564_v22  ;;  %v19640_v53 = vld [vmem:[%s20795_s21 + $0x2bf0] ss:$8 sps:$4 sm:$0xff]  }
 0x561   : > { %14369 = vmatpush1.bf16.msra.mxu0 %v19504_v2  ;;  %v19582_v2 = vld [vmem:[%s20795_s21 + $0x2880] ss:$8 sps:$4 sm:$0xff]  }
 0x562   : > { %14410 = vmatpush1.bf16.msra.mxu1 %v19507_v7  ;;  %14370 = vmatprep.subr.bf16.mxu0 %v19512_v29  ;;  %v19585_v7 = vld [vmem:[%s20795_s21 + $0x2980] ss:$8 sps:$4 sm:$0xff]   ;;  %v19594_v29 = vld [vmem:[%s20795_s21 + $0x2b74] ss:$8 sps:$4 sm:$0xff]  }
 0x563   : > { %14411 = vmatprep.subr.bf16.mxu1 %v19515_v41  ;;  %v721_v41 = vcombine.high %v22561_v35, %v22561_v35 }
 0x565   : > { %14371 = vmatpush1.bf16.msra.mxu0 %v19510_v42  ;;  %v1067_v42 = vpack.c.bf16 %v22476_v10, %v22476_v10 }
 0x566   : > { %14412 = vmatpush1.bf16.msra.mxu1 %v19513_v47  ;;  %14372 = vmatprep.subr.bf16.mxu0 %v19518_v30  ;;  %v1069_v47 = vpack.c.bf16 %v22479_v60, %v22479_v60  ;;  %v19588_v30 = vld [vmem:[%s20795_s21 + $0x2a70] ss:$8 sps:$4 sm:$0xff]  }
 0x567   : > { %14413 = vmatprep.subr.bf16.mxu1 %v19521_v3  ;;  %v19592_v3 = vld [vmem:[%s20795_s21 + $0x2b70] ss:$8 sps:$4 sm:$0xff]  }
 0x569   : > { %14373 = vmatpush1.bf16.msra.mxu0 %v19516_v5  ;;  %v19597_v5 = vld [vmem:[%s20795_s21 + $0x2a64] ss:$8 sps:$4 sm:$0xff]  }
 0x56a   : > { %14414 = vmatpush1.bf16.msra.mxu1 %v19519_v55  ;;  %14374 = vmatprep.subr.bf16.mxu0 %v19524_v18  ;;  %v19600_v55 = vld [vmem:[%s20795_s21 + $0x2b64] ss:$8 sps:$4 sm:$0xff]   ;;  %v1072_v18 = vpack.c.bf16 %v721_v41, %v721_v41 }
 0x56b   : > { %14415 = vmatprep.subr.bf16.mxu1 %v19527_v6  ;;  %v1074_v6 = vpack.c.bf16 %v722_v62, %v722_v62  ;;  %v19657_v41 = vld [vmem:[%s20795_s21 + $0x2ac4] ss:$8 sps:$4 sm:$0xff]  }
 0x56c   : > { %v19660_v62 = vld [vmem:[%s20795_s21 + $0x2bc4] ss:$8 sps:$4 sm:$0xff]  }
 0x56d   : > { %14375 = vmatpush1.bf16.msra.mxu0 %v19522_v19 }
 0x56e   : > { %14416 = vmatpush1.bf16.msra.mxu1 %v19525_v20  ;;  %14376 = vmatprep.subr.bf16.mxu0 %v19530_v25  ;;  %v19595_v20 = vld [vmem:[%s20795_s21 + $0x2a60] ss:$8 sps:$4 sm:$0xff]  }
 0x56f   : > { %14417 = vmatprep.subr.bf16.mxu1 %v19533_v12  ;;  %v19598_v25 = vld [vmem:[%s20795_s21 + $0x2b60] ss:$8 sps:$4 sm:$0xff]  }
 0x571   : > { %14377 = vmatpush1.bf16.msra.mxu0 %v19528_v9 }
 0x572   : > { %14418 = vmatpush1.bf16.msra.mxu1 %v19531_v13  ;;  %14378 = vmatprep.subr.bf16.mxu0 %v19536_v26  ;;  %v19603_v13 = vld [vmem:[%s20795_s21 + $0x2a54] ss:$8 sps:$4 sm:$0xff]  }
 0x573   : > { %14419 = vmatprep.subr.bf16.mxu1 %v19539_v15  ;;  %v19606_v26 = vld [vmem:[%s20795_s21 + $0x2b54] ss:$8 sps:$4 sm:$0xff]  }
 0x575   : > { %14379 = vmatpush1.bf16.msra.mxu0 %v19534_v27 }
 0x576   : > { %14420 = vmatpush1.bf16.msra.mxu1 %v19537_v21  ;;  %14380 = vmatprep.subr.bf16.mxu0 %v19542_v52 }
 0x577   : > { %14421 = vmatprep.subr.bf16.mxu1 %v19545_v28  ;;  %v19601_v28 = vld [vmem:[%s20795_s21 + $0x2a50] ss:$8 sps:$4 sm:$0xff]  }
 0x579   : > { %14381 = vmatpush2.bf16.msra.mxu0 %v19540_v33  ;;  %v19604_v33 = vld [vmem:[%s20795_s21 + $0x2b50] ss:$8 sps:$4 sm:$0xff]  }
 0x57a   : > { %14422 = vmatpush2.bf16.msra.mxu1 %v19543_v23  ;;  %14382 = vmatprep.subr.bf16.mxu0 %v19548_v58  ;;  %v19612_v58 = vld [vmem:[%s20795_s21 + $0x2b44] ss:$8 sps:$4 sm:$0xff]  }
 0x57b   : > { %14423 = vmatprep.subr.bf16.mxu1 %v19551_v24 }
 0x57d   : > { %14383 = vmatpush2.bf16.msra.mxu0 %v19546_v34  ;;  %v19607_v34 = vld [vmem:[%s20795_s21 + $0x2a40] ss:$8 sps:$4 sm:$0xff]  }
 0x57e   : > { %14424 = vmatpush2.bf16.msra.mxu1 %v19549_v8  ;;  %14384 = vmatprep.subr.bf16.mxu0 %v19554_v37  ;;  %v19610_v8 = vld [vmem:[%s20795_s21 + $0x2b40] ss:$8 sps:$4 sm:$0xff]   ;;  %v19615_v37 = vld [vmem:[%s20795_s21 + $0x2a34] ss:$8 sps:$4 sm:$0xff]  }
 0x57f   : > { %14425 = vmatprep.subr.bf16.mxu1 %v19557_v46  ;;  %v19618_v46 = vld [vmem:[%s20795_s21 + $0x2b34] ss:$8 sps:$4 sm:$0xff]  }
 0x581   : > { %14385 = vmatpush2.bf16.msra.mxu0 %v19552_v31  ;;  %v19613_v31 = vld [vmem:[%s20795_s21 + $0x2a30] ss:$8 sps:$4 sm:$0xff]  }
 0x582   : > { %14426 = vmatpush2.bf16.msra.mxu1 %v19555_v17  ;;  %14386 = vmatprep.subr.bf16.mxu0 %v19560_v48  ;;  %v19616_v17 = vld [vmem:[%s20795_s21 + $0x2b30] ss:$8 sps:$4 sm:$0xff]   ;;  %v19621_v48 = vld [vmem:[%s20795_s21 + $0x2a24] ss:$8 sps:$4 sm:$0xff]  }
 0x583   : > { %14427 = vmatprep.subr.bf16.mxu1 %v19563_v32  ;;  %v19624_v32 = vld [vmem:[%s20795_s21 + $0x2b24] ss:$8 sps:$4 sm:$0xff]  }
 0x585   : > { %14387 = vmatpush2.bf16.msra.mxu0 %v19558_v49  ;;  %v19619_v49 = vld [vmem:[%s20795_s21 + $0x2a20] ss:$8 sps:$4 sm:$0xff]  }
 0x586   : > { %14428 = vmatpush2.bf16.msra.mxu1 %v19561_v14  ;;  %14388 = vmatprep.subr.bf16.mxu0 %v19566_v4  ;;  %v19622_v14 = vld [vmem:[%s20795_s21 + $0x2b20] ss:$8 sps:$4 sm:$0xff]   ;;  %v19627_v4 = vld [vmem:[%s20795_s21 + $0x2a14] ss:$8 sps:$4 sm:$0xff]  }
 0x587   : > { %14429 = vmatprep.subr.bf16.mxu1 %v19569_v38  ;;  %v19630_v38 = vld [vmem:[%s20795_s21 + $0x2b14] ss:$8 sps:$4 sm:$0xff]  }
 0x589   : > { %14389 = vmatpush2.bf16.msra.mxu0 %v19564_v43  ;;  %v19625_v43 = vld [vmem:[%s20795_s21 + $0x2a10] ss:$8 sps:$4 sm:$0xff]  }
 0x58a   : > { %14430 = vmatpush2.bf16.msra.mxu1 %v19567_v39  ;;  %14390 = vmatprep.subr.bf16.mxu0 %v19572_v56  ;;  %v19628_v39 = vld [vmem:[%s20795_s21 + $0x2b10] ss:$8 sps:$4 sm:$0xff]   ;;  %v19633_v56 = vld [vmem:[%s20795_s21 + $0x2a04] ss:$8 sps:$4 sm:$0xff]  }
 0x58b   : > { %14431 = vmatprep.subr.bf16.mxu1 %v19575_v45  ;;  %v19636_v45 = vld [vmem:[%s20795_s21 + $0x2b04] ss:$8 sps:$4 sm:$0xff]  }
 0x58d   : > { %14391 = vmatpush2.bf16.msra.mxu0 %v19570_v51  ;;  %v19634_v51 = vld [vmem:[%s20795_s21 + $0x2b00] ss:$8 sps:$4 sm:$0xff]  }
 0x58e   : > { %14432 = vmatpush2.bf16.msra.mxu1 %v19573_v11  ;;  %14392 = vmatprep.subr.bf16.mxu0 %v19578_v59  ;;  %v19639_v11 = vld [vmem:[%s20795_s21 + $0x2af4] ss:$8 sps:$4 sm:$0xff]  }
 0x58f   : > { %14433 = vmatprep.subr.bf16.mxu1 %v19581_v63  ;;  %v19642_v59 = vld [vmem:[%s20795_s21 + $0x2bf4] ss:$8 sps:$4 sm:$0xff]   ;;  %v19637_v63 = vld [vmem:[%s20795_s21 + $0x2af0] ss:$8 sps:$4 sm:$0xff]  }
 0x591   : > { %14393 = vmatpush2.bf16.msra.mxu0 %v19576_v16  ;;  %v19645_v16 = vld [vmem:[%s20795_s21 + $0x2ae4] ss:$8 sps:$4 sm:$0xff]  }
 0x592   : > { %14434 = vmatpush2.bf16.msra.mxu1 %v19579_v54  ;;  %14394 = vmatprep.subr.bf16.mxu0 %v19584_v0  ;;  %v19648_v54 = vld [vmem:[%s20795_s21 + $0x2be4] ss:$8 sps:$4 sm:$0xff]   ;;  %v19643_v0 = vld [vmem:[%s20795_s21 + $0x2ae0] ss:$8 sps:$4 sm:$0xff]  }
 0x593   : > { %14435 = vmatprep.subr.bf16.mxu1 %v19587_v57  ;;  %v19646_v57 = vld [vmem:[%s20795_s21 + $0x2be0] ss:$8 sps:$4 sm:$0xff]  }
 0x595   : > { %14395 = vmatpush2.bf16.msra.mxu0 %v19582_v2  ;;  %v19651_v2 = vld [vmem:[%s20795_s21 + $0x2ad4] ss:$8 sps:$4 sm:$0xff]  }
 0x596   : > { %14436 = vmatpush2.bf16.msra.mxu1 %v19585_v7  ;;  %14446 = vmatprep.subr.bf16.mxu0 %v19590_v61  ;;  %v19654_v7 = vld [vmem:[%s20795_s21 + $0x2bd4] ss:$8 sps:$4 sm:$0xff]   ;;  %v19649_v61 = vld [vmem:[%s20795_s21 + $0x2ad0] ss:$8 sps:$4 sm:$0xff]  }
 0x597   : > { %14487 = vmatprep.subr.bf16.mxu1 %v19594_v29  ;;  %v19652_v29 = vld [vmem:[%s20795_s21 + $0x2bd0] ss:$8 sps:$4 sm:$0xff]  }
 0x598   : > { %v14152_v19 = vpop.f32.mrf.mxu0  ;;  %14397 = vmatmul.mubr.bf16.vlgmr.msra.gmra.mxu0 %v1067_v42  ;;  %v19655_v42 = vld [vmem:[%s20795_s21 + $0x2ac0] ss:$8 sps:$4 sm:$0xff]  }
 0x599   : > { %v14193_v10 = vpop.f32.mrf.mxu1  ;;  %14438 = vmatmul.mubr.bf16.vlgmr.msra.gmra.mxu1 %v1069_v47  ;;  %v14153_v60 = vadd.f32 %v14152_v19, %v22503_v1  ;;  %14447 = vmatpush1.bf16.msra.mxu0 %v19588_v30  ;;  %v19658_v47 = vld [vmem:[%s20795_s21 + $0x2bc0] ss:$8 sps:$4 sm:$0xff]   ;;  %v19663_v30 = vld [vmem:[%s20795_s21 + $0x2ab4] ss:$8 sps:$4 sm:$0xff]   ;;  %v309_v19 = vld [vmem:[%s20809_s7 + $0xb0] sm:$0xff] }
 0x59a   : > { %14488 = vmatpush1.bf16.msra.mxu1 %v19592_v3  ;;  %v14154_v12 = vpop.f32.mrf.mxu0  ;;  %14448 = vmatprep.subr.bf16.mxu0 %v19597_v5  ;;  %v19666_v3 = vld [vmem:[%s20795_s21 + $0x2bb4] ss:$8 sps:$4 sm:$0xff]   ;;  %v19661_v5 = vld [vmem:[%s20795_s21 + $0x2ab0] ss:$8 sps:$4 sm:$0xff]  }
 0x59b   : > { %v14195_v9 = vpop.f32.mrf.mxu1  ;;  %14489 = vmatprep.subr.bf16.mxu1 %v19600_v55  ;;  %v14155_v15 = vadd.f32 %v14154_v12, %v22505_v40  ;;  %v22588_v27 = vadd.f32 %v14193_v10, %v14153_v60  ;;  %14478 = vmatprep.mubr.bf16.mxu0 %v1072_v18  ;;  %v19609_v40 = vld [vmem:[%s20795_s21 + $0x2a44] ss:$8 sps:$4 sm:$0xff]   ;;  %v19664_v55 = vld [vmem:[%s20795_s21 + $0x2bb0] ss:$8 sps:$4 sm:$0xff]   ;;  %v19667_v10 = vld [vmem:[%s20795_s21 + $0x2aa0] ss:$8 sps:$4 sm:$0xff]   ;;  %v723_v12 = vcombine.high %v309_v19, %v309_v19 }
 0x59c   : > { %14519 = vmatprep.mubr.bf16.mxu1 %v1074_v6  ;;  %v14156_v1 = vpop.f32.mrf.mxu0  ;;  %v19669_v18 = vld [vmem:[%s20795_s21 + $0x2aa4] ss:$8 sps:$4 sm:$0xff]   ;;  %v19670_v60 = vld [vmem:[%s20795_s21 + $0x2ba0] ss:$8 sps:$4 sm:$0xff]  }
 0x59d   : > { %v14197_v21 = vpop.f32.mrf.mxu1  ;;  %v22590_v52 = vadd.f32 %v14195_v9, %v14155_v15  ;;  %14449 = vmatpush1.bf16.msra.mxu0 %v19595_v20  ;;  %v19672_v6 = vld [vmem:[%s20795_s21 + $0x2ba4] ss:$8 sps:$4 sm:$0xff]   ;;  %v19675_v20 = vld [vmem:[%s20795_s21 + $0x2a94] ss:$8 sps:$4 sm:$0xff]   ;;  %v19673_v9 = vld [vmem:[%s20795_s21 + $0x2a90] ss:$8 sps:$4 sm:$0xff]   ;;  %v22646_v1 = vrot.slane %v309_v19, %v20860_v50 }
 0x59e   : > { %14490 = vmatpush1.bf16.msra.mxu1 %v19598_v25  ;;  %v14157_v23 = vpop.f32.mrf.mxu0  ;;  %14450 = vmatprep.subr.bf16.mxu0 %v19603_v13  ;;  %v19678_v25 = vld [vmem:[%s20795_s21 + $0x2b94] ss:$8 sps:$4 sm:$0xff]   ;;  %v19676_v13 = vld [vmem:[%s20795_s21 + $0x2b90] ss:$8 sps:$4 sm:$0xff]   ;;  %v19684_v15 = vld [vmem:[%s20795_s21 + $0x2b84] ss:$8 sps:$4 sm:$0xff]   ;;  %v22649_v21 = vrot.slane %v723_v12, %v20860_v50 }
 0x59f   : > { %14491 = vmatprep.subr.bf16.mxu1 %v19606_v26  ;;  %v14198_v24 = vpop.f32.mrf.mxu1  ;;  %v19681_v26 = vld [vmem:[%s20795_s21 + $0x2a84] ss:$8 sps:$4 sm:$0xff]   ;;  %v19687_v23 = vld [vmem:[%s20795_s21 + $0x2c74] ss:$8 sps:$4 sm:$0xff]   ;;  %v19728_v19 = vld [vmem:[%s20795_s21 + $0x2c00] ss:$8 sps:$4 sm:$0xff]  }
 0x5a0   : > { %v739_v24 = vcombine.high %v22649_v21, %v22649_v21  ;;  %v19737_v12 = vld [vmem:[%s20795_s21 + $0x2df0] ss:$8 sps:$4 sm:$0xff]  }
 0x5a1   : > { %14451 = vmatpush1.bf16.msra.mxu0 %v19601_v28  ;;  %v19679_v28 = vld [vmem:[%s20795_s21 + $0x2a80] ss:$8 sps:$4 sm:$0xff]  }
 0x5a2   : > { %14492 = vmatpush1.bf16.msra.mxu1 %v19604_v33  ;;  %14452 = vmatprep.subr.bf16.mxu0 %v19609_v40  ;;  %v19682_v33 = vld [vmem:[%s20795_s21 + $0x2b80] ss:$8 sps:$4 sm:$0xff]   ;;  %v19691_v40 = vld [vmem:[%s20795_s21 + $0x2d74] ss:$8 sps:$4 sm:$0xff]  }
 0x5a3   : > { %14493 = vmatprep.subr.bf16.mxu1 %v19612_v58  ;;  %v738_v58 = vcombine.high %v22646_v1, %v22646_v1 }
 0x5a5   : > { %14453 = vmatpush1.bf16.msra.mxu0 %v19607_v34  ;;  %v1071_v34 = vpack.c.bf16 %v22561_v35, %v22561_v35 }
 0x5a6   : > { %14494 = vmatpush1.bf16.msra.mxu1 %v19610_v8  ;;  %14454 = vmatprep.subr.bf16.mxu0 %v19615_v37  ;;  %v1073_v8 = vpack.c.bf16 %v22564_v22, %v22564_v22  ;;  %v19685_v37 = vld [vmem:[%s20795_s21 + $0x2c70] ss:$8 sps:$4 sm:$0xff]  }
 0x5a7   : > { %14495 = vmatprep.subr.bf16.mxu1 %v19618_v46  ;;  %v19689_v46 = vld [vmem:[%s20795_s21 + $0x2d70] ss:$8 sps:$4 sm:$0xff]  }
 0x5a9   : > { %14455 = vmatpush1.bf16.msra.mxu0 %v19613_v31  ;;  %v19694_v31 = vld [vmem:[%s20795_s21 + $0x2c64] ss:$8 sps:$4 sm:$0xff]  }
 0x5aa   : > { %14496 = vmatpush1.bf16.msra.mxu1 %v19616_v17  ;;  %14456 = vmatprep.subr.bf16.mxu0 %v19621_v48  ;;  %v19697_v17 = vld [vmem:[%s20795_s21 + $0x2d64] ss:$8 sps:$4 sm:$0xff]   ;;  %v1076_v48 = vpack.c.bf16 %v738_v58, %v738_v58 }
 0x5ab   : > { %14497 = vmatprep.subr.bf16.mxu1 %v19624_v32  ;;  %v1078_v32 = vpack.c.bf16 %v739_v24, %v739_v24  ;;  %v19754_v58 = vld [vmem:[%s20795_s21 + $0x2cc4] ss:$8 sps:$4 sm:$0xff]  }
 0x5ac   : > { %v19757_v24 = vld [vmem:[%s20795_s21 + $0x2dc4] ss:$8 sps:$4 sm:$0xff]  }
 0x5ad   : > { %14457 = vmatpush1.bf16.msra.mxu0 %v19619_v49 }
 0x5ae   : > { %14498 = vmatpush1.bf16.msra.mxu1 %v19622_v14  ;;  %14458 = vmatprep.subr.bf16.mxu0 %v19627_v4  ;;  %v19692_v14 = vld [vmem:[%s20795_s21 + $0x2c60] ss:$8 sps:$4 sm:$0xff]  }
 0x5af   : > { %14499 = vmatprep.subr.bf16.mxu1 %v19630_v38  ;;  %v19695_v4 = vld [vmem:[%s20795_s21 + $0x2d60] ss:$8 sps:$4 sm:$0xff]  }
 0x5b1   : > { %14459 = vmatpush1.bf16.msra.mxu0 %v19625_v43 }
 0x5b2   : > { %14500 = vmatpush1.bf16.msra.mxu1 %v19628_v39  ;;  %14460 = vmatprep.subr.bf16.mxu0 %v19633_v56  ;;  %v19700_v39 = vld [vmem:[%s20795_s21 + $0x2c54] ss:$8 sps:$4 sm:$0xff]  }
 0x5b3   : > { %14501 = vmatprep.subr.bf16.mxu1 %v19636_v45  ;;  %v19703_v56 = vld [vmem:[%s20795_s21 + $0x2d54] ss:$8 sps:$4 sm:$0xff]  }
 0x5b5   : > { %14461 = vmatpush1.bf16.msra.mxu0 %v19631_v36 }
 0x5b6   : > { %14502 = vmatpush1.bf16.msra.mxu1 %v19634_v51  ;;  %14462 = vmatprep.subr.bf16.mxu0 %v19639_v11 }
 0x5b7   : > { %14503 = vmatprep.subr.bf16.mxu1 %v19642_v59  ;;  %v19698_v59 = vld [vmem:[%s20795_s21 + $0x2c50] ss:$8 sps:$4 sm:$0xff]  }
 0x5b9   : > { %14463 = vmatpush2.bf16.msra.mxu0 %v19637_v63  ;;  %v19701_v63 = vld [vmem:[%s20795_s21 + $0x2d50] ss:$8 sps:$4 sm:$0xff]  }
 0x5ba   : > { %14504 = vmatpush2.bf16.msra.mxu1 %v19640_v53  ;;  %14464 = vmatprep.subr.bf16.mxu0 %v19645_v16  ;;  %v19709_v16 = vld [vmem:[%s20795_s21 + $0x2d44] ss:$8 sps:$4 sm:$0xff]  }
 0x5bb   : > { %14505 = vmatprep.subr.bf16.mxu1 %v19648_v54 }
 0x5bd   : > { %14465 = vmatpush2.bf16.msra.mxu0 %v19643_v0  ;;  %v19704_v0 = vld [vmem:[%s20795_s21 + $0x2c40] ss:$8 sps:$4 sm:$0xff]  }
 0x5be   : > { %14506 = vmatpush2.bf16.msra.mxu1 %v19646_v57  ;;  %14466 = vmatprep.subr.bf16.mxu0 %v19651_v2  ;;  %v19707_v57 = vld [vmem:[%s20795_s21 + $0x2d40] ss:$8 sps:$4 sm:$0xff]   ;;  %v19712_v2 = vld [vmem:[%s20795_s21 + $0x2c34] ss:$8 sps:$4 sm:$0xff]  }
 0x5bf   : > { %14507 = vmatprep.subr.bf16.mxu1 %v19654_v7  ;;  %v19715_v7 = vld [vmem:[%s20795_s21 + $0x2d34] ss:$8 sps:$4 sm:$0xff]  }
 0x5c1   : > { %14467 = vmatpush2.bf16.msra.mxu0 %v19649_v61  ;;  %v19710_v61 = vld [vmem:[%s20795_s21 + $0x2c30] ss:$8 sps:$4 sm:$0xff]  }
 0x5c2   : > { %14508 = vmatpush2.bf16.msra.mxu1 %v19652_v29  ;;  %14468 = vmatprep.subr.bf16.mxu0 %v19657_v41  ;;  %v19713_v29 = vld [vmem:[%s20795_s21 + $0x2d30] ss:$8 sps:$4 sm:$0xff]   ;;  %v19718_v41 = vld [vmem:[%s20795_s21 + $0x2c24] ss:$8 sps:$4 sm:$0xff]  }
 0x5c3   : > { %14509 = vmatprep.subr.bf16.mxu1 %v19660_v62  ;;  %v19721_v62 = vld [vmem:[%s20795_s21 + $0x2d24] ss:$8 sps:$4 sm:$0xff]  }
 0x5c5   : > { %14469 = vmatpush2.bf16.msra.mxu0 %v19655_v42  ;;  %v19716_v42 = vld [vmem:[%s20795_s21 + $0x2c20] ss:$8 sps:$4 sm:$0xff]  }
 0x5c6   : > { %14510 = vmatpush2.bf16.msra.mxu1 %v19658_v47  ;;  %14470 = vmatprep.subr.bf16.mxu0 %v19663_v30  ;;  %v19719_v47 = vld [vmem:[%s20795_s21 + $0x2d20] ss:$8 sps:$4 sm:$0xff]   ;;  %v19724_v30 = vld [vmem:[%s20795_s21 + $0x2c14] ss:$8 sps:$4 sm:$0xff]  }
 0x5c7   : > { %14511 = vmatprep.subr.bf16.mxu1 %v19666_v3  ;;  %v19727_v3 = vld [vmem:[%s20795_s21 + $0x2d14] ss:$8 sps:$4 sm:$0xff]  }
 0x5c9   : > { %14471 = vmatpush2.bf16.msra.mxu0 %v19661_v5  ;;  %v19722_v5 = vld [vmem:[%s20795_s21 + $0x2c10] ss:$8 sps:$4 sm:$0xff]  }
 0x5ca   : > { %14512 = vmatpush2.bf16.msra.mxu1 %v19664_v55  ;;  %14472 = vmatprep.subr.bf16.mxu0 %v19669_v18  ;;  %v19725_v55 = vld [vmem:[%s20795_s21 + $0x2d10] ss:$8 sps:$4 sm:$0xff]   ;;  %v19730_v18 = vld [vmem:[%s20795_s21 + $0x2c04] ss:$8 sps:$4 sm:$0xff]  }
 0x5cb   : > { %14513 = vmatprep.subr.bf16.mxu1 %v19672_v6  ;;  %v19733_v6 = vld [vmem:[%s20795_s21 + $0x2d04] ss:$8 sps:$4 sm:$0xff]  }
 0x5cd   : > { %14473 = vmatpush2.bf16.msra.mxu0 %v19667_v10  ;;  %v19731_v10 = vld [vmem:[%s20795_s21 + $0x2d00] ss:$8 sps:$4 sm:$0xff]  }
 0x5ce   : > { %14514 = vmatpush2.bf16.msra.mxu1 %v19670_v60  ;;  %14474 = vmatprep.subr.bf16.mxu0 %v19675_v20  ;;  %v19736_v60 = vld [vmem:[%s20795_s21 + $0x2cf4] ss:$8 sps:$4 sm:$0xff]  }
 0x5cf   : > { %14515 = vmatprep.subr.bf16.mxu1 %v19678_v25  ;;  %v19739_v20 = vld [vmem:[%s20795_s21 + $0x2df4] ss:$8 sps:$4 sm:$0xff]   ;;  %v19734_v25 = vld [vmem:[%s20795_s21 + $0x2cf0] ss:$8 sps:$4 sm:$0xff]  }
 0x5d1   : > { %14475 = vmatpush2.bf16.msra.mxu0 %v19673_v9  ;;  %v19742_v9 = vld [vmem:[%s20795_s21 + $0x2ce4] ss:$8 sps:$4 sm:$0xff]  }
 0x5d2   : > { %14516 = vmatpush2.bf16.msra.mxu1 %v19676_v13  ;;  %14476 = vmatprep.subr.bf16.mxu0 %v19681_v26  ;;  %v19745_v13 = vld [vmem:[%s20795_s21 + $0x2de4] ss:$8 sps:$4 sm:$0xff]   ;;  %v19740_v26 = vld [vmem:[%s20795_s21 + $0x2ce0] ss:$8 sps:$4 sm:$0xff]  }
 0x5d3   : > { %14517 = vmatprep.subr.bf16.mxu1 %v19684_v15  ;;  %v19743_v15 = vld [vmem:[%s20795_s21 + $0x2de0] ss:$8 sps:$4 sm:$0xff]  }
 0x5d5   : > { %14477 = vmatpush2.bf16.msra.mxu0 %v19679_v28  ;;  %v19748_v28 = vld [vmem:[%s20795_s21 + $0x2cd4] ss:$8 sps:$4 sm:$0xff]  }
 0x5d6   : > { %14518 = vmatpush2.bf16.msra.mxu1 %v19682_v33  ;;  %14528 = vmatprep.subr.bf16.mxu0 %v19687_v23  ;;  %v19751_v33 = vld [vmem:[%s20795_s21 + $0x2dd4] ss:$8 sps:$4 sm:$0xff]   ;;  %v19746_v23 = vld [vmem:[%s20795_s21 + $0x2cd0] ss:$8 sps:$4 sm:$0xff]  }
 0x5d7   : > { %14569 = vmatprep.subr.bf16.mxu1 %v19691_v40  ;;  %v19749_v40 = vld [vmem:[%s20795_s21 + $0x2dd0] ss:$8 sps:$4 sm:$0xff]  }
 0x5d8   : > { %v14234_v49 = vpop.f32.mrf.mxu0  ;;  %14479 = vmatmul.mubr.bf16.vlgmr.msra.gmra.mxu0 %v1071_v34  ;;  %v19752_v34 = vld [vmem:[%s20795_s21 + $0x2cc0] ss:$8 sps:$4 sm:$0xff]  }
 0x5d9   : > { %v14275_v35 = vpop.f32.mrf.mxu1  ;;  %14520 = vmatmul.mubr.bf16.vlgmr.msra.gmra.mxu1 %v1073_v8  ;;  %v14235_v22 = vadd.f32 %v14234_v49, %v22588_v27  ;;  %14529 = vmatpush1.bf16.msra.mxu0 %v19685_v37  ;;  %v19755_v8 = vld [vmem:[%s20795_s21 + $0x2dc0] ss:$8 sps:$4 sm:$0xff]   ;;  %v19760_v37 = vld [vmem:[%s20795_s21 + $0x2cb4] ss:$8 sps:$4 sm:$0xff]  }
 0x5da   : > { %14570 = vmatpush1.bf16.msra.mxu1 %v19689_v46  ;;  %v14236_v38 = vpop.f32.mrf.mxu0  ;;  %14530 = vmatprep.subr.bf16.mxu0 %v19694_v31  ;;  %v19763_v46 = vld [vmem:[%s20795_s21 + $0x2db4] ss:$8 sps:$4 sm:$0xff]   ;;  %v19758_v31 = vld [vmem:[%s20795_s21 + $0x2cb0] ss:$8 sps:$4 sm:$0xff]  }
 0x5db   : > { %v14277_v43 = vpop.f32.mrf.mxu1  ;;  %14571 = vmatprep.subr.bf16.mxu1 %v19697_v17  ;;  %v14237_v45 = vadd.f32 %v14236_v38, %v22590_v52  ;;  %v22673_v36 = vadd.f32 %v14275_v35, %v14235_v22  ;;  %14560 = vmatprep.mubr.bf16.mxu0 %v1076_v48  ;;  %v19706_v52 = vld [vmem:[%s20795_s21 + $0x2c44] ss:$8 sps:$4 sm:$0xff]   ;;  %v19761_v17 = vld [vmem:[%s20795_s21 + $0x2db0] ss:$8 sps:$4 sm:$0xff]   ;;  %v19764_v35 = vld [vmem:[%s20795_s21 + $0x2ca0] ss:$8 sps:$4 sm:$0xff]  }
 0x5dc   : > { %14601 = vmatprep.mubr.bf16.mxu1 %v1078_v32  ;;  %v14238_v27 = vpop.f32.mrf.mxu0  ;;  %v19766_v48 = vld [vmem:[%s20795_s21 + $0x2ca4] ss:$8 sps:$4 sm:$0xff]   ;;  %v310_v49 = vld [vmem:[%s20809_s7 + $0xb8] sm:$0xff]  ;;  %v19767_v22 = vld [vmem:[%s20795_s21 + $0x2da0] ss:$8 sps:$4 sm:$0xff]  }
 0x5dd   : > { %v14279_v51 = vpop.f32.mrf.mxu1  ;;  %v22675_v11 = vadd.f32 %v14277_v43, %v14237_v45  ;;  %14531 = vmatpush1.bf16.msra.mxu0 %v19692_v14  ;;  %v19769_v32 = vld [vmem:[%s20795_s21 + $0x2da4] ss:$8 sps:$4 sm:$0xff]   ;;  %v19772_v14 = vld [vmem:[%s20795_s21 + $0x2c94] ss:$8 sps:$4 sm:$0xff]   ;;  %v740_v38 = vcombine.high %v310_v49, %v310_v49  ;;  %v19770_v43 = vld [vmem:[%s20795_s21 + $0x2c90] ss:$8 sps:$4 sm:$0xff]   ;;  %v22731_v27 = vrot.slane %v310_v49, %v20860_v50 }
 0x5de   : > { %14572 = vmatpush1.bf16.msra.mxu1 %v19695_v4  ;;  %v14239_v53 = vpop.f32.mrf.mxu0  ;;  %14532 = vmatprep.subr.bf16.mxu0 %v19700_v39  ;;  %v19775_v4 = vld [vmem:[%s20795_s21 + $0x2d94] ss:$8 sps:$4 sm:$0xff]   ;;  %v19773_v39 = vld [vmem:[%s20795_s21 + $0x2d90] ss:$8 sps:$4 sm:$0xff]   ;;  %v19781_v45 = vld [vmem:[%s20795_s21 + $0x2d84] ss:$8 sps:$4 sm:$0xff]  }
 0x5df   : > { %14573 = vmatprep.subr.bf16.mxu1 %v19703_v56  ;;  %v14280_v54 = vpop.f32.mrf.mxu1  ;;  %v19778_v56 = vld [vmem:[%s20795_s21 + $0x2c84] ss:$8 sps:$4 sm:$0xff]   ;;  %v22734_v51 = vrot.slane %v740_v38, %v20860_v50  ;;  %v19784_v53 = vld [vmem:[%s20795_s21 + $0x2e74] ss:$8 sps:$4 sm:$0xff]   ;;  %v19825_v49 = vld [vmem:[%s20795_s21 + $0x2e00] ss:$8 sps:$4 sm:$0xff]  }
 0x5e0   : > { %v19834_v38 = vld [vmem:[%s20795_s21 + $0x2ff0] ss:$8 sps:$4 sm:$0xff]  }
 0x5e1   : > { %14533 = vmatpush1.bf16.msra.mxu0 %v19698_v59  ;;  %v19776_v59 = vld [vmem:[%s20795_s21 + $0x2c80] ss:$8 sps:$4 sm:$0xff]   ;;  %v756_v54 = vcombine.high %v22734_v51, %v22734_v51 }
 0x5e2   : > { %14574 = vmatpush1.bf16.msra.mxu1 %v19701_v63  ;;  %14534 = vmatprep.subr.bf16.mxu0 %v19706_v52  ;;  %v19779_v63 = vld [vmem:[%s20795_s21 + $0x2d80] ss:$8 sps:$4 sm:$0xff]   ;;  %v19788_v52 = vld [vmem:[%s20795_s21 + $0x2f74] ss:$8 sps:$4 sm:$0xff]  }
 0x5e3   : > { %14575 = vmatprep.subr.bf16.mxu1 %v19709_v16  ;;  %v755_v16 = vcombine.high %v22731_v27, %v22731_v27 }
 0x5e5   : > { %14535 = vmatpush1.bf16.msra.mxu0 %v19704_v0  ;;  %v1075_v0 = vpack.c.bf16 %v22646_v1, %v22646_v1 }
 0x5e6   : > { %14576 = vmatpush1.bf16.msra.mxu1 %v19707_v57  ;;  %14536 = vmatprep.subr.bf16.mxu0 %v19712_v2  ;;  %v1077_v57 = vpack.c.bf16 %v22649_v21, %v22649_v21  ;;  %v19782_v2 = vld [vmem:[%s20795_s21 + $0x2e70] ss:$8 sps:$4 sm:$0xff]  }
 0x5e7   : > { %14577 = vmatprep.subr.bf16.mxu1 %v19715_v7  ;;  %v19786_v7 = vld [vmem:[%s20795_s21 + $0x2f70] ss:$8 sps:$4 sm:$0xff]  }
 0x5e9   : > { %14537 = vmatpush1.bf16.msra.mxu0 %v19710_v61  ;;  %v19791_v61 = vld [vmem:[%s20795_s21 + $0x2e64] ss:$8 sps:$4 sm:$0xff]  }
 0x5ea   : > { %14578 = vmatpush1.bf16.msra.mxu1 %v19713_v29  ;;  %14538 = vmatprep.subr.bf16.mxu0 %v19718_v41  ;;  %v19794_v29 = vld [vmem:[%s20795_s21 + $0x2f64] ss:$8 sps:$4 sm:$0xff]   ;;  %v1080_v41 = vpack.c.bf16 %v755_v16, %v755_v16 }
 0x5eb   : > { %14579 = vmatprep.subr.bf16.mxu1 %v19721_v62  ;;  %v1082_v62 = vpack.c.bf16 %v756_v54, %v756_v54  ;;  %v19851_v16 = vld [vmem:[%s20795_s21 + $0x2ec4] ss:$8 sps:$4 sm:$0xff]  }
 0x5ec   : > { %v19854_v54 = vld [vmem:[%s20795_s21 + $0x2fc4] ss:$8 sps:$4 sm:$0xff]  }
 0x5ed   : > { %14539 = vmatpush1.bf16.msra.mxu0 %v19716_v42 }
 0x5ee   : > { %14580 = vmatpush1.bf16.msra.mxu1 %v19719_v47  ;;  %14540 = vmatprep.subr.bf16.mxu0 %v19724_v30  ;;  %v19789_v47 = vld [vmem:[%s20795_s21 + $0x2e60] ss:$8 sps:$4 sm:$0xff]  }
 0x5ef   : > { %14581 = vmatprep.subr.bf16.mxu1 %v19727_v3  ;;  %v19792_v30 = vld [vmem:[%s20795_s21 + $0x2f60] ss:$8 sps:$4 sm:$0xff]  }
 0x5f1   : > { %14541 = vmatpush1.bf16.msra.mxu0 %v19722_v5 }
 0x5f2   : > { %14582 = vmatpush1.bf16.msra.mxu1 %v19725_v55  ;;  %14542 = vmatprep.subr.bf16.mxu0 %v19730_v18  ;;  %v19797_v55 = vld [vmem:[%s20795_s21 + $0x2e54] ss:$8 sps:$4 sm:$0xff]  }
 0x5f3   : > { %14583 = vmatprep.subr.bf16.mxu1 %v19733_v6  ;;  %v19800_v18 = vld [vmem:[%s20795_s21 + $0x2f54] ss:$8 sps:$4 sm:$0xff]  }
 0x5f5   : > { %14543 = vmatpush1.bf16.msra.mxu0 %v19728_v19 }
 0x5f6   : > { %14584 = vmatpush1.bf16.msra.mxu1 %v19731_v10  ;;  %14544 = vmatprep.subr.bf16.mxu0 %v19736_v60 }
 0x5f7   : > { %14585 = vmatprep.subr.bf16.mxu1 %v19739_v20  ;;  %v19795_v20 = vld [vmem:[%s20795_s21 + $0x2e50] ss:$8 sps:$4 sm:$0xff]  }
 0x5f9   : > { %14545 = vmatpush2.bf16.msra.mxu0 %v19734_v25  ;;  %v19798_v25 = vld [vmem:[%s20795_s21 + $0x2f50] ss:$8 sps:$4 sm:$0xff]  }
 0x5fa   : > { %14586 = vmatpush2.bf16.msra.mxu1 %v19737_v12  ;;  %14546 = vmatprep.subr.bf16.mxu0 %v19742_v9  ;;  %v19806_v9 = vld [vmem:[%s20795_s21 + $0x2f44] ss:$8 sps:$4 sm:$0xff]  }
 0x5fb   : > { %14587 = vmatprep.subr.bf16.mxu1 %v19745_v13 }
 0x5fd   : > { %14547 = vmatpush2.bf16.msra.mxu0 %v19740_v26  ;;  %v19801_v26 = vld [vmem:[%s20795_s21 + $0x2e40] ss:$8 sps:$4 sm:$0xff]  }
 0x5fe   : > { %14588 = vmatpush2.bf16.msra.mxu1 %v19743_v15  ;;  %14548 = vmatprep.subr.bf16.mxu0 %v19748_v28  ;;  %v19804_v15 = vld [vmem:[%s20795_s21 + $0x2f40] ss:$8 sps:$4 sm:$0xff]   ;;  %v19809_v28 = vld [vmem:[%s20795_s21 + $0x2e34] ss:$8 sps:$4 sm:$0xff]  }
 0x5ff   : > { %14589 = vmatprep.subr.bf16.mxu1 %v19751_v33  ;;  %v19812_v33 = vld [vmem:[%s20795_s21 + $0x2f34] ss:$8 sps:$4 sm:$0xff]  }
 0x601   : > { %14549 = vmatpush2.bf16.msra.mxu0 %v19746_v23  ;;  %v19807_v23 = vld [vmem:[%s20795_s21 + $0x2e30] ss:$8 sps:$4 sm:$0xff]  }
 0x602   : > { %14590 = vmatpush2.bf16.msra.mxu1 %v19749_v40  ;;  %14550 = vmatprep.subr.bf16.mxu0 %v19754_v58  ;;  %v19810_v40 = vld [vmem:[%s20795_s21 + $0x2f30] ss:$8 sps:$4 sm:$0xff]   ;;  %v19815_v58 = vld [vmem:[%s20795_s21 + $0x2e24] ss:$8 sps:$4 sm:$0xff]  }
 0x603   : > { %14591 = vmatprep.subr.bf16.mxu1 %v19757_v24  ;;  %v19818_v24 = vld [vmem:[%s20795_s21 + $0x2f24] ss:$8 sps:$4 sm:$0xff]  }
 0x605   : > { %14551 = vmatpush2.bf16.msra.mxu0 %v19752_v34  ;;  %v19813_v34 = vld [vmem:[%s20795_s21 + $0x2e20] ss:$8 sps:$4 sm:$0xff]  }
 0x606   : > { %14592 = vmatpush2.bf16.msra.mxu1 %v19755_v8  ;;  %14552 = vmatprep.subr.bf16.mxu0 %v19760_v37  ;;  %v19816_v8 = vld [vmem:[%s20795_s21 + $0x2f20] ss:$8 sps:$4 sm:$0xff]   ;;  %v19821_v37 = vld [vmem:[%s20795_s21 + $0x2e14] ss:$8 sps:$4 sm:$0xff]  }
 0x607   : > { %14593 = vmatprep.subr.bf16.mxu1 %v19763_v46  ;;  %v19824_v46 = vld [vmem:[%s20795_s21 + $0x2f14] ss:$8 sps:$4 sm:$0xff]  }
 0x609   : > { %14553 = vmatpush2.bf16.msra.mxu0 %v19758_v31  ;;  %v19819_v31 = vld [vmem:[%s20795_s21 + $0x2e10] ss:$8 sps:$4 sm:$0xff]  }
 0x60a   : > { %14594 = vmatpush2.bf16.msra.mxu1 %v19761_v17  ;;  %14554 = vmatprep.subr.bf16.mxu0 %v19766_v48  ;;  %v19822_v17 = vld [vmem:[%s20795_s21 + $0x2f10] ss:$8 sps:$4 sm:$0xff]   ;;  %v19827_v48 = vld [vmem:[%s20795_s21 + $0x2e04] ss:$8 sps:$4 sm:$0xff]  }
 0x60b   : > { %14595 = vmatprep.subr.bf16.mxu1 %v19769_v32  ;;  %v19830_v32 = vld [vmem:[%s20795_s21 + $0x2f04] ss:$8 sps:$4 sm:$0xff]  }
 0x60d   : > { %14555 = vmatpush2.bf16.msra.mxu0 %v19764_v35  ;;  %v19828_v35 = vld [vmem:[%s20795_s21 + $0x2f00] ss:$8 sps:$4 sm:$0xff]  }
 0x60e   : > { %14596 = vmatpush2.bf16.msra.mxu1 %v19767_v22  ;;  %14556 = vmatprep.subr.bf16.mxu0 %v19772_v14  ;;  %v19833_v22 = vld [vmem:[%s20795_s21 + $0x2ef4] ss:$8 sps:$4 sm:$0xff]  }
 0x60f   : > { %14597 = vmatprep.subr.bf16.mxu1 %v19775_v4  ;;  %v19836_v14 = vld [vmem:[%s20795_s21 + $0x2ff4] ss:$8 sps:$4 sm:$0xff]   ;;  %v19831_v4 = vld [vmem:[%s20795_s21 + $0x2ef0] ss:$8 sps:$4 sm:$0xff]  }
 0x611   : > { %14557 = vmatpush2.bf16.msra.mxu0 %v19770_v43  ;;  %v19839_v43 = vld [vmem:[%s20795_s21 + $0x2ee4] ss:$8 sps:$4 sm:$0xff]  }
 0x612   : > { %14598 = vmatpush2.bf16.msra.mxu1 %v19773_v39  ;;  %14558 = vmatprep.subr.bf16.mxu0 %v19778_v56  ;;  %v19842_v39 = vld [vmem:[%s20795_s21 + $0x2fe4] ss:$8 sps:$4 sm:$0xff]   ;;  %v19837_v56 = vld [vmem:[%s20795_s21 + $0x2ee0] ss:$8 sps:$4 sm:$0xff]  }
 0x613   : > { %14599 = vmatprep.subr.bf16.mxu1 %v19781_v45  ;;  %v19840_v45 = vld [vmem:[%s20795_s21 + $0x2fe0] ss:$8 sps:$4 sm:$0xff]  }
 0x615   : > { %14559 = vmatpush2.bf16.msra.mxu0 %v19776_v59  ;;  %v19845_v59 = vld [vmem:[%s20795_s21 + $0x2ed4] ss:$8 sps:$4 sm:$0xff]  }
 0x616   : > { %14600 = vmatpush2.bf16.msra.mxu1 %v19779_v63  ;;  %14610 = vmatprep.subr.bf16.mxu0 %v19784_v53  ;;  %v19848_v63 = vld [vmem:[%s20795_s21 + $0x2fd4] ss:$8 sps:$4 sm:$0xff]   ;;  %v19843_v53 = vld [vmem:[%s20795_s21 + $0x2ed0] ss:$8 sps:$4 sm:$0xff]  }
 0x617   : > { %14651 = vmatprep.subr.bf16.mxu1 %v19788_v52  ;;  %v19846_v52 = vld [vmem:[%s20795_s21 + $0x2fd0] ss:$8 sps:$4 sm:$0xff]  }
 0x618   : > { %v14316_v42 = vpop.f32.mrf.mxu0  ;;  %14561 = vmatmul.mubr.bf16.vlgmr.msra.gmra.mxu0 %v1075_v0  ;;  %v19849_v0 = vld [vmem:[%s20795_s21 + $0x2ec0] ss:$8 sps:$4 sm:$0xff]  }
 0x619   : > { %v14357_v1 = vpop.f32.mrf.mxu1  ;;  %14602 = vmatmul.mubr.bf16.vlgmr.msra.gmra.mxu1 %v1077_v57  ;;  %v14317_v21 = vadd.f32 %v14316_v42, %v22673_v36  ;;  %14611 = vmatpush1.bf16.msra.mxu0 %v19782_v2  ;;  %v19852_v57 = vld [vmem:[%s20795_s21 + $0x2fc0] ss:$8 sps:$4 sm:$0xff]   ;;  %v19857_v2 = vld [vmem:[%s20795_s21 + $0x2eb4] ss:$8 sps:$4 sm:$0xff]  }
 0x61a   : > { %14652 = vmatpush1.bf16.msra.mxu1 %v19786_v7  ;;  %v14318_v3 = vpop.f32.mrf.mxu0  ;;  %14612 = vmatprep.subr.bf16.mxu0 %v19791_v61  ;;  %v19860_v7 = vld [vmem:[%s20795_s21 + $0x2fb4] ss:$8 sps:$4 sm:$0xff]   ;;  %v19855_v61 = vld [vmem:[%s20795_s21 + $0x2eb0] ss:$8 sps:$4 sm:$0xff]  }
 0x61b   : > { %v14359_v5 = vpop.f32.mrf.mxu1  ;;  %14653 = vmatprep.subr.bf16.mxu1 %v19794_v29  ;;  %v14319_v6 = vadd.f32 %v14318_v3, %v22675_v11  ;;  %v22758_v19 = vadd.f32 %v14357_v1, %v14317_v21  ;;  %14642 = vmatprep.mubr.bf16.mxu0 %v1080_v41  ;;  %v19803_v11 = vld [vmem:[%s20795_s21 + $0x2e44] ss:$8 sps:$4 sm:$0xff]   ;;  %v19858_v29 = vld [vmem:[%s20795_s21 + $0x2fb0] ss:$8 sps:$4 sm:$0xff]   ;;  %v311_v42 = vld [vmem:[%s20809_s7 + $0xc0] sm:$0xff] }
 0x61c   : > { %14683 = vmatprep.mubr.bf16.mxu1 %v1082_v62  ;;  %v14320_v36 = vpop.f32.mrf.mxu0  ;;  %v19863_v41 = vld [vmem:[%s20795_s21 + $0x2ea4] ss:$8 sps:$4 sm:$0xff]   ;;  %v19861_v1 = vld [vmem:[%s20795_s21 + $0x2ea0] ss:$8 sps:$4 sm:$0xff]   ;;  %v757_v3 = vcombine.high %v311_v42, %v311_v42 }
 0x61d   : > { %v14361_v10 = vpop.f32.mrf.mxu1  ;;  %v22760_v60 = vadd.f32 %v14359_v5, %v14319_v6  ;;  %14613 = vmatpush1.bf16.msra.mxu0 %v19789_v47  ;;  %v19866_v62 = vld [vmem:[%s20795_s21 + $0x2fa4] ss:$8 sps:$4 sm:$0xff]   ;;  %v19864_v21 = vld [vmem:[%s20795_s21 + $0x2fa0] ss:$8 sps:$4 sm:$0xff]   ;;  %v19869_v47 = vld [vmem:[%s20795_s21 + $0x2e94] ss:$8 sps:$4 sm:$0xff]   ;;  %v22816_v36 = vrot.slane %v311_v42, %v20860_v50 }
 0x61e   : > { %14654 = vmatpush1.bf16.msra.mxu1 %v19792_v30  ;;  %v14321_v12 = vpop.f32.mrf.mxu0  ;;  %14614 = vmatprep.subr.bf16.mxu0 %v19797_v55  ;;  %v19872_v30 = vld [vmem:[%s20795_s21 + $0x2f94] ss:$8 sps:$4 sm:$0xff]   ;;  %v19867_v5 = vld [vmem:[%s20795_s21 + $0x2e90] ss:$8 sps:$4 sm:$0xff]   ;;  %v19878_v6 = vld [vmem:[%s20795_s21 + $0x2f84] ss:$8 sps:$4 sm:$0xff]   ;;  %v22819_v10 = vrot.slane %v757_v3, %v20860_v50 }
 0x61f   : > { %14655 = vmatprep.subr.bf16.mxu1 %v19800_v18  ;;  %v14362_v13 = vpop.f32.mrf.mxu1  ;;  %v19870_v55 = vld [vmem:[%s20795_s21 + $0x2f90] ss:$8 sps:$4 sm:$0xff]   ;;  %v19875_v18 = vld [vmem:[%s20795_s21 + $0x2e84] ss:$8 sps:$4 sm:$0xff]   ;;  %v19881_v12 = vld [vmem:[%s20795_s21 + $0x3074] ss:$8 sps:$4 sm:$0xff]  }
 0x620   : > { %v773_v13 = vcombine.high %v22819_v10, %v22819_v10  ;;  %v19922_v42 = vld [vmem:[%s20795_s21 + $0x3000] ss:$8 sps:$4 sm:$0xff]   ;;  %v19931_v3 = vld [vmem:[%s20795_s21 + $0x31f0] ss:$8 sps:$4 sm:$0xff]  }
 0x621   : > { %14615 = vmatpush1.bf16.msra.mxu0 %v19795_v20  ;;  %v19873_v20 = vld [vmem:[%s20795_s21 + $0x2e80] ss:$8 sps:$4 sm:$0xff]  }
 0x622   : > { %14656 = vmatpush1.bf16.msra.mxu1 %v19798_v25  ;;  %14616 = vmatprep.subr.bf16.mxu0 %v19803_v11  ;;  %v19876_v25 = vld [vmem:[%s20795_s21 + $0x2f80] ss:$8 sps:$4 sm:$0xff]   ;;  %v19885_v11 = vld [vmem:[%s20795_s21 + $0x3174] ss:$8 sps:$4 sm:$0xff]  }
 0x623   : > { %14657 = vmatprep.subr.bf16.mxu1 %v19806_v9  ;;  %v772_v9 = vcombine.high %v22816_v36, %v22816_v36 }
 0x625   : > { %14617 = vmatpush1.bf16.msra.mxu0 %v19801_v26  ;;  %v1079_v26 = vpack.c.bf16 %v22731_v27, %v22731_v27 }
 0x626   : > { %14658 = vmatpush1.bf16.msra.mxu1 %v19804_v15  ;;  %14618 = vmatprep.subr.bf16.mxu0 %v19809_v28  ;;  %v1081_v15 = vpack.c.bf16 %v22734_v51, %v22734_v51  ;;  %v19879_v28 = vld [vmem:[%s20795_s21 + $0x3070] ss:$8 sps:$4 sm:$0xff]  }
 0x627   : > { %14659 = vmatprep.subr.bf16.mxu1 %v19812_v33  ;;  %v19883_v33 = vld [vmem:[%s20795_s21 + $0x3170] ss:$8 sps:$4 sm:$0xff]  }
 0x629   : > { %14619 = vmatpush1.bf16.msra.mxu0 %v19807_v23  ;;  %v19888_v23 = vld [vmem:[%s20795_s21 + $0x3064] ss:$8 sps:$4 sm:$0xff]  }
 0x62a   : > { %14660 = vmatpush1.bf16.msra.mxu1 %v19810_v40  ;;  %14620 = vmatprep.subr.bf16.mxu0 %v19815_v58  ;;  %v19891_v40 = vld [vmem:[%s20795_s21 + $0x3164] ss:$8 sps:$4 sm:$0xff]   ;;  %v1084_v58 = vpack.c.bf16 %v772_v9, %v772_v9 }
 0x62b   : > { %14661 = vmatprep.subr.bf16.mxu1 %v19818_v24  ;;  %v1086_v24 = vpack.c.bf16 %v773_v13, %v773_v13  ;;  %v19948_v9 = vld [vmem:[%s20795_s21 + $0x30c4] ss:$8 sps:$4 sm:$0xff]  }
 0x62c   : > { %v19951_v13 = vld [vmem:[%s20795_s21 + $0x31c4] ss:$8 sps:$4 sm:$0xff]  }
 0x62d   : > { %14621 = vmatpush1.bf16.msra.mxu0 %v19813_v34 }
 0x62e   : > { %14662 = vmatpush1.bf16.msra.mxu1 %v19816_v8  ;;  %14622 = vmatprep.subr.bf16.mxu0 %v19821_v37  ;;  %v19886_v8 = vld [vmem:[%s20795_s21 + $0x3060] ss:$8 sps:$4 sm:$0xff]  }
 0x62f   : > { %14663 = vmatprep.subr.bf16.mxu1 %v19824_v46  ;;  %v19889_v37 = vld [vmem:[%s20795_s21 + $0x3160] ss:$8 sps:$4 sm:$0xff]  }
 0x631   : > { %14623 = vmatpush1.bf16.msra.mxu0 %v19819_v31 }
 0x632   : > { %14664 = vmatpush1.bf16.msra.mxu1 %v19822_v17  ;;  %14624 = vmatprep.subr.bf16.mxu0 %v19827_v48  ;;  %v19894_v17 = vld [vmem:[%s20795_s21 + $0x3054] ss:$8 sps:$4 sm:$0xff]  }
 0x633   : > { %14665 = vmatprep.subr.bf16.mxu1 %v19830_v32  ;;  %v19897_v48 = vld [vmem:[%s20795_s21 + $0x3154] ss:$8 sps:$4 sm:$0xff]  }
 0x635   : > { %14625 = vmatpush1.bf16.msra.mxu0 %v19825_v49 }
 0x636   : > { %14666 = vmatpush1.bf16.msra.mxu1 %v19828_v35  ;;  %14626 = vmatprep.subr.bf16.mxu0 %v19833_v22 }
 0x637   : > { %14667 = vmatprep.subr.bf16.mxu1 %v19836_v14  ;;  %v19892_v14 = vld [vmem:[%s20795_s21 + $0x3050] ss:$8 sps:$4 sm:$0xff]  }
 0x639   : > { %14627 = vmatpush2.bf16.msra.mxu0 %v19831_v4  ;;  %v19895_v4 = vld [vmem:[%s20795_s21 + $0x3150] ss:$8 sps:$4 sm:$0xff]  }
 0x63a   : > { %14668 = vmatpush2.bf16.msra.mxu1 %v19834_v38  ;;  %14628 = vmatprep.subr.bf16.mxu0 %v19839_v43  ;;  %v19903_v43 = vld [vmem:[%s20795_s21 + $0x3144] ss:$8 sps:$4 sm:$0xff]  }
 0x63b   : > { %14669 = vmatprep.subr.bf16.mxu1 %v19842_v39 }
 0x63d   : > { %14629 = vmatpush2.bf16.msra.mxu0 %v19837_v56  ;;  %v19898_v56 = vld [vmem:[%s20795_s21 + $0x3040] ss:$8 sps:$4 sm:$0xff]  }
 0x63e   : > { %14670 = vmatpush2.bf16.msra.mxu1 %v19840_v45  ;;  %14630 = vmatprep.subr.bf16.mxu0 %v19845_v59  ;;  %v19901_v45 = vld [vmem:[%s20795_s21 + $0x3140] ss:$8 sps:$4 sm:$0xff]   ;;  %v19906_v59 = vld [vmem:[%s20795_s21 + $0x3034] ss:$8 sps:$4 sm:$0xff]  }
 0x63f   : > { %14671 = vmatprep.subr.bf16.mxu1 %v19848_v63  ;;  %v19909_v63 = vld [vmem:[%s20795_s21 + $0x3134] ss:$8 sps:$4 sm:$0xff]  }
 0x641   : > { %14631 = vmatpush2.bf16.msra.mxu0 %v19843_v53  ;;  %v19904_v53 = vld [vmem:[%s20795_s21 + $0x3030] ss:$8 sps:$4 sm:$0xff]  }
 0x642   : > { %14672 = vmatpush2.bf16.msra.mxu1 %v19846_v52  ;;  %14632 = vmatprep.subr.bf16.mxu0 %v19851_v16  ;;  %v19907_v52 = vld [vmem:[%s20795_s21 + $0x3130] ss:$8 sps:$4 sm:$0xff]   ;;  %v19912_v16 = vld [vmem:[%s20795_s21 + $0x3024] ss:$8 sps:$4 sm:$0xff]  }
 0x643   : > { %14673 = vmatprep.subr.bf16.mxu1 %v19854_v54  ;;  %v19915_v54 = vld [vmem:[%s20795_s21 + $0x3124] ss:$8 sps:$4 sm:$0xff]  }
 0x645   : > { %14633 = vmatpush2.bf16.msra.mxu0 %v19849_v0  ;;  %v19910_v0 = vld [vmem:[%s20795_s21 + $0x3020] ss:$8 sps:$4 sm:$0xff]  }
 0x646   : > { %14674 = vmatpush2.bf16.msra.mxu1 %v19852_v57  ;;  %14634 = vmatprep.subr.bf16.mxu0 %v19857_v2  ;;  %v19913_v57 = vld [vmem:[%s20795_s21 + $0x3120] ss:$8 sps:$4 sm:$0xff]   ;;  %v19918_v2 = vld [vmem:[%s20795_s21 + $0x3014] ss:$8 sps:$4 sm:$0xff]  }
 0x647   : > { %14675 = vmatprep.subr.bf16.mxu1 %v19860_v7  ;;  %v19921_v7 = vld [vmem:[%s20795_s21 + $0x3114] ss:$8 sps:$4 sm:$0xff]  }
 0x649   : > { %14635 = vmatpush2.bf16.msra.mxu0 %v19855_v61  ;;  %v19916_v61 = vld [vmem:[%s20795_s21 + $0x3010] ss:$8 sps:$4 sm:$0xff]  }
 0x64a   : > { %14676 = vmatpush2.bf16.msra.mxu1 %v19858_v29  ;;  %14636 = vmatprep.subr.bf16.mxu0 %v19863_v41  ;;  %v19919_v29 = vld [vmem:[%s20795_s21 + $0x3110] ss:$8 sps:$4 sm:$0xff]   ;;  %v19924_v41 = vld [vmem:[%s20795_s21 + $0x3004] ss:$8 sps:$4 sm:$0xff]  }
 0x64b   : > { %14677 = vmatprep.subr.bf16.mxu1 %v19866_v62  ;;  %v19927_v62 = vld [vmem:[%s20795_s21 + $0x3104] ss:$8 sps:$4 sm:$0xff]  }
 0x64d   : > { %14637 = vmatpush2.bf16.msra.mxu0 %v19861_v1  ;;  %v19925_v1 = vld [vmem:[%s20795_s21 + $0x3100] ss:$8 sps:$4 sm:$0xff]  }
 0x64e   : > { %14678 = vmatpush2.bf16.msra.mxu1 %v19864_v21  ;;  %14638 = vmatprep.subr.bf16.mxu0 %v19869_v47  ;;  %v19930_v21 = vld [vmem:[%s20795_s21 + $0x30f4] ss:$8 sps:$4 sm:$0xff]  }
 0x64f   : > { %14679 = vmatprep.subr.bf16.mxu1 %v19872_v30  ;;  %v19933_v47 = vld [vmem:[%s20795_s21 + $0x31f4] ss:$8 sps:$4 sm:$0xff]   ;;  %v19928_v30 = vld [vmem:[%s20795_s21 + $0x30f0] ss:$8 sps:$4 sm:$0xff]  }
 0x651   : > { %14639 = vmatpush2.bf16.msra.mxu0 %v19867_v5  ;;  %v19936_v5 = vld [vmem:[%s20795_s21 + $0x30e4] ss:$8 sps:$4 sm:$0xff]  }
 0x652   : > { %14680 = vmatpush2.bf16.msra.mxu1 %v19870_v55  ;;  %14640 = vmatprep.subr.bf16.mxu0 %v19875_v18  ;;  %v19939_v55 = vld [vmem:[%s20795_s21 + $0x31e4] ss:$8 sps:$4 sm:$0xff]   ;;  %v19934_v18 = vld [vmem:[%s20795_s21 + $0x30e0] ss:$8 sps:$4 sm:$0xff]  }
 0x653   : > { %14681 = vmatprep.subr.bf16.mxu1 %v19878_v6  ;;  %v19937_v6 = vld [vmem:[%s20795_s21 + $0x31e0] ss:$8 sps:$4 sm:$0xff]  }
 0x655   : > { %14641 = vmatpush2.bf16.msra.mxu0 %v19873_v20  ;;  %v19942_v20 = vld [vmem:[%s20795_s21 + $0x30d4] ss:$8 sps:$4 sm:$0xff]  }
 0x656   : > { %14682 = vmatpush2.bf16.msra.mxu1 %v19876_v25  ;;  %14692 = vmatprep.subr.bf16.mxu0 %v19881_v12  ;;  %v19945_v25 = vld [vmem:[%s20795_s21 + $0x31d4] ss:$8 sps:$4 sm:$0xff]   ;;  %v19940_v12 = vld [vmem:[%s20795_s21 + $0x30d0] ss:$8 sps:$4 sm:$0xff]  }
 0x657   : > { %14733 = vmatprep.subr.bf16.mxu1 %v19885_v11  ;;  %v19943_v11 = vld [vmem:[%s20795_s21 + $0x31d0] ss:$8 sps:$4 sm:$0xff]  }
 0x658   : > { %v14398_v34 = vpop.f32.mrf.mxu0  ;;  %14643 = vmatmul.mubr.bf16.vlgmr.msra.gmra.mxu0 %v1079_v26  ;;  %v19946_v26 = vld [vmem:[%s20795_s21 + $0x30c0] ss:$8 sps:$4 sm:$0xff]  }
 0x659   : > { %v14439_v27 = vpop.f32.mrf.mxu1  ;;  %14684 = vmatmul.mubr.bf16.vlgmr.msra.gmra.mxu1 %v1081_v15  ;;  %v14399_v51 = vadd.f32 %v14398_v34, %v22758_v19  ;;  %14693 = vmatpush1.bf16.msra.mxu0 %v19879_v28  ;;  %v19949_v15 = vld [vmem:[%s20795_s21 + $0x31c0] ss:$8 sps:$4 sm:$0xff]   ;;  %v19954_v28 = vld [vmem:[%s20795_s21 + $0x30b4] ss:$8 sps:$4 sm:$0xff]  }
 0x65a   : > { %14734 = vmatpush1.bf16.msra.mxu1 %v19883_v33  ;;  %v14400_v46 = vpop.f32.mrf.mxu0  ;;  %14694 = vmatprep.subr.bf16.mxu0 %v19888_v23  ;;  %v19957_v33 = vld [vmem:[%s20795_s21 + $0x31b4] ss:$8 sps:$4 sm:$0xff]   ;;  %v19952_v23 = vld [vmem:[%s20795_s21 + $0x30b0] ss:$8 sps:$4 sm:$0xff]   ;;  %v312_v34 = vld [vmem:[%s20809_s7 + $0xc8] sm:$0xff] }
 0x65b   : > { %v14441_v31 = vpop.f32.mrf.mxu1  ;;  %14735 = vmatprep.subr.bf16.mxu1 %v19891_v40  ;;  %v14401_v32 = vadd.f32 %v14400_v46, %v22760_v60  ;;  %v22843_v49 = vadd.f32 %v14439_v27, %v14399_v51  ;;  %14724 = vmatprep.mubr.bf16.mxu0 %v1084_v58  ;;  %v19900_v60 = vld [vmem:[%s20795_s21 + $0x3044] ss:$8 sps:$4 sm:$0xff]   ;;  %v19955_v40 = vld [vmem:[%s20795_s21 + $0x31b0] ss:$8 sps:$4 sm:$0xff]   ;;  %v19958_v27 = vld [vmem:[%s20795_s21 + $0x30a0] ss:$8 sps:$4 sm:$0xff]   ;;  %v774_v46 = vcombine.high %v312_v34, %v312_v34 }
 0x65c   : > { %14765 = vmatprep.mubr.bf16.mxu1 %v1086_v24  ;;  %v14402_v19 = vpop.f32.mrf.mxu0  ;;  %v19960_v58 = vld [vmem:[%s20795_s21 + $0x30a4] ss:$8 sps:$4 sm:$0xff]   ;;  %v19961_v51 = vld [vmem:[%s20795_s21 + $0x31a0] ss:$8 sps:$4 sm:$0xff]  }
 0x65d   : > { %v14443_v35 = vpop.f32.mrf.mxu1  ;;  %v22845_v22 = vadd.f32 %v14441_v31, %v14401_v32  ;;  %14695 = vmatpush1.bf16.msra.mxu0 %v19886_v8  ;;  %v19963_v24 = vld [vmem:[%s20795_s21 + $0x31a4] ss:$8 sps:$4 sm:$0xff]   ;;  %v19966_v8 = vld [vmem:[%s20795_s21 + $0x3094] ss:$8 sps:$4 sm:$0xff]   ;;  %v19964_v31 = vld [vmem:[%s20795_s21 + $0x3090] ss:$8 sps:$4 sm:$0xff]   ;;  %v22901_v19 = vrot.slane %v312_v34, %v20860_v50 }
 0x65e   : > { %14736 = vmatpush1.bf16.msra.mxu1 %v19889_v37  ;;  %v14403_v38 = vpop.f32.mrf.mxu0  ;;  %14696 = vmatprep.subr.bf16.mxu0 %v19894_v17  ;;  %v19969_v37 = vld [vmem:[%s20795_s21 + $0x3194] ss:$8 sps:$4 sm:$0xff]   ;;  %v19967_v17 = vld [vmem:[%s20795_s21 + $0x3190] ss:$8 sps:$4 sm:$0xff]   ;;  %v19975_v32 = vld [vmem:[%s20795_s21 + $0x3184] ss:$8 sps:$4 sm:$0xff]   ;;  %v22904_v35 = vrot.slane %v774_v46, %v20860_v50 }
 0x65f   : > { %14737 = vmatprep.subr.bf16.mxu1 %v19897_v48  ;;  %v14444_v39 = vpop.f32.mrf.mxu1  ;;  %v19972_v48 = vld [vmem:[%s20795_s21 + $0x3084] ss:$8 sps:$4 sm:$0xff]   ;;  %v19978_v38 = vld [vmem:[%s20795_s21 + $0x3274] ss:$8 sps:$4 sm:$0xff]   ;;  %v20019_v34 = vld [vmem:[%s20795_s21 + $0x3200] ss:$8 sps:$4 sm:$0xff]  }
 0x660   : > { %v790_v39 = vcombine.high %v22904_v35, %v22904_v35  ;;  %v20028_v46 = vld [vmem:[%s20795_s21 + $0x33f0] ss:$8 sps:$4 sm:$0xff]  }
 0x661   : > { %14697 = vmatpush1.bf16.msra.mxu0 %v19892_v14  ;;  %v19970_v14 = vld [vmem:[%s20795_s21 + $0x3080] ss:$8 sps:$4 sm:$0xff]  }
 0x662   : > { %14738 = vmatpush1.bf16.msra.mxu1 %v19895_v4  ;;  %14698 = vmatprep.subr.bf16.mxu0 %v19900_v60  ;;  %v19973_v4 = vld [vmem:[%s20795_s21 + $0x3180] ss:$8 sps:$4 sm:$0xff]   ;;  %v19982_v60 = vld [vmem:[%s20795_s21 + $0x3374] ss:$8 sps:$4 sm:$0xff]  }
 0x663   : > { %14739 = vmatprep.subr.bf16.mxu1 %v19903_v43  ;;  %v789_v43 = vcombine.high %v22901_v19, %v22901_v19 }
 0x665   : > { %14699 = vmatpush1.bf16.msra.mxu0 %v19898_v56  ;;  %v1083_v56 = vpack.c.bf16 %v22816_v36, %v22816_v36 }
 0x666   : > { %14740 = vmatpush1.bf16.msra.mxu1 %v19901_v45  ;;  %14700 = vmatprep.subr.bf16.mxu0 %v19906_v59  ;;  %v1085_v45 = vpack.c.bf16 %v22819_v10, %v22819_v10  ;;  %v19976_v59 = vld [vmem:[%s20795_s21 + $0x3270] ss:$8 sps:$4 sm:$0xff]  }
 0x667   : > { %14741 = vmatprep.subr.bf16.mxu1 %v19909_v63  ;;  %v19980_v63 = vld [vmem:[%s20795_s21 + $0x3370] ss:$8 sps:$4 sm:$0xff]  }
 0x669   : > { %14701 = vmatpush1.bf16.msra.mxu0 %v19904_v53  ;;  %v19985_v53 = vld [vmem:[%s20795_s21 + $0x3264] ss:$8 sps:$4 sm:$0xff]  }
 0x66a   : > { %14742 = vmatpush1.bf16.msra.mxu1 %v19907_v52  ;;  %14702 = vmatprep.subr.bf16.mxu0 %v19912_v16  ;;  %v19988_v52 = vld [vmem:[%s20795_s21 + $0x3364] ss:$8 sps:$4 sm:$0xff]   ;;  %v1088_v16 = vpack.c.bf16 %v789_v43, %v789_v43 }
 0x66b   : > { %14743 = vmatprep.subr.bf16.mxu1 %v19915_v54  ;;  %v1090_v54 = vpack.c.bf16 %v790_v39, %v790_v39  ;;  %v20045_v43 = vld [vmem:[%s20795_s21 + $0x32c4] ss:$8 sps:$4 sm:$0xff]  }
 0x66c   : > { %v20048_v39 = vld [vmem:[%s20795_s21 + $0x33c4] ss:$8 sps:$4 sm:$0xff]  }
 0x66d   : > { %14703 = vmatpush1.bf16.msra.mxu0 %v19910_v0 }
 0x66e   : > { %14744 = vmatpush1.bf16.msra.mxu1 %v19913_v57  ;;  %14704 = vmatprep.subr.bf16.mxu0 %v19918_v2  ;;  %v19983_v57 = vld [vmem:[%s20795_s21 + $0x3260] ss:$8 sps:$4 sm:$0xff]  }
 0x66f   : > { %14745 = vmatprep.subr.bf16.mxu1 %v19921_v7  ;;  %v19986_v2 = vld [vmem:[%s20795_s21 + $0x3360] ss:$8 sps:$4 sm:$0xff]  }
 0x671   : > { %14705 = vmatpush1.bf16.msra.mxu0 %v19916_v61 }
 0x672   : > { %14746 = vmatpush1.bf16.msra.mxu1 %v19919_v29  ;;  %14706 = vmatprep.subr.bf16.mxu0 %v19924_v41  ;;  %v19991_v29 = vld [vmem:[%s20795_s21 + $0x3254] ss:$8 sps:$4 sm:$0xff]  }
 0x673   : > { %14747 = vmatprep.subr.bf16.mxu1 %v19927_v62  ;;  %v19994_v41 = vld [vmem:[%s20795_s21 + $0x3354] ss:$8 sps:$4 sm:$0xff]  }
 0x675   : > { %14707 = vmatpush1.bf16.msra.mxu0 %v19922_v42 }
 0x676   : > { %14748 = vmatpush1.bf16.msra.mxu1 %v19925_v1  ;;  %14708 = vmatprep.subr.bf16.mxu0 %v19930_v21 }
 0x677   : > { %14749 = vmatprep.subr.bf16.mxu1 %v19933_v47  ;;  %v19989_v47 = vld [vmem:[%s20795_s21 + $0x3250] ss:$8 sps:$4 sm:$0xff]  }
 0x679   : > { %14709 = vmatpush2.bf16.msra.mxu0 %v19928_v30  ;;  %v19992_v30 = vld [vmem:[%s20795_s21 + $0x3350] ss:$8 sps:$4 sm:$0xff]  }
 0x67a   : > { %14750 = vmatpush2.bf16.msra.mxu1 %v19931_v3  ;;  %14710 = vmatprep.subr.bf16.mxu0 %v19936_v5  ;;  %v20000_v5 = vld [vmem:[%s20795_s21 + $0x3344] ss:$8 sps:$4 sm:$0xff]  }
 0x67b   : > { %14751 = vmatprep.subr.bf16.mxu1 %v19939_v55 }
 0x67d   : > { %14711 = vmatpush2.bf16.msra.mxu0 %v19934_v18  ;;  %v19995_v18 = vld [vmem:[%s20795_s21 + $0x3240] ss:$8 sps:$4 sm:$0xff]  }
 0x67e   : > { %14752 = vmatpush2.bf16.msra.mxu1 %v19937_v6  ;;  %14712 = vmatprep.subr.bf16.mxu0 %v19942_v20  ;;  %v19998_v6 = vld [vmem:[%s20795_s21 + $0x3340] ss:$8 sps:$4 sm:$0xff]   ;;  %v20003_v20 = vld [vmem:[%s20795_s21 + $0x3234] ss:$8 sps:$4 sm:$0xff]  }
 0x67f   : > { %14753 = vmatprep.subr.bf16.mxu1 %v19945_v25  ;;  %v20006_v25 = vld [vmem:[%s20795_s21 + $0x3334] ss:$8 sps:$4 sm:$0xff]  }
 0x681   : > { %14713 = vmatpush2.bf16.msra.mxu0 %v19940_v12  ;;  %v20001_v12 = vld [vmem:[%s20795_s21 + $0x3230] ss:$8 sps:$4 sm:$0xff]  }
 0x682   : > { %14754 = vmatpush2.bf16.msra.mxu1 %v19943_v11  ;;  %14714 = vmatprep.subr.bf16.mxu0 %v19948_v9  ;;  %v20004_v11 = vld [vmem:[%s20795_s21 + $0x3330] ss:$8 sps:$4 sm:$0xff]   ;;  %v20009_v9 = vld [vmem:[%s20795_s21 + $0x3224] ss:$8 sps:$4 sm:$0xff]  }
 0x683   : > { %14755 = vmatprep.subr.bf16.mxu1 %v19951_v13  ;;  %v20012_v13 = vld [vmem:[%s20795_s21 + $0x3324] ss:$8 sps:$4 sm:$0xff]  }
 0x685   : > { %14715 = vmatpush2.bf16.msra.mxu0 %v19946_v26  ;;  %v20007_v26 = vld [vmem:[%s20795_s21 + $0x3220] ss:$8 sps:$4 sm:$0xff]  }
 0x686   : > { %14756 = vmatpush2.bf16.msra.mxu1 %v19949_v15  ;;  %14716 = vmatprep.subr.bf16.mxu0 %v19954_v28  ;;  %v20010_v15 = vld [vmem:[%s20795_s21 + $0x3320] ss:$8 sps:$4 sm:$0xff]   ;;  %v20015_v28 = vld [vmem:[%s20795_s21 + $0x3214] ss:$8 sps:$4 sm:$0xff]  }
 0x687   : > { %14757 = vmatprep.subr.bf16.mxu1 %v19957_v33  ;;  %v20018_v33 = vld [vmem:[%s20795_s21 + $0x3314] ss:$8 sps:$4 sm:$0xff]  }
 0x689   : > { %14717 = vmatpush2.bf16.msra.mxu0 %v19952_v23  ;;  %v20013_v23 = vld [vmem:[%s20795_s21 + $0x3210] ss:$8 sps:$4 sm:$0xff]  }
 0x68a   : > { %14758 = vmatpush2.bf16.msra.mxu1 %v19955_v40  ;;  %14718 = vmatprep.subr.bf16.mxu0 %v19960_v58  ;;  %v20016_v40 = vld [vmem:[%s20795_s21 + $0x3310] ss:$8 sps:$4 sm:$0xff]   ;;  %v20021_v58 = vld [vmem:[%s20795_s21 + $0x3204] ss:$8 sps:$4 sm:$0xff]  }
 0x68b   : > { %14759 = vmatprep.subr.bf16.mxu1 %v19963_v24  ;;  %v20024_v24 = vld [vmem:[%s20795_s21 + $0x3304] ss:$8 sps:$4 sm:$0xff]  }
 0x68d   : > { %14719 = vmatpush2.bf16.msra.mxu0 %v19958_v27  ;;  %v20022_v27 = vld [vmem:[%s20795_s21 + $0x3300] ss:$8 sps:$4 sm:$0xff]  }
 0x68e   : > { %14760 = vmatpush2.bf16.msra.mxu1 %v19961_v51  ;;  %14720 = vmatprep.subr.bf16.mxu0 %v19966_v8  ;;  %v20027_v51 = vld [vmem:[%s20795_s21 + $0x32f4] ss:$8 sps:$4 sm:$0xff]  }
 0x68f   : > { %14761 = vmatprep.subr.bf16.mxu1 %v19969_v37  ;;  %v20030_v8 = vld [vmem:[%s20795_s21 + $0x33f4] ss:$8 sps:$4 sm:$0xff]   ;;  %v20025_v37 = vld [vmem:[%s20795_s21 + $0x32f0] ss:$8 sps:$4 sm:$0xff]  }
 0x691   : > { %14721 = vmatpush2.bf16.msra.mxu0 %v19964_v31  ;;  %v20033_v31 = vld [vmem:[%s20795_s21 + $0x32e4] ss:$8 sps:$4 sm:$0xff]  }
 0x692   : > { %14762 = vmatpush2.bf16.msra.mxu1 %v19967_v17  ;;  %14722 = vmatprep.subr.bf16.mxu0 %v19972_v48  ;;  %v20036_v17 = vld [vmem:[%s20795_s21 + $0x33e4] ss:$8 sps:$4 sm:$0xff]   ;;  %v20031_v48 = vld [vmem:[%s20795_s21 + $0x32e0] ss:$8 sps:$4 sm:$0xff]  }
 0x693   : > { %14763 = vmatprep.subr.bf16.mxu1 %v19975_v32  ;;  %v20034_v32 = vld [vmem:[%s20795_s21 + $0x33e0] ss:$8 sps:$4 sm:$0xff]  }
 0x695   : > { %14723 = vmatpush2.bf16.msra.mxu0 %v19970_v14  ;;  %v20039_v14 = vld [vmem:[%s20795_s21 + $0x32d4] ss:$8 sps:$4 sm:$0xff]  }
 0x696   : > { %14764 = vmatpush2.bf16.msra.mxu1 %v19973_v4  ;;  %14774 = vmatprep.subr.bf16.mxu0 %v19978_v38  ;;  %v20042_v4 = vld [vmem:[%s20795_s21 + $0x33d4] ss:$8 sps:$4 sm:$0xff]   ;;  %v20037_v38 = vld [vmem:[%s20795_s21 + $0x32d0] ss:$8 sps:$4 sm:$0xff]  }
 0x697   : > { %14815 = vmatprep.subr.bf16.mxu1 %v19982_v60  ;;  %v20040_v60 = vld [vmem:[%s20795_s21 + $0x33d0] ss:$8 sps:$4 sm:$0xff]  }
 0x698   : > { %v14480_v0 = vpop.f32.mrf.mxu0  ;;  %14725 = vmatmul.mubr.bf16.vlgmr.msra.gmra.mxu0 %v1083_v56  ;;  %v20043_v56 = vld [vmem:[%s20795_s21 + $0x32c0] ss:$8 sps:$4 sm:$0xff]  }
 0x699   : > { %v14521_v36 = vpop.f32.mrf.mxu1  ;;  %14766 = vmatmul.mubr.bf16.vlgmr.msra.gmra.mxu1 %v1085_v45  ;;  %v14481_v10 = vadd.f32 %v14480_v0, %v22843_v49  ;;  %14775 = vmatpush1.bf16.msra.mxu0 %v19976_v59  ;;  %v20046_v45 = vld [vmem:[%s20795_s21 + $0x33c0] ss:$8 sps:$4 sm:$0xff]   ;;  %v20051_v59 = vld [vmem:[%s20795_s21 + $0x32b4] ss:$8 sps:$4 sm:$0xff]   ;;  %v313_v0 = vld [vmem:[%s20809_s7 + $0xd0] sm:$0xff] }
 0x69a   : > { %14816 = vmatpush1.bf16.msra.mxu1 %v19980_v63  ;;  %v14482_v7 = vpop.f32.mrf.mxu0  ;;  %14776 = vmatprep.subr.bf16.mxu0 %v19985_v53  ;;  %v20054_v63 = vld [vmem:[%s20795_s21 + $0x33b4] ss:$8 sps:$4 sm:$0xff]   ;;  %v20049_v53 = vld [vmem:[%s20795_s21 + $0x32b0] ss:$8 sps:$4 sm:$0xff]  }
 0x69b   : > { %v14523_v61 = vpop.f32.mrf.mxu1  ;;  %14817 = vmatprep.subr.bf16.mxu1 %v19988_v52  ;;  %v14483_v62 = vadd.f32 %v14482_v7, %v22845_v22  ;;  %v22928_v42 = vadd.f32 %v14521_v36, %v14481_v10  ;;  %14806 = vmatprep.mubr.bf16.mxu0 %v1088_v16  ;;  %v19997_v22 = vld [vmem:[%s20795_s21 + $0x3244] ss:$8 sps:$4 sm:$0xff]   ;;  %v20052_v52 = vld [vmem:[%s20795_s21 + $0x33b0] ss:$8 sps:$4 sm:$0xff]   ;;  %v20055_v36 = vld [vmem:[%s20795_s21 + $0x32a0] ss:$8 sps:$4 sm:$0xff]   ;;  %v791_v7 = vcombine.high %v313_v0, %v313_v0 }
 0x69c   : > { %14847 = vmatprep.mubr.bf16.mxu1 %v1090_v54  ;;  %v14484_v49 = vpop.f32.mrf.mxu0  ;;  %v20057_v16 = vld [vmem:[%s20795_s21 + $0x32a4] ss:$8 sps:$4 sm:$0xff]   ;;  %v20058_v10 = vld [vmem:[%s20795_s21 + $0x33a0] ss:$8 sps:$4 sm:$0xff]  }
 0x69d   : > { %v14525_v1 = vpop.f32.mrf.mxu1  ;;  %v22930_v21 = vadd.f32 %v14523_v61, %v14483_v62  ;;  %14777 = vmatpush1.bf16.msra.mxu0 %v19983_v57  ;;  %v20060_v54 = vld [vmem:[%s20795_s21 + $0x33a4] ss:$8 sps:$4 sm:$0xff]   ;;  %v20063_v57 = vld [vmem:[%s20795_s21 + $0x3294] ss:$8 sps:$4 sm:$0xff]   ;;  %v20061_v61 = vld [vmem:[%s20795_s21 + $0x3290] ss:$8 sps:$4 sm:$0xff]   ;;  %v22986_v49 = vrot.slane %v313_v0, %v20860_v50 }
 0x69e   : > { %14818 = vmatpush1.bf16.msra.mxu1 %v19986_v2  ;;  %v14485_v3 = vpop.f32.mrf.mxu0  ;;  %14778 = vmatprep.subr.bf16.mxu0 %v19991_v29  ;;  %v20066_v2 = vld [vmem:[%s20795_s21 + $0x3394] ss:$8 sps:$4 sm:$0xff]   ;;  %v20064_v29 = vld [vmem:[%s20795_s21 + $0x3390] ss:$8 sps:$4 sm:$0xff]   ;;  %v20072_v62 = vld [vmem:[%s20795_s21 + $0x3384] ss:$8 sps:$4 sm:$0xff]   ;;  %v22989_v1 = vrot.slane %v791_v7, %v20860_v50 }
 0x69f   : > { %14819 = vmatprep.subr.bf16.mxu1 %v19994_v41  ;;  %v14526_v55 = vpop.f32.mrf.mxu1  ;;  %v20069_v41 = vld [vmem:[%s20795_s21 + $0x3284] ss:$8 sps:$4 sm:$0xff]   ;;  %v20075_v3 = vld [vmem:[%s20795_s21 + $0x3474] ss:$8 sps:$4 sm:$0xff]   ;;  %v20116_v0 = vld [vmem:[%s20795_s21 + $0x3400] ss:$8 sps:$4 sm:$0xff]  }
 0x6a0   : > { %v807_v55 = vcombine.high %v22989_v1, %v22989_v1  ;;  %v20125_v7 = vld [vmem:[%s20795_s21 + $0x35f0] ss:$8 sps:$4 sm:$0xff]  }
 0x6a1   : > { %14779 = vmatpush1.bf16.msra.mxu0 %v19989_v47  ;;  %v20067_v47 = vld [vmem:[%s20795_s21 + $0x3280] ss:$8 sps:$4 sm:$0xff]  }
 0x6a2   : > { %14820 = vmatpush1.bf16.msra.mxu1 %v19992_v30  ;;  %14780 = vmatprep.subr.bf16.mxu0 %v19997_v22  ;;  %v20070_v30 = vld [vmem:[%s20795_s21 + $0x3380] ss:$8 sps:$4 sm:$0xff]   ;;  %v20079_v22 = vld [vmem:[%s20795_s21 + $0x3574] ss:$8 sps:$4 sm:$0xff]  }
 0x6a3   : > { %14821 = vmatprep.subr.bf16.mxu1 %v20000_v5  ;;  %v806_v5 = vcombine.high %v22986_v49, %v22986_v49 }
 0x6a5   : > { %14781 = vmatpush1.bf16.msra.mxu0 %v19995_v18  ;;  %v1087_v18 = vpack.c.bf16 %v22901_v19, %v22901_v19 }
 0x6a6   : > { %14822 = vmatpush1.bf16.msra.mxu1 %v19998_v6  ;;  %14782 = vmatprep.subr.bf16.mxu0 %v20003_v20  ;;  %v1089_v6 = vpack.c.bf16 %v22904_v35, %v22904_v35  ;;  %v20073_v20 = vld [vmem:[%s20795_s21 + $0x3470] ss:$8 sps:$4 sm:$0xff]  }
 0x6a7   : > { %14823 = vmatprep.subr.bf16.mxu1 %v20006_v25  ;;  %v20077_v25 = vld [vmem:[%s20795_s21 + $0x3570] ss:$8 sps:$4 sm:$0xff]  }
 0x6a9   : > { %14783 = vmatpush1.bf16.msra.mxu0 %v20001_v12  ;;  %v20082_v12 = vld [vmem:[%s20795_s21 + $0x3464] ss:$8 sps:$4 sm:$0xff]  }
 0x6aa   : > { %14824 = vmatpush1.bf16.msra.mxu1 %v20004_v11  ;;  %14784 = vmatprep.subr.bf16.mxu0 %v20009_v9  ;;  %v20085_v11 = vld [vmem:[%s20795_s21 + $0x3564] ss:$8 sps:$4 sm:$0xff]   ;;  %v1092_v9 = vpack.c.bf16 %v806_v5, %v806_v5 }
 0x6ab   : > { %14825 = vmatprep.subr.bf16.mxu1 %v20012_v13  ;;  %v1094_v13 = vpack.c.bf16 %v807_v55, %v807_v55  ;;  %v20142_v5 = vld [vmem:[%s20795_s21 + $0x34c4] ss:$8 sps:$4 sm:$0xff]  }
 0x6ac   : > { %v20145_v55 = vld [vmem:[%s20795_s21 + $0x35c4] ss:$8 sps:$4 sm:$0xff]  }
 0x6ad   : > { %14785 = vmatpush1.bf16.msra.mxu0 %v20007_v26 }
 0x6ae   : > { %14826 = vmatpush1.bf16.msra.mxu1 %v20010_v15  ;;  %14786 = vmatprep.subr.bf16.mxu0 %v20015_v28  ;;  %v20080_v15 = vld [vmem:[%s20795_s21 + $0x3460] ss:$8 sps:$4 sm:$0xff]  }
 0x6af   : > { %14827 = vmatprep.subr.bf16.mxu1 %v20018_v33  ;;  %v20083_v28 = vld [vmem:[%s20795_s21 + $0x3560] ss:$8 sps:$4 sm:$0xff]  }
 0x6b1   : > { %14787 = vmatpush1.bf16.msra.mxu0 %v20013_v23 }
 0x6b2   : > { %14828 = vmatpush1.bf16.msra.mxu1 %v20016_v40  ;;  %14788 = vmatprep.subr.bf16.mxu0 %v20021_v58  ;;  %v20088_v40 = vld [vmem:[%s20795_s21 + $0x3454] ss:$8 sps:$4 sm:$0xff]  }
 0x6b3   : > { %14829 = vmatprep.subr.bf16.mxu1 %v20024_v24  ;;  %v20091_v58 = vld [vmem:[%s20795_s21 + $0x3554] ss:$8 sps:$4 sm:$0xff]  }
 0x6b5   : > { %14789 = vmatpush1.bf16.msra.mxu0 %v20019_v34 }
 0x6b6   : > { %14830 = vmatpush1.bf16.msra.mxu1 %v20022_v27  ;;  %14790 = vmatprep.subr.bf16.mxu0 %v20027_v51 }
 0x6b7   : > { %14831 = vmatprep.subr.bf16.mxu1 %v20030_v8  ;;  %v20086_v8 = vld [vmem:[%s20795_s21 + $0x3450] ss:$8 sps:$4 sm:$0xff]  }
 0x6b9   : > { %14791 = vmatpush2.bf16.msra.mxu0 %v20025_v37  ;;  %v20089_v37 = vld [vmem:[%s20795_s21 + $0x3550] ss:$8 sps:$4 sm:$0xff]  }
 0x6ba   : > { %14832 = vmatpush2.bf16.msra.mxu1 %v20028_v46  ;;  %14792 = vmatprep.subr.bf16.mxu0 %v20033_v31  ;;  %v20097_v31 = vld [vmem:[%s20795_s21 + $0x3544] ss:$8 sps:$4 sm:$0xff]  }
 0x6bb   : > { %14833 = vmatprep.subr.bf16.mxu1 %v20036_v17 }
 0x6bd   : > { %14793 = vmatpush2.bf16.msra.mxu0 %v20031_v48  ;;  %v20092_v48 = vld [vmem:[%s20795_s21 + $0x3440] ss:$8 sps:$4 sm:$0xff]  }
 0x6be   : > { %14834 = vmatpush2.bf16.msra.mxu1 %v20034_v32  ;;  %14794 = vmatprep.subr.bf16.mxu0 %v20039_v14  ;;  %v20095_v32 = vld [vmem:[%s20795_s21 + $0x3540] ss:$8 sps:$4 sm:$0xff]   ;;  %v20100_v14 = vld [vmem:[%s20795_s21 + $0x3434] ss:$8 sps:$4 sm:$0xff]  }
 0x6bf   : > { %14835 = vmatprep.subr.bf16.mxu1 %v20042_v4  ;;  %v20103_v4 = vld [vmem:[%s20795_s21 + $0x3534] ss:$8 sps:$4 sm:$0xff]  }
 0x6c1   : > { %14795 = vmatpush2.bf16.msra.mxu0 %v20037_v38  ;;  %v20098_v38 = vld [vmem:[%s20795_s21 + $0x3430] ss:$8 sps:$4 sm:$0xff]  }
 0x6c2   : > { %14836 = vmatpush2.bf16.msra.mxu1 %v20040_v60  ;;  %14796 = vmatprep.subr.bf16.mxu0 %v20045_v43  ;;  %v20101_v60 = vld [vmem:[%s20795_s21 + $0x3530] ss:$8 sps:$4 sm:$0xff]   ;;  %v20106_v43 = vld [vmem:[%s20795_s21 + $0x3424] ss:$8 sps:$4 sm:$0xff]  }
 0x6c3   : > { %14837 = vmatprep.subr.bf16.mxu1 %v20048_v39  ;;  %v20109_v39 = vld [vmem:[%s20795_s21 + $0x3524] ss:$8 sps:$4 sm:$0xff]  }
 0x6c5   : > { %14797 = vmatpush2.bf16.msra.mxu0 %v20043_v56  ;;  %v20104_v56 = vld [vmem:[%s20795_s21 + $0x3420] ss:$8 sps:$4 sm:$0xff]  }
 0x6c6   : > { %14838 = vmatpush2.bf16.msra.mxu1 %v20046_v45  ;;  %14798 = vmatprep.subr.bf16.mxu0 %v20051_v59  ;;  %v20107_v45 = vld [vmem:[%s20795_s21 + $0x3520] ss:$8 sps:$4 sm:$0xff]   ;;  %v20112_v59 = vld [vmem:[%s20795_s21 + $0x3414] ss:$8 sps:$4 sm:$0xff]  }
 0x6c7   : > { %14839 = vmatprep.subr.bf16.mxu1 %v20054_v63  ;;  %v20115_v63 = vld [vmem:[%s20795_s21 + $0x3514] ss:$8 sps:$4 sm:$0xff]  }
 0x6c9   : > { %14799 = vmatpush2.bf16.msra.mxu0 %v20049_v53  ;;  %v20110_v53 = vld [vmem:[%s20795_s21 + $0x3410] ss:$8 sps:$4 sm:$0xff]  }
 0x6ca   : > { %14840 = vmatpush2.bf16.msra.mxu1 %v20052_v52  ;;  %14800 = vmatprep.subr.bf16.mxu0 %v20057_v16  ;;  %v20113_v52 = vld [vmem:[%s20795_s21 + $0x3510] ss:$8 sps:$4 sm:$0xff]   ;;  %v20118_v16 = vld [vmem:[%s20795_s21 + $0x3404] ss:$8 sps:$4 sm:$0xff]  }
 0x6cb   : > { %14841 = vmatprep.subr.bf16.mxu1 %v20060_v54  ;;  %v20121_v54 = vld [vmem:[%s20795_s21 + $0x3504] ss:$8 sps:$4 sm:$0xff]  }
 0x6cd   : > { %14801 = vmatpush2.bf16.msra.mxu0 %v20055_v36  ;;  %v20119_v36 = vld [vmem:[%s20795_s21 + $0x3500] ss:$8 sps:$4 sm:$0xff]  }
 0x6ce   : > { %14842 = vmatpush2.bf16.msra.mxu1 %v20058_v10  ;;  %14802 = vmatprep.subr.bf16.mxu0 %v20063_v57  ;;  %v20124_v10 = vld [vmem:[%s20795_s21 + $0x34f4] ss:$8 sps:$4 sm:$0xff]  }
 0x6cf   : > { %14843 = vmatprep.subr.bf16.mxu1 %v20066_v2  ;;  %v20127_v57 = vld [vmem:[%s20795_s21 + $0x35f4] ss:$8 sps:$4 sm:$0xff]   ;;  %v20122_v2 = vld [vmem:[%s20795_s21 + $0x34f0] ss:$8 sps:$4 sm:$0xff]  }
 0x6d1   : > { %14803 = vmatpush2.bf16.msra.mxu0 %v20061_v61  ;;  %v20130_v61 = vld [vmem:[%s20795_s21 + $0x34e4] ss:$8 sps:$4 sm:$0xff]  }
 0x6d2   : > { %14844 = vmatpush2.bf16.msra.mxu1 %v20064_v29  ;;  %14804 = vmatprep.subr.bf16.mxu0 %v20069_v41  ;;  %v20133_v29 = vld [vmem:[%s20795_s21 + $0x35e4] ss:$8 sps:$4 sm:$0xff]   ;;  %v20128_v41 = vld [vmem:[%s20795_s21 + $0x34e0] ss:$8 sps:$4 sm:$0xff]  }
 0x6d3   : > { %14845 = vmatprep.subr.bf16.mxu1 %v20072_v62  ;;  %v20131_v62 = vld [vmem:[%s20795_s21 + $0x35e0] ss:$8 sps:$4 sm:$0xff]  }
 0x6d5   : > { %14805 = vmatpush2.bf16.msra.mxu0 %v20067_v47  ;;  %v20136_v47 = vld [vmem:[%s20795_s21 + $0x34d4] ss:$8 sps:$4 sm:$0xff]  }
 0x6d6   : > { %14846 = vmatpush2.bf16.msra.mxu1 %v20070_v30  ;;  %14856 = vmatprep.subr.bf16.mxu0 %v20075_v3  ;;  %v20139_v30 = vld [vmem:[%s20795_s21 + $0x35d4] ss:$8 sps:$4 sm:$0xff]   ;;  %v20134_v3 = vld [vmem:[%s20795_s21 + $0x34d0] ss:$8 sps:$4 sm:$0xff]  }
 0x6d7   : > { %14897 = vmatprep.subr.bf16.mxu1 %v20079_v22  ;;  %v20137_v22 = vld [vmem:[%s20795_s21 + $0x35d0] ss:$8 sps:$4 sm:$0xff]  }
 0x6d8   : > { %v14562_v26 = vpop.f32.mrf.mxu0  ;;  %14807 = vmatmul.mubr.bf16.vlgmr.msra.gmra.mxu0 %v1087_v18  ;;  %v20140_v18 = vld [vmem:[%s20795_s21 + $0x34c0] ss:$8 sps:$4 sm:$0xff]  }
 0x6d9   : > { %v14603_v19 = vpop.f32.mrf.mxu1  ;;  %14848 = vmatmul.mubr.bf16.vlgmr.msra.gmra.mxu1 %v1089_v6  ;;  %v14563_v35 = vadd.f32 %v14562_v26, %v22928_v42  ;;  %14857 = vmatpush1.bf16.msra.mxu0 %v20073_v20  ;;  %v20143_v6 = vld [vmem:[%s20795_s21 + $0x35c0] ss:$8 sps:$4 sm:$0xff]   ;;  %v20148_v20 = vld [vmem:[%s20795_s21 + $0x34b4] ss:$8 sps:$4 sm:$0xff]  }
 0x6da   : > { %14898 = vmatpush1.bf16.msra.mxu1 %v20077_v25  ;;  %v14564_v33 = vpop.f32.mrf.mxu0  ;;  %14858 = vmatprep.subr.bf16.mxu0 %v20082_v12  ;;  %v20151_v25 = vld [vmem:[%s20795_s21 + $0x35b4] ss:$8 sps:$4 sm:$0xff]   ;;  %v20146_v12 = vld [vmem:[%s20795_s21 + $0x34b0] ss:$8 sps:$4 sm:$0xff]  }
 0x6db   : > { %v14605_v23 = vpop.f32.mrf.mxu1  ;;  %14899 = vmatprep.subr.bf16.mxu1 %v20085_v11  ;;  %v14565_v24 = vadd.f32 %v14564_v33, %v22930_v21  ;;  %v23013_v34 = vadd.f32 %v14603_v19, %v14563_v35  ;;  %14888 = vmatprep.mubr.bf16.mxu0 %v1092_v9  ;;  %v20094_v21 = vld [vmem:[%s20795_s21 + $0x3444] ss:$8 sps:$4 sm:$0xff]   ;;  %v20149_v11 = vld [vmem:[%s20795_s21 + $0x35b0] ss:$8 sps:$4 sm:$0xff]   ;;  %v20152_v19 = vld [vmem:[%s20795_s21 + $0x34a0] ss:$8 sps:$4 sm:$0xff]  }
 0x6dc   : > { %14929 = vmatprep.mubr.bf16.mxu1 %v1094_v13  ;;  %v14566_v42 = vpop.f32.mrf.mxu0  ;;  %v20154_v9 = vld [vmem:[%s20795_s21 + $0x34a4] ss:$8 sps:$4 sm:$0xff]   ;;  %v314_v26 = vld [vmem:[%s20809_s7 + $0xd8] sm:$0xff]  ;;  %v20155_v35 = vld [vmem:[%s20795_s21 + $0x35a0] ss:$8 sps:$4 sm:$0xff]  }
 0x6dd   : > { %v14607_v27 = vpop.f32.mrf.mxu1  ;;  %v23015_v51 = vadd.f32 %v14605_v23, %v14565_v24  ;;  %14859 = vmatpush1.bf16.msra.mxu0 %v20080_v15  ;;  %v20157_v13 = vld [vmem:[%s20795_s21 + $0x35a4] ss:$8 sps:$4 sm:$0xff]   ;;  %v20160_v15 = vld [vmem:[%s20795_s21 + $0x3494] ss:$8 sps:$4 sm:$0xff]   ;;  %v808_v33 = vcombine.high %v314_v26, %v314_v26  ;;  %v20158_v23 = vld [vmem:[%s20795_s21 + $0x3490] ss:$8 sps:$4 sm:$0xff]   ;;  %v23071_v42 = vrot.slane %v314_v26, %v20860_v50 }
 0x6de   : > { %14900 = vmatpush1.bf16.msra.mxu1 %v20083_v28  ;;  %v14567_v46 = vpop.f32.mrf.mxu0  ;;  %14860 = vmatprep.subr.bf16.mxu0 %v20088_v40  ;;  %v20163_v28 = vld [vmem:[%s20795_s21 + $0x3594] ss:$8 sps:$4 sm:$0xff]   ;;  %v20161_v40 = vld [vmem:[%s20795_s21 + $0x3590] ss:$8 sps:$4 sm:$0xff]   ;;  %v20169_v24 = vld [vmem:[%s20795_s21 + $0x3584] ss:$8 sps:$4 sm:$0xff]  }
 0x6df   : > { %14901 = vmatprep.subr.bf16.mxu1 %v20091_v58  ;;  %v14608_v17 = vpop.f32.mrf.mxu1  ;;  %v20166_v58 = vld [vmem:[%s20795_s21 + $0x3484] ss:$8 sps:$4 sm:$0xff]   ;;  %v23074_v27 = vrot.slane %v808_v33, %v20860_v50  ;;  %v20172_v46 = vld [vmem:[%s20795_s21 + $0x3674] ss:$8 sps:$4 sm:$0xff]   ;;  %v20213_v26 = vld [vmem:[%s20795_s21 + $0x3600] ss:$8 sps:$4 sm:$0xff]  }
 0x6e0   : > { %v20222_v33 = vld [vmem:[%s20795_s21 + $0x37f0] ss:$8 sps:$4 sm:$0xff]  }
 0x6e1   : > { %14861 = vmatpush1.bf16.msra.mxu0 %v20086_v8  ;;  %v20164_v8 = vld [vmem:[%s20795_s21 + $0x3480] ss:$8 sps:$4 sm:$0xff]   ;;  %v824_v17 = vcombine.high %v23074_v27, %v23074_v27 }
 0x6e2   : > { %14902 = vmatpush1.bf16.msra.mxu1 %v20089_v37  ;;  %14862 = vmatprep.subr.bf16.mxu0 %v20094_v21  ;;  %v20167_v37 = vld [vmem:[%s20795_s21 + $0x3580] ss:$8 sps:$4 sm:$0xff]   ;;  %v20176_v21 = vld [vmem:[%s20795_s21 + $0x3774] ss:$8 sps:$4 sm:$0xff]  }
 0x6e3   : > { %14903 = vmatprep.subr.bf16.mxu1 %v20097_v31  ;;  %v823_v31 = vcombine.high %v23071_v42, %v23071_v42 }
 0x6e5   : > { %14863 = vmatpush1.bf16.msra.mxu0 %v20092_v48  ;;  %v1091_v48 = vpack.c.bf16 %v22986_v49, %v22986_v49 }
 0x6e6   : > { %14904 = vmatpush1.bf16.msra.mxu1 %v20095_v32  ;;  %14864 = vmatprep.subr.bf16.mxu0 %v20100_v14  ;;  %v1093_v32 = vpack.c.bf16 %v22989_v1, %v22989_v1  ;;  %v20170_v14 = vld [vmem:[%s20795_s21 + $0x3670] ss:$8 sps:$4 sm:$0xff]  }
 0x6e7   : > { %14905 = vmatprep.subr.bf16.mxu1 %v20103_v4  ;;  %v20174_v4 = vld [vmem:[%s20795_s21 + $0x3770] ss:$8 sps:$4 sm:$0xff]  }
 0x6e9   : > { %14865 = vmatpush1.bf16.msra.mxu0 %v20098_v38  ;;  %v20179_v38 = vld [vmem:[%s20795_s21 + $0x3664] ss:$8 sps:$4 sm:$0xff]  }
 0x6ea   : > { %14906 = vmatpush1.bf16.msra.mxu1 %v20101_v60  ;;  %14866 = vmatprep.subr.bf16.mxu0 %v20106_v43  ;;  %v20182_v60 = vld [vmem:[%s20795_s21 + $0x3764] ss:$8 sps:$4 sm:$0xff]   ;;  %v1096_v43 = vpack.c.bf16 %v823_v31, %v823_v31 }
 0x6eb   : > { %14907 = vmatprep.subr.bf16.mxu1 %v20109_v39  ;;  %v1098_v39 = vpack.c.bf16 %v824_v17, %v824_v17  ;;  %v20239_v31 = vld [vmem:[%s20795_s21 + $0x36c4] ss:$8 sps:$4 sm:$0xff]  }
 0x6ec   : > { %v20242_v17 = vld [vmem:[%s20795_s21 + $0x37c4] ss:$8 sps:$4 sm:$0xff]  }
 0x6ed   : > { %14867 = vmatpush1.bf16.msra.mxu0 %v20104_v56 }
 0x6ee   : > { %14908 = vmatpush1.bf16.msra.mxu1 %v20107_v45  ;;  %14868 = vmatprep.subr.bf16.mxu0 %v20112_v59  ;;  %v20177_v45 = vld [vmem:[%s20795_s21 + $0x3660] ss:$8 sps:$4 sm:$0xff]  }
 0x6ef   : > { %14909 = vmatprep.subr.bf16.mxu1 %v20115_v63  ;;  %v20180_v59 = vld [vmem:[%s20795_s21 + $0x3760] ss:$8 sps:$4 sm:$0xff]  }
 0x6f1   : > { %14869 = vmatpush1.bf16.msra.mxu0 %v20110_v53 }
 0x6f2   : > { %14910 = vmatpush1.bf16.msra.mxu1 %v20113_v52  ;;  %14870 = vmatprep.subr.bf16.mxu0 %v20118_v16  ;;  %v20185_v52 = vld [vmem:[%s20795_s21 + $0x3654] ss:$8 sps:$4 sm:$0xff]  }
 0x6f3   : > { %14911 = vmatprep.subr.bf16.mxu1 %v20121_v54  ;;  %v20188_v16 = vld [vmem:[%s20795_s21 + $0x3754] ss:$8 sps:$4 sm:$0xff]  }
 0x6f5   : > { %14871 = vmatpush1.bf16.msra.mxu0 %v20116_v0 }
 0x6f6   : > { %14912 = vmatpush1.bf16.msra.mxu1 %v20119_v36  ;;  %14872 = vmatprep.subr.bf16.mxu0 %v20124_v10 }
 0x6f7   : > { %14913 = vmatprep.subr.bf16.mxu1 %v20127_v57  ;;  %v20183_v57 = vld [vmem:[%s20795_s21 + $0x3650] ss:$8 sps:$4 sm:$0xff]  }
 0x6f9   : > { %14873 = vmatpush2.bf16.msra.mxu0 %v20122_v2  ;;  %v20186_v2 = vld [vmem:[%s20795_s21 + $0x3750] ss:$8 sps:$4 sm:$0xff]  }
 0x6fa   : > { %14914 = vmatpush2.bf16.msra.mxu1 %v20125_v7  ;;  %14874 = vmatprep.subr.bf16.mxu0 %v20130_v61  ;;  %v20194_v61 = vld [vmem:[%s20795_s21 + $0x3744] ss:$8 sps:$4 sm:$0xff]  }
 0x6fb   : > { %14915 = vmatprep.subr.bf16.mxu1 %v20133_v29 }
 0x6fd   : > { %14875 = vmatpush2.bf16.msra.mxu0 %v20128_v41  ;;  %v20189_v41 = vld [vmem:[%s20795_s21 + $0x3640] ss:$8 sps:$4 sm:$0xff]  }
 0x6fe   : > { %14916 = vmatpush2.bf16.msra.mxu1 %v20131_v62  ;;  %14876 = vmatprep.subr.bf16.mxu0 %v20136_v47  ;;  %v20192_v62 = vld [vmem:[%s20795_s21 + $0x3740] ss:$8 sps:$4 sm:$0xff]   ;;  %v20197_v47 = vld [vmem:[%s20795_s21 + $0x3634] ss:$8 sps:$4 sm:$0xff]  }
 0x6ff   : > { %14917 = vmatprep.subr.bf16.mxu1 %v20139_v30  ;;  %v20200_v30 = vld [vmem:[%s20795_s21 + $0x3734] ss:$8 sps:$4 sm:$0xff]  }
 0x701   : > { %14877 = vmatpush2.bf16.msra.mxu0 %v20134_v3  ;;  %v20195_v3 = vld [vmem:[%s20795_s21 + $0x3630] ss:$8 sps:$4 sm:$0xff]  }
 0x702   : > { %14918 = vmatpush2.bf16.msra.mxu1 %v20137_v22  ;;  %14878 = vmatprep.subr.bf16.mxu0 %v20142_v5  ;;  %v20198_v22 = vld [vmem:[%s20795_s21 + $0x3730] ss:$8 sps:$4 sm:$0xff]   ;;  %v20203_v5 = vld [vmem:[%s20795_s21 + $0x3624] ss:$8 sps:$4 sm:$0xff]  }
 0x703   : > { %14919 = vmatprep.subr.bf16.mxu1 %v20145_v55  ;;  %v20206_v55 = vld [vmem:[%s20795_s21 + $0x3724] ss:$8 sps:$4 sm:$0xff]  }
 0x705   : > { %14879 = vmatpush2.bf16.msra.mxu0 %v20140_v18  ;;  %v20201_v18 = vld [vmem:[%s20795_s21 + $0x3620] ss:$8 sps:$4 sm:$0xff]  }
 0x706   : > { %14920 = vmatpush2.bf16.msra.mxu1 %v20143_v6  ;;  %14880 = vmatprep.subr.bf16.mxu0 %v20148_v20  ;;  %v20204_v6 = vld [vmem:[%s20795_s21 + $0x3720] ss:$8 sps:$4 sm:$0xff]   ;;  %v20209_v20 = vld [vmem:[%s20795_s21 + $0x3614] ss:$8 sps:$4 sm:$0xff]  }
 0x707   : > { %14921 = vmatprep.subr.bf16.mxu1 %v20151_v25  ;;  %v20212_v25 = vld [vmem:[%s20795_s21 + $0x3714] ss:$8 sps:$4 sm:$0xff]  }
 0x709   : > { %14881 = vmatpush2.bf16.msra.mxu0 %v20146_v12  ;;  %v20207_v12 = vld [vmem:[%s20795_s21 + $0x3610] ss:$8 sps:$4 sm:$0xff]  }
 0x70a   : > { %14922 = vmatpush2.bf16.msra.mxu1 %v20149_v11  ;;  %14882 = vmatprep.subr.bf16.mxu0 %v20154_v9  ;;  %v20210_v11 = vld [vmem:[%s20795_s21 + $0x3710] ss:$8 sps:$4 sm:$0xff]   ;;  %v20215_v9 = vld [vmem:[%s20795_s21 + $0x3604] ss:$8 sps:$4 sm:$0xff]  }
 0x70b   : > { %14923 = vmatprep.subr.bf16.mxu1 %v20157_v13  ;;  %v20218_v13 = vld [vmem:[%s20795_s21 + $0x3704] ss:$8 sps:$4 sm:$0xff]  }
 0x70d   : > { %14883 = vmatpush2.bf16.msra.mxu0 %v20152_v19  ;;  %v20216_v19 = vld [vmem:[%s20795_s21 + $0x3700] ss:$8 sps:$4 sm:$0xff]  }
 0x70e   : > { %14924 = vmatpush2.bf16.msra.mxu1 %v20155_v35  ;;  %14884 = vmatprep.subr.bf16.mxu0 %v20160_v15  ;;  %v20221_v35 = vld [vmem:[%s20795_s21 + $0x36f4] ss:$8 sps:$4 sm:$0xff]  }
 0x70f   : > { %14925 = vmatprep.subr.bf16.mxu1 %v20163_v28  ;;  %v20224_v15 = vld [vmem:[%s20795_s21 + $0x37f4] ss:$8 sps:$4 sm:$0xff]   ;;  %v20219_v28 = vld [vmem:[%s20795_s21 + $0x36f0] ss:$8 sps:$4 sm:$0xff]  }
 0x711   : > { %14885 = vmatpush2.bf16.msra.mxu0 %v20158_v23  ;;  %v20227_v23 = vld [vmem:[%s20795_s21 + $0x36e4] ss:$8 sps:$4 sm:$0xff]  }
 0x712   : > { %14926 = vmatpush2.bf16.msra.mxu1 %v20161_v40  ;;  %14886 = vmatprep.subr.bf16.mxu0 %v20166_v58  ;;  %v20230_v40 = vld [vmem:[%s20795_s21 + $0x37e4] ss:$8 sps:$4 sm:$0xff]   ;;  %v20225_v58 = vld [vmem:[%s20795_s21 + $0x36e0] ss:$8 sps:$4 sm:$0xff]  }
 0x713   : > { %14927 = vmatprep.subr.bf16.mxu1 %v20169_v24  ;;  %v20228_v24 = vld [vmem:[%s20795_s21 + $0x37e0] ss:$8 sps:$4 sm:$0xff]  }
 0x715   : > { %14887 = vmatpush2.bf16.msra.mxu0 %v20164_v8  ;;  %v20233_v8 = vld [vmem:[%s20795_s21 + $0x36d4] ss:$8 sps:$4 sm:$0xff]  }
 0x716   : > { %14928 = vmatpush2.bf16.msra.mxu1 %v20167_v37  ;;  %14938 = vmatprep.subr.bf16.mxu0 %v20172_v46  ;;  %v20236_v37 = vld [vmem:[%s20795_s21 + $0x37d4] ss:$8 sps:$4 sm:$0xff]   ;;  %v20231_v46 = vld [vmem:[%s20795_s21 + $0x36d0] ss:$8 sps:$4 sm:$0xff]  }
 0x717   : > { %14979 = vmatprep.subr.bf16.mxu1 %v20176_v21  ;;  %v20234_v21 = vld [vmem:[%s20795_s21 + $0x37d0] ss:$8 sps:$4 sm:$0xff]  }
 0x718   : > { %v14644_v56 = vpop.f32.mrf.mxu0  ;;  %14889 = vmatmul.mubr.bf16.vlgmr.msra.gmra.mxu0 %v1091_v48  ;;  %v20237_v48 = vld [vmem:[%s20795_s21 + $0x36c0] ss:$8 sps:$4 sm:$0xff]  }
 0x719   : > { %v14685_v49 = vpop.f32.mrf.mxu1  ;;  %14930 = vmatmul.mubr.bf16.vlgmr.msra.gmra.mxu1 %v1093_v32  ;;  %v14645_v1 = vadd.f32 %v14644_v56, %v23013_v34  ;;  %14939 = vmatpush1.bf16.msra.mxu0 %v20170_v14  ;;  %v20240_v32 = vld [vmem:[%s20795_s21 + $0x37c0] ss:$8 sps:$4 sm:$0xff]   ;;  %v20245_v14 = vld [vmem:[%s20795_s21 + $0x36b4] ss:$8 sps:$4 sm:$0xff]  }
 0x71a   : > { %14980 = vmatpush1.bf16.msra.mxu1 %v20174_v4  ;;  %v14646_v63 = vpop.f32.mrf.mxu0  ;;  %14940 = vmatprep.subr.bf16.mxu0 %v20179_v38  ;;  %v20248_v4 = vld [vmem:[%s20795_s21 + $0x37b4] ss:$8 sps:$4 sm:$0xff]   ;;  %v20243_v38 = vld [vmem:[%s20795_s21 + $0x36b0] ss:$8 sps:$4 sm:$0xff]  }
 0x71b   : > { %v14687_v53 = vpop.f32.mrf.mxu1  ;;  %14981 = vmatprep.subr.bf16.mxu1 %v20182_v60  ;;  %v14647_v54 = vadd.f32 %v14646_v63, %v23015_v51  ;;  %v23098_v0 = vadd.f32 %v14685_v49, %v14645_v1  ;;  %14970 = vmatprep.mubr.bf16.mxu0 %v1096_v43  ;;  %v20191_v51 = vld [vmem:[%s20795_s21 + $0x3644] ss:$8 sps:$4 sm:$0xff]   ;;  %v20246_v60 = vld [vmem:[%s20795_s21 + $0x37b0] ss:$8 sps:$4 sm:$0xff]   ;;  %v315_v56 = vld [vmem:[%s20809_s7 + $0xe0] sm:$0xff] }
 0x71c   : > { %15011 = vmatprep.mubr.bf16.mxu1 %v1098_v39  ;;  %v14648_v34 = vpop.f32.mrf.mxu0  ;;  %v20251_v43 = vld [vmem:[%s20795_s21 + $0x36a4] ss:$8 sps:$4 sm:$0xff]   ;;  %v20249_v49 = vld [vmem:[%s20795_s21 + $0x36a0] ss:$8 sps:$4 sm:$0xff]   ;;  %v825_v63 = vcombine.high %v315_v56, %v315_v56 }
 0x71d   : > { %v14689_v36 = vpop.f32.mrf.mxu1  ;;  %v23100_v10 = vadd.f32 %v14687_v53, %v14647_v54  ;;  %14941 = vmatpush1.bf16.msra.mxu0 %v20177_v45  ;;  %v20254_v39 = vld [vmem:[%s20795_s21 + $0x37a4] ss:$8 sps:$4 sm:$0xff]   ;;  %v20252_v1 = vld [vmem:[%s20795_s21 + $0x37a0] ss:$8 sps:$4 sm:$0xff]   ;;  %v20257_v45 = vld [vmem:[%s20795_s21 + $0x3694] ss:$8 sps:$4 sm:$0xff]   ;;  %v23156_v34 = vrot.slane %v315_v56, %v20860_v50 }
 0x71e   : > { %14982 = vmatpush1.bf16.msra.mxu1 %v20180_v59  ;;  %v14649_v7 = vpop.f32.mrf.mxu0  ;;  %14942 = vmatprep.subr.bf16.mxu0 %v20185_v52  ;;  %v20260_v59 = vld [vmem:[%s20795_s21 + $0x3794] ss:$8 sps:$4 sm:$0xff]   ;;  %v20255_v53 = vld [vmem:[%s20795_s21 + $0x3690] ss:$8 sps:$4 sm:$0xff]   ;;  %v20266_v54 = vld [vmem:[%s20795_s21 + $0x3784] ss:$8 sps:$4 sm:$0xff]   ;;  %v23159_v36 = vrot.slane %v825_v63, %v20860_v50 }
 0x71f   : > { %14983 = vmatprep.subr.bf16.mxu1 %v20188_v16  ;;  %v14690_v29 = vpop.f32.mrf.mxu1  ;;  %v20258_v52 = vld [vmem:[%s20795_s21 + $0x3790] ss:$8 sps:$4 sm:$0xff]   ;;  %v20263_v16 = vld [vmem:[%s20795_s21 + $0x3684] ss:$8 sps:$4 sm:$0xff]   ;;  %v20269_v7 = vld [vmem:[%s20795_s21 + $0x3874] ss:$8 sps:$4 sm:$0xff]  }
 0x720   : > { %v841_v29 = vcombine.high %v23159_v36, %v23159_v36  ;;  %v20310_v56 = vld [vmem:[%s20795_s21 + $0x3800] ss:$8 sps:$4 sm:$0xff]   ;;  %v20319_v63 = vld [vmem:[%s20795_s21 + $0x39f0] ss:$8 sps:$4 sm:$0xff]  }
 0x721   : > { %14943 = vmatpush1.bf16.msra.mxu0 %v20183_v57  ;;  %v20261_v57 = vld [vmem:[%s20795_s21 + $0x3680] ss:$8 sps:$4 sm:$0xff]  }
 0x722   : > { %14984 = vmatpush1.bf16.msra.mxu1 %v20186_v2  ;;  %14944 = vmatprep.subr.bf16.mxu0 %v20191_v51  ;;  %v20264_v2 = vld [vmem:[%s20795_s21 + $0x3780] ss:$8 sps:$4 sm:$0xff]   ;;  %v20273_v51 = vld [vmem:[%s20795_s21 + $0x3974] ss:$8 sps:$4 sm:$0xff]  }
 0x723   : > { %14985 = vmatprep.subr.bf16.mxu1 %v20194_v61  ;;  %v840_v61 = vcombine.high %v23156_v34, %v23156_v34 }
 0x725   : > { %14945 = vmatpush1.bf16.msra.mxu0 %v20189_v41  ;;  %v1095_v41 = vpack.c.bf16 %v23071_v42, %v23071_v42 }
 0x726   : > { %14986 = vmatpush1.bf16.msra.mxu1 %v20192_v62  ;;  %14946 = vmatprep.subr.bf16.mxu0 %v20197_v47  ;;  %v1097_v62 = vpack.c.bf16 %v23074_v27, %v23074_v27  ;;  %v20267_v47 = vld [vmem:[%s20795_s21 + $0x3870] ss:$8 sps:$4 sm:$0xff]  }
 0x727   : > { %14987 = vmatprep.subr.bf16.mxu1 %v20200_v30  ;;  %v20271_v30 = vld [vmem:[%s20795_s21 + $0x3970] ss:$8 sps:$4 sm:$0xff]  }
 0x729   : > { %14947 = vmatpush1.bf16.msra.mxu0 %v20195_v3  ;;  %v20276_v3 = vld [vmem:[%s20795_s21 + $0x3864] ss:$8 sps:$4 sm:$0xff]  }
 0x72a   : > { %14988 = vmatpush1.bf16.msra.mxu1 %v20198_v22  ;;  %14948 = vmatprep.subr.bf16.mxu0 %v20203_v5  ;;  %v20279_v22 = vld [vmem:[%s20795_s21 + $0x3964] ss:$8 sps:$4 sm:$0xff]   ;;  %v1100_v5 = vpack.c.bf16 %v840_v61, %v840_v61 }
 0x72b   : > { %14989 = vmatprep.subr.bf16.mxu1 %v20206_v55  ;;  %v1102_v55 = vpack.c.bf16 %v841_v29, %v841_v29  ;;  %v20336_v61 = vld [vmem:[%s20795_s21 + $0x38c4] ss:$8 sps:$4 sm:$0xff]  }
 0x72c   : > { %v20339_v29 = vld [vmem:[%s20795_s21 + $0x39c4] ss:$8 sps:$4 sm:$0xff]  }
 0x72d   : > { %14949 = vmatpush1.bf16.msra.mxu0 %v20201_v18 }
 0x72e   : > { %14990 = vmatpush1.bf16.msra.mxu1 %v20204_v6  ;;  %14950 = vmatprep.subr.bf16.mxu0 %v20209_v20  ;;  %v20274_v6 = vld [vmem:[%s20795_s21 + $0x3860] ss:$8 sps:$4 sm:$0xff]  }
 0x72f   : > { %14991 = vmatprep.subr.bf16.mxu1 %v20212_v25  ;;  %v20277_v20 = vld [vmem:[%s20795_s21 + $0x3960] ss:$8 sps:$4 sm:$0xff]  }
 0x731   : > { %14951 = vmatpush1.bf16.msra.mxu0 %v20207_v12 }
 0x732   : > { %14992 = vmatpush1.bf16.msra.mxu1 %v20210_v11  ;;  %14952 = vmatprep.subr.bf16.mxu0 %v20215_v9  ;;  %v20282_v11 = vld [vmem:[%s20795_s21 + $0x3854] ss:$8 sps:$4 sm:$0xff]  }
 0x733   : > { %14993 = vmatprep.subr.bf16.mxu1 %v20218_v13  ;;  %v20285_v9 = vld [vmem:[%s20795_s21 + $0x3954] ss:$8 sps:$4 sm:$0xff]  }
 0x735   : > { %14953 = vmatpush1.bf16.msra.mxu0 %v20213_v26 }
 0x736   : > { %14994 = vmatpush1.bf16.msra.mxu1 %v20216_v19  ;;  %14954 = vmatprep.subr.bf16.mxu0 %v20221_v35 }
 0x737   : > { %14995 = vmatprep.subr.bf16.mxu1 %v20224_v15  ;;  %v20280_v15 = vld [vmem:[%s20795_s21 + $0x3850] ss:$8 sps:$4 sm:$0xff]  }
 0x739   : > { %14955 = vmatpush2.bf16.msra.mxu0 %v20219_v28  ;;  %v20283_v28 = vld [vmem:[%s20795_s21 + $0x3950] ss:$8 sps:$4 sm:$0xff]  }
 0x73a   : > { %14996 = vmatpush2.bf16.msra.mxu1 %v20222_v33  ;;  %14956 = vmatprep.subr.bf16.mxu0 %v20227_v23  ;;  %v20291_v23 = vld [vmem:[%s20795_s21 + $0x3944] ss:$8 sps:$4 sm:$0xff]  }
 0x73b   : > { %14997 = vmatprep.subr.bf16.mxu1 %v20230_v40 }
 0x73d   : > { %14957 = vmatpush2.bf16.msra.mxu0 %v20225_v58  ;;  %v20286_v58 = vld [vmem:[%s20795_s21 + $0x3840] ss:$8 sps:$4 sm:$0xff]  }
 0x73e   : > { %14998 = vmatpush2.bf16.msra.mxu1 %v20228_v24  ;;  %14958 = vmatprep.subr.bf16.mxu0 %v20233_v8  ;;  %v20289_v24 = vld [vmem:[%s20795_s21 + $0x3940] ss:$8 sps:$4 sm:$0xff]   ;;  %v20294_v8 = vld [vmem:[%s20795_s21 + $0x3834] ss:$8 sps:$4 sm:$0xff]  }
 0x73f   : > { %14999 = vmatprep.subr.bf16.mxu1 %v20236_v37  ;;  %v20297_v37 = vld [vmem:[%s20795_s21 + $0x3934] ss:$8 sps:$4 sm:$0xff]  }
 0x741   : > { %14959 = vmatpush2.bf16.msra.mxu0 %v20231_v46  ;;  %v20292_v46 = vld [vmem:[%s20795_s21 + $0x3830] ss:$8 sps:$4 sm:$0xff]  }
 0x742   : > { %15000 = vmatpush2.bf16.msra.mxu1 %v20234_v21  ;;  %14960 = vmatprep.subr.bf16.mxu0 %v20239_v31  ;;  %v20295_v21 = vld [vmem:[%s20795_s21 + $0x3930] ss:$8 sps:$4 sm:$0xff]   ;;  %v20300_v31 = vld [vmem:[%s20795_s21 + $0x3824] ss:$8 sps:$4 sm:$0xff]  }
 0x743   : > { %15001 = vmatprep.subr.bf16.mxu1 %v20242_v17  ;;  %v20303_v17 = vld [vmem:[%s20795_s21 + $0x3924] ss:$8 sps:$4 sm:$0xff]  }
 0x745   : > { %14961 = vmatpush2.bf16.msra.mxu0 %v20237_v48  ;;  %v20298_v48 = vld [vmem:[%s20795_s21 + $0x3820] ss:$8 sps:$4 sm:$0xff]  }
 0x746   : > { %15002 = vmatpush2.bf16.msra.mxu1 %v20240_v32  ;;  %14962 = vmatprep.subr.bf16.mxu0 %v20245_v14  ;;  %v20301_v32 = vld [vmem:[%s20795_s21 + $0x3920] ss:$8 sps:$4 sm:$0xff]   ;;  %v20306_v14 = vld [vmem:[%s20795_s21 + $0x3814] ss:$8 sps:$4 sm:$0xff]  }
 0x747   : > { %15003 = vmatprep.subr.bf16.mxu1 %v20248_v4  ;;  %v20309_v4 = vld [vmem:[%s20795_s21 + $0x3914] ss:$8 sps:$4 sm:$0xff]  }
 0x749   : > { %14963 = vmatpush2.bf16.msra.mxu0 %v20243_v38  ;;  %v20304_v38 = vld [vmem:[%s20795_s21 + $0x3810] ss:$8 sps:$4 sm:$0xff]  }
 0x74a   : > { %15004 = vmatpush2.bf16.msra.mxu1 %v20246_v60  ;;  %14964 = vmatprep.subr.bf16.mxu0 %v20251_v43  ;;  %v20307_v60 = vld [vmem:[%s20795_s21 + $0x3910] ss:$8 sps:$4 sm:$0xff]   ;;  %v20312_v43 = vld [vmem:[%s20795_s21 + $0x3804] ss:$8 sps:$4 sm:$0xff]  }
 0x74b   : > { %15005 = vmatprep.subr.bf16.mxu1 %v20254_v39  ;;  %v20315_v39 = vld [vmem:[%s20795_s21 + $0x3904] ss:$8 sps:$4 sm:$0xff]  }
 0x74d   : > { %14965 = vmatpush2.bf16.msra.mxu0 %v20249_v49  ;;  %v20313_v49 = vld [vmem:[%s20795_s21 + $0x3900] ss:$8 sps:$4 sm:$0xff]  }
 0x74e   : > { %15006 = vmatpush2.bf16.msra.mxu1 %v20252_v1  ;;  %14966 = vmatprep.subr.bf16.mxu0 %v20257_v45  ;;  %v20318_v1 = vld [vmem:[%s20795_s21 + $0x38f4] ss:$8 sps:$4 sm:$0xff]  }
 0x74f   : > { %15007 = vmatprep.subr.bf16.mxu1 %v20260_v59  ;;  %v20321_v45 = vld [vmem:[%s20795_s21 + $0x39f4] ss:$8 sps:$4 sm:$0xff]   ;;  %v20316_v59 = vld [vmem:[%s20795_s21 + $0x38f0] ss:$8 sps:$4 sm:$0xff]  }
 0x751   : > { %14967 = vmatpush2.bf16.msra.mxu0 %v20255_v53  ;;  %v20324_v53 = vld [vmem:[%s20795_s21 + $0x38e4] ss:$8 sps:$4 sm:$0xff]  }
 0x752   : > { %15008 = vmatpush2.bf16.msra.mxu1 %v20258_v52  ;;  %14968 = vmatprep.subr.bf16.mxu0 %v20263_v16  ;;  %v20327_v52 = vld [vmem:[%s20795_s21 + $0x39e4] ss:$8 sps:$4 sm:$0xff]   ;;  %v20322_v16 = vld [vmem:[%s20795_s21 + $0x38e0] ss:$8 sps:$4 sm:$0xff]  }
 0x753   : > { %15009 = vmatprep.subr.bf16.mxu1 %v20266_v54  ;;  %v20325_v54 = vld [vmem:[%s20795_s21 + $0x39e0] ss:$8 sps:$4 sm:$0xff]  }
 0x755   : > { %14969 = vmatpush2.bf16.msra.mxu0 %v20261_v57  ;;  %v20330_v57 = vld [vmem:[%s20795_s21 + $0x38d4] ss:$8 sps:$4 sm:$0xff]  }
 0x756   : > { %15010 = vmatpush2.bf16.msra.mxu1 %v20264_v2  ;;  %15020 = vmatprep.subr.bf16.mxu0 %v20269_v7  ;;  %v20333_v2 = vld [vmem:[%s20795_s21 + $0x39d4] ss:$8 sps:$4 sm:$0xff]   ;;  %v20328_v7 = vld [vmem:[%s20795_s21 + $0x38d0] ss:$8 sps:$4 sm:$0xff]  }
 0x757   : > { %15061 = vmatprep.subr.bf16.mxu1 %v20273_v51  ;;  %v20331_v51 = vld [vmem:[%s20795_s21 + $0x39d0] ss:$8 sps:$4 sm:$0xff]  }
 0x758   : > { %v14726_v18 = vpop.f32.mrf.mxu0  ;;  %14971 = vmatmul.mubr.bf16.vlgmr.msra.gmra.mxu0 %v1095_v41  ;;  %v20334_v41 = vld [vmem:[%s20795_s21 + $0x38c0] ss:$8 sps:$4 sm:$0xff]  }
 0x759   : > { %v14767_v42 = vpop.f32.mrf.mxu1  ;;  %15012 = vmatmul.mubr.bf16.vlgmr.msra.gmra.mxu1 %v1097_v62  ;;  %v14727_v27 = vadd.f32 %v14726_v18, %v23098_v0  ;;  %15021 = vmatpush1.bf16.msra.mxu0 %v20267_v47  ;;  %v20337_v62 = vld [vmem:[%s20795_s21 + $0x39c0] ss:$8 sps:$4 sm:$0xff]   ;;  %v20342_v47 = vld [vmem:[%s20795_s21 + $0x38b4] ss:$8 sps:$4 sm:$0xff]  }
 0x75a   : > { %15062 = vmatpush1.bf16.msra.mxu1 %v20271_v30  ;;  %v14728_v25 = vpop.f32.mrf.mxu0  ;;  %15022 = vmatprep.subr.bf16.mxu0 %v20276_v3  ;;  %v20345_v30 = vld [vmem:[%s20795_s21 + $0x39b4] ss:$8 sps:$4 sm:$0xff]   ;;  %v20340_v3 = vld [vmem:[%s20795_s21 + $0x38b0] ss:$8 sps:$4 sm:$0xff]   ;;  %v316_v18 = vld [vmem:[%s20809_s7 + $0xe8] sm:$0xff] }
 0x75b   : > { %v14769_v12 = vpop.f32.mrf.mxu1  ;;  %15063 = vmatprep.subr.bf16.mxu1 %v20279_v22  ;;  %v14729_v13 = vadd.f32 %v14728_v25, %v23100_v10  ;;  %v23183_v26 = vadd.f32 %v14767_v42, %v14727_v27  ;;  %15052 = vmatprep.mubr.bf16.mxu0 %v1100_v5  ;;  %v20288_v10 = vld [vmem:[%s20795_s21 + $0x3844] ss:$8 sps:$4 sm:$0xff]   ;;  %v20343_v22 = vld [vmem:[%s20795_s21 + $0x39b0] ss:$8 sps:$4 sm:$0xff]   ;;  %v20346_v42 = vld [vmem:[%s20795_s21 + $0x38a0] ss:$8 sps:$4 sm:$0xff]   ;;  %v842_v25 = vcombine.high %v316_v18, %v316_v18 }
 0x75c   : > { %15093 = vmatprep.mubr.bf16.mxu1 %v1102_v55  ;;  %v14730_v0 = vpop.f32.mrf.mxu0  ;;  %v20348_v5 = vld [vmem:[%s20795_s21 + $0x38a4] ss:$8 sps:$4 sm:$0xff]   ;;  %v20349_v27 = vld [vmem:[%s20795_s21 + $0x39a0] ss:$8 sps:$4 sm:$0xff]  }
 0x75d   : > { %v14771_v19 = vpop.f32.mrf.mxu1  ;;  %v23185_v35 = vadd.f32 %v14769_v12, %v14729_v13  ;;  %15023 = vmatpush1.bf16.msra.mxu0 %v20274_v6  ;;  %v20351_v55 = vld [vmem:[%s20795_s21 + $0x39a4] ss:$8 sps:$4 sm:$0xff]   ;;  %v20354_v6 = vld [vmem:[%s20795_s21 + $0x3894] ss:$8 sps:$4 sm:$0xff]   ;;  %v20352_v12 = vld [vmem:[%s20795_s21 + $0x3890] ss:$8 sps:$4 sm:$0xff]   ;;  %v23241_v0 = vrot.slane %v316_v18, %v20860_v50 }
 0x75e   : > { %15064 = vmatpush1.bf16.msra.mxu1 %v20277_v20  ;;  %v14731_v33 = vpop.f32.mrf.mxu0  ;;  %15024 = vmatprep.subr.bf16.mxu0 %v20282_v11  ;;  %v20357_v20 = vld [vmem:[%s20795_s21 + $0x3994] ss:$8 sps:$4 sm:$0xff]   ;;  %v20355_v11 = vld [vmem:[%s20795_s21 + $0x3990] ss:$8 sps:$4 sm:$0xff]   ;;  %v20363_v13 = vld [vmem:[%s20795_s21 + $0x3984] ss:$8 sps:$4 sm:$0xff]   ;;  %v23244_v19 = vrot.slane %v842_v25, %v20860_v50 }
 0x75f   : > { %15065 = vmatprep.subr.bf16.mxu1 %v20285_v9  ;;  %v14772_v40 = vpop.f32.mrf.mxu1  ;;  %v20360_v9 = vld [vmem:[%s20795_s21 + $0x3884] ss:$8 sps:$4 sm:$0xff]   ;;  %v20366_v33 = vld [vmem:[%s20795_s21 + $0x3a74] ss:$8 sps:$4 sm:$0xff]   ;;  %v20407_v18 = vld [vmem:[%s20795_s21 + $0x3a00] ss:$8 sps:$4 sm:$0xff]  }
 0x760   : > { %v858_v40 = vcombine.high %v23244_v19, %v23244_v19  ;;  %v20416_v25 = vld [vmem:[%s20795_s21 + $0x3bf0] ss:$8 sps:$4 sm:$0xff]  }
 0x761   : > { %15025 = vmatpush1.bf16.msra.mxu0 %v20280_v15  ;;  %v20358_v15 = vld [vmem:[%s20795_s21 + $0x3880] ss:$8 sps:$4 sm:$0xff]  }
 0x762   : > { %15066 = vmatpush1.bf16.msra.mxu1 %v20283_v28  ;;  %15026 = vmatprep.subr.bf16.mxu0 %v20288_v10  ;;  %v20361_v28 = vld [vmem:[%s20795_s21 + $0x3980] ss:$8 sps:$4 sm:$0xff]   ;;  %v20370_v10 = vld [vmem:[%s20795_s21 + $0x3b74] ss:$8 sps:$4 sm:$0xff]  }
 0x763   : > { %15067 = vmatprep.subr.bf16.mxu1 %v20291_v23  ;;  %v857_v23 = vcombine.high %v23241_v0, %v23241_v0 }
 0x765   : > { %15027 = vmatpush1.bf16.msra.mxu0 %v20286_v58  ;;  %v1099_v58 = vpack.c.bf16 %v23156_v34, %v23156_v34 }
 0x766   : > { %15068 = vmatpush1.bf16.msra.mxu1 %v20289_v24  ;;  %15028 = vmatprep.subr.bf16.mxu0 %v20294_v8  ;;  %v1101_v24 = vpack.c.bf16 %v23159_v36, %v23159_v36  ;;  %v20364_v8 = vld [vmem:[%s20795_s21 + $0x3a70] ss:$8 sps:$4 sm:$0xff]  }
 0x767   : > { %15069 = vmatprep.subr.bf16.mxu1 %v20297_v37  ;;  %v20368_v37 = vld [vmem:[%s20795_s21 + $0x3b70] ss:$8 sps:$4 sm:$0xff]  }
 0x769   : > { %15029 = vmatpush1.bf16.msra.mxu0 %v20292_v46  ;;  %v20373_v46 = vld [vmem:[%s20795_s21 + $0x3a64] ss:$8 sps:$4 sm:$0xff]  }
 0x76a   : > { %15070 = vmatpush1.bf16.msra.mxu1 %v20295_v21  ;;  %15030 = vmatprep.subr.bf16.mxu0 %v20300_v31  ;;  %v20376_v21 = vld [vmem:[%s20795_s21 + $0x3b64] ss:$8 sps:$4 sm:$0xff]   ;;  %v1104_v31 = vpack.c.bf16 %v857_v23, %v857_v23 }
 0x76b   : > { %15071 = vmatprep.subr.bf16.mxu1 %v20303_v17  ;;  %v1106_v17 = vpack.c.bf16 %v858_v40, %v858_v40  ;;  %v20433_v23 = vld [vmem:[%s20795_s21 + $0x3ac4] ss:$8 sps:$4 sm:$0xff]  }
 0x76c   : > { %v20436_v40 = vld [vmem:[%s20795_s21 + $0x3bc4] ss:$8 sps:$4 sm:$0xff]  }
 0x76d   : > { %15031 = vmatpush1.bf16.msra.mxu0 %v20298_v48 }
 0x76e   : > { %15072 = vmatpush1.bf16.msra.mxu1 %v20301_v32  ;;  %15032 = vmatprep.subr.bf16.mxu0 %v20306_v14  ;;  %v20371_v32 = vld [vmem:[%s20795_s21 + $0x3a60] ss:$8 sps:$4 sm:$0xff]  }
 0x76f   : > { %15073 = vmatprep.subr.bf16.mxu1 %v20309_v4  ;;  %v20374_v14 = vld [vmem:[%s20795_s21 + $0x3b60] ss:$8 sps:$4 sm:$0xff]  }
 0x771   : > { %15033 = vmatpush1.bf16.msra.mxu0 %v20304_v38 }
 0x772   : > { %15074 = vmatpush1.bf16.msra.mxu1 %v20307_v60  ;;  %15034 = vmatprep.subr.bf16.mxu0 %v20312_v43  ;;  %v20379_v60 = vld [vmem:[%s20795_s21 + $0x3a54] ss:$8 sps:$4 sm:$0xff]  }
 0x773   : > { %15075 = vmatprep.subr.bf16.mxu1 %v20315_v39  ;;  %v20382_v43 = vld [vmem:[%s20795_s21 + $0x3b54] ss:$8 sps:$4 sm:$0xff]  }
 0x775   : > { %15035 = vmatpush1.bf16.msra.mxu0 %v20310_v56 }
 0x776   : > { %15076 = vmatpush1.bf16.msra.mxu1 %v20313_v49  ;;  %15036 = vmatprep.subr.bf16.mxu0 %v20318_v1 }
 0x777   : > { %15077 = vmatprep.subr.bf16.mxu1 %v20321_v45  ;;  %v20377_v45 = vld [vmem:[%s20795_s21 + $0x3a50] ss:$8 sps:$4 sm:$0xff]  }
 0x779   : > { %15037 = vmatpush2.bf16.msra.mxu0 %v20316_v59  ;;  %v20380_v59 = vld [vmem:[%s20795_s21 + $0x3b50] ss:$8 sps:$4 sm:$0xff]  }
 0x77a   : > { %15078 = vmatpush2.bf16.msra.mxu1 %v20319_v63  ;;  %15038 = vmatprep.subr.bf16.mxu0 %v20324_v53  ;;  %v20388_v53 = vld [vmem:[%s20795_s21 + $0x3b44] ss:$8 sps:$4 sm:$0xff]  }
 0x77b   : > { %15079 = vmatprep.subr.bf16.mxu1 %v20327_v52 }
 0x77d   : > { %15039 = vmatpush2.bf16.msra.mxu0 %v20322_v16  ;;  %v20383_v16 = vld [vmem:[%s20795_s21 + $0x3a40] ss:$8 sps:$4 sm:$0xff]  }
 0x77e   : > { %15080 = vmatpush2.bf16.msra.mxu1 %v20325_v54  ;;  %15040 = vmatprep.subr.bf16.mxu0 %v20330_v57  ;;  %v20386_v54 = vld [vmem:[%s20795_s21 + $0x3b40] ss:$8 sps:$4 sm:$0xff]   ;;  %v20391_v57 = vld [vmem:[%s20795_s21 + $0x3a34] ss:$8 sps:$4 sm:$0xff]  }
 0x77f   : > { %15081 = vmatprep.subr.bf16.mxu1 %v20333_v2  ;;  %v20394_v2 = vld [vmem:[%s20795_s21 + $0x3b34] ss:$8 sps:$4 sm:$0xff]  }
 0x781   : > { %15041 = vmatpush2.bf16.msra.mxu0 %v20328_v7  ;;  %v20389_v7 = vld [vmem:[%s20795_s21 + $0x3a30] ss:$8 sps:$4 sm:$0xff]  }
 0x782   : > { %15082 = vmatpush2.bf16.msra.mxu1 %v20331_v51  ;;  %15042 = vmatprep.subr.bf16.mxu0 %v20336_v61  ;;  %v20392_v51 = vld [vmem:[%s20795_s21 + $0x3b30] ss:$8 sps:$4 sm:$0xff]   ;;  %v20397_v61 = vld [vmem:[%s20795_s21 + $0x3a24] ss:$8 sps:$4 sm:$0xff]  }
 0x783   : > { %15083 = vmatprep.subr.bf16.mxu1 %v20339_v29  ;;  %v20400_v29 = vld [vmem:[%s20795_s21 + $0x3b24] ss:$8 sps:$4 sm:$0xff]  }
 0x785   : > { %15043 = vmatpush2.bf16.msra.mxu0 %v20334_v41  ;;  %v20395_v41 = vld [vmem:[%s20795_s21 + $0x3a20] ss:$8 sps:$4 sm:$0xff]  }
 0x786   : > { %15084 = vmatpush2.bf16.msra.mxu1 %v20337_v62  ;;  %15044 = vmatprep.subr.bf16.mxu0 %v20342_v47  ;;  %v20398_v62 = vld [vmem:[%s20795_s21 + $0x3b20] ss:$8 sps:$4 sm:$0xff]   ;;  %v20403_v47 = vld [vmem:[%s20795_s21 + $0x3a14] ss:$8 sps:$4 sm:$0xff]  }
 0x787   : > { %15085 = vmatprep.subr.bf16.mxu1 %v20345_v30  ;;  %v20406_v30 = vld [vmem:[%s20795_s21 + $0x3b14] ss:$8 sps:$4 sm:$0xff]  }
 0x789   : > { %15045 = vmatpush2.bf16.msra.mxu0 %v20340_v3  ;;  %v20401_v3 = vld [vmem:[%s20795_s21 + $0x3a10] ss:$8 sps:$4 sm:$0xff]  }
 0x78a   : > { %15086 = vmatpush2.bf16.msra.mxu1 %v20343_v22  ;;  %15046 = vmatprep.subr.bf16.mxu0 %v20348_v5  ;;  %v20404_v22 = vld [vmem:[%s20795_s21 + $0x3b10] ss:$8 sps:$4 sm:$0xff]   ;;  %v20409_v5 = vld [vmem:[%s20795_s21 + $0x3a04] ss:$8 sps:$4 sm:$0xff]  }
 0x78b   : > { %15087 = vmatprep.subr.bf16.mxu1 %v20351_v55  ;;  %v20412_v55 = vld [vmem:[%s20795_s21 + $0x3b04] ss:$8 sps:$4 sm:$0xff]  }
 0x78d   : > { %15047 = vmatpush2.bf16.msra.mxu0 %v20346_v42  ;;  %v20410_v42 = vld [vmem:[%s20795_s21 + $0x3b00] ss:$8 sps:$4 sm:$0xff]  }
 0x78e   : > { %15088 = vmatpush2.bf16.msra.mxu1 %v20349_v27  ;;  %15048 = vmatprep.subr.bf16.mxu0 %v20354_v6  ;;  %v20415_v27 = vld [vmem:[%s20795_s21 + $0x3af4] ss:$8 sps:$4 sm:$0xff]  }
 0x78f   : > { %15089 = vmatprep.subr.bf16.mxu1 %v20357_v20  ;;  %v20418_v6 = vld [vmem:[%s20795_s21 + $0x3bf4] ss:$8 sps:$4 sm:$0xff]   ;;  %v20413_v20 = vld [vmem:[%s20795_s21 + $0x3af0] ss:$8 sps:$4 sm:$0xff]  }
 0x791   : > { %15049 = vmatpush2.bf16.msra.mxu0 %v20352_v12  ;;  %v20421_v12 = vld [vmem:[%s20795_s21 + $0x3ae4] ss:$8 sps:$4 sm:$0xff]  }
 0x792   : > { %15090 = vmatpush2.bf16.msra.mxu1 %v20355_v11  ;;  %15050 = vmatprep.subr.bf16.mxu0 %v20360_v9  ;;  %v20424_v11 = vld [vmem:[%s20795_s21 + $0x3be4] ss:$8 sps:$4 sm:$0xff]   ;;  %v20419_v9 = vld [vmem:[%s20795_s21 + $0x3ae0] ss:$8 sps:$4 sm:$0xff]  }
 0x793   : > { %15091 = vmatprep.subr.bf16.mxu1 %v20363_v13  ;;  %v20422_v13 = vld [vmem:[%s20795_s21 + $0x3be0] ss:$8 sps:$4 sm:$0xff]  }
 0x795   : > { %15051 = vmatpush2.bf16.msra.mxu0 %v20358_v15  ;;  %v20427_v15 = vld [vmem:[%s20795_s21 + $0x3ad4] ss:$8 sps:$4 sm:$0xff]  }
 0x796   : > { %15092 = vmatpush2.bf16.msra.mxu1 %v20361_v28  ;;  %15102 = vmatprep.subr.bf16.mxu0 %v20366_v33  ;;  %v20430_v28 = vld [vmem:[%s20795_s21 + $0x3bd4] ss:$8 sps:$4 sm:$0xff]   ;;  %v20425_v33 = vld [vmem:[%s20795_s21 + $0x3ad0] ss:$8 sps:$4 sm:$0xff]  }
 0x797   : > { %15143 = vmatprep.subr.bf16.mxu1 %v20370_v10  ;;  %v20428_v10 = vld [vmem:[%s20795_s21 + $0x3bd0] ss:$8 sps:$4 sm:$0xff]  }
 0x798   : > { %v14808_v48 = vpop.f32.mrf.mxu0  ;;  %15053 = vmatmul.mubr.bf16.vlgmr.msra.gmra.mxu0 %v1099_v58  ;;  %v20431_v58 = vld [vmem:[%s20795_s21 + $0x3ac0] ss:$8 sps:$4 sm:$0xff]  }
 0x799   : > { %v14849_v34 = vpop.f32.mrf.mxu1  ;;  %15094 = vmatmul.mubr.bf16.vlgmr.msra.gmra.mxu1 %v1101_v24  ;;  %v14809_v36 = vadd.f32 %v14808_v48, %v23183_v26  ;;  %15103 = vmatpush1.bf16.msra.mxu0 %v20364_v8  ;;  %v20434_v24 = vld [vmem:[%s20795_s21 + $0x3bc0] ss:$8 sps:$4 sm:$0xff]   ;;  %v20439_v8 = vld [vmem:[%s20795_s21 + $0x3ab4] ss:$8 sps:$4 sm:$0xff]  }
 0x79a   : > { %15144 = vmatpush1.bf16.msra.mxu1 %v20368_v37  ;;  %v14810_v4 = vpop.f32.mrf.mxu0  ;;  %15104 = vmatprep.subr.bf16.mxu0 %v20373_v46  ;;  %v20442_v37 = vld [vmem:[%s20795_s21 + $0x3bb4] ss:$8 sps:$4 sm:$0xff]   ;;  %v20437_v46 = vld [vmem:[%s20795_s21 + $0x3ab0] ss:$8 sps:$4 sm:$0xff]   ;;  %v20443_v48 = vld [vmem:[%s20795_s21 + $0x3aa0] ss:$8 sps:$4 sm:$0xff]  }
 0x79b   : > { %v14851_v38 = vpop.f32.mrf.mxu1  ;;  %15145 = vmatprep.subr.bf16.mxu1 %v20376_v21  ;;  %v14811_v39 = vadd.f32 %v14810_v4, %v23185_v35  ;;  %v23268_v56 = vadd.f32 %v14849_v34, %v14809_v36  ;;  %15134 = vmatprep.mubr.bf16.mxu0 %v1104_v31  ;;  %v20385_v35 = vld [vmem:[%s20795_s21 + $0x3a44] ss:$8 sps:$4 sm:$0xff]   ;;  %v20440_v21 = vld [vmem:[%s20795_s21 + $0x3bb0] ss:$8 sps:$4 sm:$0xff]   ;;  %v20446_v34 = vld [vmem:[%s20795_s21 + $0x3ba0] ss:$8 sps:$4 sm:$0xff]  }
 0x79c   : > { %15175 = vmatprep.mubr.bf16.mxu1 %v1106_v17  ;;  %v14812_v26 = vpop.f32.mrf.mxu0  ;;  %v20445_v31 = vld [vmem:[%s20795_s21 + $0x3aa4] ss:$8 sps:$4 sm:$0xff]   ;;  %v20451_v36 = vld [vmem:[%s20795_s21 + $0x3a94] ss:$8 sps:$4 sm:$0xff]   ;;  %v20452_v4 = vld [vmem:[%s20795_s21 + $0x3b90] ss:$8 sps:$4 sm:$0xff]  }
 0x79d   : > { %v14853_v49 = vpop.f32.mrf.mxu1  ;;  %v23270_v1 = vadd.f32 %v14851_v38, %v14811_v39  ;;  %15105 = vmatpush1.bf16.msra.mxu0 %v20371_v32  ;;  %v20448_v17 = vld [vmem:[%s20795_s21 + $0x3ba4] ss:$8 sps:$4 sm:$0xff]   ;;  %v20454_v32 = vld [vmem:[%s20795_s21 + $0x3b94] ss:$8 sps:$4 sm:$0xff]   ;;  %v20458_v39 = vld [vmem:[%s20795_s21 + $0x3b80] ss:$8 sps:$4 sm:$0xff]  }
 0x79e   : > { %15146 = vmatpush1.bf16.msra.mxu1 %v20374_v14  ;;  %v14813_v63 = vpop.f32.mrf.mxu0  ;;  %15106 = vmatprep.subr.bf16.mxu0 %v20379_v60  ;;  %v20449_v14 = vld [vmem:[%s20795_s21 + $0x3a90] ss:$8 sps:$4 sm:$0xff]   ;;  %v20457_v38 = vld [vmem:[%s20795_s21 + $0x3a84] ss:$8 sps:$4 sm:$0xff]   ;;  %v20463_v26 = vld [vmem:[%s20795_s21 + $0x3c74] ss:$8 sps:$4 sm:$0xff]   ;;  %v1103_v49 = vpack.c.bf16 %v23241_v0, %v23241_v0 }
 0x79f   : > { %15147 = vmatprep.subr.bf16.mxu1 %v20382_v43  ;;  %v14854_v52 = vpop.f32.mrf.mxu1  ;;  %v20460_v60 = vld [vmem:[%s20795_s21 + $0x3b84] ss:$8 sps:$4 sm:$0xff]   ;;  %v20455_v43 = vld [vmem:[%s20795_s21 + $0x3a80] ss:$8 sps:$4 sm:$0xff]   ;;  %v20645_v0 = vmov 0  }
 0x7a0   : > { %v20467_v63 = vld [vmem:[%s20795_s21 + $0x3c64] ss:$8 sps:$4 sm:$0xff]  }
 0x7a1   : > { %15107 = vmatpush1.bf16.msra.mxu0 %v20377_v45  ;;  %v1105_v45 = vpack.c.bf16 %v23244_v19, %v23244_v19 }
 0x7a2   : > { %15148 = vmatpush1.bf16.msra.mxu1 %v20380_v59  ;;  %15108 = vmatprep.subr.bf16.mxu0 %v20385_v35  ;;  %v20461_v59 = vld [vmem:[%s20795_s21 + $0x3c70] ss:$8 sps:$4 sm:$0xff]  }
 0x7a3   : > { %15149 = vmatprep.subr.bf16.mxu1 %v20388_v53 }
 0x7a5   : > { %15109 = vmatpush1.bf16.msra.mxu0 %v20383_v16  ;;  %v20465_v16 = vld [vmem:[%s20795_s21 + $0x3c60] ss:$8 sps:$4 sm:$0xff]  }
 0x7a6   : > { %15150 = vmatpush1.bf16.msra.mxu1 %v20386_v54  ;;  %15110 = vmatprep.subr.bf16.mxu0 %v20391_v57  ;;  %v20470_v57 = vld [vmem:[%s20795_s21 + $0x3c54] ss:$8 sps:$4 sm:$0xff]  }
 0x7a7   : > { %15151 = vmatprep.subr.bf16.mxu1 %v20394_v2 }
 0x7a9   : > { %15111 = vmatpush1.bf16.msra.mxu0 %v20389_v7 }
 0x7aa   : > { %15152 = vmatpush1.bf16.msra.mxu1 %v20392_v51  ;;  %15112 = vmatprep.subr.bf16.mxu0 %v20397_v61 }
 0x7ab   : > { %15153 = vmatprep.subr.bf16.mxu1 %v20400_v29 }
 0x7ad   : > { %15113 = vmatpush1.bf16.msra.mxu0 %v20395_v41 }
 0x7ae   : > { %15154 = vmatpush1.bf16.msra.mxu1 %v20398_v62  ;;  %15114 = vmatprep.subr.bf16.mxu0 %v20403_v47  ;;  %v20473_v62 = vld [vmem:[%s20795_s21 + $0x3c44] ss:$8 sps:$4 sm:$0xff]  }
 0x7af   : > { %15155 = vmatprep.subr.bf16.mxu1 %v20406_v30  ;;  %v20471_v30 = vld [vmem:[%s20795_s21 + $0x3c40] ss:$8 sps:$4 sm:$0xff]  }
 0x7b1   : > { %15115 = vmatpush1.bf16.msra.mxu0 %v20401_v3  ;;  %v20474_v3 = vld [vmem:[%s20795_s21 + $0x3c30] ss:$8 sps:$4 sm:$0xff]  }
 0x7b2   : > { %15156 = vmatpush1.bf16.msra.mxu1 %v20404_v22  ;;  %15116 = vmatprep.subr.bf16.mxu0 %v20409_v5  ;;  %v20479_v22 = vld [vmem:[%s20795_s21 + $0x3c24] ss:$8 sps:$4 sm:$0xff]   ;;  %v20477_v5 = vld [vmem:[%s20795_s21 + $0x3c20] ss:$8 sps:$4 sm:$0xff]  }
 0x7b3   : > { %15157 = vmatprep.subr.bf16.mxu1 %v20412_v55  ;;  %v20482_v55 = vld [vmem:[%s20795_s21 + $0x3c14] ss:$8 sps:$4 sm:$0xff]  }
 0x7b5   : > { %15117 = vmatpush1.bf16.msra.mxu0 %v20407_v18  ;;  %v20480_v18 = vld [vmem:[%s20795_s21 + $0x3c10] ss:$8 sps:$4 sm:$0xff]  }
 0x7b6   : > { %15158 = vmatpush1.bf16.msra.mxu1 %v20410_v42  ;;  %15118 = vmatprep.subr.bf16.mxu0 %v20415_v27  ;;  %v20485_v42 = vld [vmem:[%s20795_s21 + $0x3c04] ss:$8 sps:$4 sm:$0xff]   ;;  %v20483_v27 = vld [vmem:[%s20795_s21 + $0x3c00] ss:$8 sps:$4 sm:$0xff]  }
 0x7b7   : > { %15159 = vmatprep.subr.bf16.mxu1 %v20418_v6  ;;  %v15497_v6 = vld.sshfl [vmem:[%s20809_s7 + $0xf0] sm:$0x3 pattern:$0x76325410] }
 0x7b9   : > { %15119 = vmatpush2.bf16.msra.mxu0 %v20413_v20  ;;  %v1107_v20 = vpack.c.bf16 %v15497_v6, %v15497_v6 }
 0x7ba   : > { %15160 = vmatpush2.bf16.msra.mxu1 %v20416_v25  ;;  %15120 = vmatprep.subr.bf16.mxu0 %v20421_v12 }
 0x7bb   : > { %15161 = vmatprep.subr.bf16.mxu1 %v20424_v11 }
 0x7bd   : > { %15121 = vmatpush2.bf16.msra.mxu0 %v20419_v9 }
 0x7be   : > { %15162 = vmatpush2.bf16.msra.mxu1 %v20422_v13  ;;  %15122 = vmatprep.subr.bf16.mxu0 %v20427_v15 }
 0x7bf   : > { %15163 = vmatprep.subr.bf16.mxu1 %v20430_v28 }
 0x7c1   : > { %15123 = vmatpush2.bf16.msra.mxu0 %v20425_v33 }
 0x7c2   : > { %15164 = vmatpush2.bf16.msra.mxu1 %v20428_v10  ;;  %15124 = vmatprep.subr.bf16.mxu0 %v20433_v23 }
 0x7c3   : > { %15165 = vmatprep.subr.bf16.mxu1 %v20436_v40 }
 0x7c5   : > { %15125 = vmatpush2.bf16.msra.mxu0 %v20431_v58 }
 0x7c6   : > { %15166 = vmatpush2.bf16.msra.mxu1 %v20434_v24  ;;  %15126 = vmatprep.subr.bf16.mxu0 %v20439_v8 }
 0x7c7   : > { %15167 = vmatprep.subr.bf16.mxu1 %v20442_v37 }
 0x7c9   : > { %15127 = vmatpush2.bf16.msra.mxu0 %v20437_v46 }
 0x7ca   : > { %15168 = vmatpush2.bf16.msra.mxu1 %v20440_v21  ;;  %15128 = vmatprep.subr.bf16.mxu0 %v20445_v31 }
 0x7cb   : > { %15169 = vmatprep.subr.bf16.mxu1 %v20448_v17 }
 0x7cd   : > { %15129 = vmatpush2.bf16.msra.mxu0 %v20443_v48 }
 0x7ce   : > { %15170 = vmatpush2.bf16.msra.mxu1 %v20446_v34  ;;  %15130 = vmatprep.subr.bf16.mxu0 %v20451_v36 }
 0x7cf   : > { %15171 = vmatprep.subr.bf16.mxu1 %v20454_v32 }
 0x7d1   : > { %15131 = vmatpush2.bf16.msra.mxu0 %v20449_v14 }
 0x7d2   : > { %15172 = vmatpush2.bf16.msra.mxu1 %v20452_v4  ;;  %15132 = vmatprep.subr.bf16.mxu0 %v20457_v38 }
 0x7d3   : > { %15173 = vmatprep.subr.bf16.mxu1 %v20460_v60 }
 0x7d5   : > { %15133 = vmatpush2.bf16.msra.mxu0 %v20455_v43 }
 0x7d6   : > { %15174 = vmatpush2.bf16.msra.mxu1 %v20458_v39  ;;  %15184 = vmatprep.subr.bf16.mxu0 %v20463_v26 }
 0x7d8   : > { %v14890_v35 = vpop.f32.mrf.mxu0  ;;  %15135 = vmatmul.mubr.bf16.vlgmr.msra.gmra.mxu0 %v1103_v49 }
 0x7d9   : > { %v14931_v53 = vpop.f32.mrf.mxu1  ;;  %15176 = vmatmul.mubr.bf16.vlgmr.msra.gmra.mxu1 %v1105_v45  ;;  %v14891_v52 = vadd.f32 %v14890_v35, %v23268_v56  ;;  %15185 = vmatpush1.bf16.msra.mxu0 %v20461_v59  ;;  %v20468_v56 = vld [vmem:[%s20795_s21 + $0x3c50] ss:$8 sps:$4 sm:$0xff]  }
 0x7da   : > { %15216 = vmatprep.mubr.bf16.mxu0 %v20645_v0  ;;  %v14892_v54 = vpop.f32.mrf.mxu0  ;;  %15186 = vmatprep.subr.bf16.mxu0 %v20467_v63 }
 0x7db   : > { %v14933_v19 = vpop.f32.mrf.mxu1  ;;  %v14893_v2 = vadd.f32 %v14892_v54, %v23270_v1  ;;  %v14932_v7 = vadd.f32 %v14931_v53, %v14891_v52  ;;  %v20476_v1 = vld [vmem:[%s20795_s21 + $0x3c34] ss:$8 sps:$4 sm:$0xff]  }
 0x7dc   : > { %v14894_v51 = vpop.f32.mrf.mxu0 }
 0x7dd   : > { %v14935_v61 = vpop.f32.mrf.mxu1  ;;  %v14934_v29 = vadd.f32 %v14933_v19, %v14893_v2  ;;  %15187 = vmatpush1.bf16.msra.mxu0 %v20465_v16  ;;  %v286_v2 = vld [vmem:[#allocation2] sm:$0xf] }
 0x7de   : > { %v14895_v41 = vpop.f32.mrf.mxu0  ;;  %15188 = vmatprep.subr.bf16.mxu0 %v20470_v57 }
 0x7df   : > { %v14936_v47 = vpop.f32.mrf.mxu1 }
 0x7e1   : > { %15189 = vmatpush1.bf16.msra.mxu0 %v20468_v56 }
 0x7e2   : > { %15190 = vmatprep.subr.bf16.mxu0 %v20473_v62 }
 0x7e5   : > { %15191 = vmatpush1.bf16.msra.mxu0 %v20471_v30 }
 0x7e6   : > { %15192 = vmatprep.subr.bf16.mxu0 %v20476_v1 }
 0x7e9   : > { %15193 = vmatpush1.bf16.msra.mxu0 %v20474_v3 }
 0x7ea   : > { %15194 = vmatprep.subr.bf16.mxu0 %v20479_v22 }
 0x7ed   : > { %15195 = vmatpush1.bf16.msra.mxu0 %v20477_v5 }
 0x7ee   : > { %15196 = vmatprep.subr.bf16.mxu0 %v20482_v55 }
 0x7f1   : > { %15197 = vmatpush1.bf16.msra.mxu0 %v20480_v18 }
 0x7f2   : > { %15198 = vmatprep.subr.bf16.mxu0 %v20485_v42 }
 0x7f5   : > { %15199 = vmatpush1.bf16.msra.mxu0 %v20483_v27 }
 0x7f8   : > { %15217 = vmatmul.mubr.bf16.vlgmr.msra.gmra.mxu0 %v1107_v20 }
 0x818   : > { %v14972_v25 = vpop.f32.mrf.mxu0 }
 0x819   : > { %v15013_v12 = vpop.f32.mrf.mxu1  ;;  %v14973_v11 = vadd.f32 %v14972_v25, %v14932_v7 }
 0x81a   : > { %v14974_v9 = vpop.f32.mrf.mxu0 }
 0x81b   : > { %v15015_v13 = vpop.f32.mrf.mxu1  ;;  %v14975_v15 = vadd.f32 %v14974_v9, %v14934_v29  ;;  %v15014_v28 = vadd.f32 %v15013_v12, %v14973_v11 }
 0x81c   : > { %v14976_v33 = vpop.f32.mrf.mxu0 }
 0x81d   : > { %v15017_v10 = vpop.f32.mrf.mxu1  ;;  %v15016_v23 = vadd.f32 %v15015_v13, %v14975_v15 }
 0x81e   : > { %v14977_v40 = vpop.f32.mrf.mxu0 }
 0x81f   : > { %v15018_v58 = vpop.f32.mrf.mxu1 }
 0x858   : > { %v15054_v24 = vpop.f32.mrf.mxu0 }
 0x859   : > { %v15095_v8 = vpop.f32.mrf.mxu1  ;;  %v15055_v37 = vadd.f32 %v15054_v24, %v15014_v28 }
 0x85a   : > { %v15056_v46 = vpop.f32.mrf.mxu0 }
 0x85b   : > { %v15097_v21 = vpop.f32.mrf.mxu1  ;;  %v15057_v31 = vadd.f32 %v15056_v46, %v15016_v23  ;;  %v15096_v17 = vadd.f32 %v15095_v8, %v15055_v37 }
 0x85c   : > { %v15058_v48 = vpop.f32.mrf.mxu0 }
 0x85d   : > { %v15099_v34 = vpop.f32.mrf.mxu1  ;;  %v15098_v36 = vadd.f32 %v15097_v21, %v15057_v31 }
 0x85e   : > { %v15059_v32 = vpop.f32.mrf.mxu0 }
 0x85f   : > { %v15100_v14 = vpop.f32.mrf.mxu1 }
 0x898   : > { %v15136_v4 = vpop.f32.mrf.mxu0 }
 0x899   : > { %v15177_v38 = vpop.f32.mrf.mxu1  ;;  %v15137_v59 = vadd.f32 %v15136_v4, %v15096_v17 }
 0x89a   : > { %v15138_v60 = vpop.f32.mrf.mxu0 }
 0x89b   : > { %v15179_v43 = vpop.f32.mrf.mxu1  ;;  %v15139_v63 = vadd.f32 %v15138_v60, %v15098_v36  ;;  %v15178_v53 = vadd.f32 %v15177_v38, %v15137_v59 }
 0x89c   : > { %v15140_v39 = vpop.f32.mrf.mxu0 }
 0x89d   : > { %v15181_v26 = vpop.f32.mrf.mxu1  ;;  %v15180_v52 = vadd.f32 %v15179_v43, %v15139_v63 }
 0x89e   : > { %v15141_v49 = vpop.f32.mrf.mxu0 }
 0x89f   : > { %v15182_v45 = vpop.f32.mrf.mxu1 }
 0x8b8   : > { %v15218_v35 = vpop.f32.mrf.mxu0 }
 0x8b9   : > { %v15219_v0 = vadd.f32 %v15218_v35, %v15178_v53 }
 0x8ba   : > { %v15220_v16 = vpop.f32.mrf.mxu0 }
 0x8bb   : > { %v15221_v54 = vadd.f32 %v15220_v16, %v15180_v52 }
 0x8bc   : > { %v15222_v19 = vpop.f32.mrf.mxu0 }
 0x8bd   : > { %v15227_v57 = vcombine.low %v15219_v0, %v15221_v54 }
 0x8be   : > { %v15223_v7 = vpop.f32.mrf.mxu0 }
 0x8bf   : > { %v15234_v51 = vrot.slane %v15227_v57, %v20860_v50  ;;  %15241 = sbr.rel (%p17434_p11) target bundleno = 2789 (0xae5), region = 60 }
 0x8c1   : > { %v15236_v61 = vadd.f32 %v15234_v51, %v286_v2 }
 0x8c3   : > { %15237 = vst [vmem:[#allocation2] sm:$0xf] %v15236_v61 }
 0x8c4   : > { %v15295_v29 = vld [vmem:[%s23479_s3 + $0xf8] sm:$0xff]  ;;  %v15294_v41 = vld [vmem:[%s23479_s3 + $0xf0] sm:$0xff]  ;;  %v15293_v47 = vld [vmem:[%s23479_s3 + $0xe8] sm:$0xff]  ;;  %v15247_v18 = vsub.s32 0, %v20852_v44  ;;  %v15251_v42 = vsub.s32 1, %v20852_v44  ;;  %vm15384_vm0 = vcmask 99328  }
 0x8c5   : > { %v15279_v56 = vld [vmem:[%s23479_s3 + $0x78] sm:$0xff]  ;;  %17443 = vmatprep.subr.mxu0 %v15295_v29  ;;  %v15278_v62 = vld [vmem:[%s23479_s3 + $0x70] sm:$0xff]  ;;  %v15277_v30 = vld [vmem:[%s23479_s3 + $0x68] sm:$0xff] }
 0x8c6   : > { %17444 = vmatpush3.msra.mxu0 %v15279_v56  ;;  %v15292_v1 = vld [vmem:[%s23479_s3 + $0xe0] sm:$0xff]  ;;  %v15291_v22 = vld [vmem:[%s23479_s3 + $0xd8] sm:$0xff]  ;;  %v15290_v55 = vld [vmem:[%s23479_s3 + $0xd0] sm:$0xff] }
 0x8c7   : > { %17445 = vmatprep.subr.mxu0 %v15294_v41  ;;  %v15276_v3 = vld [vmem:[%s23479_s3 + $0x60] sm:$0xff]  ;;  %v15275_v5 = vld [vmem:[%s23479_s3 + $0x58] sm:$0xff]  ;;  %v15274_v27 = vld [vmem:[%s23479_s3 + $0x50] sm:$0xff] }
 0x8c8   : > { %17446 = vmatpush3.msra.mxu0 %v15278_v62  ;;  %v15289_v6 = vld [vmem:[%s23479_s3 + $0xc8] sm:$0xff]  ;;  %v15243_v25 = vld [vmem:[#allocation6] sm:$0x3]  ;;  %v15287_v13 = vld [vmem:[%s23479_s3 + $0xb8] sm:$0xff] }
 0x8c9   : > { %17447 = vmatprep.subr.mxu0 %v15293_v47  ;;  %v15273_v20 = vld [vmem:[%s23479_s3 + $0x48] sm:$0xff]  ;;  %v15288_v44 = vld [vmem:[%s23479_s3 + $0xc0] sm:$0xff]  ;;  %v15248_v12 = vrot.slane %v15243_v25, %v15247_v18  ;;  %v15252_v11 = vrot.slane %v15243_v25, %v15251_v42  ;;  %v15271_v28 = vld [vmem:[%s23479_s3 + $0x38] sm:$0xff] }
 0x8ca   : > { %17448 = vmatpush3.msra.mxu0 %v15277_v30  ;;  %v15272_v9 = vld [vmem:[%s23479_s3 + $0x40] sm:$0xff]  ;;  %v15286_v10 = vld [vmem:[%s23479_s3 + $0xb0] sm:$0xff]  ;;  %v15285_v58 = vld [vmem:[%s23479_s3 + $0xa8] sm:$0xff] }
 0x8cb   : > { %17449 = vmatprep.subr.mxu0 %v15292_v1  ;;  %v15253_v15 = vcombine.low %v15248_v12, %v15252_v11  ;;  %v15242_v33 = vld [vmem:[#allocation2] sm:$0xf]  ;;  %v15270_v40 = vld [vmem:[%s23479_s3 + $0x30] sm:$0xff]  ;;  %v15269_v8 = vld [vmem:[%s23479_s3 + $0x28] sm:$0xff] }
 0x8cc   : > { %17450 = vmatpush3.msra.mxu0 %v15276_v3  ;;  %v15284_v37 = vld [vmem:[%s23479_s3 + $0xa0] sm:$0xff]  ;;  %v15283_v31 = vld [vmem:[%s23479_s3 + $0x98] sm:$0xff]  ;;  %v15282_v34 = vld [vmem:[%s23479_s3 + $0x90] sm:$0xff] }
 0x8cd   : > { %17451 = vmatprep.subr.mxu0 %v15291_v22  ;;  %v15260_v23 = vrot.slane %v15253_v15, %v20860_v50  ;;  %v15268_v21 = vld [vmem:[%s23479_s3 + $0x20] sm:$0xff]  ;;  %v15267_v48 = vld [vmem:[%s23479_s3 + $0x18] sm:$0xff]  ;;  %v15266_v32 = vld [vmem:[%s23479_s3 + $0x10] sm:$0xff] }
 0x8ce   : > { %17452 = vmatpush3.msra.mxu0 %v15275_v5  ;;  %v15265_v14 = vld [vmem:[%s23479_s3 + $0x8] sm:$0xff]  ;;  %v15280_v4 = vld [vmem:[%s23479_s3 + $0x80] sm:$0xff] }
 0x8cf   : > { %17453 = vmatprep.subr.mxu0 %v15290_v55  ;;  %v15262_v24 = vadd.f32 %v15260_v23, %v15242_v33  ;;  %v15264_v38 = vld [vmem:[%s23479_s3] sm:$0xff] }
 0x8d0   : > { %17454 = vmatpush3.msra.mxu0 %v15274_v27  ;;  %v17435_v39 = vld [vmem:[#allocation8] ss:$0 sm:$0xff] }
 0x8d1   : > { %17455 = vmatprep.subr.mxu0 %v15289_v6  ;;  %v15263_v46 = vmax.f32 %v15262_v24, 0.0 }
 0x8d2   : > { %17456 = vmatpush3.msra.mxu0 %v15273_v20 }
 0x8d3   : > { %17457 = vmatprep.subr.mxu0 %v15288_v44  ;;  %v15310_v17 = vrot.slane %v15263_v46, %v20860_v50  ;;  %v15281_v50 = vld [vmem:[%s23479_s3 + $0x88] sm:$0xff] }
 0x8d4   : > { %17458 = vmatpush3.msra.mxu0 %v15272_v9 }
 0x8d5   : > { %17459 = vmatprep.subr.mxu0 %v15287_v13  ;;  %v15311_v36 = vcombine.high %v15310_v17, %v15310_v17 }
 0x8d6   : > { %17460 = vmatpush3.msra.mxu0 %v15271_v28 }
 0x8d7   : > { %17461 = vmatprep.subr.mxu0 %v15286_v10  ;;  %15378 = vmatprep.mubr.f32.mxu0 %v15311_v36 }
 0x8d8   : > { %17462 = vmatpush3.msra.mxu0 %v15270_v40 }
 0x8d9   : > { %17463 = vmatprep.subr.mxu0 %v15285_v58 }
 0x8da   : > { %17464 = vmatpush3.msra.mxu0 %v15269_v8 }
 0x8db   : > { %17465 = vmatprep.subr.mxu0 %v15284_v37 }
 0x8dc   : > { %17466 = vmatpush3.msra.mxu0 %v15268_v21 }
 0x8dd   : > { %17467 = vmatprep.subr.mxu0 %v15283_v31 }
 0x8de   : > { %17468 = vmatpush3.msra.mxu0 %v15267_v48 }
 0x8df   : > { %17469 = vmatprep.subr.mxu0 %v15282_v34 }
 0x8e0   : > { %17470 = vmatpush3.msra.mxu0 %v15266_v32 }
 0x8e1   : > { %17471 = vmatprep.subr.mxu0 %v15281_v50 }
 0x8e2   : > { %17472 = vmatpush3.msra.mxu0 %v15265_v14 }
 0x8e3   : > { %17473 = vmatprep.subr.mxu0 %v15280_v4 }
 0x8e4   : > { %17474 = vmatpush3.msra.mxu0 %v15264_v38 }
 0x8e5   : > { %15379 = vmatmul.mubr.f32.vlgmr.msra.gmra.mxu0 %v15310_v17 }
 0x9a5   : > { %v17475_v60 = vpop.f32.mrf.mxu0 }
 0x9a7   : > { %v17476_v43 = vpop.f32.mrf.mxu0 }
 0x9a8   : > { %v17477_v26 = vadd.f32 %v17476_v43, %v17475_v60 }
 0x9aa   : > { %v15381_v49 = vadd.f32 %v17477_v26, %v17435_v39 }
 0x9ac   : > { %v15385_v45 = vsel %vm15384_vm0, %v15381_v49, -inf }
 0x9ad   : > { %15386 = vmax.xlane.f32.xlu0 %v15385_v45 }
 0xa36   : > { %v15387_v59 = vpop.xlane.xlu0 %15386 }
 0xa37   : > { %v15388_v63 = vsub.f32 %v15381_v49, %v15387_v59 }
 0xa39   : > { %v15389_v35 = vmul.f32 1.442695, %v15388_v63 }
 0xa3b   : > { %20486 = vpow2.f32 %v15389_v35 }
 0xa48   : > { %v20487_v53 = vpop.eup %20486 }
 0xa49   : > { %v15391_v52 = vsel %vm15384_vm0, %v20487_v53, 0.0 }
 0xa4a   : > { %15392 = vadd.xlane.f32.xlu0 %v15391_v52 }
 0xad3   : > { %v15393_v16 = vpop.xlane.xlu0 %15392 }
 0xad4   : > { %20488 = vrcp.f32 %v15393_v16 }
 0xae1   : > { %v20489_v0 = vpop.eup %20488 }
 0xae2   : > { %v15395_v54 = vmul.f32 %v20489_v0, %v20487_v53 }
 0xae4   : > { %15396 = vst.msk [vmem:[#allocation9] sm:$0x3] %vm15384_vm0, %v15395_v54 }
 0xae5 PF: > { %p17510_p4 = scmp.eq.s32.totalorder %s20696_s22, 1  ;;  %s20646_s16 = smov [#allocation9]  }
 0xae6   : > { %s15404_s11 = sshll.u32 %s20646_s16, 4  ;;  %s15405_s11 = int_to_ptr.vmem [resolvable:$true] %s15404_s11 }
 0xae7   : > { %s20570_s17 = scalar_lea.vmem %s15405_s11, 32  ;;  %p20577_p7 = scmp.lt.s32.totalorder %s15405_s11, %s15405_s11 }
 0xae8   : > { %p20571_p12 = scmp.ne.s32.totalorder %s15405_s11, %s20570_s17  ;;  %p20578_p5 = scmp.lt.s32.totalorder %s20570_s17, %s20570_s17 }
 0xaea   : > { %p20572_p2 = pnand %p20571_p12, %p17510_p4  ;;  %p20579_p9 = por %p20578_p5, %p20577_p7 }
 0xaec   : > { %p20573_p3 = pneg %p20572_p2 }
 0xaee   : > { %p20580_p8 = pnand %p20579_p9, %p20573_p3 }
 0xaf0   : > { %20583 = shalt.err (!%p20580_p8)
}
 0xaf1   : > { %17491 = dma.vmem_to_hbm [thread:$0]  (%p17510_p4), %s15405_s11, 32, %s23481_s5, [#allocation5]  }
 0xaf2   : > { %20619 = dma.done.wait (%p17510_p4), [#allocation5], 32  }
 0xaf3   : > { %20621 = vsyncadd (%p17510_p4), [#allocation5], 4294967264 }
 0xaf4 PF: > { %p17_p10 = scmp.ge.s32.totalorder %s20699_s23, 4   ;;  %s23495_s18 = smov %s20628_s19 }
 0xaf5   : > { %s23496_s19 = smov %s20632_s20  ;;  %s23497_s20 = smov %s20709_s26 }
 0xaf6   : > { %s23498_s21 = smov %s20699_s23  ;;  %19 = sbr.rel (!%p17_p10) target bundleno = 5 (0x5), region = 96 }
 0xafb   :  { %15417 = vsyncpa [#allocation4], 1 }
 0xafc   :  { %15419 = vsyncpa [#allocation4 + $0x1], 1 }
 0xafd   :  { %15420 = vsyncpa [#allocation7], 1 }
 0xafe   :  { %15421 = vsyncpa [#allocation5], 1 }
 0xaff   :  { %15423 = vsyncpa [#allocation5 + $0x1], 1 }

</bundles_post_ra>
